<compile_context>
chip_gen: v5e
topology: v5e:2x2
jax: 0.10.0
libtpu: 0.0.40
codegen_flags: <defaults>
</compile_context>

<pallas_src>
import functools

import jax
import jax.numpy as jnp
from jax.experimental import pallas as pl
from jax.experimental.pallas import tpu as pltpu


def _fused_cnn_encoder_kernel(x_ref, row_ref, col_ref,
                              w1_ref, b1_ref, w2_ref, b2_ref, w3_ref, b3_ref,
                              o_ref, aext2_ref, aext3_ref, *, H, W, halo):
    """One batch tile per grid step: 3 fused conv3x3+BN+ReLU layers, VMEM-resident.

    x_ref   : (M, 9*C0)   bf16   wrapper-built layer-1 im2col (M = Bt*H*W rows)
    row/col : (M, 1)      int32  row / column index of each pixel inside its image
    wK_ref  : layer-1 (27, C1) bf16; layers 2/3 (9, Cin, Cout) bf16, BN scale folded
    bK_ref  : (1, Cout)   f32    folded BN shift (+ conv bias)
    o_ref   : (M, Cpad)   f32    final activation, channel dim padded to 128
    aextK   : (M + 2*halo, Cin) f32 scratch: halo'd activation for layers 2/3
    """
    M = x_ref.shape[0]

    # ---- layer 1: wrapper-built im2col -> one (M, 27) x (27, C1) MXU matmul ----
    a = jnp.dot(x_ref[...], w1_ref[...], preferred_element_type=jnp.float32)
    a = jnp.maximum(a + b1_ref[...], 0.0)               # folded BN shift + ReLU (f32)

    # ---- per-row tap-validity masks, computed once and shared by layers 2 & 3 ----
    ri = row_ref[...]                                   # (M, 1) row index in image
    ci = col_ref[...]                                   # (M, 1) column index in row
    vmask = {-1: ri >= 1, 0: None, 1: ri <= H - 2}
    hmask = {-1: ci >= 1, 0: None, 1: ci <= W - 2}
    masks = {}
    for dh in (-1, 0, 1):
        for dw in (-1, 0, 1):
            m = None
            for part in (vmask[dh], hmask[dw]):
                if part is not None:
                    m = part if m is None else jnp.logical_and(m, part)
            masks[(dh, dw)] = m

    # ---- layers 2 & 3: halo'd activation + 9 accumulating per-tap matmuls ----
    for w_ref, b_ref, aext in ((w2_ref, b2_ref, aext2_ref),
                               (w3_ref, b3_ref, aext3_ref)):
        # Single sublane-aligned store of the activation.  The halo rows stay
        # uninitialized: every tap read that lands in the halo (or in a neighbouring
        # image of the flattened batch slab) is zeroed by the masks below.
        aext[halo:halo + M, :] = a

        acc = None
        tap = 0
        for dh in (-1, 0, 1):
            for dw in (-1, 0, 1):
                col = aext[pl.ds(halo + dh * W + dw, M), :]     # (M, Cin) row window
                m = masks[(dh, dw)]
                if m is not None:
                    col = jnp.where(m, col, 0.0)                # SAME padding + halo
                part = jnp.dot(col.astype(jnp.bfloat16), w_ref[tap],
                               preferred_element_type=jnp.float32)
                acc = part if acc is None else acc + part       # split-K f32 acc
                tap += 1
        a = jnp.maximum(acc + b_ref[...], 0.0)                  # folded BN + ReLU

    o_ref[...] = a.astype(o_ref.dtype)                  # (M, 128): lane-dense store


def _pick_batch_tile(batch):
    """Largest divisor of `batch` that is <= 8 and keeps >= 2 grid steps (v7x: 2 TCs)."""
    cap = min(8, max(1, batch // 2))
    for bt in range(cap, 0, -1):
        if batch % bt == 0:
            return bt
    return 1


def prepare_kernel_params(params):
    """One-time transform of CNNEncoder parameters into kernel operands.

    Folds the eval-mode BatchNorm scale into the bf16 conv weights (the kernel only
    adds the shift), reshapes layer-2/3 weights to (9, Cin, Cout) for per-tap
    indexing, and pads the final Cout to a lane-dense multiple of 128.
    """
    (w1, s1, t1), (w2, s2, t2), (w3, s3, t3) = params
    hidden = w3.shape[1]
    hp = ((hidden + 127) // 128) * 128

    w1f = (w1 * s1[None, :]).astype(jnp.bfloat16)                     # (9*C0, C1)
    b1 = t1.reshape(1, -1).astype(jnp.float32)

    cin2 = w2.shape[0] // 9
    w2f = (w2 * s2[None, :]).reshape(9, cin2, w2.shape[1]).astype(jnp.bfloat16)
    b2 = t2.reshape(1, -1).astype(jnp.float32)

    cin3 = w3.shape[0] // 9
    w3p = jnp.pad(w3 * s3[None, :], ((0, 0), (0, hp - hidden)))
    w3f = w3p.reshape(9, cin3, hp).astype(jnp.bfloat16)
    b3 = jnp.pad(t3, (0, hp - hidden)).reshape(1, hp).astype(jnp.float32)

    return (w1f, b1, w2f, b2, w3f, b3), hidden


@functools.partial(jax.jit, static_argnames=("hidden",))
def cnn_encoder_forward(x_nchw, kparams, *, hidden):
    """Equivalent of CNNEncoder.forward: (B, 3, H, W) f32 -> (B, H*W, hidden) f32."""
    w1f, b1, w2f, b2, w3f, b3 = kparams
    B, C0, H, W = x_nchw.shape
    HW = H * W
    k1 = w1f.shape[0]                    # 9 * C0
    assert k1 == 9 * C0
    hp = w3f.shape[-1]                   # padded hidden (multiple of 128)
    cin2, cin3 = w2f.shape[1], w3f.shape[1]

    bt = _pick_batch_tile(B)
    M = bt * HW
    halo = ((W + 1 + 7) // 8) * 8        # >= W+1 guard rows, sublane (8) aligned

    # Layer-1 im2col in XLA: Cin=3 is the pathological narrow-lane case in-kernel.
    # Tap order = (kh, kw) major, channel minor -> matches w1 row ordering.
    x = jnp.transpose(x_nchw, (0, 2, 3, 1)).astype(jnp.float32)       # NHWC
    xp = jnp.pad(x, ((0, 0), (1, 1), (1, 1), (0, 0)))
    taps = [xp[:, kh:kh + H, kw:kw + W, :] for kh in range(3) for kw in range(3)]
    x27 = jnp.concatenate(taps, axis=-1).reshape(B * HW, k1).astype(jnp.bfloat16)

    # Per-row image-local row / column indices (block-invariant mask support).
    row_idx = jnp.tile(jnp.repeat(jnp.arange(H, dtype=jnp.int32), W), bt).reshape(M, 1)
    col_idx = jnp.tile(jnp.arange(W, dtype=jnp.int32), bt * H).reshape(M, 1)

    kernel = functools.partial(_fused_cnn_encoder_kernel, H=H, W=W, halo=halo)
    out = pl.pallas_call(
        kernel,
        out_shape=jax.ShapeDtypeStruct((B * HW, hp), jnp.float32),
        grid=(B // bt,),
        in_specs=[
            pl.BlockSpec((M, k1), lambda b: (b, 0)),
            pl.BlockSpec((M, 1), lambda b: (0, 0)),
            pl.BlockSpec((M, 1), lambda b: (0, 0)),
            pl.BlockSpec(w1f.shape, lambda b: (0, 0)),
            pl.BlockSpec(b1.shape, lambda b: (0, 0)),
            pl.BlockSpec(w2f.shape, lambda b: (0, 0, 0)),
            pl.BlockSpec(b2.shape, lambda b: (0, 0)),
            pl.BlockSpec(w3f.shape, lambda b: (0, 0, 0)),
            pl.BlockSpec(b3.shape, lambda b: (0, 0)),
        ],
        out_specs=pl.BlockSpec((M, hp), lambda b: (b, 0)),
        scratch_shapes=[
            pltpu.VMEM((M + 2 * halo, cin2), jnp.float32),
            pltpu.VMEM((M + 2 * halo, cin3), jnp.float32),
        ],
        compiler_params=pltpu.CompilerParams(
            dimension_semantics=("parallel",),       # independent batch tiles
            vmem_limit_bytes=32 * 1024 * 1024),      # safe on v5e/v6e/v7x defaults
    )(x27, row_idx, col_idx, w1f, b1, w2f, b2, w3f, b3)

    return out.reshape(B, HW, hp)[:, :, :hidden]     # drop channel padding


def init_params(key, hidden_dim=64):
    """Deterministic synthetic parameters matching CNNEncoder(hidden_dim).

    Returns per-layer (w_flat (9*Cin, Cout) f32, scale (Cout,), shift (Cout,)) with
    conv bias + eval-mode BatchNorm folded into scale/shift.
    K-index convention: row = (3*kh + kw) * Cin + c  (kh, kw in [0,3)).
    """
    dims = [(3, 16), (16, 32), (32, hidden_dim)]
    eps = 1e-5
    params = []
    for (cin, cout) in dims:
        key, kw_, kb, kg, kbeta = jax.random.split(key, 5)
        w = 0.1 * jax.random.normal(kw_, (cout, cin, 3, 3), jnp.float32)  # torch layout
        b = 0.1 * jax.random.normal(kb, (cout,), jnp.float32)
        gamma = 1.0 + 0.1 * jax.random.normal(kg, (cout,), jnp.float32)
        beta = 0.1 * jax.random.normal(kbeta, (cout,), jnp.float32)
        running_mean = jnp.zeros((cout,), jnp.float32)
        running_var = jnp.ones((cout,), jnp.float32)
        scale = gamma / jnp.sqrt(running_var + eps)
        shift = beta + scale * (b - running_mean)
        # (Cout, Cin, 3, 3) -> (kh, kw, Cin, Cout) -> (9*Cin, Cout)
        w_flat = jnp.transpose(w, (2, 3, 1, 0)).reshape(9 * cin, cout)
        params.append((w_flat, scale, shift))
    return params


def _reference_forward(x_nchw, params):
    """Pure-JAX reference (lax conv, f32, unfolded scale) for correctness check."""
    x = jnp.transpose(x_nchw, (0, 2, 3, 1)).astype(jnp.float32)
    B, H, W, _ = x.shape
    for (w_flat, scale, shift) in params:
        k, cout = w_flat.shape
        cin = k // 9
        w_hwio = w_flat.reshape(3, 3, cin, cout)
        y = jax.lax.conv_general_dilated(
            x, w_hwio, window_strides=(1, 1), padding="SAME",
            dimension_numbers=("NHWC", "HWIO", "NHWC"))
        y = y * scale + shift
        x = jnp.maximum(y, 0.0)
    return x.reshape(B, H * W, -1)


if __name__ == "__main__":
    key = jax.random.PRNGKey(0)
    kx, kp = jax.random.split(key)

    B, C, H, W = 2, 3, 16, 16
    hidden_dim = 64
    x = jax.random.normal(kx, (B, C, H, W), jnp.float32)

    params = init_params(kp, hidden_dim=hidden_dim)
    kparams, hidden = prepare_kernel_params(params)

    out = jax.block_until_ready(cnn_encoder_forward(x, kparams, hidden=hidden))
    assert out.shape == (B, H * W, hidden_dim), out.shape

    ref = jax.block_until_ready(_reference_forward(x, params))
    max_err = float(jnp.max(jnp.abs(out - ref)))
    assert max_err < 5e-2, f"mismatch vs reference: {max_err}"

    print("KERNEL_OK")
</pallas_src>

<mosaic_0001>
module attributes {stable_mosaic.version = 11 : i64} {
  func.func @_fused_cnn_encoder_kernel(%arg0: i32, %arg1: memref<256x27xbf16, #tpu.memory_space<vmem>>, %arg2: memref<256x1xi32, #tpu.memory_space<vmem>>, %arg3: memref<256x1xi32, #tpu.memory_space<vmem>>, %arg4: memref<27x16xbf16, #tpu.memory_space<vmem>>, %arg5: memref<1x16xf32, #tpu.memory_space<vmem>>, %arg6: memref<9x16x32xbf16, #tpu.memory_space<vmem>>, %arg7: memref<1x32xf32, #tpu.memory_space<vmem>>, %arg8: memref<9x32x128xbf16, #tpu.memory_space<vmem>>, %arg9: memref<1x128xf32, #tpu.memory_space<vmem>>, %arg10: memref<256x128xf32, #tpu.memory_space<vmem>>, %arg11: memref<304x16xf32, #tpu.memory_space<vmem>>, %arg12: memref<304x32xf32, #tpu.memory_space<vmem>>) attributes {dimension_semantics = [#tpu.dimension_semantics<parallel>], iteration_bounds = array<i64: 2>, scalar_prefetch = 0 : i64, scratch_operands = 2 : i64, tpu.core_type = #tpu.core_type<tc>, window_params = [{transform_indices = @transform_0, window_bounds = array<i64: 256, 27>}, {pipeline_mode = #tpu.pipeline_mode<synchronous>, transform_indices = @transform_1, window_bounds = array<i64: 256, 1>}, {pipeline_mode = #tpu.pipeline_mode<synchronous>, transform_indices = @transform_2, window_bounds = array<i64: 256, 1>}, {pipeline_mode = #tpu.pipeline_mode<synchronous>, transform_indices = @transform_3, window_bounds = array<i64: 27, 16>}, {pipeline_mode = #tpu.pipeline_mode<synchronous>, transform_indices = @transform_4, window_bounds = array<i64: 1, 16>}, {pipeline_mode = #tpu.pipeline_mode<synchronous>, transform_indices = @transform_5, window_bounds = array<i64: 9, 16, 32>}, {pipeline_mode = #tpu.pipeline_mode<synchronous>, transform_indices = @transform_6, window_bounds = array<i64: 1, 32>}, {pipeline_mode = #tpu.pipeline_mode<synchronous>, transform_indices = @transform_7, window_bounds = array<i64: 9, 32, 128>}, {pipeline_mode = #tpu.pipeline_mode<synchronous>, transform_indices = @transform_8, window_bounds = array<i64: 1, 128>}, {transform_indices = @transform_9, window_bounds = array<i64: 256, 128>}]} {
    %c0 = arith.constant 0 : index
    %c0_0 = arith.constant 0 : index
    %0 = vector.load %arg1[%c0, %c0_0] : memref<256x27xbf16, #tpu.memory_space<vmem>>, vector<256x27xbf16>
    %c0_1 = arith.constant 0 : index
    %c0_2 = arith.constant 0 : index
    %1 = vector.load %arg4[%c0_1, %c0_2] : memref<27x16xbf16, #tpu.memory_space<vmem>>, vector<27x16xbf16>
    %cst = arith.constant dense<0.000000e+00> : vector<256x16xf32>
    %2 = tpu.matmul %0, %1, %cst {dimension_numbers = #tpu.dot_dimension_numbers<[1], [0], [0], [1], [0, 0, 1, 1], [], []>} : vector<256x27xbf16>, vector<27x16xbf16>, vector<256x16xf32> -> vector<256x16xf32>
    %c0_3 = arith.constant 0 : index
    %c0_4 = arith.constant 0 : index
    %3 = vector.load %arg5[%c0_3, %c0_4] : memref<1x16xf32, #tpu.memory_space<vmem>>, vector<1x16xf32>
    %4 = vector.broadcast %3 : vector<1x16xf32> to vector<256x16xf32>
    %5 = arith.addf %2, %4 : vector<256x16xf32>
    %cst_5 = arith.constant 0.000000e+00 : f32
    %6 = vector.broadcast %cst_5 : f32 to vector<256x16xf32>
    %7 = arith.maximumf %5, %6 : vector<256x16xf32>
    %c0_6 = arith.constant 0 : index
    %c0_7 = arith.constant 0 : index
    %8 = vector.load %arg2[%c0_6, %c0_7] : memref<256x1xi32, #tpu.memory_space<vmem>>, vector<256x1xi32>
    %c0_8 = arith.constant 0 : index
    %c0_9 = arith.constant 0 : index
    %9 = vector.load %arg3[%c0_8, %c0_9] : memref<256x1xi32, #tpu.memory_space<vmem>>, vector<256x1xi32>
    %c1_i32 = arith.constant 1 : i32
    %10 = vector.broadcast %c1_i32 : i32 to vector<256x1xi32>
    %11 = arith.cmpi sge, %8, %10 : vector<256x1xi32>
    %c14_i32 = arith.constant 14 : i32
    %12 = vector.broadcast %c14_i32 : i32 to vector<256x1xi32>
    %13 = arith.cmpi sle, %8, %12 : vector<256x1xi32>
    %c1_i32_10 = arith.constant 1 : i32
    %14 = vector.broadcast %c1_i32_10 : i32 to vector<256x1xi32>
    %15 = arith.cmpi sge, %9, %14 : vector<256x1xi32>
    %c14_i32_11 = arith.constant 14 : i32
    %16 = vector.broadcast %c14_i32_11 : i32 to vector<256x1xi32>
    %17 = arith.cmpi sle, %9, %16 : vector<256x1xi32>
    %18 = arith.andi %11, %15 : vector<256x1xi1>
    %19 = arith.andi %11, %17 : vector<256x1xi1>
    %20 = arith.andi %13, %15 : vector<256x1xi1>
    %21 = arith.andi %13, %17 : vector<256x1xi1>
    %c24 = arith.constant 24 : index
    %c0_12 = arith.constant 0 : index
    %22 = vector.load %arg11[%c24, %c0_12] : memref<304x16xf32, #tpu.memory_space<vmem>>, vector<256x16xf32>
    tpu.vector_store %arg11[%c24, %c0_12], %7 {strides = array<i32>} : memref<304x16xf32, #tpu.memory_space<vmem>>, vector<256x16xf32>,
    %c7 = arith.constant 7 : index
    %c0_13 = arith.constant 0 : index
    %23 = vector.load %arg11[%c7, %c0_13] : memref<304x16xf32, #tpu.memory_space<vmem>>, vector<256x16xf32>
    %cst_14 = arith.constant 0.000000e+00 : f32
    %24 = vector.shape_cast %18 : vector<256x1xi1> to vector<256x1xi1>
    %25 = vector.broadcast %24 : vector<256x1xi1> to vector<256x16xi1>
    %26 = vector.broadcast %cst_14 : f32 to vector<256x16xf32>
    %27 = arith.select %25, %23, %26 : vector<256x16xi1>, vector<256x16xf32>
    %28 = arith.truncf %27 : vector<256x16xf32> to vector<256x16xbf16>
    %c0_15 = arith.constant 0 : index
    %c0_16 = arith.constant 0 : index
    %c0_17 = arith.constant 0 : index
    %29 = vector.load %arg6[%c0_15, %c0_16, %c0_17] : memref<9x16x32xbf16, #tpu.memory_space<vmem>>, vector<1x16x32xbf16>
    %30 = vector.shape_cast %29 : vector<1x16x32xbf16> to vector<16x32xbf16>
    %cst_18 = arith.constant dense<0.000000e+00> : vector<256x32xf32>
    %31 = tpu.matmul %28, %30, %cst_18 {dimension_numbers = #tpu.dot_dimension_numbers<[1], [0], [0], [1], [0, 0, 1, 1], [], []>} : vector<256x16xbf16>, vector<16x32xbf16>, vector<256x32xf32> -> vector<256x32xf32>
    %c8 = arith.constant 8 : index
    %c0_19 = arith.constant 0 : index
    %32 = vector.load %arg11[%c8, %c0_19] : memref<304x16xf32, #tpu.memory_space<vmem>>, vector<256x16xf32>
    %cst_20 = arith.constant 0.000000e+00 : f32
    %33 = vector.shape_cast %11 : vector<256x1xi1> to vector<256x1xi1>
    %34 = vector.broadcast %33 : vector<256x1xi1> to vector<256x16xi1>
    %35 = vector.broadcast %cst_20 : f32 to vector<256x16xf32>
    %36 = arith.select %34, %32, %35 : vector<256x16xi1>, vector<256x16xf32>
    %37 = arith.truncf %36 : vector<256x16xf32> to vector<256x16xbf16>
    %c1 = arith.constant 1 : index
    %c0_21 = arith.constant 0 : index
    %c0_22 = arith.constant 0 : index
    %38 = vector.load %arg6[%c1, %c0_21, %c0_22] : memref<9x16x32xbf16, #tpu.memory_space<vmem>>, vector<1x16x32xbf16>
    %39 = vector.shape_cast %38 : vector<1x16x32xbf16> to vector<16x32xbf16>
    %cst_23 = arith.constant dense<0.000000e+00> : vector<256x32xf32>
    %40 = tpu.matmul %37, %39, %cst_23 {dimension_numbers = #tpu.dot_dimension_numbers<[1], [0], [0], [1], [0, 0, 1, 1], [], []>} : vector<256x16xbf16>, vector<16x32xbf16>, vector<256x32xf32> -> vector<256x32xf32>
    %41 = arith.addf %31, %40 : vector<256x32xf32>
    %c9 = arith.constant 9 : index
    %c0_24 = arith.constant 0 : index
    %42 = vector.load %arg11[%c9, %c0_24] : memref<304x16xf32, #tpu.memory_space<vmem>>, vector<256x16xf32>
    %cst_25 = arith.constant 0.000000e+00 : f32
    %43 = vector.shape_cast %19 : vector<256x1xi1> to vector<256x1xi1>
    %44 = vector.broadcast %43 : vector<256x1xi1> to vector<256x16xi1>
    %45 = vector.broadcast %cst_25 : f32 to vector<256x16xf32>
    %46 = arith.select %44, %42, %45 : vector<256x16xi1>, vector<256x16xf32>
    %47 = arith.truncf %46 : vector<256x16xf32> to vector<256x16xbf16>
    %c2 = arith.constant 2 : index
    %c0_26 = arith.constant 0 : index
    %c0_27 = arith.constant 0 : index
    %48 = vector.load %arg6[%c2, %c0_26, %c0_27] : memref<9x16x32xbf16, #tpu.memory_space<vmem>>, vector<1x16x32xbf16>
    %49 = vector.shape_cast %48 : vector<1x16x32xbf16> to vector<16x32xbf16>
    %cst_28 = arith.constant dense<0.000000e+00> : vector<256x32xf32>
    %50 = tpu.matmul %47, %49, %cst_28 {dimension_numbers = #tpu.dot_dimension_numbers<[1], [0], [0], [1], [0, 0, 1, 1], [], []>} : vector<256x16xbf16>, vector<16x32xbf16>, vector<256x32xf32> -> vector<256x32xf32>
    %51 = arith.addf %41, %50 : vector<256x32xf32>
    %c23 = arith.constant 23 : index
    %c0_29 = arith.constant 0 : index
    %52 = vector.load %arg11[%c23, %c0_29] : memref<304x16xf32, #tpu.memory_space<vmem>>, vector<256x16xf32>
    %cst_30 = arith.constant 0.000000e+00 : f32
    %53 = vector.shape_cast %15 : vector<256x1xi1> to vector<256x1xi1>
    %54 = vector.broadcast %53 : vector<256x1xi1> to vector<256x16xi1>
    %55 = vector.broadcast %cst_30 : f32 to vector<256x16xf32>
    %56 = arith.select %54, %52, %55 : vector<256x16xi1>, vector<256x16xf32>
    %57 = arith.truncf %56 : vector<256x16xf32> to vector<256x16xbf16>
    %c3 = arith.constant 3 : index
    %c0_31 = arith.constant 0 : index
    %c0_32 = arith.constant 0 : index
    %58 = vector.load %arg6[%c3, %c0_31, %c0_32] : memref<9x16x32xbf16, #tpu.memory_space<vmem>>, vector<1x16x32xbf16>
    %59 = vector.shape_cast %58 : vector<1x16x32xbf16> to vector<16x32xbf16>
    %cst_33 = arith.constant dense<0.000000e+00> : vector<256x32xf32>
    %60 = tpu.matmul %57, %59, %cst_33 {dimension_numbers = #tpu.dot_dimension_numbers<[1], [0], [0], [1], [0, 0, 1, 1], [], []>} : vector<256x16xbf16>, vector<16x32xbf16>, vector<256x32xf32> -> vector<256x32xf32>
    %61 = arith.addf %51, %60 : vector<256x32xf32>
    %c24_34 = arith.constant 24 : index
    %c0_35 = arith.constant 0 : index
    %62 = vector.load %arg11[%c24_34, %c0_35] : memref<304x16xf32, #tpu.memory_space<vmem>>, vector<256x16xf32>
    %63 = arith.truncf %62 : vector<256x16xf32> to vector<256x16xbf16>
    %c4 = arith.constant 4 : index
    %c0_36 = arith.constant 0 : index
    %c0_37 = arith.constant 0 : index
    %64 = vector.load %arg6[%c4, %c0_36, %c0_37] : memref<9x16x32xbf16, #tpu.memory_space<vmem>>, vector<1x16x32xbf16>
    %65 = vector.shape_cast %64 : vector<1x16x32xbf16> to vector<16x32xbf16>
    %cst_38 = arith.constant dense<0.000000e+00> : vector<256x32xf32>
    %66 = tpu.matmul %63, %65, %cst_38 {dimension_numbers = #tpu.dot_dimension_numbers<[1], [0], [0], [1], [0, 0, 1, 1], [], []>} : vector<256x16xbf16>, vector<16x32xbf16>, vector<256x32xf32> -> vector<256x32xf32>
    %67 = arith.addf %61, %66 : vector<256x32xf32>
    %c25 = arith.constant 25 : index
    %c0_39 = arith.constant 0 : index
    %68 = vector.load %arg11[%c25, %c0_39] : memref<304x16xf32, #tpu.memory_space<vmem>>, vector<256x16xf32>
    %cst_40 = arith.constant 0.000000e+00 : f32
    %69 = vector.shape_cast %17 : vector<256x1xi1> to vector<256x1xi1>
    %70 = vector.broadcast %69 : vector<256x1xi1> to vector<256x16xi1>
    %71 = vector.broadcast %cst_40 : f32 to vector<256x16xf32>
    %72 = arith.select %70, %68, %71 : vector<256x16xi1>, vector<256x16xf32>
    %73 = arith.truncf %72 : vector<256x16xf32> to vector<256x16xbf16>
    %c5 = arith.constant 5 : index
    %c0_41 = arith.constant 0 : index
    %c0_42 = arith.constant 0 : index
    %74 = vector.load %arg6[%c5, %c0_41, %c0_42] : memref<9x16x32xbf16, #tpu.memory_space<vmem>>, vector<1x16x32xbf16>
    %75 = vector.shape_cast %74 : vector<1x16x32xbf16> to vector<16x32xbf16>
    %cst_43 = arith.constant dense<0.000000e+00> : vector<256x32xf32>
    %76 = tpu.matmul %73, %75, %cst_43 {dimension_numbers = #tpu.dot_dimension_numbers<[1], [0], [0], [1], [0, 0, 1, 1], [], []>} : vector<256x16xbf16>, vector<16x32xbf16>, vector<256x32xf32> -> vector<256x32xf32>
    %77 = arith.addf %67, %76 : vector<256x32xf32>
    %c39 = arith.constant 39 : index
    %c0_44 = arith.constant 0 : index
    %78 = vector.load %arg11[%c39, %c0_44] : memref<304x16xf32, #tpu.memory_space<vmem>>, vector<256x16xf32>
    %cst_45 = arith.constant 0.000000e+00 : f32
    %79 = vector.shape_cast %20 : vector<256x1xi1> to vector<256x1xi1>
    %80 = vector.broadcast %79 : vector<256x1xi1> to vector<256x16xi1>
    %81 = vector.broadcast %cst_45 : f32 to vector<256x16xf32>
    %82 = arith.select %80, %78, %81 : vector<256x16xi1>, vector<256x16xf32>
    %83 = arith.truncf %82 : vector<256x16xf32> to vector<256x16xbf16>
    %c6 = arith.constant 6 : index
    %c0_46 = arith.constant 0 : index
    %c0_47 = arith.constant 0 : index
    %84 = vector.load %arg6[%c6, %c0_46, %c0_47] : memref<9x16x32xbf16, #tpu.memory_space<vmem>>, vector<1x16x32xbf16>
    %85 = vector.shape_cast %84 : vector<1x16x32xbf16> to vector<16x32xbf16>
    %cst_48 = arith.constant dense<0.000000e+00> : vector<256x32xf32>
    %86 = tpu.matmul %83, %85, %cst_48 {dimension_numbers = #tpu.dot_dimension_numbers<[1], [0], [0], [1], [0, 0, 1, 1], [], []>} : vector<256x16xbf16>, vector<16x32xbf16>, vector<256x32xf32> -> vector<256x32xf32>
    %87 = arith.addf %77, %86 : vector<256x32xf32>
    %c40 = arith.constant 40 : index
    %c0_49 = arith.constant 0 : index
    %88 = vector.load %arg11[%c40, %c0_49] : memref<304x16xf32, #tpu.memory_space<vmem>>, vector<256x16xf32>
    %cst_50 = arith.constant 0.000000e+00 : f32
    %89 = vector.shape_cast %13 : vector<256x1xi1> to vector<256x1xi1>
    %90 = vector.broadcast %89 : vector<256x1xi1> to vector<256x16xi1>
    %91 = vector.broadcast %cst_50 : f32 to vector<256x16xf32>
    %92 = arith.select %90, %88, %91 : vector<256x16xi1>, vector<256x16xf32>
    %93 = arith.truncf %92 : vector<256x16xf32> to vector<256x16xbf16>
    %c7_51 = arith.constant 7 : index
    %c0_52 = arith.constant 0 : index
    %c0_53 = arith.constant 0 : index
    %94 = vector.load %arg6[%c7_51, %c0_52, %c0_53] : memref<9x16x32xbf16, #tpu.memory_space<vmem>>, vector<1x16x32xbf16>
    %95 = vector.shape_cast %94 : vector<1x16x32xbf16> to vector<16x32xbf16>
    %cst_54 = arith.constant dense<0.000000e+00> : vector<256x32xf32>
    %96 = tpu.matmul %93, %95, %cst_54 {dimension_numbers = #tpu.dot_dimension_numbers<[1], [0], [0], [1], [0, 0, 1, 1], [], []>} : vector<256x16xbf16>, vector<16x32xbf16>, vector<256x32xf32> -> vector<256x32xf32>
    %97 = arith.addf %87, %96 : vector<256x32xf32>
    %c41 = arith.constant 41 : index
    %c0_55 = arith.constant 0 : index
    %98 = vector.load %arg11[%c41, %c0_55] : memref<304x16xf32, #tpu.memory_space<vmem>>, vector<256x16xf32>
    %cst_56 = arith.constant 0.000000e+00 : f32
    %99 = vector.shape_cast %21 : vector<256x1xi1> to vector<256x1xi1>
    %100 = vector.broadcast %99 : vector<256x1xi1> to vector<256x16xi1>
    %101 = vector.broadcast %cst_56 : f32 to vector<256x16xf32>
    %102 = arith.select %100, %98, %101 : vector<256x16xi1>, vector<256x16xf32>
    %103 = arith.truncf %102 : vector<256x16xf32> to vector<256x16xbf16>
    %c8_57 = arith.constant 8 : index
    %c0_58 = arith.constant 0 : index
    %c0_59 = arith.constant 0 : index
    %104 = vector.load %arg6[%c8_57, %c0_58, %c0_59] : memref<9x16x32xbf16, #tpu.memory_space<vmem>>, vector<1x16x32xbf16>
    %105 = vector.shape_cast %104 : vector<1x16x32xbf16> to vector<16x32xbf16>
    %cst_60 = arith.constant dense<0.000000e+00> : vector<256x32xf32>
    %106 = tpu.matmul %103, %105, %cst_60 {dimension_numbers = #tpu.dot_dimension_numbers<[1], [0], [0], [1], [0, 0, 1, 1], [], []>} : vector<256x16xbf16>, vector<16x32xbf16>, vector<256x32xf32> -> vector<256x32xf32>
    %107 = arith.addf %97, %106 : vector<256x32xf32>
    %c0_61 = arith.constant 0 : index
    %c0_62 = arith.constant 0 : index
    %108 = vector.load %arg7[%c0_61, %c0_62] : memref<1x32xf32, #tpu.memory_space<vmem>>, vector<1x32xf32>
    %109 = vector.broadcast %108 : vector<1x32xf32> to vector<256x32xf32>
    %110 = arith.addf %107, %109 : vector<256x32xf32>
    %cst_63 = arith.constant 0.000000e+00 : f32
    %111 = vector.broadcast %cst_63 : f32 to vector<256x32xf32>
    %112 = arith.maximumf %110, %111 : vector<256x32xf32>
    %c24_64 = arith.constant 24 : index
    %c0_65 = arith.constant 0 : index
    %113 = vector.load %arg12[%c24_64, %c0_65] : memref<304x32xf32, #tpu.memory_space<vmem>>, vector<256x32xf32>
    tpu.vector_store %arg12[%c24_64, %c0_65], %112 {strides = array<i32>} : memref<304x32xf32, #tpu.memory_space<vmem>>, vector<256x32xf32>,
    %c7_66 = arith.constant 7 : index
    %c0_67 = arith.constant 0 : index
    %114 = vector.load %arg12[%c7_66, %c0_67] : memref<304x32xf32, #tpu.memory_space<vmem>>, vector<256x32xf32>
    %cst_68 = arith.constant 0.000000e+00 : f32
    %115 = vector.shape_cast %18 : vector<256x1xi1> to vector<256x1xi1>
    %116 = vector.broadcast %115 : vector<256x1xi1> to vector<256x32xi1>
    %117 = vector.broadcast %cst_68 : f32 to vector<256x32xf32>
    %118 = arith.select %116, %114, %117 : vector<256x32xi1>, vector<256x32xf32>
    %119 = arith.truncf %118 : vector<256x32xf32> to vector<256x32xbf16>
    %c0_69 = arith.constant 0 : index
    %c0_70 = arith.constant 0 : index
    %c0_71 = arith.constant 0 : index
    %120 = vector.load %arg8[%c0_69, %c0_70, %c0_71] : memref<9x32x128xbf16, #tpu.memory_space<vmem>>, vector<1x32x128xbf16>
    %121 = vector.shape_cast %120 : vector<1x32x128xbf16> to vector<32x128xbf16>
    %cst_72 = arith.constant dense<0.000000e+00> : vector<256x128xf32>
    %122 = tpu.matmul %119, %121, %cst_72 {dimension_numbers = #tpu.dot_dimension_numbers<[1], [0], [0], [1], [0, 0, 1, 1], [], []>} : vector<256x32xbf16>, vector<32x128xbf16>, vector<256x128xf32> -> vector<256x128xf32>
    %c8_73 = arith.constant 8 : index
    %c0_74 = arith.constant 0 : index
    %123 = vector.load %arg12[%c8_73, %c0_74] : memref<304x32xf32, #tpu.memory_space<vmem>>, vector<256x32xf32>
    %cst_75 = arith.constant 0.000000e+00 : f32
    %124 = vector.shape_cast %11 : vector<256x1xi1> to vector<256x1xi1>
    %125 = vector.broadcast %124 : vector<256x1xi1> to vector<256x32xi1>
    %126 = vector.broadcast %cst_75 : f32 to vector<256x32xf32>
    %127 = arith.select %125, %123, %126 : vector<256x32xi1>, vector<256x32xf32>
    %128 = arith.truncf %127 : vector<256x32xf32> to vector<256x32xbf16>
    %c1_76 = arith.constant 1 : index
    %c0_77 = arith.constant 0 : index
    %c0_78 = arith.constant 0 : index
    %129 = vector.load %arg8[%c1_76, %c0_77, %c0_78] : memref<9x32x128xbf16, #tpu.memory_space<vmem>>, vector<1x32x128xbf16>
    %130 = vector.shape_cast %129 : vector<1x32x128xbf16> to vector<32x128xbf16>
    %cst_79 = arith.constant dense<0.000000e+00> : vector<256x128xf32>
    %131 = tpu.matmul %128, %130, %cst_79 {dimension_numbers = #tpu.dot_dimension_numbers<[1], [0], [0], [1], [0, 0, 1, 1], [], []>} : vector<256x32xbf16>, vector<32x128xbf16>, vector<256x128xf32> -> vector<256x128xf32>
    %132 = arith.addf %122, %131 : vector<256x128xf32>
    %c9_80 = arith.constant 9 : index
    %c0_81 = arith.constant 0 : index
    %133 = vector.load %arg12[%c9_80, %c0_81] : memref<304x32xf32, #tpu.memory_space<vmem>>, vector<256x32xf32>
    %cst_82 = arith.constant 0.000000e+00 : f32
    %134 = vector.shape_cast %19 : vector<256x1xi1> to vector<256x1xi1>
    %135 = vector.broadcast %134 : vector<256x1xi1> to vector<256x32xi1>
    %136 = vector.broadcast %cst_82 : f32 to vector<256x32xf32>
    %137 = arith.select %135, %133, %136 : vector<256x32xi1>, vector<256x32xf32>
    %138 = arith.truncf %137 : vector<256x32xf32> to vector<256x32xbf16>
    %c2_83 = arith.constant 2 : index
    %c0_84 = arith.constant 0 : index
    %c0_85 = arith.constant 0 : index
    %139 = vector.load %arg8[%c2_83, %c0_84, %c0_85] : memref<9x32x128xbf16, #tpu.memory_space<vmem>>, vector<1x32x128xbf16>
    %140 = vector.shape_cast %139 : vector<1x32x128xbf16> to vector<32x128xbf16>
    %cst_86 = arith.constant dense<0.000000e+00> : vector<256x128xf32>
    %141 = tpu.matmul %138, %140, %cst_86 {dimension_numbers = #tpu.dot_dimension_numbers<[1], [0], [0], [1], [0, 0, 1, 1], [], []>} : vector<256x32xbf16>, vector<32x128xbf16>, vector<256x128xf32> -> vector<256x128xf32>
    %142 = arith.addf %132, %141 : vector<256x128xf32>
    %c23_87 = arith.constant 23 : index
    %c0_88 = arith.constant 0 : index
    %143 = vector.load %arg12[%c23_87, %c0_88] : memref<304x32xf32, #tpu.memory_space<vmem>>, vector<256x32xf32>
    %cst_89 = arith.constant 0.000000e+00 : f32
    %144 = vector.shape_cast %15 : vector<256x1xi1> to vector<256x1xi1>
    %145 = vector.broadcast %144 : vector<256x1xi1> to vector<256x32xi1>
    %146 = vector.broadcast %cst_89 : f32 to vector<256x32xf32>
    %147 = arith.select %145, %143, %146 : vector<256x32xi1>, vector<256x32xf32>
    %148 = arith.truncf %147 : vector<256x32xf32> to vector<256x32xbf16>
    %c3_90 = arith.constant 3 : index
    %c0_91 = arith.constant 0 : index
    %c0_92 = arith.constant 0 : index
    %149 = vector.load %arg8[%c3_90, %c0_91, %c0_92] : memref<9x32x128xbf16, #tpu.memory_space<vmem>>, vector<1x32x128xbf16>
    %150 = vector.shape_cast %149 : vector<1x32x128xbf16> to vector<32x128xbf16>
    %cst_93 = arith.constant dense<0.000000e+00> : vector<256x128xf32>
    %151 = tpu.matmul %148, %150, %cst_93 {dimension_numbers = #tpu.dot_dimension_numbers<[1], [0], [0], [1], [0, 0, 1, 1], [], []>} : vector<256x32xbf16>, vector<32x128xbf16>, vector<256x128xf32> -> vector<256x128xf32>
    %152 = arith.addf %142, %151 : vector<256x128xf32>
    %c24_94 = arith.constant 24 : index
    %c0_95 = arith.constant 0 : index
    %153 = vector.load %arg12[%c24_94, %c0_95] : memref<304x32xf32, #tpu.memory_space<vmem>>, vector<256x32xf32>
    %154 = arith.truncf %153 : vector<256x32xf32> to vector<256x32xbf16>
    %c4_96 = arith.constant 4 : index
    %c0_97 = arith.constant 0 : index
    %c0_98 = arith.constant 0 : index
    %155 = vector.load %arg8[%c4_96, %c0_97, %c0_98] : memref<9x32x128xbf16, #tpu.memory_space<vmem>>, vector<1x32x128xbf16>
    %156 = vector.shape_cast %155 : vector<1x32x128xbf16> to vector<32x128xbf16>
    %cst_99 = arith.constant dense<0.000000e+00> : vector<256x128xf32>
    %157 = tpu.matmul %154, %156, %cst_99 {dimension_numbers = #tpu.dot_dimension_numbers<[1], [0], [0], [1], [0, 0, 1, 1], [], []>} : vector<256x32xbf16>, vector<32x128xbf16>, vector<256x128xf32> -> vector<256x128xf32>
    %158 = arith.addf %152, %157 : vector<256x128xf32>
    %c25_100 = arith.constant 25 : index
    %c0_101 = arith.constant 0 : index
    %159 = vector.load %arg12[%c25_100, %c0_101] : memref<304x32xf32, #tpu.memory_space<vmem>>, vector<256x32xf32>
    %cst_102 = arith.constant 0.000000e+00 : f32
    %160 = vector.shape_cast %17 : vector<256x1xi1> to vector<256x1xi1>
    %161 = vector.broadcast %160 : vector<256x1xi1> to vector<256x32xi1>
    %162 = vector.broadcast %cst_102 : f32 to vector<256x32xf32>
    %163 = arith.select %161, %159, %162 : vector<256x32xi1>, vector<256x32xf32>
    %164 = arith.truncf %163 : vector<256x32xf32> to vector<256x32xbf16>
    %c5_103 = arith.constant 5 : index
    %c0_104 = arith.constant 0 : index
    %c0_105 = arith.constant 0 : index
    %165 = vector.load %arg8[%c5_103, %c0_104, %c0_105] : memref<9x32x128xbf16, #tpu.memory_space<vmem>>, vector<1x32x128xbf16>
    %166 = vector.shape_cast %165 : vector<1x32x128xbf16> to vector<32x128xbf16>
    %cst_106 = arith.constant dense<0.000000e+00> : vector<256x128xf32>
    %167 = tpu.matmul %164, %166, %cst_106 {dimension_numbers = #tpu.dot_dimension_numbers<[1], [0], [0], [1], [0, 0, 1, 1], [], []>} : vector<256x32xbf16>, vector<32x128xbf16>, vector<256x128xf32> -> vector<256x128xf32>
    %168 = arith.addf %158, %167 : vector<256x128xf32>
    %c39_107 = arith.constant 39 : index
    %c0_108 = arith.constant 0 : index
    %169 = vector.load %arg12[%c39_107, %c0_108] : memref<304x32xf32, #tpu.memory_space<vmem>>, vector<256x32xf32>
    %cst_109 = arith.constant 0.000000e+00 : f32
    %170 = vector.shape_cast %20 : vector<256x1xi1> to vector<256x1xi1>
    %171 = vector.broadcast %170 : vector<256x1xi1> to vector<256x32xi1>
    %172 = vector.broadcast %cst_109 : f32 to vector<256x32xf32>
    %173 = arith.select %171, %169, %172 : vector<256x32xi1>, vector<256x32xf32>
    %174 = arith.truncf %173 : vector<256x32xf32> to vector<256x32xbf16>
    %c6_110 = arith.constant 6 : index
    %c0_111 = arith.constant 0 : index
    %c0_112 = arith.constant 0 : index
    %175 = vector.load %arg8[%c6_110, %c0_111, %c0_112] : memref<9x32x128xbf16, #tpu.memory_space<vmem>>, vector<1x32x128xbf16>
    %176 = vector.shape_cast %175 : vector<1x32x128xbf16> to vector<32x128xbf16>
    %cst_113 = arith.constant dense<0.000000e+00> : vector<256x128xf32>
    %177 = tpu.matmul %174, %176, %cst_113 {dimension_numbers = #tpu.dot_dimension_numbers<[1], [0], [0], [1], [0, 0, 1, 1], [], []>} : vector<256x32xbf16>, vector<32x128xbf16>, vector<256x128xf32> -> vector<256x128xf32>
    %178 = arith.addf %168, %177 : vector<256x128xf32>
    %c40_114 = arith.constant 40 : index
    %c0_115 = arith.constant 0 : index
    %179 = vector.load %arg12[%c40_114, %c0_115] : memref<304x32xf32, #tpu.memory_space<vmem>>, vector<256x32xf32>
    %cst_116 = arith.constant 0.000000e+00 : f32
    %180 = vector.shape_cast %13 : vector<256x1xi1> to vector<256x1xi1>
    %181 = vector.broadcast %180 : vector<256x1xi1> to vector<256x32xi1>
    %182 = vector.broadcast %cst_116 : f32 to vector<256x32xf32>
    %183 = arith.select %181, %179, %182 : vector<256x32xi1>, vector<256x32xf32>
    %184 = arith.truncf %183 : vector<256x32xf32> to vector<256x32xbf16>
    %c7_117 = arith.constant 7 : index
    %c0_118 = arith.constant 0 : index
    %c0_119 = arith.constant 0 : index
    %185 = vector.load %arg8[%c7_117, %c0_118, %c0_119] : memref<9x32x128xbf16, #tpu.memory_space<vmem>>, vector<1x32x128xbf16>
    %186 = vector.shape_cast %185 : vector<1x32x128xbf16> to vector<32x128xbf16>
    %cst_120 = arith.constant dense<0.000000e+00> : vector<256x128xf32>
    %187 = tpu.matmul %184, %186, %cst_120 {dimension_numbers = #tpu.dot_dimension_numbers<[1], [0], [0], [1], [0, 0, 1, 1], [], []>} : vector<256x32xbf16>, vector<32x128xbf16>, vector<256x128xf32> -> vector<256x128xf32>
    %188 = arith.addf %178, %187 : vector<256x128xf32>
    %c41_121 = arith.constant 41 : index
    %c0_122 = arith.constant 0 : index
    %189 = vector.load %arg12[%c41_121, %c0_122] : memref<304x32xf32, #tpu.memory_space<vmem>>, vector<256x32xf32>
    %cst_123 = arith.constant 0.000000e+00 : f32
    %190 = vector.shape_cast %21 : vector<256x1xi1> to vector<256x1xi1>
    %191 = vector.broadcast %190 : vector<256x1xi1> to vector<256x32xi1>
    %192 = vector.broadcast %cst_123 : f32 to vector<256x32xf32>
    %193 = arith.select %191, %189, %192 : vector<256x32xi1>, vector<256x32xf32>
    %194 = arith.truncf %193 : vector<256x32xf32> to vector<256x32xbf16>
    %c8_124 = arith.constant 8 : index
    %c0_125 = arith.constant 0 : index
    %c0_126 = arith.constant 0 : index
    %195 = vector.load %arg8[%c8_124, %c0_125, %c0_126] : memref<9x32x128xbf16, #tpu.memory_space<vmem>>, vector<1x32x128xbf16>
    %196 = vector.shape_cast %195 : vector<1x32x128xbf16> to vector<32x128xbf16>
    %cst_127 = arith.constant dense<0.000000e+00> : vector<256x128xf32>
    %197 = tpu.matmul %194, %196, %cst_127 {dimension_numbers = #tpu.dot_dimension_numbers<[1], [0], [0], [1], [0, 0, 1, 1], [], []>} : vector<256x32xbf16>, vector<32x128xbf16>, vector<256x128xf32> -> vector<256x128xf32>
    %198 = arith.addf %188, %197 : vector<256x128xf32>
    %c0_128 = arith.constant 0 : index
    %c0_129 = arith.constant 0 : index
    %199 = vector.load %arg9[%c0_128, %c0_129] : memref<1x128xf32, #tpu.memory_space<vmem>>, vector<1x128xf32>
    %200 = vector.broadcast %199 : vector<1x128xf32> to vector<256x128xf32>
    %201 = arith.addf %198, %200 : vector<256x128xf32>
    %cst_130 = arith.constant 0.000000e+00 : f32
    %202 = vector.broadcast %cst_130 : f32 to vector<256x128xf32>
    %203 = arith.maximumf %201, %202 : vector<256x128xf32>
    %c0_131 = arith.constant 0 : index
    %c0_132 = arith.constant 0 : index
    %204 = vector.load %arg10[%c0_131, %c0_132] : memref<256x128xf32, #tpu.memory_space<vmem>>, vector<256x128xf32>
    tpu.vector_store %arg10[%c0_131, %c0_132], %203 {strides = array<i32>} : memref<256x128xf32, #tpu.memory_space<vmem>>, vector<256x128xf32>,
    return
  }
  func.func @transform_0(%arg0: i32) -> (i32, i32) {
    %c0_i32 = arith.constant 0 : i32
    %c0_i32_0 = arith.constant 0 : i32
    return %arg0, %c0_i32 : i32, i32
  }
  func.func @transform_1(%arg0: i32) -> (i32, i32) {
    %c0_i32 = arith.constant 0 : i32
    %c0_i32_0 = arith.constant 0 : i32
    %c0_i32_1 = arith.constant 0 : i32
    return %c0_i32, %c0_i32_0 : i32, i32
  }
  func.func @transform_2(%arg0: i32) -> (i32, i32) {
    %c0_i32 = arith.constant 0 : i32
    %c0_i32_0 = arith.constant 0 : i32
    %c0_i32_1 = arith.constant 0 : i32
    return %c0_i32, %c0_i32_0 : i32, i32
  }
  func.func @transform_3(%arg0: i32) -> (i32, i32) {
    %c0_i32 = arith.constant 0 : i32
    %c0_i32_0 = arith.constant 0 : i32
    %c0_i32_1 = arith.constant 0 : i32
    return %c0_i32, %c0_i32_0 : i32, i32
  }
  func.func @transform_4(%arg0: i32) -> (i32, i32) {
    %c0_i32 = arith.constant 0 : i32
    %c0_i32_0 = arith.constant 0 : i32
    %c0_i32_1 = arith.constant 0 : i32
    return %c0_i32, %c0_i32_0 : i32, i32
  }
  func.func @transform_5(%arg0: i32) -> (i32, i32, i32) {
    %c0_i32 = arith.constant 0 : i32
    %c0_i32_0 = arith.constant 0 : i32
    %c0_i32_1 = arith.constant 0 : i32
    %c0_i32_2 = arith.constant 0 : i32
    return %c0_i32, %c0_i32_0, %c0_i32_1 : i32, i32, i32
  }
  func.func @transform_6(%arg0: i32) -> (i32, i32) {
    %c0_i32 = arith.constant 0 : i32
    %c0_i32_0 = arith.constant 0 : i32
    %c0_i32_1 = arith.constant 0 : i32
    return %c0_i32, %c0_i32_0 : i32, i32
  }
  func.func @transform_7(%arg0: i32) -> (i32, i32, i32) {
    %c0_i32 = arith.constant 0 : i32
    %c0_i32_0 = arith.constant 0 : i32
    %c0_i32_1 = arith.constant 0 : i32
    %c0_i32_2 = arith.constant 0 : i32
    return %c0_i32, %c0_i32_0, %c0_i32_1 : i32, i32, i32
  }
  func.func @transform_8(%arg0: i32) -> (i32, i32) {
    %c0_i32 = arith.constant 0 : i32
    %c0_i32_0 = arith.constant 0 : i32
    %c0_i32_1 = arith.constant 0 : i32
    return %c0_i32, %c0_i32_0 : i32, i32
  }
  func.func @transform_9(%arg0: i32) -> (i32, i32) {
    %c0_i32 = arith.constant 0 : i32
    %c0_i32_0 = arith.constant 0 : i32
    return %arg0, %c0_i32 : i32, i32
  }
}

</mosaic_0001>

<bundles_post_ra>
// kernel: cnn_encoder_forward.1
= control target key start
LH: loop header
LB: loop body
LE: loop exit
PB: predicated region body
PF: predicated region fallthrough
CT: control target
= control target key end

     0   :  { %s7849_s30 = smov 0   ;;  %s13468_s0 = inlined_call_operand.vmem [shape: bf16[512,27], index: 0, kind: input, shape index: {}]   ;;  %s13469_s1 = inlined_call_operand.vmem [shape: s32[256,1], index: 1, kind: input, shape index: {}]   ;;  %s13470_s2 = inlined_call_operand.vmem [shape: s32[256,1], index: 2, kind: input, shape index: {}]   ;;  %s13471_s3 = inlined_call_operand.vmem [shape: bf16[27,16], index: 3, kind: input, shape index: {}]   ;;  %s13472_s4 = inlined_call_operand.vmem [shape: f32[1,16], index: 4, kind: input, shape index: {}]   ;;  %s13473_s5 = inlined_call_operand.vmem [shape: bf16[9,16,32], index: 5, kind: input, shape index: {}]   ;;  %s13474_s6 = inlined_call_operand.vmem [shape: f32[1,32], index: 6, kind: input, shape index: {}]   ;;  %s13475_s7 = inlined_call_operand.vmem [shape: bf16[9,32,128], index: 7, kind: input, shape index: {}]   ;;  %s13476_s8 = inlined_call_operand.vmem [shape: f32[1,128], index: 8, kind: input, shape index: {}]   ;;  %s13477_s9 = inlined_call_operand.vmem [shape: f32[512,128], index: 9, kind: output, shape index: {}]  }
   0x1 LB: > { %s7057_s10 = sadd.s32 4294967295, %s7795_s30   ;;  %p7061_p0 = scmp.ge.s32.totalorder %s7795_s30, 1  ;;  %s7795_s30 = sphi %s7849_s30, %s19_s30  }
   0x2   : > { %p288_p1 = scmp.lt.s32.totalorder %s7795_s30, 3 }
   0x4   : > { %p289_p2 = pnand %p7061_p0, %p288_p1 }
   0x6   : > { %292 = sbr.rel (%p289_p2) target bundleno = 1714 (0x6b2), region = 56 }
   0xb   : > { %v7860_v0 = vld [vmem:[%s13469_s1 + $0x30] sm:$0xff]  ;;  %v7865_v1 = vld [vmem:[%s13469_s1 + $0x40] sm:$0xff]  ;;  %vm517_vm0 = vcmask 1044480   ;;  %v13519_v3 = vmov 0   ;;  %vm518_vm3 = vcmask 1045504   ;;  %v7798_v8 = vmov 65535  }
   0xc   : > { %v7870_v2 = vld [vmem:[%s13470_s2 + $0x40] sm:$0xff]  ;;  %7659 = vset.pattern.permute.xlu1 %v13519_v3  ;;  %7660 = vset.pattern.permute.xlu2 %v13519_v3  ;;  %vm715_vm1 = vcmp.ge.s32.totalorder %v7860_v0, 1  ;;  %vm717_vm2 = vcmp.ge.s32.totalorder %v7865_v1, 1  ;;  %v7879_v4 = vld [vmem:[%s13470_s2 + $0x30] sm:$0xff]  ;;  %v7136_v6 = vld [vmem:[%s13471_s3 + $0x8] sm:$0xf] }
   0xd   : > { %7658 = vset.pattern.permute.xlu0 %v13519_v3  ;;  %v1278_v5 = vsel %vm715_vm1, 1, %v13519_v3  ;;  %vm13480_vm4 = vcmp.ge.s32.totalorder %v7870_v2, 1  ;;  %vm13485_vm5 = vcmp.ge.s32.totalorder %v7879_v4, 1  ;;  %v7617_v7 = vld [vmem:[%s13471_s3 + $0x8] sm:$0x30]  ;;  %v519_v9 = vsel %vm517_vm0, 4294967295, %v7798_v8 }
   0xe   : > { %1323 = vperm.xlu1 %7659, %v1278_v5   ;;  %vm845_vm6 = vmand %vm717_vm2, %vm13480_vm4  ;;  %v7901_v10 = vld [vmem:[%s13469_s1 + $0x38] sm:$0xff]  ;;  %s7062_s25 = sshll.u32 %s7057_s10, 5  ;;  %v7137_v12 = vor.u32 %v7617_v7, %v7136_v6  ;;  %v520_v13 = vsel %vm518_vm3, %v519_v9, 0  ;;  %v7912_v14 = vld [vmem:[%s13469_s1 + $0x48] sm:$0xff]  ;;  %vm468_vm14 = vcmask 220160   ;;  %v1280_v30 = vsel %vm717_vm2, 1, %v13519_v3 }
   0xf   : > { %v1038_v11 = vsel %vm845_vm6, 1, %v13519_v3  ;;  %vm843_vm7 = vmand %vm715_vm1, %vm13485_vm5  ;;  %v7917_v15 = vld [vmem:[%s13470_s2 + $0x48] sm:$0xff]  ;;  %p325_p3 = scmp.lt.s32.totalorder %s7062_s25, 63  ;;  %vm716_vm8 = vcmp.ge.s32.totalorder %v7901_v10, 1  ;;  %vm718_vm9 = vcmp.ge.s32.totalorder %v7912_v14, 1  ;;  %v7925_v17 = vld [vmem:[%s13470_s2 + $0x38] sm:$0xff] }
  0x10   : > { %1087 = vperm.xlu2 %7660, %v1038_v11   ;;  %v1036_v16 = vsel %vm843_vm7, 1, %v13519_v3  ;;  %v522_v18 = vand.u32 %v7137_v12, %v520_v13  ;;  %vm13483_vm10 = vcmp.ge.s32.totalorder %v7917_v15, 1  ;;  %vm13484_vm11 = vcmp.ge.s32.totalorder %v7925_v17, 1  ;;  %v7616_v19 = vld [vmem:[%s13471_s3] sm:$0xff]  ;;  %v7954_v21 = vld [vmem:[%s13469_s1 + $0x50] sm:$0xff]  ;;  %v7978_v28 = vld [vmem:[%s13469_s1 + $0x58] sm:$0xff] }
  0x11   : > { %1081 = vperm.xlu0 %7658, %v1036_v16   ;;  %s15517_s25 = smov (!%p325_p3, %s7062_s25), 63  ;;  %vm846_vm12 = vmand %vm718_vm9, %vm13483_vm10  ;;  %v1279_v20 = vsel %vm716_vm8, 1, %v13519_v3  ;;  %v7959_v22 = vld [vmem:[%s13470_s2 + $0x50] sm:$0xff]  ;;  %vm719_vm15 = vcmp.ge.s32.totalorder %v7954_v21, 1  ;;  %v1281_v26 = vsel %vm718_vm9, 1, %v13519_v3  ;;  %v7983_v29 = vld [vmem:[%s13470_s2 + $0x58] sm:$0xff] }
  0x12   : > { %530 = vmatpush.bf16.msra.mxu0 %v522_v18  ;;  %vm844_vm13 = vmand %vm716_vm8, %vm13484_vm11  ;;  %s7063_s14 = sshll.u32 %s15517_s25, 2  ;;  %v1039_v23 = vsel %vm846_vm12, 1, %v13519_v3  ;;  %vm13479_vm0 = vcmp.ge.s32.totalorder %v7959_v22, 1  ;;  %vm720_vm6 = vcmp.ge.s32.totalorder %v7978_v28, 1  ;;  %vm13478_vm7 = vcmp.ge.s32.totalorder %v7983_v29, 1  ;;  %v7993_v31 = vld [vmem:[%s13469_s1 + $0x68] sm:$0xff] }
  0x13   : > { %s7949_s17 = scalar_lea.vmem %s13468_s0, %s7063_s14  ;;  %v1037_v24 = vsel %vm844_vm13, 1, %v13519_v3  ;;  %vm847_vm3 = vmand %vm719_vm15, %vm13479_vm0  ;;  %v7998_v32 = vld [vmem:[%s13470_s2 + $0x68] sm:$0xff]  ;;  %v1282_v33 = vsel %vm719_vm15, 1, %v13519_v3  ;;  %v1283_v34 = vsel %vm720_vm6, 1, %v13519_v3  ;;  %vm722_vm13 = vcmp.ge.s32.totalorder %v7993_v31, 1  ;;  %v8015_v35 = vld [vmem:[%s13469_s1 + $0x60] sm:$0xff] }
  0x14   : > { %v7600_v25 = vld [vmem:[%s7949_s17] sm:$0xff]  ;;  %v1040_v27 = vsel %vm847_vm3, 1, %v13519_v3  ;;  %14202 = vst [vmem:[#allocation4_spill] sm:$0xff] %v7998_v32  ;;  %vm848_vm12 = vmand %vm720_vm6, %vm13478_vm7  ;;  %vm13481_vm3 = vcmp.ge.s32.totalorder %v7998_v32, 1  ;;  %v7601_v38 = vld [vmem:[%s7949_s17 + $0x8] sm:$0xff]  ;;  %vm13496_vm0 = vcmp.ge.s32.totalorder %v8015_v35, 1 }
  0x15   : > { %v8020_v36 = vld [vmem:[%s13470_s2 + $0x60] sm:$0xff]  ;;  %v1041_v37 = vsel %vm848_vm12, 1, %v13519_v3  ;;  %vm850_vm7 = vmand %vm722_vm13, %vm13481_vm3  ;;  %v8034_v39 = vld [vmem:[%s13469_s1 + $0x70] sm:$0xff]  ;;  %v1284_v44 = vsel %vm13496_vm0, 1, %v13519_v3  ;;  %v1285_v50 = vsel %vm722_vm13, 1, %v13519_v3  ;;  %s7065_s21 = sshll.u32 %s15517_s25, 3 }
  0x16   : > { %1326 = vperm.xlu1 %7659, %v1279_v20   ;;  %531 = vmatpush.bf16.msra.mxu0 %v7616_v19  ;;  %vm13482_vm4 = vcmp.ge.s32.totalorder %v8020_v36, 1  ;;  %v8039_v40 = vld [vmem:[%s13470_s2 + $0x70] sm:$0xff]  ;;  %v1043_v41 = vsel %vm850_vm7, 1, %v13519_v3  ;;  %v8049_v42 = vld [vmem:[%s13469_s1 + $0x78] sm:$0xff]  ;;  %vm13489_vm7 = vcmp.ge.s32.totalorder %v8034_v39, 1  ;;  %v8076_v47 = vld [vmem:[%s13469_s1 + $0x80] sm:$0xff]  ;;  %s13294_s24 = scalar_lea.vmem %s13477_s9, %s7065_s21 }
  0x17   : > { %14203 = vst [vmem:[#allocation5_spill] sm:$0xff] %v8039_v40  ;;  %vm849_vm12 = vmand %vm13496_vm0, %vm13482_vm4  ;;  %v8054_v43 = vld [vmem:[%s13470_s2 + $0x78] sm:$0xff]  ;;  %vm13488_vm3 = vcmp.ge.s32.totalorder %v8039_v40, 1  ;;  %vm13495_vm4 = vcmp.ge.s32.totalorder %v8049_v42, 1  ;;  %v8081_v48 = vld [vmem:[%s13470_s2 + $0x80] sm:$0xff]  ;;  %v1286_v56 = vsel %vm13489_vm7, 1, %v13519_v3 }
  0x18   : > { %1090 = vperm.xlu2 %7660, %v1039_v23   ;;  %14204 = vst [vmem:[#allocation6_spill] sm:$0xff] %v8054_v43  ;;  %v1042_v45 = vsel %vm849_vm12, 1, %v13519_v3  ;;  %vm13486_vm10 = vcmp.ge.s32.totalorder %v8054_v43, 1  ;;  %vm851_vm11 = vmand %vm13489_vm7, %vm13488_vm3  ;;  %v7602_v51 = vld [vmem:[%s7949_s17 + $0x10] sm:$0xff]  ;;  %vm13487_vm12 = vcmp.ge.s32.totalorder %v8081_v48, 1  ;;  %v1287_v52 = vsel %vm13495_vm4, 1, %v13519_v3 }
  0x19   : > { %1084 = vperm.xlu0 %7658, %v1037_v24   ;;  %7138 = vmatmul.msk.bf16.vlgmr.msra.gmra.mxu0 %vm468_vm14, %v7600_v25  ;;  %vm852_vm5 = vmand %vm13495_vm4, %vm13486_vm10  ;;  %v1044_v46 = vsel %vm851_vm11, 1, %v13519_v3  ;;  %14205 = vst [vmem:[#allocation7_spill] sm:$0xff] %v8081_v48  ;;  %vm13492_vm11 = vcmp.ge.s32.totalorder %v8076_v47, 1  ;;  %v8102_v54 = vld [vmem:[%s13469_s1 + $0x88] sm:$0xff]  ;;  %v8117_v57 = vld [vmem:[%s13469_s1 + $0x98] sm:$0xff] }
  0x1a   : > { %v1045_v49 = vsel %vm852_vm5, 1, %v13519_v3  ;;  %vm853_vm10 = vmand %vm13492_vm11, %vm13487_vm12  ;;  %v8107_v55 = vld [vmem:[%s13470_s2 + $0x88] sm:$0xff]  ;;  %vm13491_vm5 = vcmp.ge.s32.totalorder %v8102_v54, 1  ;;  %v8122_v58 = vld [vmem:[%s13470_s2 + $0x98] sm:$0xff]  ;;  %v1288_v59 = vsel %vm13492_vm11, 1, %v13519_v3  ;;  %vm728_vm3 = vcmp.ge.s32.totalorder %v8117_v57, 1 }
  0x1b   : > { %v1046_v53 = vsel %vm853_vm10, 1, %v13519_v3  ;;  %14206 = vst [vmem:[#allocation8_spill] sm:$0xff] %v8107_v55  ;;  %vm13490_vm10 = vcmp.ge.s32.totalorder %v8107_v55, 1  ;;  %v1289_v60 = vsel %vm13491_vm5, 1, %v13519_v3  ;;  %vm13493_vm7 = vcmp.ge.s32.totalorder %v8122_v58, 1  ;;  %v8139_v61 = vld [vmem:[%s13469_s1 + $0x90] sm:$0xff] }
  0x1c   : > { %14207 = vst [vmem:[#allocation9_spill] sm:$0xff] %v8122_v58  ;;  %vm854_vm12 = vmand %vm13491_vm5, %vm13490_vm10  ;;  %v8144_v62 = vld [vmem:[%s13470_s2 + $0x90] sm:$0xff]  ;;  %v7603_v5 = vld [vmem:[%s7949_s17 + $0x18] sm:$0xff]  ;;  %vm13497_vm5 = vcmp.ge.s32.totalorder %v8139_v61, 1  ;;  %v1291_v23 = vsel %vm728_vm3, 1, %v13519_v3 }
  0x1d   : > { %14208 = vst [vmem:[#allocation10_spill] sm:$0xff] %v8144_v62  ;;  %v1047_v63 = vsel %vm854_vm12, 1, %v13519_v3  ;;  %vm856_vm10 = vmand %vm728_vm3, %vm13493_vm7  ;;  %vm13494_vm11 = vcmp.ge.s32.totalorder %v8144_v62, 1  ;;  %v8158_v6 = vld [vmem:[%s13469_s1 + $0xa0] sm:$0xff]  ;;  %v8173_v9 = vld [vmem:[%s13469_s1 + $0xa8] sm:$0xff]  ;;  %v1290_v12 = vsel %vm13497_vm5, 1, %v13519_v3 }
  0x1e   : > { %1332 = vperm.xlu1 %7659, %v1281_v26   ;;  %v8163_v7 = vld [vmem:[%s13470_s2 + $0xa0] sm:$0xff]  ;;  %v1049_v8 = vsel %vm856_vm10, 1, %v13519_v3  ;;  %vm855_vm12 = vmand %vm13497_vm5, %vm13494_vm11  ;;  %v8178_v11 = vld [vmem:[%s13470_s2 + $0xa8] sm:$0xff]  ;;  %vm13503_vm10 = vcmp.ge.s32.totalorder %v8158_v6, 1  ;;  %vm13504_vm11 = vcmp.ge.s32.totalorder %v8173_v9, 1 }
  0x1f   : > { %14209 = vst [vmem:[#allocation11_spill] sm:$0xff] %v8163_v7  ;;  %vm13500_vm7 = vcmp.ge.s32.totalorder %v8163_v7, 1  ;;  %v1048_v13 = vsel %vm855_vm12, 1, %v13519_v3  ;;  %vm13498_vm4 = vcmp.ge.s32.totalorder %v8178_v11, 1  ;;  %v8200_v18 = vld [vmem:[%s13469_s1 + $0xb0] sm:$0xff]  ;;  %v7604_v24 = vld [vmem:[%s7949_s17 + $0x20] sm:$0xff] }
  0x20   : > { %1093 = vperm.xlu2 %7660, %v1040_v27   ;;  %14210 = vst [vmem:[#allocation12_spill] sm:$0xff] %v8178_v11  ;;  %vm857_vm0 = vmand %vm13503_vm10, %vm13500_vm7  ;;  %v8205_v19 = vld [vmem:[%s13470_s2 + $0xb0] sm:$0xff]  ;;  %v1293_v25 = vsel %vm13504_vm11, 1, %v13519_v3  ;;  %v8226_v27 = vld [vmem:[%s13469_s1 + $0xb8] sm:$0xff]  ;;  %vm13508_vm7 = vcmp.le.s32.totalorder %v7925_v17, 14 }
  0x21   : > { %1329 = vperm.xlu0 %7658, %v1280_v30   ;;  %vm858_vm5 = vmand %vm13504_vm11, %vm13498_vm4  ;;  %v1050_v16 = vsel %vm857_vm0, 1, %v13519_v3  ;;  %14211 = vst [vmem:[#allocation13_spill] sm:$0xff] %v8205_v19  ;;  %vm13502_vm0 = vcmp.ge.s32.totalorder %v8200_v18, 1  ;;  %vm13499_vm12 = vcmp.ge.s32.totalorder %v8205_v19, 1  ;;  %v8231_v30 = vld [vmem:[%s13470_s2 + $0xb8] sm:$0xff]  ;;  %vm13509_vm11 = vcmp.le.s32.totalorder %v7879_v4, 14 }
  0x22   : > { %v1051_v20 = vsel %vm858_vm5, 1, %v13519_v3  ;;  %vm859_vm4 = vmand %vm13502_vm0, %vm13499_vm12  ;;  %vm13505_vm5 = vcmp.ge.s32.totalorder %v8226_v27, 1 }
  0x23   : > { %v1052_v26 = vsel %vm859_vm4, 1, %v13519_v3  ;;  %vm13501_vm4 = vcmp.ge.s32.totalorder %v8231_v30, 1 }
  0x24   : > { %vm860_vm12 = vmand %vm13505_vm5, %vm13501_vm4 }
  0x26   : > { %1335 = vperm.xlu1 %7659, %v1282_v33   ;;  %v1292_v33 = vsel %vm13503_vm10, 1, %v13519_v3  ;;  %vm876_vm10 = vmand %vm716_vm8, %vm13508_vm7  ;;  %vm13518_vm7 = vcmp.le.s32.totalorder %v7870_v2, 14 }
  0x28   : > { %1338 = vperm.xlu2 %7660, %v1283_v34   ;;  %v1294_v34 = vsel %vm13502_vm0, 1, %v13519_v3 }
  0x29   : > { %1096 = vperm.xlu0 %7658, %v1041_v37   ;;  %7139 = vmatmul.msk.bf16.gmra.mxu0 %vm468_vm14, %v7601_v38  ;;  %v8248_v37 = vld [vmem:[%s13469_s1 + $0xc0] sm:$0xff] }
  0x2a   : > { %v8253_v38 = vld [vmem:[%s13470_s2 + $0xc0] sm:$0xff]  ;;  %vm733_vm4 = vcmp.ge.s32.totalorder %v8248_v37, 1 }
  0x2b   : > { %vm13507_vm0 = vcmp.ge.s32.totalorder %v8253_v38, 1 }
  0x2e   : > { %1102 = vperm.xlu1 %7659, %v1043_v41   ;;  %v1295_v41 = vsel %vm13505_vm5, 1, %v13519_v3  ;;  %vm875_vm5 = vmand %vm715_vm1, %vm13509_vm11 }
  0x2f   : > { %vm877_vm11 = vmand %vm717_vm2, %vm13518_vm7  ;;  %vm965_vm7 = vcmask 130048  }
  0x30   : > { %1341 = vperm.xlu2 %7660, %v1284_v44   ;;  %v1053_v44 = vsel %vm860_vm12, 1, %v13519_v3  ;;  %vm861_vm12 = vmand %vm733_vm4, %vm13507_vm0 }
  0x31   : > { %1099 = vperm.xlu0 %7658, %v1042_v45   ;;  %v7605_v45 = vld [vmem:[%s7949_s17 + $0x28] sm:$0xff]  ;;  %v1054_v10 = vsel %vm861_vm12, 1, %v13519_v3 }
  0x36   : > { %1105 = vperm.xlu1 %7659, %v1044_v46  }
  0x38   : > { %1108 = vperm.xlu2 %7660, %v1045_v49   ;;  %v1808_v49 = vsel %vm876_vm10, 1, %v13519_v3 }
  0x39   : > { %1344 = vperm.xlu0 %7658, %v1285_v50   ;;  %7140 = vmatmul.msk.bf16.gmra.mxu0 %vm468_vm14, %v7602_v51  ;;  %v8284_v50 = vld [vmem:[%s13469_s1 + $0xc8] sm:$0xff] }
  0x3a   : > { %v8289_v51 = vld [vmem:[%s13470_s2 + $0xc8] sm:$0xff]  ;;  %vm734_vm8 = vcmp.ge.s32.totalorder %v8284_v50, 1 }
  0x3b   : > { %vm13506_vm1 = vcmp.ge.s32.totalorder %v8289_v51, 1  ;;  %v7613_v50 = vld [vmem:[%s7949_s17 + $0x68] sm:$0xff] }
  0x3c   : > { %vm862_vm10 = vmand %vm734_vm8, %vm13506_vm1 }
  0x3e   : > { %1350 = vperm.xlu1 %7659, %v1287_v52   ;;  %v1807_v52 = vsel %vm875_vm5, 1, %v13519_v3  ;;  %vm13512_vm5 = vcmp.le.s32.totalorder %v7917_v15, 14 }
  0x3f   : > { %vm878_vm0 = vmand %vm718_vm9, %vm13512_vm5  ;;  %vm13517_vm5 = vcmp.le.s32.totalorder %v7959_v22, 14 }
  0x40   : > { %1111 = vperm.xlu2 %7660, %v1046_v53   ;;  %v1296_v53 = vsel %vm733_vm4, 1, %v13519_v3 }
  0x41   : > { %1347 = vperm.xlu0 %7658, %v1286_v56   ;;  %v8306_v56 = vld [vmem:[%s13469_s1 + $0xd0] sm:$0xff] }
  0x42   : > { %vm735_vm12 = vcmp.ge.s32.totalorder %v8306_v56, 1 }
  0x46   : > { %1353 = vperm.xlu1 %7659, %v1288_v59   ;;  %v8311_v59 = vld [vmem:[%s13470_s2 + $0xd0] sm:$0xff] }
  0x47   : > { %vm13511_vm1 = vcmp.ge.s32.totalorder %v8311_v59, 1 }
  0x48   : > { %1356 = vperm.xlu2 %7660, %v1289_v60   ;;  %v1297_v60 = vsel %vm734_vm8, 1, %v13519_v3 }
  0x49   : > { %1114 = vperm.xlu0 %7658, %v1047_v63   ;;  %7141 = vmatmul.msk.bf16.gmra.mxu0 %vm468_vm14, %v7603_v5  ;;  %v1055_v63 = vsel %vm862_vm10, 1, %v13519_v3  ;;  %v7606_v5 = vld [vmem:[%s7949_s17 + $0x30] sm:$0xff]  ;;  %vm863_vm10 = vmand %vm735_vm12, %vm13511_vm1 }
  0x4a   : > { %v1056_v14 = vsel %vm863_vm10, 1, %v13519_v3 }
  0x4e   : > { %1120 = vperm.xlu1 %7659, %v1049_v8  }
  0x50   : > { %1359 = vperm.xlu2 %7660, %v1290_v12   ;;  %v1810_v12 = vsel %vm878_vm0, 1, %v13519_v3  ;;  %vm13516_vm0 = vcmp.le.s32.totalorder %v7983_v29, 14 }
  0x51   : > { %1117 = vperm.xlu0 %7658, %v1048_v13   ;;  %v8342_v13 = vld [vmem:[%s13469_s1 + $0xd8] sm:$0xff]  ;;  %vm880_vm1 = vmand %vm720_vm6, %vm13516_vm0 }
  0x52   : > { %vm736_vm2 = vcmp.ge.s32.totalorder %v8342_v13, 1  ;;  %vm879_vm6 = vmand %vm719_vm15, %vm13517_vm5  ;;  %vm13533_vm5 = vcmp.le.s32.totalorder %v8020_v36, 14 }
  0x56   : > { %1123 = vperm.xlu1 %7659, %v1050_v16   ;;  %v8347_v16 = vld [vmem:[%s13470_s2 + $0xd8] sm:$0xff] }
  0x57   : > { %vm13510_vm9 = vcmp.ge.s32.totalorder %v8347_v16, 1 }
  0x58   : > { %1126 = vperm.xlu2 %7660, %v1051_v20   ;;  %v1809_v20 = vsel %vm877_vm11, 1, %v13519_v3  ;;  %vm864_vm11 = vmand %vm736_vm2, %vm13510_vm9 }
  0x59   : > { %1362 = vperm.xlu0 %7658, %v1291_v23   ;;  %7142 = vmatmul.msk.bf16.gmra.mxu0 %vm468_vm14, %v7604_v24 }
  0x5e   : > { %1368 = vperm.xlu1 %7659, %v1293_v25   ;;  %v1298_v25 = vsel %vm735_vm12, 1, %v13519_v3 }
  0x60   : > { %1129 = vperm.xlu2 %7660, %v1052_v26   ;;  %v8368_v26 = vld [vmem:[%s13469_s1 + $0xe0] sm:$0xff] }
  0x61   : > { %1365 = vperm.xlu0 %7658, %v1292_v33   ;;  %v8373_v33 = vld [vmem:[%s13470_s2 + $0xe0] sm:$0xff]  ;;  %vm737_vm10 = vcmp.ge.s32.totalorder %v8368_v26, 1 }
  0x62   : > { %vm13514_vm9 = vcmp.ge.s32.totalorder %v8373_v33, 1 }
  0x66   : > { %1371 = vperm.xlu1 %7659, %v1294_v34   ;;  %v1299_v34 = vsel %vm736_vm2, 1, %v13519_v3 }
  0x68   : > { %1374 = vperm.xlu2 %7660, %v1295_v41   ;;  %v1057_v41 = vsel %vm864_vm11, 1, %v13519_v3  ;;  %vm865_vm11 = vmand %vm737_vm10, %vm13514_vm9 }
  0x69   : > { %1132 = vperm.xlu0 %7658, %v1053_v44   ;;  %7143 = vmatmul.msk.bf16.gmra.mxu0 %vm468_vm14, %v7605_v45  ;;  %v7607_v44 = vld [vmem:[%s7949_s17 + $0x38] sm:$0xff]  ;;  %v1058_v28 = vsel %vm865_vm11, 1, %v13519_v3 }
  0x6a   : > { %v8269_v46 = vpop.permute.xlu2 %1087 }
  0x6b   : > { %14212 = vst [vmem:[#allocation14_spill] sm:$0xff] %v8269_v46 }
  0x6e   : > { %1855 = vperm.xlu1 %7659, %v1808_v49  }
  0x70   : > { %1135 = vperm.xlu2 %7660, %v1054_v10  }
  0x71   : > { %1852 = vperm.xlu0 %7658, %v1807_v52   ;;  %v1812_v52 = vsel %vm880_vm1, 1, %v13519_v3 }
  0x72   : > { %v8294_v0 = vpop.permute.xlu2 %1090 }
  0x73   : > { %14213 = vst [vmem:[#allocation15_spill] sm:$0xff] %v8294_v0 }
  0x76   : > { %1377 = vperm.xlu1 %7659, %v1296_v53   ;;  %v8408_v53 = vld [vmem:[%s13469_s1 + $0xe8] sm:$0xff] }
  0x77   : > { %14221 = vst [vmem:[#allocation23_spill] sm:$0xff] %v8408_v53  ;;  %vm738_vm15 = vcmp.ge.s32.totalorder %v8408_v53, 1 }
  0x78   : > { %1380 = vperm.xlu2 %7660, %v1297_v60   ;;  %v8413_v60 = vld [vmem:[%s13470_s2 + $0xe8] sm:$0xff] }
  0x79   : > { %1138 = vperm.xlu0 %7658, %v1055_v63   ;;  %7144 = vmatmul.msk.bf16.gmra.mxu0 %vm468_vm14, %v7606_v5  ;;  %v1811_v63 = vsel %vm879_vm6, 1, %v13519_v3  ;;  %vm13513_vm1 = vcmp.ge.s32.totalorder %v8413_v60, 1  ;;  %vm13522_vm6 = vcmp.le.s32.totalorder %v7998_v32, 14 }
  0x7a   : > { %v8327_v8 = vpop.permute.xlu2 %1093  ;;  %vm866_vm11 = vmand %vm738_vm15, %vm13513_vm1 }
  0x7b   : > { %14214 = vst [vmem:[#allocation16_spill] sm:$0xff] %v8327_v8  ;;  %vm882_vm0 = vmand %vm722_vm13, %vm13522_vm6  ;;  %vm14231_vm13 = vcmp.ge.s32.totalorder %v8015_v35, 1 }
  0x7c   : > { %vm881_vm6 = vmand %vm14231_vm13, %vm13533_vm5  ;;  %vm13536_vm13 = vcmp.le.s32.totalorder %v8054_v43, 14  ;;  %vm13538_vm5 = vcmp.le.s32.totalorder %v8039_v40, 14 }
  0x7e   : > { %1861 = vperm.xlu1 %7659, %v1810_v12  }
  0x80   : > { %1141 = vperm.xlu2 %7660, %v1056_v14   ;;  %v8350_v23 = vpop.permute.xlu1 %1323  ;;  %v1300_v14 = vsel %vm737_vm10, 1, %v13519_v3 }
  0x81   : > { %14215 = vst [vmem:[#allocation17_spill] sm:$0xff] %v8350_v23  ;;  %1858 = vperm.xlu0 %7658, %v1809_v20   ;;  %v8434_v20 = vld [vmem:[%s13472_s4] ss:$0 sm:$0xff] }
  0x82   : > { %v8354_v1 = vpop.permute.xlu2 %1338 }
  0x83   : > { %14216 = vst [vmem:[#allocation18_spill] sm:$0xff] %v8354_v1  ;;  %v8356_v24 = vpop.permute.xlu0 %1081 }
  0x84   : > { %14217 = vst [vmem:[#allocation19_spill] sm:$0xff] %v8356_v24 }
  0x86   : > { %1383 = vperm.xlu1 %7659, %v1298_v25   ;;  %v8439_v25 = vld [vmem:[%s13469_s1 + $0xf0] sm:$0xff] }
  0x87   : > { %14225 = vst [vmem:[#allocation27_spill] sm:$0xff] %v8439_v25  ;;  %vm13567_vm1 = vcmp.ge.s32.totalorder %v8439_v25, 1 }
  0x88   : > { %1386 = vperm.xlu2 %7660, %v1299_v34   ;;  %v8383_v45 = vpop.permute.xlu1 %1326  ;;  %v8444_v34 = vld [vmem:[%s13470_s2 + $0xf0] sm:$0xff] }
  0x89   : > { %14218 = vst [vmem:[#allocation20_spill] sm:$0xff] %v8383_v45  ;;  %1144 = vperm.xlu0 %7658, %v1057_v41   ;;  %7145 = vmatmul.msk.bf16.gmra.mxu0 %vm468_vm14, %v7607_v44  ;;  %v1301_v41 = vsel %vm738_vm15, 1, %v13519_v3  ;;  %v1059_v44 = vsel %vm866_vm11, 1, %v13519_v3  ;;  %vm13532_vm9 = vcmp.ge.s32.totalorder %v8444_v34, 1 }
  0x8a   : > { %v8391_v49 = vpop.permute.xlu2 %1341  ;;  %14226 = vst [vmem:[#allocation28_spill] sm:$0xff] %v8444_v34  ;;  %vm867_vm11 = vmand %vm13567_vm1, %vm13532_vm9 }
  0x8b   : > { %14219 = vst [vmem:[#allocation21_spill] sm:$0xff] %v8391_v49  ;;  %v8397_v10 = vpop.permute.xlu0 %1084 }
  0x8c   : > { %14220 = vst [vmem:[#allocation22_spill] sm:$0xff] %v8397_v10 }
  0x8e   : > { %1867 = vperm.xlu1 %7659, %v1812_v52   ;;  %v7608_v52 = vld [vmem:[%s7949_s17 + $0x40] sm:$0xff] }
  0x90   : > { %1147 = vperm.xlu2 %7660, %v1058_v28   ;;  %v8416_v5 = vpop.permute.xlu1 %1332 }
  0x91   : > { %14222 = vst [vmem:[#allocation24_spill] sm:$0xff] %v8416_v5  ;;  %1864 = vperm.xlu0 %7658, %v1811_v63  }
  0x92   : > { %v8420_v21 = vpop.permute.xlu2 %1108 }
  0x93   : > { %14223 = vst [vmem:[#allocation25_spill] sm:$0xff] %v8420_v21  ;;  %v8422_v12 = vpop.permute.xlu0 %1329 }
  0x94   : > { %14224 = vst [vmem:[#allocation26_spill] sm:$0xff] %v8422_v12 }
  0x96   : > { %1389 = vperm.xlu1 %7659, %v1300_v14   ;;  %v533_v28 = vpop.f32.mrf.mxu0 }
  0x97   : > { %v534_v63 = vadd.f32 %v8434_v20, %v533_v28  ;;  %v14230_v28 = vmov 0  }
  0x98   : > { %1392 = vperm.xlu2 %7660, %v1301_v41   ;;  %v8455_v21 = vpop.permute.xlu1 %1335  ;;  %v1814_v49 = vsel %vm882_vm0, 1, %v14230_v28  ;;  %v1060_v31 = vsel %vm867_vm11, 1, %v14230_v28 }
  0x99   : > { %14227 = vst [vmem:[#allocation29_spill] sm:$0xff] %v8455_v21  ;;  %1150 = vperm.xlu0 %7658, %v1059_v44   ;;  %v613_v14 = vmax.f32 %v534_v63, 0.0  ;;  %7146 = vmatmul.msk.bf16.gmra.mxu0 %vm468_vm14, %v7608_v52  ;;  %v8481_v44 = vld [vmem:[%s13469_s1 + $0xf8] sm:$0xff]  ;;  %v1813_v63 = vsel %vm881_vm6, 1, %v14230_v28 }
  0x9a   : > { %v8463_v3 = vpop.permute.xlu2 %1111  ;;  %14232 = vst [vmem:[#allocation32_spill] sm:$0xff] %v8481_v44  ;;  %v8486_v52 = vld [vmem:[%s13470_s2 + $0xf8] sm:$0xff]  ;;  %vm13537_vm0 = vcmp.ge.s32.totalorder %v8481_v44, 1 }
  0x9b   : > { %14228 = vst [vmem:[#allocation30_spill] sm:$0xff] %v8463_v3  ;;  %v8469_v41 = vpop.permute.xlu0 %1096  ;;  %vm13531_vm11 = vcmp.ge.s32.totalorder %v8486_v52, 1 }
  0x9c   : > { %14229 = vst [vmem:[#allocation31_spill] sm:$0xff] %v8469_v41  ;;  %vm868_vm6 = vmand %vm13537_vm0, %vm13531_vm11  ;;  %vm14239_vm11 = vcmp.ge.s32.totalorder %v8049_v42, 1 }
  0x9d   : > { %966 = vst.msk [vmem:[#allocation2 + $0x18] sm:$0xff] %vm965_vm7, %v613_v14  ;;  %vm884_vm9 = vmand %vm14239_vm11, %vm13536_vm13  ;;  %vm14242_vm11 = vcmp.ge.s32.totalorder %v8034_v39, 1 }
  0x9e   : > { %14233 = vst [vmem:[#allocation33_spill] sm:$0xff] %v8486_v52  ;;  %1873 = vperm.xlu1 %7659, %v1814_v49   ;;  %v535_v3 = vpop.f32.mrf.mxu0  ;;  %v1302_v49 = vsel %vm13567_vm1, 1, %v14230_v28  ;;  %vm883_vm13 = vmand %vm14242_vm11, %vm13538_vm5  ;;  %vm14244_vm11 = vcmp.ge.s32.totalorder %v8076_v47, 1  ;;  %vm13576_vm1 = vcmp.eq.s32.totalorder %v8397_v10, 1 }
  0x9f   : > { %v536_v35 = vadd.f32 %v8434_v20, %v535_v3  ;;  %v1303_v3 = vsel %vm13537_vm0, 1, %v14230_v28  ;;  %vm13548_vm0 = vcmp.le.s32.totalorder %v8081_v48, 14 }
  0xa0   : > { %1153 = vperm.xlu2 %7660, %v1060_v31   ;;  %v8490_v14 = vpop.permute.xlu1 %1102  ;;  %v1061_v31 = vsel %vm868_vm6, 1, %v14230_v28  ;;  %vm885_vm5 = vmand %vm14244_vm11, %vm13548_vm0 }
  0xa1   : > { %14234 = vst [vmem:[#allocation34_spill] sm:$0xff] %v8490_v14  ;;  %1870 = vperm.xlu0 %7658, %v1813_v63   ;;  %v614_v34 = vmax.f32 %v536_v35, 0.0  ;;  %v7609_v63 = vld [vmem:[%s7949_s17 + $0x48] sm:$0xff]  ;;  %v1817_v47 = vsel %vm885_vm5, 1, %v14230_v28  ;;  %vm13553_vm5 = vcmp.le.s32.totalorder %v8144_v62, 14 }
  0xa2   : > { %v8494_v32 = vpop.permute.xlu2 %1356 }
  0xa3   : > { %14235 = vst [vmem:[#allocation35_spill] sm:$0xff] %v8494_v32  ;;  %v8496_v53 = vpop.permute.xlu0 %1099  ;;  %v8515_v32 = vld [vmem:[%s13470_s2] sm:$0xff] }
  0xa4   : > { %14236 = vst [vmem:[#allocation36_spill] sm:$0xff] %v8496_v53  ;;  %vm13539_vm6 = vcmp.ge.s32.totalorder %v8515_v32, 1 }
  0xa5   : > { %967 = vst.msk [vmem:[#allocation2 + $0x20] sm:$0xff] %vm965_vm7, %v614_v34 }
  0xa6   : > { %1395 = vperm.xlu1 %7659, %v1302_v49   ;;  %v538_v35 = vpop.f32.mrf.mxu0  ;;  %14237 = vst [vmem:[#allocation37_spill] sm:$0xff] %v8515_v32 }
  0xa7   : > { %v539_v25 = vadd.f32 %v8434_v20, %v538_v35  ;;  %v7618_v35 = vld [vmem:[%s13473_s5] sm:$0xff] }
  0xa8   : > { %1398 = vperm.xlu2 %7660, %v1303_v3   ;;  %v8518_v34 = vpop.permute.xlu1 %1105  ;;  %v7619_v3 = vld [vmem:[%s13473_s5 + $0x8] sm:$0xff]  ;;  %7646 = vmatpush.bf16.msra.mxu2 %v7618_v35 }
  0xa9   : > { %14238 = vst [vmem:[#allocation38_spill] sm:$0xff] %v8518_v34  ;;  %1156 = vperm.xlu0 %7658, %v1061_v31   ;;  %v615_v49 = vmax.f32 %v539_v25, 0.0  ;;  %7147 = vmatmul.msk.bf16.gmra.mxu0 %vm468_vm14, %v7609_v63  ;;  %v1816_v34 = vsel %vm884_vm9, 1, %v14230_v28  ;;  %v2219_v25 = vsel %vm13539_vm6, 1, %v14230_v28  ;;  %v1815_v31 = vsel %vm883_vm13, 1, %v14230_v28 }
  0xaa   : > { %v8526_v44 = vpop.permute.xlu2 %1359  ;;  %7645 = vmatpush.bf16.msra.mxu1 %v7619_v3  ;;  %1544 = vmatpush.bf16.msrb.mxu0 %v7619_v3  ;;  %vm13549_vm9 = vcmp.le.s32.totalorder %v8107_v55, 14  ;;  %vm14247_vm13 = vcmp.ge.s32.totalorder %v8102_v54, 1  ;;  %v8582_v54 = vld [vmem:[%s13470_s2 + $0x18] sm:$0xff] }
  0xab   : > { %14240 = vst [vmem:[#allocation39_spill] sm:$0xff] %v8526_v44  ;;  %v8535_v42 = vpop.permute.xlu0 %1344  ;;  %vm886_vm6 = vmand %vm14247_vm13, %vm13549_vm9  ;;  %vm14253_vm13 = vcmp.ge.s32.totalorder %v8139_v61, 1 }
  0xac   : > { %14241 = vst [vmem:[#allocation40_spill] sm:$0xff] %v8535_v42  ;;  %vm887_vm0 = vmand %vm14253_vm13, %vm13553_vm5  ;;  %vm13561_vm13 = vcmp.le.s32.totalorder %v8122_v58, 14 }
  0xad   : > { %968 = vst.msk [vmem:[#allocation2 + $0x28] sm:$0xff] %vm965_vm7, %v615_v49 }
  0xae   : > { %1879 = vperm.xlu1 %7659, %v1816_v34   ;;  %1687 = vmatpush.bf16.msra.mxu0 %v7618_v35  ;;  %v540_v63 = vpop.f32.mrf.mxu0  ;;  %v8559_v34 = vld [vmem:[%s13470_s2 + $0x8] sm:$0xff]  ;;  %14249 = vst [vmem:[#allocation45_spill] sm:$0xff] %v8582_v54 }
  0xaf   : > { %v541_v39 = vadd.f32 %v8434_v20, %v540_v63  ;;  %14245 = vst [vmem:[#allocation42_spill] sm:$0xff] %v8559_v34  ;;  %vm13564_vm11 = vcmp.ge.s32.totalorder %v8559_v34, 1  ;;  %v7621_v63 = vld [vmem:[%s13473_s5 + $0x18] sm:$0xff] }
  0xb0   : > { %2252 = vperm.xlu2 %7660, %v2219_v25   ;;  %v8550_v49 = vpop.permute.xlu1 %1350  ;;  %2491 = vmatpush.bf16.msrb.mxu1 %v7621_v63 }
  0xb1   : > { %14243 = vst [vmem:[#allocation41_spill] sm:$0xff] %v8550_v49  ;;  %1876 = vperm.xlu0 %7658, %v1815_v31   ;;  %v616_v3 = vmax.f32 %v541_v39, 0.0  ;;  %v7622_v31 = vld [vmem:[%s13473_s5 + $0x20] sm:$0xff]  ;;  %v1818_v39 = vsel %vm886_vm6, 1, %v14230_v28  ;;  %vm13557_vm6 = vcmp.ge.s32.totalorder %v8582_v54, 1 }
  0xb2   : > { %v8561_v35 = vpop.permute.xlu2 %1126  ;;  %2717 = vmatpush.bf16.msrb.mxu2 %v7622_v31  ;;  %v2222_v63 = vsel %vm13557_vm6, 1, %v14230_v28  ;;  %vm13571_vm6 = vcmp.le.s32.totalorder %v8178_v11, 14 }
  0xb3   : > { %14246 = vst [vmem:[#allocation43_spill] sm:$0xff] %v8561_v35  ;;  %v8567_v25 = vpop.permute.xlu0 %1347  ;;  %v7610_v35 = vld [vmem:[%s7949_s17 + $0x50] sm:$0xff] }
  0xb4   : > { %14248 = vst [vmem:[#allocation44_spill] sm:$0xff] %v8567_v25 }
  0xb5   : > { %969 = vst.msk [vmem:[#allocation2 + $0x30] sm:$0xff] %vm965_vm7, %v616_v3  ;;  %v2220_v3 = vsel %vm13564_vm11, 1, %v14230_v28  ;;  %vm13575_vm11 = vcmp.eq.s32.totalorder %v8356_v24, 1 }
  0xb6   : > { %1882 = vperm.xlu1 %7659, %v1817_v47   ;;  %v543_v44 = vpop.f32.mrf.mxu0  ;;  %v8596_v47 = vld [vmem:[%s13470_s2 + $0x10] sm:$0xff] }
  0xb7   : > { %v544_v55 = vadd.f32 %v8434_v20, %v543_v44  ;;  %14251 = vst [vmem:[#allocation47_spill] sm:$0xff] %v8596_v47  ;;  %vm13556_vm9 = vcmp.ge.s32.totalorder %v8596_v47, 1 }
  0xb8   : > { %1885 = vperm.xlu2 %7660, %v1818_v39   ;;  %v8590_v32 = vpop.permute.xlu1 %1353  ;;  %v2221_v61 = vsel %vm13556_vm9, 1, %v14230_v28  ;;  %vm888_vm9 = vmand %vm728_vm3, %vm13561_vm13  ;;  %vm14261_vm3 = vcmp.ge.s32.totalorder %v8173_v9, 1 }
  0xb9   : > { %14250 = vst [vmem:[#allocation46_spill] sm:$0xff] %v8590_v32  ;;  %2255 = vperm.xlu0 %7658, %v2220_v3   ;;  %v617_v34 = vmax.f32 %v544_v55, 0.0  ;;  %7148 = vmatmul.msk.bf16.gmra.mxu0 %vm468_vm14, %v7610_v35  ;;  %v1819_v55 = vsel %vm887_vm0, 1, %v14230_v28  ;;  %v8616_v35 = vld [vmem:[%s13470_s2 + $0x20] sm:$0xff]  ;;  %v8624_v3 = vld [vmem:[%s13470_s2 + $0x28] sm:$0xff]  ;;  %vm890_vm13 = vmand %vm14261_vm3, %vm13571_vm6  ;;  %vm14264_vm3 = vcmp.ge.s32.totalorder %v8158_v6, 1 }
  0xba   : > { %v8599_v31 = vpop.permute.xlu2 %1129  ;;  %14255 = vst [vmem:[#allocation50_spill] sm:$0xff] %v8616_v35  ;;  %vm13562_vm0 = vcmp.ge.s32.totalorder %v8616_v35, 1  ;;  %vm13563_vm5 = vcmp.ge.s32.totalorder %v8624_v3, 1  ;;  %v1822_v11 = vsel %vm890_vm13, 1, %v14230_v28  ;;  %vm14265_vm13 = vcmp.ge.s32.totalorder %v7879_v4, 1 }
  0xbb   : > { %14252 = vst [vmem:[#allocation48_spill] sm:$0xff] %v8599_v31  ;;  %v8605_v44 = vpop.permute.xlu0 %1114  ;;  %v2225_v6 = vsel %vm14265_vm13, 1, %v14230_v28  ;;  %vm14267_vm13 = vcmp.ge.s32.totalorder %v8200_v18, 1 }
  0xbc   : > { %14254 = vst [vmem:[#allocation49_spill] sm:$0xff] %v8605_v44 }
  0xbd   : > { %970 = vst.msk [vmem:[#allocation2 + $0x38] sm:$0xff] %vm965_vm7, %v617_v34 }
  0xbe   : > { %2261 = vperm.xlu1 %7659, %v2222_v63   ;;  %v545_v39 = vpop.f32.mrf.mxu0  ;;  %14256 = vst [vmem:[#allocation51_spill] sm:$0xff] %v8624_v3 }
  0xbf   : > { %v546_v34 = vadd.f32 %v8434_v20, %v545_v39  ;;  %v2223_v39 = vsel %vm13562_vm0, 1, %v14230_v28  ;;  %vm13664_vm0 = vcmp.le.s32.totalorder %v8163_v7, 14 }
  0xc0   : > { %1888 = vperm.xlu2 %7660, %v1819_v55   ;;  %v8627_v31 = vpop.permute.xlu1 %1120  ;;  %v7620_v55 = vld [vmem:[%s13473_s5 + $0x10] sm:$0xff]  ;;  %vm889_vm6 = vmand %vm14264_vm3, %vm13664_vm0  ;;  %vm13579_vm3 = vcmp.le.s32.totalorder %v8205_v19, 14 }
  0xc1   : > { %14257 = vst [vmem:[#allocation52_spill] sm:$0xff] %v8627_v31  ;;  %2258 = vperm.xlu0 %7658, %v2221_v61   ;;  %v618_v63 = vmax.f32 %v546_v34, 0.0  ;;  %v2224_v61 = vsel %vm13563_vm5, 1, %v14230_v28  ;;  %v1820_v34 = vsel %vm888_vm9, 1, %v14230_v28  ;;  %7647 = vmatpush.bf16.msra.mxu3 %v7620_v55  ;;  %vm13578_vm5 = vcmp.eq.s32.totalorder %v8350_v23, 1  ;;  %v14297_v23 = vld [vmem:[#allocation28_spill] sm:$0xff] }
  0xc2   : > { %v8631_v54 = vpop.permute.xlu2 %1374  ;;  %vm13577_vm9 = vcmp.eq.s32.totalorder %v8383_v45, 1 }
  0xc3   : > { %14258 = vst [vmem:[#allocation53_spill] sm:$0xff] %v8631_v54  ;;  %v8634_v47 = vpop.permute.xlu0 %1117  ;;  %v7611_v54 = vld [vmem:[%s7949_s17 + $0x58] sm:$0xff] }
  0xc4   : > { %14259 = vst [vmem:[#allocation54_spill] sm:$0xff] %v8634_v47  ;;  %v1004_v55 = vld [vmem:[#allocation2 + $0x37] sm:$0xff] }
  0xc5   : > { %971 = vst.msk [vmem:[#allocation2 + $0x40] sm:$0xff] %vm965_vm7, %v618_v63 }
  0xc6   : > { %2264 = vperm.xlu1 %7659, %v2223_v39   ;;  %v548_v35 = vpop.f32.mrf.mxu0  ;;  %v1246_v39 = vld [vmem:[#allocation2 + $0x38] sm:$0xff] }
  0xc7   : > { %v549_v57 = vadd.f32 %v8434_v20, %v548_v35 }
  0xc8   : > { %2267 = vperm.xlu2 %7660, %v2224_v61   ;;  %v8654_v63 = vpop.permute.xlu1 %1123 }
  0xc9   : > { %14260 = vst [vmem:[#allocation55_spill] sm:$0xff] %v8654_v63  ;;  %1891 = vperm.xlu0 %7658, %v1820_v34   ;;  %v619_v3 = vmax.f32 %v549_v57, 0.0  ;;  %7149 = vmatmul.msk.bf16.gmra.mxu0 %vm468_vm14, %v7611_v54  ;;  %v1438_v54 = vsel %vm13578_vm5, %v1246_v39, 0.0  ;;  %v1196_v57 = vsel %vm13575_vm11, %v1004_v55, 0.0  ;;  %vm13580_vm11 = vcmp.le.s32.totalorder %v8231_v30, 14 }
  0xca   : > { %v8664_v35 = vpop.permute.xlu2 %1135  ;;  %vm13662_vm5 = vcmp.le.s32.totalorder %v8253_v38, 14 }
  0xcb   : > { %14262 = vst [vmem:[#allocation56_spill] sm:$0xff] %v8664_v35  ;;  %v8668_v9 = vpop.permute.xlu0 %1362 }
  0xcc   : > { %14263 = vst [vmem:[#allocation57_spill] sm:$0xff] %v8668_v9  ;;  %v1247_v61 = vld [vmem:[#allocation2 + $0x40] sm:$0xff] }
  0xcd   : > { %v1005_v63 = vld [vmem:[#allocation2 + $0x3f] sm:$0xff]  ;;  %972 = vst.msk [vmem:[#allocation2 + $0x48] sm:$0xff] %vm965_vm7, %v619_v3  ;;  %v1439_v34 = vsel %vm13577_vm9, %v1247_v61, 0.0  ;;  %v1821_v3 = vsel %vm889_vm6, 1, %v14230_v28  ;;  %vm14269_vm6 = vcmp.ge.s32.totalorder %v8226_v27, 1 }
  0xce   : > { %v1197_v35 = vsel %vm13576_vm1, %v1005_v63, 0.0  ;;  %v1467_v9 = vpack.c.bf16 %v1439_v34, %v1438_v54  ;;  %1897 = vperm.xlu1 %7659, %v1822_v11   ;;  %v550_v39 = vpop.f32.mrf.mxu0  ;;  %vm891_vm1 = vmand %vm14267_vm13, %vm13579_vm3  ;;  %vm14271_vm13 = vcmp.ge.s32.totalorder %v7925_v17, 1  ;;  %v7612_v54 = vld [vmem:[%s7949_s17 + $0x60] sm:$0xff]  ;;  %vm13590_vm3 = vcmp.eq.s32.totalorder %v8422_v12, 1 }
  0xcf   : > { %v1225_v47 = vpack.c.bf16 %v1197_v35, %v1196_v57  ;;  %v551_v63 = vadd.f32 %v8434_v20, %v550_v39  ;;  %vm892_vm9 = vmand %vm14269_vm6, %vm13580_vm11  ;;  %v2226_v18 = vsel %vm14271_vm13, 1, %v14230_v28  ;;  %vm13586_vm6 = vcmp.eq.s32.totalorder %v8294_v0, 1 }
  0xd0   : > { %7163 = vmatmul.msk.bf16.vlgmr.msra.gmra.mxu1 %vm965_vm7, %v1467_v9  ;;  %2270 = vperm.xlu2 %7660, %v2225_v6   ;;  %v8693_v55 = vpop.permute.xlu1 %1368  ;;  %v1823_v9 = vsel %vm891_vm1, 1, %v14230_v28  ;;  %v1824_v61 = vsel %vm892_vm9, 1, %v14230_v28  ;;  %vm13585_vm1 = vcmp.eq.s32.totalorder %v8269_v46, 1  ;;  %vm893_vm9 = vmand %vm733_vm4, %vm13662_vm5  ;;  %vm13588_vm13 = vcmp.eq.s32.totalorder %v8416_v5, 1 }
  0xd1   : > { %7183 = vmatmul.msk.bf16.vlgmr.msra.gmra.mxu2 %vm965_vm7, %v1225_v47  ;;  %14266 = vst [vmem:[#allocation58_spill] sm:$0xff] %v8693_v55  ;;  %1894 = vperm.xlu0 %7658, %v1821_v3   ;;  %v620_v11 = vmax.f32 %v551_v63, 0.0  ;;  %vm14275_vm11 = vcmp.ge.s32.totalorder %v7917_v15, 1  ;;  %v1825_v45 = vsel %vm893_vm9, 1, %v14230_v28  ;;  %vm14276_vm4 = vcmp.ge.s32.totalorder %v7870_v2, 1 }
  0xd2   : > { %v8699_v35 = vpop.permute.xlu2 %1380 }
  0xd3   : > { %14268 = vst [vmem:[#allocation59_spill] sm:$0xff] %v8699_v35  ;;  %v8705_v47 = vpop.permute.xlu0 %1365 }
  0xd4   : > { %14270 = vst [vmem:[#allocation60_spill] sm:$0xff] %v8705_v47  ;;  %v1248_v6 = vld [vmem:[#allocation2 + $0x48] sm:$0xff] }
  0xd5   : > { %973 = vst.msk [vmem:[#allocation2 + $0x50] sm:$0xff] %vm965_vm7, %v620_v11  ;;  %v1006_v3 = vld [vmem:[#allocation2 + $0x47] sm:$0xff]  ;;  %v1440_v37 = vsel %vm13590_vm3, %v1248_v6, 0.0  ;;  %vm13594_vm3 = vcmp.eq.s32.totalorder %v8469_v41, 1 }
  0xd6   : > { %1900 = vperm.xlu1 %7659, %v1823_v9   ;;  %v553_v34 = vpop.f32.mrf.mxu0 }
  0xd7   : > { %v554_v27 = vadd.f32 %v8434_v20, %v553_v34  ;;  %v1198_v34 = vsel %vm13585_vm1, %v1006_v3, 0.0 }
  0xd8   : > { %1903 = vperm.xlu2 %7660, %v1824_v61   ;;  %v8716_v57 = vpop.permute.xlu1 %1371 }
  0xd9   : > { %14272 = vst [vmem:[#allocation61_spill] sm:$0xff] %v8716_v57  ;;  %2273 = vperm.xlu0 %7658, %v2226_v18   ;;  %v621_v39 = vmax.f32 %v554_v27, 0.0  ;;  %7150 = vmatmul.msk.bf16.gmra.mxu0 %vm468_vm14, %v7612_v54  ;;  %v2228_v18 = vsel %vm14275_vm11, 1, %v14230_v28  ;;  %vm13652_vm11 = vcmp.le.s32.totalorder %v8289_v51, 14 }
  0xda   : > { %v8720_v63 = vpop.permute.xlu2 %1141  ;;  %vm894_vm1 = vmand %vm734_vm8, %vm13652_vm11  ;;  %vm14324_vm11 = vcmp.ge.s32.totalorder %v8144_v62, 1 }
  0xdb   : > { %14273 = vst [vmem:[#allocation62_spill] sm:$0xff] %v8720_v63  ;;  %v8729_v11 = vpop.permute.xlu0 %1132 }
  0xdc   : > { %14274 = vst [vmem:[#allocation63_spill] sm:$0xff] %v8729_v11  ;;  %v1249_v9 = vld [vmem:[#allocation2 + $0x50] sm:$0xff] }
  0xdd   : > { %v1007_v61 = vld [vmem:[#allocation2 + $0x4f] sm:$0xff]  ;;  %974 = vst.msk [vmem:[#allocation2 + $0x58] sm:$0xff] %vm965_vm7, %v621_v39  ;;  %v1441_v54 = vsel %vm13588_vm13, %v1249_v9, 0.0  ;;  %v2227_v39 = vsel %vm14276_vm4, 1, %v14230_v28  ;;  %vm14280_vm4 = vcmp.ge.s32.totalorder %v7959_v22, 1  ;;  %vm13642_vm13 = vcmp.le.s32.totalorder %v8347_v16, 14 }
  0xde   : > { %v1199_v27 = vsel %vm13586_vm6, %v1007_v61, 0.0  ;;  %v1468_v24 = vpack.c.bf16 %v1441_v54, %v1440_v37  ;;  %2279 = vperm.xlu1 %7659, %v2228_v18   ;;  %v555_v12 = vpop.f32.mrf.mxu0  ;;  %v1776_v61 = vld [vmem:[#allocation2 + $0x41] sm:$0xff]  ;;  %vm896_vm8 = vmand %vm736_vm2, %vm13642_vm13  ;;  %vm13655_vm13 = vcmp.eq.s32.totalorder %v8605_v44, 1 }
  0xdf   : > { %v1226_v10 = vpack.c.bf16 %v1199_v27, %v1198_v34  ;;  %v556_v6 = vadd.f32 %v8434_v20, %v555_v12  ;;  %v1826_v27 = vsel %vm894_vm1, 1, %v14230_v28  ;;  %vm13593_vm1 = vcmp.eq.s32.totalorder %v8327_v8, 1 }
  0xe0   : > { %7164 = vmatmul.msk.bf16.gmra.mxu1 %vm965_vm7, %v1468_v24  ;;  %1906 = vperm.xlu2 %7660, %v1825_v45   ;;  %v8750_v3 = vpop.permute.xlu1 %1855  ;;  %v2229_v45 = vsel %vm14280_vm4, 1, %v14230_v28  ;;  %vm13601_vm4 = vcmp.eq.s32.totalorder %v8354_v1, 1 }
  0xe1   : > { %7184 = vmatmul.msk.bf16.gmra.mxu2 %vm965_vm7, %v1226_v10  ;;  %14277 = vst [vmem:[#allocation64_spill] sm:$0xff] %v8750_v3  ;;  %2276 = vperm.xlu0 %7658, %v2227_v39   ;;  %vm13587_vm9 = vcmp.eq.s32.totalorder %v8750_v3, 1  ;;  %v622_v9 = vmax.f32 %v556_v6, 0.0  ;;  %v1775_v10 = vld [vmem:[#allocation2 + $0x39] sm:$0xff] }
  0xe2   : > { %v8754_v18 = vpop.permute.xlu2 %1386  ;;  %v1968_v24 = vsel %vm13587_vm9, %v1776_v61, 0.0  ;;  %vm14281_vm9 = vcmp.ge.s32.totalorder %v7983_v29, 1 }
  0xe3   : > { %14278 = vst [vmem:[#allocation65_spill] sm:$0xff] %v8754_v18  ;;  %v8758_v37 = vpop.permute.xlu0 %1852  ;;  %v2230_v54 = vsel %vm14281_vm9, 1, %v14230_v28  ;;  %vm13645_vm9 = vcmp.le.s32.totalorder %v8311_v59, 14 }
  0xe4   : > { %14279 = vst [vmem:[#allocation66_spill] sm:$0xff] %v8758_v37  ;;  %vm13589_vm6 = vcmp.eq.s32.totalorder %v8758_v37, 1  ;;  %v1250_v61 = vld [vmem:[#allocation2 + $0x58] sm:$0xff]  ;;  %vm895_vm2 = vmand %vm735_vm12, %vm13645_vm9  ;;  %vm13609_vm12 = vcmp.le.s32.totalorder %v8373_v33, 14 }
  0xe5   : > { %975 = vst.msk [vmem:[#allocation2 + $0x60] sm:$0xff] %vm965_vm7, %v622_v9  ;;  %v1967_v12 = vsel %vm13589_vm6, %v1775_v10, 0.0  ;;  %vm13606_vm6 = vcmp.eq.s32.totalorder %v8455_v21, 1 }
  0xe6   : > { %v1996_v34 = vpack.c.bf16 %v1968_v24, %v1967_v12  ;;  %2282 = vperm.xlu1 %7659, %v2229_v45   ;;  %v558_v39 = vpop.f32.mrf.mxu0  ;;  %v1008_v24 = vld [vmem:[#allocation2 + $0x57] sm:$0xff] }
  0xe7   : > { %v559_v6 = vadd.f32 %v8434_v20, %v558_v39  ;;  %v1200_v39 = vsel %vm13593_vm1, %v1008_v24, 0.0  ;;  %vm13614_vm1 = vcmp.le.s32.totalorder %v8413_v60, 14 }
  0xe8   : > { %7205 = vmatmul.msk.bf16.vlgmr.msra.gmra.mxu3 %vm965_vm7, %v1996_v34  ;;  %2285 = vperm.xlu2 %7660, %v2230_v54   ;;  %v8779_v9 = vpop.permute.xlu1 %1377  ;;  %v1828_v34 = vsel %vm896_vm8, 1, %v14230_v28  ;;  %vm14285_vm8 = vcmp.ge.s32.totalorder %v8020_v36, 1 }
  0xe9   : > { %14282 = vst [vmem:[#allocation67_spill] sm:$0xff] %v8779_v9  ;;  %1909 = vperm.xlu0 %7658, %v1826_v27   ;;  %v623_v45 = vmax.f32 %v559_v6, 0.0  ;;  %7151 = vmatmul.msk.bf16.gmra.mxu0 %vm468_vm14, %v7613_v50  ;;  %v1442_v27 = vsel %vm13606_vm6, %v1250_v61, 0.0  ;;  %v2231_v56 = vsel %vm14285_vm8, 1, %v14230_v28  ;;  %v1827_v61 = vsel %vm895_vm2, 1, %v14230_v28  ;;  %vm897_vm8 = vmand %vm737_vm10, %vm13609_vm12 }
  0xea   : > { %v8788_v10 = vpop.permute.xlu2 %1147  ;;  %v1829_v26 = vsel %vm897_vm8, 1, %v14230_v28  ;;  %vm14296_vm6 = vcmp.ge.s32.totalorder %v8039_v40, 1  ;;  %vm13641_vm12 = vcmp.le.s32.totalorder %v14297_v23, 14  ;;  %v2237_v23 = vsel %vm14324_vm11, 1, %v14230_v28 }
  0xeb   : > { %14283 = vst [vmem:[#allocation68_spill] sm:$0xff] %v8788_v10  ;;  %v8793_v13 = vpop.permute.xlu0 %1138  ;;  %v2233_v5 = vsel %vm14296_vm6, 1, %v14230_v28 }
  0xec   : > { %14284 = vst [vmem:[#allocation69_spill] sm:$0xff] %v8793_v13  ;;  %v1251_v12 = vld [vmem:[#allocation2 + $0x60] sm:$0xff] }
  0xed   : > { %v1009_v54 = vld [vmem:[#allocation2 + $0x5f] sm:$0xff]  ;;  %976 = vst.msk [vmem:[#allocation2 + $0x68] sm:$0xff] %vm965_vm7, %v623_v45  ;;  %v1443_v50 = vsel %vm13601_vm4, %v1251_v12, 0.0 }
  0xee   : > { %v1201_v6 = vsel %vm13594_vm3, %v1009_v54, 0.0  ;;  %v1469_v37 = vpack.c.bf16 %v1443_v50, %v1442_v27  ;;  %1915 = vperm.xlu1 %7659, %v1828_v34   ;;  %v560_v45 = vpop.f32.mrf.mxu0  ;;  %vm898_vm3 = vmand %vm738_vm15, %vm13614_vm1 }
  0xef   : > { %v1227_v3 = vpack.c.bf16 %v1201_v6, %v1200_v39  ;;  %v561_v24 = vadd.f32 %v8434_v20, %v560_v45  ;;  %v1777_v39 = vld [vmem:[#allocation2 + $0x49] sm:$0xff] }
  0xf0   : > { %7165 = vmatmul.msk.bf16.gmra.mxu1 %vm965_vm7, %v1469_v37  ;;  %2288 = vperm.xlu2 %7660, %v2231_v56   ;;  %v8818_v12 = vpop.permute.xlu1 %1861  ;;  %v1778_v37 = vld [vmem:[#allocation2 + $0x51] sm:$0xff]  ;;  %v1830_v56 = vsel %vm898_vm3, 1, %v14230_v28 }
  0xf1   : > { %7185 = vmatmul.msk.bf16.gmra.mxu2 %vm965_vm7, %v1227_v3  ;;  %14286 = vst [vmem:[#allocation70_spill] sm:$0xff] %v8818_v12  ;;  %1912 = vperm.xlu0 %7658, %v1827_v61   ;;  %vm13598_vm2 = vcmp.eq.s32.totalorder %v8818_v12, 1  ;;  %v624_v54 = vmax.f32 %v561_v24, 0.0  ;;  %v8844_v61 = vld [vmem:[%s13469_s1 + $0x8] sm:$0xff]  ;;  %v14290_v24 = vld [vmem:[#allocation4_spill] sm:$0xff] }
  0xf2   : > { %v8825_v34 = vpop.permute.xlu2 %1392  ;;  %v1970_v27 = vsel %vm13598_vm2, %v1778_v37, 0.0  ;;  %vm14291_vm15 = vcmp.ge.s32.totalorder %v14290_v24, 1  ;;  %vm710_vm3 = vcmp.ge.s32.totalorder %v8844_v61, 1  ;;  %vm13612_vm2 = vcmp.eq.s32.totalorder %v8535_v42, 1 }
  0xf3   : > { %14287 = vst [vmem:[#allocation71_spill] sm:$0xff] %v8825_v34  ;;  %v8833_v50 = vpop.permute.xlu0 %1858  ;;  %v2232_v37 = vsel %vm14291_vm15, 1, %v14230_v28  ;;  %vm13611_vm15 = vcmp.eq.s32.totalorder %v8490_v14, 1 }
  0xf4   : > { %14289 = vst [vmem:[#allocation23_spill] sm:$0xff] %v8833_v50  ;;  %vm13597_vm10 = vcmp.eq.s32.totalorder %v8833_v50, 1  ;;  %v14293_v50 = vld [vmem:[#allocation21_spill] sm:$0xff] }
  0xf5   : > { %977 = vst.msk [vmem:[#allocation2 + $0x70] sm:$0xff] %vm965_vm7, %v624_v54  ;;  %v1969_v6 = vsel %vm13597_vm10, %v1777_v39, 0.0  ;;  %v7614_v54 = vld [vmem:[%s7949_s17 + $0x70] sm:$0xff]  ;;  %vm13613_vm8 = vcmp.eq.s32.totalorder %v14293_v50, 1  ;;  %vm13610_vm10 = vcmp.eq.s32.totalorder %v8496_v53, 1 }
  0xf6   : > { %v1997_v45 = vpack.c.bf16 %v1970_v27, %v1969_v6  ;;  %1918 = vperm.xlu1 %7659, %v1829_v26   ;;  %v563_v3 = vpop.f32.mrf.mxu0  ;;  %v8858_v27 = vld [vmem:[%s13469_s1] sm:$0xff]  ;;  %v1252_v26 = vld [vmem:[#allocation2 + $0x68] sm:$0xff]  ;;  %v14308_v53 = vld [vmem:[#allocation38_spill] sm:$0xff] }
  0xf7   : > { %v564_v12 = vadd.f32 %v8434_v20, %v563_v3  ;;  %v1010_v6 = vld [vmem:[#allocation2 + $0x67] sm:$0xff]  ;;  %vm709_vm4 = vcmp.ge.s32.totalorder %v8858_v27, 1 }
  0xf8   : > { %7206 = vmatmul.msk.bf16.gmra.mxu3 %vm965_vm7, %v1997_v45  ;;  %1921 = vperm.xlu2 %7660, %v1830_v56   ;;  %v8852_v39 = vpop.permute.xlu1 %1383  ;;  %v1202_v1 = vsel %vm13610_vm10, %v1010_v6, 0.0  ;;  %vm13622_vm10 = vcmp.le.s32.totalorder %v8486_v52, 14 }
  0xf9   : > { %14292 = vst [vmem:[#allocation4_spill] sm:$0xff] %v8852_v39  ;;  %2291 = vperm.xlu0 %7658, %v2232_v37   ;;  %v625_v3 = vmax.f32 %v564_v12, 0.0  ;;  %7152 = vmatmul.msk.bf16.gmra.mxu0 %vm468_vm14, %v7614_v54  ;;  %v1273_v37 = vsel %vm710_vm3, 1, %v14230_v28  ;;  %v1444_v12 = vsel %vm13613_vm8, %v1252_v26, 0.0  ;;  %v1272_v26 = vsel %vm709_vm4, 1, %v14230_v28 }
  0xfa   : > { %v8863_v56 = vpop.permute.xlu2 %1153 }
  0xfb   : > { %14294 = vst [vmem:[#allocation72_spill] sm:$0xff] %v8863_v56  ;;  %v8867_v45 = vpop.permute.xlu0 %1144 }
  0xfc   : > { %14295 = vst [vmem:[#allocation73_spill] sm:$0xff] %v8867_v45  ;;  %v1253_v8 = vld [vmem:[#allocation2 + $0x70] sm:$0xff] }
  0xfd   : > { %v1011_v41 = vld [vmem:[#allocation2 + $0x6f] sm:$0xff]  ;;  %978 = vst.msk [vmem:[#allocation2 + $0x78] sm:$0xff] %vm965_vm7, %v625_v3  ;;  %v1445_v54 = vsel %vm13612_vm2, %v1253_v8, 0.0 }
  0xfe   : > { %v1203_v21 = vsel %vm13611_vm15, %v1011_v41, 0.0  ;;  %v1470_v46 = vpack.c.bf16 %v1445_v54, %v1444_v12  ;;  %1308 = vperm.xlu1 %7659, %v1273_v37   ;;  %v565_v8 = vpop.f32.mrf.mxu0  ;;  %v14299_v41 = vld [vmem:[#allocation27_spill] sm:$0xff] }
  0xff   : > { %v1228_v0 = vpack.c.bf16 %v1203_v21, %v1202_v1  ;;  %v566_v1 = vadd.f32 %v8434_v20, %v565_v8  ;;  %vm14300_vm6 = vcmp.ge.s32.totalorder %v14299_v41, 1  ;;  %v1779_v54 = vld [vmem:[#allocation2 + $0x59] sm:$0xff] }
 0x100   : > { %7166 = vmatmul.msk.bf16.gmra.mxu1 %vm965_vm7, %v1470_v46  ;;  %2294 = vperm.xlu2 %7660, %v2233_v5   ;;  %v8893_v21 = vpop.permute.xlu1 %1867  ;;  %vm899_vm15 = vmand %vm14300_vm6, %vm13641_vm12  ;;  %v1780_v46 = vld [vmem:[#allocation2 + $0x61] sm:$0xff]  ;;  %vm13661_vm12 = vcmp.eq.s32.totalorder %v8590_v32, 1 }
 0x101   : > { %7186 = vmatmul.msk.bf16.gmra.mxu2 %vm965_vm7, %v1228_v0  ;;  %14298 = vst [vmem:[#allocation74_spill] sm:$0xff] %v8893_v21  ;;  %1305 = vperm.xlu0 %7658, %v1272_v26   ;;  %vm13619_vm2 = vcmp.eq.s32.totalorder %v8893_v21, 1  ;;  %v626_v6 = vmax.f32 %v566_v1, 0.0  ;;  %v14302_v0 = vld [vmem:[#allocation32_spill] sm:$0xff]  ;;  %v1831_v12 = vsel %vm899_vm15, 1, %v14230_v28  ;;  %v8919_v1 = vld [vmem:[%s13469_s1 + $0x18] sm:$0xff] }
 0x102   : > { %v8900_v3 = vpop.permute.xlu2 %1398  ;;  %vm14303_vm8 = vcmp.ge.s32.totalorder %v14302_v0, 1  ;;  %v1972_v5 = vsel %vm13619_vm2, %v1780_v46, 0.0  ;;  %vm13639_vm2 = vcmp.eq.s32.totalorder %v8567_v25, 1 }
 0x103   : > { %14301 = vst [vmem:[#allocation27_spill] sm:$0xff] %v8900_v3  ;;  %vm900_vm1 = vmand %vm14303_vm8, %vm13622_vm10  ;;  %v8908_v37 = vpop.permute.xlu0 %1864  ;;  %vm14305_vm8 = vcmp.ge.s32.totalorder %v8054_v43, 1 }
 0x104   : > { %14304 = vst [vmem:[#allocation32_spill] sm:$0xff] %v8908_v37  ;;  %vm13618_vm6 = vcmp.eq.s32.totalorder %v8908_v37, 1  ;;  %v1832_v8 = vsel %vm900_vm1, 1, %v14230_v28  ;;  %v2234_v46 = vsel %vm14305_vm8, 1, %v14230_v28  ;;  %vm712_vm1 = vcmp.ge.s32.totalorder %v8919_v1, 1  ;;  %v14307_v37 = vld [vmem:[#allocation25_spill] sm:$0xff] }
 0x105   : > { %979 = vst.msk [vmem:[#allocation2 + $0x80] sm:$0xff] %vm965_vm7, %v626_v6  ;;  %v1971_v26 = vsel %vm13618_vm6, %v1779_v54, 0.0  ;;  %v7615_v6 = vld [vmem:[%s7949_s17 + $0x78] sm:$0xff]  ;;  %vm13630_vm15 = vcmp.eq.s32.totalorder %v14307_v37, 1  ;;  %vm13629_vm8 = vcmp.eq.s32.totalorder %v14308_v53, 1  ;;  %vm13631_vm6 = vcmp.eq.s32.totalorder %v8550_v49, 1 }
 0x106   : > { %v1998_v41 = vpack.c.bf16 %v1972_v5, %v1971_v26  ;;  %1924 = vperm.xlu1 %7659, %v1831_v12   ;;  %v568_v0 = vpop.f32.mrf.mxu0  ;;  %v8933_v5 = vld [vmem:[%s13469_s1 + $0x10] sm:$0xff]  ;;  %v1254_v12 = vld [vmem:[#allocation2 + $0x78] sm:$0xff] }
 0x107   : > { %v569_v21 = vadd.f32 %v8434_v20, %v568_v0  ;;  %v1012_v26 = vld [vmem:[#allocation2 + $0x77] sm:$0xff]  ;;  %vm711_vm10 = vcmp.ge.s32.totalorder %v8933_v5, 1 }
 0x108   : > { %7207 = vmatmul.msk.bf16.gmra.mxu3 %vm965_vm7, %v1998_v41  ;;  %1927 = vperm.xlu2 %7660, %v1832_v8   ;;  %v8927_v54 = vpop.permute.xlu1 %1389  ;;  %v1204_v50 = vsel %vm13629_vm8, %v1012_v26, 0.0  ;;  %v14321_v49 = vld [vmem:[#allocation35_spill] sm:$0xff] }
 0x109   : > { %14306 = vst [vmem:[#allocation75_spill] sm:$0xff] %v8927_v54  ;;  %2297 = vperm.xlu0 %7658, %v2234_v46   ;;  %v627_v0 = vmax.f32 %v569_v21, 0.0  ;;  %7153 = vmatmul.msk.bf16.gmra.mxu0 %vm468_vm14, %v7615_v6  ;;  %v1275_v46 = vsel %vm712_vm1, 1, %v14230_v28  ;;  %v1446_v21 = vsel %vm13639_vm2, %v1254_v12, 0.0  ;;  %vm14311_vm14 = vcmp.ge.s32.totalorder %v8081_v48, 1 }
 0x10a   : > { %v8938_v8 = vpop.permute.xlu2 %2252  ;;  %v2235_v52 = vsel %vm14311_vm14, 1, %v14230_v28  ;;  %v1274_v12 = vsel %vm711_vm10, 1, %v14230_v28  ;;  %vm13656_vm2 = vcmp.eq.s32.totalorder %v14321_v49, 1 }
 0x10b   : > { %14309 = vst [vmem:[#allocation76_spill] sm:$0xff] %v8938_v8  ;;  %v8942_v41 = vpop.permute.xlu0 %1150 }
 0x10c   : > { %14310 = vst [vmem:[#allocation77_spill] sm:$0xff] %v8942_v41  ;;  %v1255_v14 = vld [vmem:[#allocation2 + $0x80] sm:$0xff] }
 0x10d   : > { %v1013_v42 = vld [vmem:[#allocation2 + $0x7f] sm:$0xff]  ;;  %980 = vst.msk [vmem:[#allocation2 + $0x88] sm:$0xff] %vm965_vm7, %v627_v0  ;;  %v1447_v6 = vsel %vm13631_vm6, %v1255_v14, 0.0 }
 0x10e   : > { %v1205_v8 = vsel %vm13630_vm15, %v1013_v42, 0.0  ;;  %v1471_v3 = vpack.c.bf16 %v1447_v6, %v1446_v21  ;;  %1314 = vperm.xlu1 %7659, %v1275_v46   ;;  %v570_v0 = vpop.f32.mrf.mxu0  ;;  %v14315_v21 = vld [vmem:[#allocation42_spill] sm:$0xff] }
 0x10f   : > { %v1229_v56 = vpack.c.bf16 %v1205_v8, %v1204_v50  ;;  %v571_v14 = vadd.f32 %v8434_v20, %v570_v0  ;;  %v14313_v50 = vld [vmem:[#allocation37_spill] sm:$0xff]  ;;  %v1782_v8 = vld [vmem:[#allocation2 + $0x71] sm:$0xff]  ;;  %vm806_vm15 = vcmp.le.s32.totalorder %v14315_v21, 14 }
 0x110   : > { %7167 = vmatmul.msk.bf16.gmra.mxu1 %vm965_vm7, %v1471_v3  ;;  %2300 = vperm.xlu2 %7660, %v2235_v52   ;;  %v8966_v42 = vpop.permute.xlu1 %1873  ;;  %vm805_vm8 = vcmp.le.s32.totalorder %v14313_v50, 14  ;;  %v1781_v6 = vld [vmem:[#allocation2 + $0x69] sm:$0xff]  ;;  %v2864_v0 = vsel %vm806_vm15, 1, %v14230_v28 }
 0x111   : > { %7187 = vmatmul.msk.bf16.gmra.mxu2 %vm965_vm7, %v1229_v56  ;;  %14312 = vst [vmem:[#allocation78_spill] sm:$0xff] %v8966_v42  ;;  %1311 = vperm.xlu0 %7658, %v1274_v12   ;;  %vm13633_vm14 = vcmp.eq.s32.totalorder %v8966_v42, 1  ;;  %v628_v26 = vmax.f32 %v571_v14, 0.0  ;;  %v2863_v52 = vsel %vm805_vm8, 1, %v14230_v28  ;;  %v8990_v14 = vld [vmem:[%s13469_s1 + $0x28] sm:$0xff]  ;;  %v14317_v42 = vld [vmem:[#allocation8_spill] sm:$0xff] }
 0x112   : > { %v8970_v46 = vpop.permute.xlu2 %1885  ;;  %v1974_v3 = vsel %vm13633_vm14, %v1782_v8, 0.0  ;;  %vm14318_vm14 = vcmp.ge.s32.totalorder %v14317_v42, 1 }
 0x113   : > { %14314 = vst [vmem:[#allocation37_spill] sm:$0xff] %v8970_v46  ;;  %v8975_v56 = vpop.permute.xlu0 %1870 }
 0x114   : > { %14316 = vst [vmem:[#allocation42_spill] sm:$0xff] %v8975_v56  ;;  %vm13636_vm6 = vcmp.eq.s32.totalorder %v8975_v56, 1  ;;  %v9003_v56 = vld [vmem:[%s13469_s1 + $0x20] sm:$0xff] }
 0x115   : > { %981 = vst.msk [vmem:[#allocation2 + $0x90] sm:$0xff] %vm965_vm7, %v628_v26  ;;  %v1973_v12 = vsel %vm13636_vm6, %v1781_v6, 0.0  ;;  %v2236_v26 = vsel %vm14318_vm14, 1, %v14230_v28  ;;  %vm714_vm6 = vcmp.ge.s32.totalorder %v8990_v14, 1  ;;  %vm713_vm9 = vcmp.ge.s32.totalorder %v9003_v56, 1 }
 0x116   : > { %v1999_v8 = vpack.c.bf16 %v1974_v3, %v1973_v12  ;;  %2896 = vperm.xlu1 %7659, %v2863_v52   ;;  %v573_v53 = vpop.f32.mrf.mxu0  ;;  %v1256_v3 = vld [vmem:[#allocation2 + $0x88] sm:$0xff]  ;;  %v14320_v12 = vld [vmem:[#allocation30_spill] sm:$0xff] }
 0x117   : > { %v574_v37 = vadd.f32 %v8434_v20, %v573_v53  ;;  %v1014_v52 = vld [vmem:[#allocation2 + $0x87] sm:$0xff]  ;;  %vm13654_vm14 = vcmp.eq.s32.totalorder %v14320_v12, 1 }
 0x118   : > { %7208 = vmatmul.msk.bf16.gmra.mxu3 %vm965_vm7, %v1999_v8  ;;  %2899 = vperm.xlu2 %7660, %v2864_v0   ;;  %v8997_v6 = vpop.permute.xlu1 %1395 }
 0x119   : > { %14319 = vst [vmem:[#allocation79_spill] sm:$0xff] %v8997_v6  ;;  %2303 = vperm.xlu0 %7658, %v2236_v26   ;;  %v629_v53 = vmax.f32 %v574_v37, 0.0  ;;  %v1277_v26 = vsel %vm714_vm6, 1, %v14230_v28  ;;  %v1448_v37 = vsel %vm13661_vm12, %v1256_v3, 0.0  ;;  %v1206_v6 = vsel %vm13654_vm14, %v1014_v52, 0.0 }
 0x11a   : > { %v9007_v25 = vpop.permute.xlu2 %1888  ;;  %v1276_v3 = vsel %vm713_vm9, 1, %v14230_v28 }
 0x11b   : > { %14322 = vst [vmem:[#allocation80_spill] sm:$0xff] %v9007_v25  ;;  %v9011_v0 = vpop.permute.xlu0 %1156 }
 0x11c   : > { %14323 = vst [vmem:[#allocation81_spill] sm:$0xff] %v9011_v0  ;;  %v1257_v8 = vld [vmem:[#allocation2 + $0x90] sm:$0xff] }
 0x11d   : > { %v1015_v48 = vld [vmem:[#allocation2 + $0x8f] sm:$0xff]  ;;  %982 = vst.msk [vmem:[#allocation2 + $0x98] sm:$0xff] %vm965_vm7, %v629_v53  ;;  %v1449_v42 = vsel %vm13656_vm2, %v1257_v8, 0.0 }
 0x11e   : > { %v1207_v0 = vsel %vm13655_vm13, %v1015_v48, 0.0  ;;  %v1472_v43 = vpack.c.bf16 %v1449_v42, %v1448_v37  ;;  %1320 = vperm.xlu1 %7659, %v1277_v26   ;;  %v575_v53 = vpop.f32.mrf.mxu0  ;;  %v14326_v42 = vld [vmem:[#allocation47_spill] sm:$0xff]  ;;  %v14328_v26 = vld [vmem:[#allocation45_spill] sm:$0xff] }
 0x11f   : > { %v1230_v40 = vpack.c.bf16 %v1207_v0, %v1206_v6  ;;  %v576_v52 = vadd.f32 %v8434_v20, %v575_v53  ;;  %vm13665_vm14 = vcmp.le.s32.totalorder %v14326_v42, 14  ;;  %v1784_v0 = vld [vmem:[#allocation2 + $0x81] sm:$0xff]  ;;  %vm13668_vm13 = vcmp.le.s32.totalorder %v14328_v26, 14  ;;  %v1783_v37 = vld [vmem:[#allocation2 + $0x79] sm:$0xff] }
 0x120   : > { %7168 = vmatmul.msk.bf16.gmra.mxu1 %vm965_vm7, %v1472_v43  ;;  %2306 = vperm.xlu2 %7660, %v2237_v23   ;;  %v9035_v48 = vpop.permute.xlu1 %1879  ;;  %v2865_v23 = vsel %vm13665_vm14, 1, %v14230_v28  ;;  %v2866_v53 = vsel %vm13668_vm13, 1, %v14230_v28 }
 0x121   : > { %7188 = vmatmul.msk.bf16.gmra.mxu2 %vm965_vm7, %v1230_v40  ;;  %14325 = vst [vmem:[#allocation82_spill] sm:$0xff] %v9035_v48  ;;  %1317 = vperm.xlu0 %7658, %v1276_v3   ;;  %vm13657_vm11 = vcmp.eq.s32.totalorder %v9035_v48, 1  ;;  %v630_v6 = vmax.f32 %v576_v52, 0.0 }
 0x122   : > { %v9039_v8 = vpop.permute.xlu2 %2267  ;;  %v1976_v43 = vsel %vm13657_vm11, %v1784_v0, 0.0  ;;  %vm14330_vm11 = vcmp.ge.s32.totalorder %v8122_v58, 1 }
 0x123   : > { %14327 = vst [vmem:[#allocation47_spill] sm:$0xff] %v9039_v8  ;;  %v9044_v40 = vpop.permute.xlu0 %1876  ;;  %v2238_v0 = vsel %vm14330_vm11, 1, %v14230_v28  ;;  %vm13683_vm11 = vcmp.eq.s32.totalorder %v8627_v31, 1 }
 0x124   : > { %14329 = vst [vmem:[#allocation45_spill] sm:$0xff] %v9044_v40  ;;  %vm13660_vm2 = vcmp.eq.s32.totalorder %v9044_v40, 1 }
 0x125   : > { %983 = vst.msk [vmem:[#allocation2 + $0xa0] sm:$0xff] %vm965_vm7, %v630_v6  ;;  %v1975_v3 = vsel %vm13660_vm2, %v1783_v37, 0.0  ;;  %vm14332_vm2 = vcmp.ge.s32.totalorder %v14315_v21, 1  ;;  %v14333_v37 = vld [vmem:[#allocation39_spill] sm:$0xff] }
 0x126   : > { %v2000_v52 = vpack.c.bf16 %v1976_v43, %v1975_v3  ;;  %2902 = vperm.xlu1 %7659, %v2865_v23   ;;  %v578_v48 = vpop.f32.mrf.mxu0  ;;  %vm838_vm12 = vmand %vm710_vm3, %vm14332_vm2  ;;  %v1258_v43 = vld [vmem:[#allocation2 + $0x98] sm:$0xff]  ;;  %vm13687_vm5 = vcmp.eq.s32.totalorder %v14333_v37, 1  ;;  %vm14338_vm2 = vcmp.ge.s32.totalorder %v14313_v50, 1 }
 0x127   : > { %v579_v12 = vadd.f32 %v8434_v20, %v578_v48  ;;  %v1016_v23 = vld [vmem:[#allocation2 + $0x97] sm:$0xff]  ;;  %v14336_v48 = vld [vmem:[#allocation57_spill] sm:$0xff]  ;;  %v1031_v49 = vsel %vm838_vm12, 1, %v14230_v28  ;;  %vm837_vm13 = vmand %vm709_vm4, %vm14338_vm2  ;;  %vm14339_vm12 = vcmp.ge.s32.totalorder %v8163_v7, 1 }
 0x128   : > { %7209 = vmatmul.msk.bf16.gmra.mxu3 %vm965_vm7, %v2000_v52  ;;  %2905 = vperm.xlu2 %7660, %v2866_v53   ;;  %v9061_v6 = vpop.permute.xlu1 %1882  ;;  %v14335_v20 = vld [vmem:[#allocation54_spill] sm:$0xff]  ;;  %vm13684_vm14 = vcmp.eq.s32.totalorder %v14336_v48, 1  ;;  %v2239_v62 = vsel %vm14339_vm12, 1, %v14230_v28  ;;  %v14351_v48 = vld [vmem:[#allocation55_spill] sm:$0xff] }
 0x129   : > { %14331 = vst [vmem:[#allocation83_spill] sm:$0xff] %v9061_v6  ;;  %2309 = vperm.xlu0 %7658, %v2238_v0   ;;  %v631_v3 = vmax.f32 %v579_v12, 0.0  ;;  %vm13677_vm0 = vcmp.eq.s32.totalorder %v14335_v20, 1  ;;  %v1450_v12 = vsel %vm13687_vm5, %v1258_v43, 0.0  ;;  %vm13678_vm2 = vcmp.eq.s32.totalorder %v9061_v6, 1  ;;  %v1785_v43 = vld [vmem:[#allocation2 + $0x89] sm:$0xff] }
 0x12a   : > { %v9068_v40 = vpop.permute.xlu2 %2270  ;;  %v1208_v32 = vsel %vm13677_vm0, %v1016_v23, 0.0  ;;  %v1786_v23 = vld [vmem:[#allocation2 + $0x91] sm:$0xff]  ;;  %vm13682_vm0 = vcmp.eq.s32.totalorder %v8970_v46, 1  ;;  %vm13702_vm5 = vcmp.eq.s32.totalorder %v8693_v55, 1 }
 0x12b   : > { %14334 = vst [vmem:[#allocation84_spill] sm:$0xff] %v9068_v40  ;;  %v9073_v53 = vpop.permute.xlu0 %2255 }
 0x12c   : > { %14337 = vst [vmem:[#allocation85_spill] sm:$0xff] %v9073_v53  ;;  %v1259_v52 = vld [vmem:[#allocation2 + $0xa0] sm:$0xff] }
 0x12d   : > { %v1017_v44 = vld [vmem:[#allocation2 + $0x9f] sm:$0xff]  ;;  %984 = vst.msk [vmem:[#allocation2 + $0xa8] sm:$0xff] %vm965_vm7, %v631_v3  ;;  %v1451_v0 = vsel %vm13684_vm14, %v1259_v52, 0.0  ;;  %v1030_v3 = vsel %vm837_vm13, 1, %v14230_v28 }
 0x12e   : > { %v1209_v40 = vsel %vm13683_vm11, %v1017_v44, 0.0  ;;  %v1473_v8 = vpack.c.bf16 %v1451_v0, %v1450_v12  ;;  %1066 = vperm.xlu1 %7659, %v1031_v49   ;;  %v580_v37 = vpop.f32.mrf.mxu0  ;;  %v9099_v44 = vld [vmem:[%s13472_s4] ss:$0 sm:$0xff]  ;;  %v14341_v49 = vld [vmem:[#allocation50_spill] sm:$0xff]  ;;  %v1977_v12 = vsel %vm13678_vm2, %v1785_v43, 0.0 }
 0x12f   : > { %v1231_v58 = vpack.c.bf16 %v1209_v40, %v1208_v32  ;;  %v581_v32 = vadd.f32 %v9099_v44, %v580_v37  ;;  %vm13688_vm12 = vcmp.le.s32.totalorder %v14341_v49, 14  ;;  %v1978_v37 = vsel %vm13682_vm0, %v1786_v23, 0.0  ;;  %v14345_v43 = vld [vmem:[#allocation12_spill] sm:$0xff] }
 0x130   : > { %7169 = vmatmul.msk.bf16.gmra.mxu1 %vm965_vm7, %v1473_v8  ;;  %2312 = vperm.xlu2 %7660, %v2239_v62   ;;  %v9102_v40 = vpop.permute.xlu1 %2261  ;;  %v2867_v62 = vsel %vm13688_vm12, 1, %v14230_v28  ;;  %vm14346_vm2 = vcmp.ge.s32.totalorder %v14345_v43, 1  ;;  %vm14348_vm0 = vcmp.ge.s32.totalorder %v14328_v26, 1  ;;  %vm13703_vm12 = vcmp.eq.s32.totalorder %v8705_v47, 1 }
 0x131   : > { %7189 = vmatmul.msk.bf16.gmra.mxu2 %vm965_vm7, %v1231_v58  ;;  %14340 = vst [vmem:[#allocation86_spill] sm:$0xff] %v9102_v40  ;;  %1063 = vperm.xlu0 %7658, %v1030_v3   ;;  %v632_v8 = vmax.f32 %v581_v32, 0.0  ;;  %v14343_v58 = vld [vmem:[#allocation51_spill] sm:$0xff]  ;;  %v2001_v32 = vpack.c.bf16 %v1978_v37, %v1977_v12  ;;  %v2240_v6 = vsel %vm14346_vm2, 1, %v14230_v28  ;;  %vm840_vm11 = vmand %vm712_vm1, %vm14348_vm0  ;;  %vm13696_vm2 = vcmp.eq.s32.totalorder %v14351_v48, 1 }
 0x132   : > { %v9105_v52 = vpop.permute.xlu2 %1903  ;;  %vm13689_vm13 = vcmp.le.s32.totalorder %v14343_v58, 14  ;;  %v1033_v43 = vsel %vm840_vm11, 1, %v14230_v28  ;;  %vm14353_vm0 = vcmp.ge.s32.totalorder %v14326_v42, 1  ;;  %vm14354_vm11 = vcmp.ge.s32.totalorder %v8205_v19, 1 }
 0x133   : > { %14342 = vst [vmem:[#allocation50_spill] sm:$0xff] %v9105_v52  ;;  %v9110_v0 = vpop.permute.xlu0 %2258  ;;  %v2868_v3 = vsel %vm13689_vm13, 1, %v14230_v28  ;;  %vm839_vm13 = vmand %vm711_vm10, %vm14353_vm0 }
 0x134   : > { %14344 = vst [vmem:[#allocation51_spill] sm:$0xff] %v9110_v0  ;;  %v1260_v23 = vld [vmem:[#allocation2 + $0xa8] sm:$0xff] }
 0x135   : > { %985 = vst.msk [vmem:[#allocation2 + $0xb0] sm:$0xff] %vm965_vm7, %v632_v8  ;;  %v1018_v12 = vld [vmem:[#allocation2 + $0xa7] sm:$0xff] }
 0x136   : > { %2908 = vperm.xlu1 %7659, %v2867_v62   ;;  %v583_v20 = vpop.f32.mrf.mxu0  ;;  %v14349_v62 = vld [vmem:[#allocation43_spill] sm:$0xff]  ;;  %v1210_v7 = vsel %vm13696_vm2, %v1018_v12, 0.0  ;;  %v7623_v0 = vld [vmem:[%s13473_s5 + $0x28] sm:$0xff]  ;;  %vm14359_vm2 = vcmp.le.s32.totalorder %v7925_v17, 14 }
 0x137   : > { %v584_v31 = vadd.f32 %v9099_v44, %v583_v20  ;;  %vm13701_vm14 = vcmp.eq.s32.totalorder %v14349_v62, 1  ;;  %3135 = vmatpush.bf16.msrb.mxu3 %v7623_v0 }
 0x138   : > { %7210 = vmatmul.msk.bf16.gmra.mxu3 %vm965_vm7, %v2001_v32  ;;  %2911 = vperm.xlu2 %7660, %v2868_v3   ;;  %v9127_v8 = vpop.permute.xlu1 %2264 }
 0x139   : > { %14347 = vst [vmem:[#allocation87_spill] sm:$0xff] %v9127_v8  ;;  %2315 = vperm.xlu0 %7658, %v2240_v6   ;;  %v633_v37 = vmax.f32 %v584_v31, 0.0  ;;  %v1452_v31 = vsel %vm13703_vm12, %v1260_v23, 0.0  ;;  %v1032_v23 = vsel %vm839_vm13, 1, %v14230_v28  ;;  %vm14358_vm13 = vcmp.le.s32.totalorder %v7879_v4, 14 }
 0x13a   : > { %v9134_v46 = vpop.permute.xlu2 %1906  ;;  %vm13782_vm12 = vcmp.eq.s32.totalorder %v8729_v11, 1 }
 0x13b   : > { %14350 = vst [vmem:[#allocation88_spill] sm:$0xff] %v9134_v46  ;;  %v9139_v20 = vpop.permute.xlu0 %1891 }
 0x13c   : > { %14352 = vst [vmem:[#allocation89_spill] sm:$0xff] %v9139_v20  ;;  %v1261_v3 = vld [vmem:[#allocation2 + $0xb0] sm:$0xff]  ;;  %vm13697_vm0 = vcmp.eq.s32.totalorder %v9139_v20, 1 }
 0x13d   : > { %v1019_v32 = vld [vmem:[#allocation2 + $0xaf] sm:$0xff]  ;;  %986 = vst.msk [vmem:[#allocation2 + $0xb8] sm:$0xff] %vm965_vm7, %v633_v37  ;;  %v1453_v6 = vsel %vm13702_vm5, %v1261_v3, 0.0  ;;  %v2241_v37 = vsel %vm14354_vm11, 1, %v14230_v28  ;;  %vm13698_vm11 = vcmp.eq.s32.totalorder %v9007_v25, 1 }
 0x13e   : > { %v1211_v8 = vsel %vm13701_vm14, %v1019_v32, 0.0  ;;  %v1474_v40 = vpack.c.bf16 %v1453_v6, %v1452_v31  ;;  %1072 = vperm.xlu1 %7659, %v1033_v43   ;;  %v585_v3 = vpop.f32.mrf.mxu0  ;;  %v14364_v25 = vld [vmem:[#allocation53_spill] sm:$0xff]  ;;  %vm14366_vm14 = vcmp.ge.s32.totalorder %v14341_v49, 1 }
 0x13f   : > { %v1232_v53 = vpack.c.bf16 %v1211_v8, %v1210_v7  ;;  %v586_v12 = vadd.f32 %v9099_v44, %v585_v3  ;;  %v1787_v7 = vld [vmem:[#allocation2 + $0x99] sm:$0xff]  ;;  %v1788_v8 = vld [vmem:[#allocation2 + $0xa1] sm:$0xff] }
 0x140   : > { %7170 = vmatmul.msk.bf16.gmra.mxu1 %vm965_vm7, %v1474_v40  ;;  %2318 = vperm.xlu2 %7660, %v2241_v37   ;;  %v9166_v32 = vpop.permute.xlu1 %1897  ;;  %v1980_v0 = vsel %vm13697_vm0, %v1788_v8, 0.0  ;;  %v1979_v40 = vsel %vm13698_vm11, %v1787_v7, 0.0  ;;  %v2870_v37 = vsel %vm14359_vm2, 1, %v14230_v28  ;;  %vm14360_vm0 = vcmp.ge.s32.totalorder %v8231_v30, 1 }
 0x141   : > { %7190 = vmatmul.msk.bf16.gmra.mxu2 %vm965_vm7, %v1232_v53  ;;  %14355 = vst [vmem:[#allocation90_spill] sm:$0xff] %v9166_v32  ;;  %1069 = vperm.xlu0 %7658, %v1032_v23   ;;  %v634_v31 = vmax.f32 %v586_v12, 0.0  ;;  %v2869_v53 = vsel %vm14358_vm13, 1, %v14230_v28  ;;  %v2002_v23 = vpack.c.bf16 %v1980_v0, %v1979_v40  ;;  %v2242_v3 = vsel %vm14360_vm0, 1, %v14230_v28 }
 0x142   : > { %v9168_v43 = vpop.permute.xlu2 %2285  ;;  %vm14362_vm13 = vcmp.ge.s32.totalorder %v14343_v58, 1  ;;  %vm13713_vm2 = vcmp.eq.s32.totalorder %v14364_v25, 1  ;;  %vm13783_vm0 = vcmp.eq.s32.totalorder %v8716_v57, 1 }
 0x143   : > { %14356 = vst [vmem:[#allocation91_spill] sm:$0xff] %v9168_v43  ;;  %v9172_v6 = vpop.permute.xlu0 %1894  ;;  %vm842_vm11 = vmand %vm714_vm6, %vm14362_vm13 }
 0x144   : > { %14357 = vst [vmem:[#allocation92_spill] sm:$0xff] %v9172_v6  ;;  %v1262_v7 = vld [vmem:[#allocation2 + $0xb8] sm:$0xff]  ;;  %v1035_v20 = vsel %vm842_vm11, 1, %v14230_v28  ;;  %vm841_vm13 = vmand %vm713_vm9, %vm14366_vm14  ;;  %vm14368_vm14 = vcmp.ge.s32.totalorder %v8253_v38, 1  ;;  %vm13717_vm11 = vcmp.eq.s32.totalorder %v9166_v32, 1 }
 0x145   : > { %987 = vst.msk [vmem:[#allocation2 + $0xc0] sm:$0xff] %vm965_vm7, %v634_v31  ;;  %v1020_v40 = vld [vmem:[#allocation2 + $0xb7] sm:$0xff]  ;;  %v1454_v48 = vsel %vm13783_vm0, %v1262_v7, 0.0  ;;  %v2243_v43 = vsel %vm14368_vm14, 1, %v14230_v28  ;;  %vm14373_vm14 = vcmp.le.s32.totalorder %v7917_v15, 14 }
 0x146   : > { %2914 = vperm.xlu1 %7659, %v2869_v53   ;;  %v588_v12 = vpop.f32.mrf.mxu0  ;;  %v1790_v7 = vld [vmem:[#allocation2 + $0xb1] sm:$0xff] }
 0x147   : > { %v589_v8 = vadd.f32 %v9099_v44, %v588_v12 }
 0x148   : > { %7211 = vmatmul.msk.bf16.gmra.mxu3 %vm965_vm7, %v2002_v23  ;;  %2917 = vperm.xlu2 %7660, %v2870_v37   ;;  %v9189_v31 = vpop.permute.xlu1 %1900 }
 0x149   : > { %14361 = vst [vmem:[#allocation93_spill] sm:$0xff] %v9189_v31  ;;  %2321 = vperm.xlu0 %7658, %v2242_v3   ;;  %v635_v0 = vmax.f32 %v589_v8, 0.0  ;;  %v14367_v3 = vld [vmem:[#allocation48_spill] sm:$0xff] }
 0x14a   : > { %v9195_v53 = vpop.permute.xlu2 %2288  ;;  %vm13718_vm5 = vcmp.eq.s32.totalorder %v14367_v3, 1 }
 0x14b   : > { %14363 = vst [vmem:[#allocation94_spill] sm:$0xff] %v9195_v53  ;;  %v9199_v12 = vpop.permute.xlu0 %2273  ;;  %v1212_v47 = vsel %vm13718_vm5, %v1020_v40, 0.0  ;;  %vm13731_vm5 = vcmp.eq.s32.totalorder %v8793_v13, 1 }
 0x14c   : > { %14365 = vst [vmem:[#allocation95_spill] sm:$0xff] %v9199_v12  ;;  %v1263_v37 = vld [vmem:[#allocation2 + $0xc0] sm:$0xff] }
 0x14d   : > { %v1021_v23 = vld [vmem:[#allocation2 + $0xbf] sm:$0xff]  ;;  %988 = vst.msk [vmem:[#allocation2 + $0xc8] sm:$0xff] %vm965_vm7, %v635_v0  ;;  %v1561_v8 = vpop.f32.mrf.mxu1  ;;  %v1455_v62 = vsel %vm13713_vm2, %v1263_v37, 0.0  ;;  %v1034_v0 = vsel %vm841_vm13, 1, %v14230_v28  ;;  %vm13714_vm2 = vcmp.eq.s32.totalorder %v9172_v6, 1  ;;  %vm14372_vm13 = vcmp.le.s32.totalorder %v7870_v2, 14 }
 0x14e   : > { %v1475_v55 = vpack.c.bf16 %v1455_v62, %v1454_v48  ;;  %v1213_v53 = vsel %vm13782_vm12, %v1021_v23, 0.0  ;;  %1078 = vperm.xlu1 %7659, %v1035_v20   ;;  %v590_v57 = vpop.f32.mrf.mxu0  ;;  %vm14453_vm12 = vcmp.le.s32.totalorder %v14328_v26, 14 }
 0x14f   : > { %v1233_v19 = vpack.c.bf16 %v1213_v53, %v1212_v47  ;;  %v591_v48 = vadd.f32 %v9099_v44, %v590_v57  ;;  %v1789_v47 = vld [vmem:[#allocation2 + $0xa9] sm:$0xff] }
 0x150   : > { %7171 = vmatmul.msk.bf16.gmra.mxu1 %vm965_vm7, %v1475_v55  ;;  %2324 = vperm.xlu2 %7660, %v2243_v43   ;;  %v9226_v62 = vpop.permute.xlu1 %2279  ;;  %v1982_v55 = vsel %vm13717_vm11, %v1790_v7, 0.0  ;;  %v1981_v37 = vsel %vm13714_vm2, %v1789_v47, 0.0  ;;  %vm14374_vm2 = vcmp.ge.s32.totalorder %v8289_v51, 1 }
 0x151   : > { %7191 = vmatmul.msk.bf16.gmra.mxu2 %vm965_vm7, %v1233_v19  ;;  %14369 = vst [vmem:[#allocation96_spill] sm:$0xff] %v9226_v62  ;;  %1075 = vperm.xlu0 %7658, %v1034_v0   ;;  %v636_v20 = vmax.f32 %v591_v48, 0.0  ;;  %v2871_v19 = vsel %vm14372_vm13, 1, %v14230_v28  ;;  %v2872_v0 = vsel %vm14373_vm14, 1, %v14230_v28  ;;  %v2003_v48 = vpack.c.bf16 %v1982_v55, %v1981_v37  ;;  %vm870_vm13 = vmand %vm710_vm3, %vm806_vm15 }
 0x152   : > { %v9228_v40 = vpop.permute.xlu2 %1921  ;;  %vm13780_vm14 = vcmp.eq.s32.totalorder %v8779_v9, 1  ;;  %v1802_v61 = vsel %vm870_vm13, 1, %v14230_v28  ;;  %vm869_vm3 = vmand %vm709_vm4, %vm805_vm8  ;;  %vm14379_vm4 = vcmp.ge.s32.totalorder %v8311_v59, 1  ;;  %vm13725_vm13 = vcmp.eq.s32.totalorder %v9105_v52, 1 }
 0x153   : > { %14370 = vst [vmem:[#allocation97_spill] sm:$0xff] %v9228_v40  ;;  %v9236_v57 = vpop.permute.xlu0 %2276  ;;  %v2245_v25 = vsel %vm14379_vm4, 1, %v14230_v28  ;;  %vm13726_vm4 = vcmp.eq.s32.totalorder %v9189_v31, 1 }
 0x154   : > { %v1704_v53 = vpop.f32.mrf.mxu2  ;;  %14371 = vst [vmem:[#allocation98_spill] sm:$0xff] %v9236_v57  ;;  %v1022_v6 = vld [vmem:[#allocation2 + $0xc7] sm:$0xff] }
 0x155   : > { %v9234_v23 = vadd.f32 %v1704_v53, %v1561_v8  ;;  %989 = vst.msk [vmem:[#allocation2 + $0xd0] sm:$0xff] %vm965_vm7, %v636_v20  ;;  %v1563_v43 = vpop.f32.mrf.mxu1  ;;  %v2244_v8 = vsel %vm14374_vm2, 1, %v14230_v28  ;;  %v1264_v20 = vld [vmem:[#allocation2 + $0xc8] sm:$0xff]  ;;  %vm13732_vm2 = vcmp.eq.s32.totalorder %v8699_v35, 1 }
 0x156   : > { %2920 = vperm.xlu1 %7659, %v2871_v19   ;;  %v593_v7 = vpop.f32.mrf.mxu0 }
 0x157   : > { %v594_v47 = vadd.f32 %v9099_v44, %v593_v7 }
 0x158   : > { %7212 = vmatmul.msk.bf16.gmra.mxu3 %vm965_vm7, %v2003_v48  ;;  %2923 = vperm.xlu2 %7660, %v2872_v0   ;;  %v9250_v53 = vpop.permute.xlu1 %2282 }
 0x159   : > { %14375 = vst [vmem:[#allocation99_spill] sm:$0xff] %v9250_v53  ;;  %2327 = vperm.xlu0 %7658, %v2244_v8   ;;  %v637_v55 = vmax.f32 %v594_v47, 0.0  ;;  %v14378_v8 = vld [vmem:[#allocation56_spill] sm:$0xff] }
 0x15a   : > { %v9256_v19 = vpop.permute.xlu2 %2294  ;;  %vm13724_vm11 = vcmp.eq.s32.totalorder %v14378_v8, 1 }
 0x15b   : > { %14376 = vst [vmem:[#allocation100_spill] sm:$0xff] %v9256_v19  ;;  %v9262_v0 = vpop.permute.xlu0 %1909  ;;  %v1214_v11 = vsel %vm13724_vm11, %v1022_v6, 0.0  ;;  %vm14384_vm11 = vcmp.le.s32.totalorder %v7983_v29, 14 }
 0x15c   : > { %v1706_v37 = vpop.f32.mrf.mxu2  ;;  %14377 = vst [vmem:[#allocation101_spill] sm:$0xff] %v9262_v0  ;;  %v1265_v7 = vld [vmem:[#allocation2 + $0xd0] sm:$0xff] }
 0x15d   : > { %v9260_v48 = vadd.f32 %v1706_v37, %v1563_v43  ;;  %v1023_v32 = vld [vmem:[#allocation2 + $0xcf] sm:$0xff]  ;;  %990 = vst.msk [vmem:[#allocation2 + $0xd8] sm:$0xff] %vm965_vm7, %v637_v55  ;;  %v1566_v47 = vpop.f32.mrf.mxu1  ;;  %v1456_v43 = vsel %vm13780_vm14, %v1264_v20, 0.0  ;;  %v1457_v37 = vsel %vm13732_vm2, %v1265_v7, 0.0  ;;  %v1801_v55 = vsel %vm869_vm3, 1, %v14230_v28  ;;  %v1792_v20 = vld [vmem:[#allocation2 + $0xc1] sm:$0xff] }
 0x15e   : > { %v1476_v3 = vpack.c.bf16 %v1457_v37, %v1456_v43  ;;  %v1215_v27 = vsel %vm13731_vm5, %v1023_v32, 0.0  ;;  %1837 = vperm.xlu1 %7659, %v1802_v61   ;;  %v595_v9 = vpop.f32.mrf.mxu0  ;;  %v1791_v32 = vld [vmem:[#allocation2 + $0xb9] sm:$0xff]  ;;  %vm14383_vm3 = vcmp.le.s32.totalorder %v7959_v22, 14  ;;  %vm13763_vm5 = vcmp.eq.s32.totalorder %v8852_v39, 1 }
 0x15f   : > { %v1234_v19 = vpack.c.bf16 %v1215_v27, %v1214_v11  ;;  %v596_v7 = vadd.f32 %v9099_v44, %v595_v9  ;;  %v1983_v27 = vsel %vm13726_vm4, %v1791_v32, 0.0  ;;  %vm13743_vm2 = vcmp.eq.s32.totalorder %v8867_v45, 1 }
 0x160   : > { %7172 = vmatmul.msk.bf16.gmra.mxu1 %vm965_vm7, %v1476_v3  ;;  %2330 = vperm.xlu2 %7660, %v2245_v25   ;;  %v9287_v6 = vpop.permute.xlu1 %1915  ;;  %v1984_v3 = vsel %vm13725_vm13, %v1792_v20, 0.0  ;;  %v2873_v25 = vsel %vm14383_vm3, 1, %v14230_v28  ;;  %vm14385_vm13 = vcmp.ge.s32.totalorder %v8347_v16, 1  ;;  %vm14387_vm3 = vcmp.le.s32.totalorder %v14328_v26, 14 }
 0x161   : > { %7192 = vmatmul.msk.bf16.gmra.mxu2 %vm965_vm7, %v1234_v19  ;;  %14380 = vst [vmem:[#allocation102_spill] sm:$0xff] %v9287_v6  ;;  %1834 = vperm.xlu0 %7658, %v1801_v55   ;;  %v638_v11 = vmax.f32 %v596_v7, 0.0  ;;  %v2874_v55 = vsel %vm14384_vm11, 1, %v14230_v28  ;;  %v2004_v7 = vpack.c.bf16 %v1984_v3, %v1983_v27  ;;  %vm872_vm4 = vmand %vm712_vm1, %vm14387_vm3  ;;  %vm13738_vm11 = vcmp.eq.s32.totalorder %v8720_v63, 1  ;;  %v4688_v63 = vld [vmem:[#allocation3 + $0x8] sm:$0xff] }
 0x162   : > { %v9291_v43 = vpop.permute.xlu2 %1927  ;;  %v1804_v13 = vsel %vm872_vm4, 1, %v14230_v28  ;;  %vm14390_vm1 = vcmp.le.s32.totalorder %v14326_v42, 14  ;;  %vm13761_vm3 = vcmp.eq.s32.totalorder %v8754_v18, 1 }
 0x163   : > { %14381 = vst [vmem:[#allocation103_spill] sm:$0xff] %v9291_v43  ;;  %v9297_v9 = vpop.permute.xlu0 %1912 }
 0x164   : > { %v1709_v61 = vpop.f32.mrf.mxu2  ;;  %14382 = vst [vmem:[#allocation104_spill] sm:$0xff] %v9297_v9  ;;  %v1266_v27 = vld [vmem:[#allocation2 + $0xd8] sm:$0xff] }
 0x165   : > { %v9295_v37 = vadd.f32 %v1709_v61, %v1566_v47  ;;  %991 = vst.msk [vmem:[#allocation2 + $0xe0] sm:$0xff] %vm965_vm7, %v638_v11  ;;  %v1568_v19 = vpop.f32.mrf.mxu1  ;;  %v2246_v47 = vsel %vm14385_vm13, 1, %v14230_v28  ;;  %v1024_v31 = vld [vmem:[#allocation2 + $0xd7] sm:$0xff]  ;;  %vm871_vm13 = vmand %vm711_vm10, %vm14390_vm1  ;;  %vm14392_vm10 = vcmp.ge.s32.totalorder %v8373_v33, 1  ;;  %vm13742_vm1 = vcmp.eq.s32.totalorder %v9262_v0, 1 }
 0x166   : > { %2926 = vperm.xlu1 %7659, %v2873_v25   ;;  %v598_v20 = vpop.f32.mrf.mxu0  ;;  %v1216_v5 = vsel %vm13738_vm11, %v1024_v31, 0.0  ;;  %v4689_v31 = vld [vmem:[#allocation3 + $0x10] sm:$0xff] }
 0x167   : > { %v599_v61 = vadd.f32 %v9099_v44, %v598_v20 }
 0x168   : > { %7213 = vmatmul.msk.bf16.gmra.mxu3 %vm965_vm7, %v2004_v7  ;;  %2929 = vperm.xlu2 %7660, %v2874_v55   ;;  %v9313_v11 = vpop.permute.xlu1 %1918 }
 0x169   : > { %14386 = vst [vmem:[#allocation105_spill] sm:$0xff] %v9313_v11  ;;  %2333 = vperm.xlu0 %7658, %v2246_v47   ;;  %v639_v32 = vmax.f32 %v599_v61, 0.0  ;;  %v1458_v47 = vsel %vm13763_vm5, %v1266_v27, 0.0  ;;  %v1794_v27 = vld [vmem:[#allocation2 + $0xd1] sm:$0xff] }
 0x16a   : > { %v9319_v25 = vpop.permute.xlu2 %2300 }
 0x16b   : > { %14388 = vst [vmem:[#allocation106_spill] sm:$0xff] %v9319_v25  ;;  %v9324_v7 = vpop.permute.xlu0 %2291  ;;  %v2090_v55 = vpop.f32.mrf.mxu3 }
 0x16c   : > { %v1711_v3 = vpop.f32.mrf.mxu2  ;;  %14389 = vst [vmem:[#allocation107_spill] sm:$0xff] %v9324_v7  ;;  %v1267_v52 = vld [vmem:[#allocation2 + $0xe0] sm:$0xff] }
 0x16d   : > { %v9322_v20 = vadd.f32 %v1711_v3, %v1568_v19  ;;  %v1025_v8 = vld [vmem:[#allocation2 + $0xdf] sm:$0xff]  ;;  %992 = vst.msk [vmem:[#allocation2 + $0xe8] sm:$0xff] %vm965_vm7, %v639_v32  ;;  %v1571_v1 = vpop.f32.mrf.mxu1  ;;  %v9336_v19 = vadd.f32 %v2090_v55, %v9234_v23  ;;  %v1459_v61 = vsel %vm13761_vm3, %v1267_v52, 0.0  ;;  %v2247_v23 = vsel %vm14392_vm10, 1, %v14230_v28  ;;  %v1241_v52 = vld [vmem:[#allocation2 + $0x10] sm:$0xff] }
 0x16e   : > { %v1217_v3 = vsel %vm13743_vm2, %v1025_v8, 0.0  ;;  %v1477_v35 = vpack.c.bf16 %v1459_v61, %v1458_v47  ;;  %1843 = vperm.xlu1 %7659, %v1804_v13   ;;  %v1803_v32 = vsel %vm871_vm13, 1, %v14230_v28  ;;  %v600_v55 = vpop.f32.mrf.mxu0  ;;  %v1793_v13 = vld [vmem:[#allocation2 + $0xc9] sm:$0xff]  ;;  %vm14394_vm13 = vcmp.le.s32.totalorder %v8020_v36, 14 }
 0x16f   : > { %14391 = vst [vmem:[#allocation108_spill] sm:$0xff] %v9336_v19  ;;  %v1235_v25 = vpack.c.bf16 %v1217_v3, %v1216_v5  ;;  %v601_v18 = vadd.f32 %v9099_v44, %v600_v55  ;;  %v1240_v3 = vld [vmem:[#allocation2 + $0x8] sm:$0xff]  ;;  %vm13741_vm10 = vcmp.eq.s32.totalorder %v9134_v46, 1  ;;  %vm13757_vm2 = vcmp.eq.s32.totalorder %v8942_v41, 1 }
 0x170   : > { %7173 = vmatmul.msk.bf16.gmra.mxu1 %vm965_vm7, %v1477_v35  ;;  %v1309_v8 = vpop.permute.xlu1 %1308  ;;  %2336 = vperm.xlu2 %7660, %v2247_v23   ;;  %v2875_v35 = vsel %vm14394_vm13, 1, %v14230_v28  ;;  %v1985_v0 = vsel %vm13741_vm10, %v1793_v13, 0.0  ;;  %vm14399_vm13 = vcmp.ge.s32.totalorder %v8413_v60, 1  ;;  %vm14406_vm10 = vcmp.le.s32.totalorder %v14341_v49, 14 }
 0x171   : > { %7193 = vmatmul.msk.bf16.gmra.mxu2 %vm965_vm7, %v1235_v25  ;;  %1840 = vperm.xlu0 %7658, %v1803_v32   ;;  %vm1401_vm4 = vcmp.eq.s32.totalorder %v1309_v8, 1  ;;  %v640_v47 = vmax.f32 %v601_v18, 0.0  ;;  %v1986_v25 = vsel %vm13742_vm1, %v1794_v27, 0.0  ;;  %vm873_vm1 = vmand %vm713_vm9, %vm14406_vm10 }
 0x172   : > { %v9354_v5 = vpop.permute.xlu2 %2899  ;;  %v1433_v23 = vsel %vm1401_vm4, %v1241_v52, 0.0  ;;  %v9363_v32 = vsel %vm1401_vm4, %v4689_v31, 0.0  ;;  %vm14398_vm4 = vcmp.le.s32.totalorder %v14290_v24, 14  ;;  %v2005_v31 = vpack.c.bf16 %v1986_v25, %v1985_v0 }
 0x173   : > { %14393 = vst [vmem:[#allocation109_spill] sm:$0xff] %v9354_v5  ;;  %v1306_v8 = vpop.permute.xlu0 %1305  ;;  %v2092_v45 = vpop.f32.mrf.mxu3  ;;  %v2876_v52 = vsel %vm14398_vm4, 1, %v14230_v28 }
 0x174   : > { %v1714_v61 = vpop.f32.mrf.mxu2  ;;  %14395 = vst [vmem:[#allocation110_spill] sm:$0xff] %v9363_v32  ;;  %vm1400_vm11 = vcmp.eq.s32.totalorder %v1306_v8, 1  ;;  %v9368_v39 = vadd.f32 %v2092_v45, %v9260_v48  ;;  %v2248_v45 = vsel %vm14399_vm13, 1, %v14230_v28  ;;  %vm13747_vm13 = vcmp.eq.s32.totalorder %v8788_v10, 1  ;;  %v1026_v8 = vld [vmem:[#allocation2 + $0xe7] sm:$0xff] }
 0x175   : > { %v9361_v55 = vadd.f32 %v1714_v61, %v1571_v1  ;;  %993 = vst.msk [vmem:[#allocation2 + $0xf0] sm:$0xff] %vm965_vm7, %v640_v47  ;;  %v1573_v18 = vpop.f32.mrf.mxu1  ;;  %v1432_v27 = vsel %vm1400_vm11, %v1240_v3, 0.0  ;;  %v9372_v1 = vsel %vm1400_vm11, %v4688_v63, 0.0  ;;  %vm14401_vm11 = vcmp.le.s32.totalorder %v14343_v58, 14  ;;  %v1268_v3 = vld [vmem:[#allocation2 + $0xe8] sm:$0xff] }
 0x176   : > { %14396 = vst [vmem:[#allocation111_spill] sm:$0xff] %v9368_v39  ;;  %v1464_v61 = vpack.c.bf16 %v1433_v23, %v1432_v27  ;;  %2932 = vperm.xlu1 %7659, %v2875_v35   ;;  %v603_v48 = vpop.f32.mrf.mxu0  ;;  %vm9391_vm4 = vmand %vm714_vm6, %vm14401_vm11  ;;  %v7665_v27 = vld [vmem:[%s13473_s5 + $0x10] sm:$0xff]  ;;  %vm13759_vm6 = vcmp.eq.s32.totalorder %v8825_v34, 1  ;;  %vm13760_vm11 = vcmp.eq.s32.totalorder %v8927_v54, 1  ;;  %v1218_v47 = vsel %vm13747_vm13, %v1026_v8, 0.0  ;;  %v1796_v8 = vld [vmem:[#allocation2 + $0xe1] sm:$0xff] }
 0x177   : > { %14397 = vst [vmem:[#allocation112_spill] sm:$0xff] %v9372_v1  ;;  %v604_v13 = vadd.f32 %v9099_v44, %v603_v48  ;;  %v1806_v48 = vsel %vm9391_vm4, 1, %v14230_v28  ;;  %v14418_v34 = vld [vmem:[#allocation33_spill] sm:$0xff]  ;;  %v7667_v1 = vld [vmem:[%s13469_s1] sm:$0xff] }
 0x178   : > { %7160 = vmatmul.msk.bf16.vlgmr.msrb.gmra.mxu0 %vm965_vm7, %v1464_v61  ;;  %7214 = vmatmul.msk.bf16.gmra.mxu3 %vm965_vm7, %v2005_v31  ;;  %v9385_v63 = vpop.permute.xlu1 %1924 }
 0x179   : > { %14400 = vst [vmem:[#allocation113_spill] sm:$0xff] %v9385_v63  ;;  %2935 = vperm.xlu2 %7660, %v2876_v52   ;;  %2339 = vperm.xlu0 %7658, %v2248_v45   ;;  %v641_v35 = vmax.f32 %v604_v13, 0.0 }
 0x17a   : > { %v9396_v23 = vpop.permute.xlu2 %2306  ;;  %2073 = vmatpush.bf16.msrb.mxu0 %v7665_v27 }
 0x17b   : > { %14404 = vst [vmem:[#allocation114_spill] sm:$0xff] %v9396_v23  ;;  %v9405_v52 = vpop.permute.xlu0 %2297  ;;  %v2095_v31 = vpop.f32.mrf.mxu3 }
 0x17c   : > { %v1716_v25 = vpop.f32.mrf.mxu2  ;;  %14405 = vst [vmem:[#allocation115_spill] sm:$0xff] %v9405_v52  ;;  %v1269_v61 = vld [vmem:[#allocation2 + $0xf0] sm:$0xff]  ;;  %v9417_v13 = vadd.f32 %v2095_v31, %v9295_v37  ;;  %v1805_v31 = vsel %vm873_vm1, 1, %v14230_v28  ;;  %vm13753_vm1 = vcmp.eq.s32.totalorder %v9287_v6, 1 }
 0x17d   : > { %v9403_v14 = vadd.f32 %v1716_v25, %v1573_v18  ;;  %v1027_v45 = vld [vmem:[#allocation2 + $0xef] sm:$0xff]  ;;  %994 = vst.msk [vmem:[#allocation2 + $0xf8] sm:$0xff] %vm965_vm7, %v641_v35  ;;  %v1576_v18 = vpop.f32.mrf.mxu1  ;;  %v1460_v25 = vsel %vm13760_vm11, %v1268_v3, 0.0  ;;  %v1461_v0 = vsel %vm13759_vm6, %v1269_v61, 0.0  ;;  %v14408_v35 = vld [vmem:[#allocation28_spill] sm:$0xff]  ;;  %vm14425_vm6 = vcmp.ge.s32.totalorder %v14313_v50, 1 }
 0x17e   : > { %14407 = vst [vmem:[#allocation116_spill] sm:$0xff] %v9417_v13  ;;  %v1478_v27 = vpack.c.bf16 %v1461_v0, %v1460_v25  ;;  %v1219_v56 = vsel %vm13757_vm2, %v1027_v45, 0.0  ;;  %1849 = vperm.xlu1 %7659, %v1806_v48   ;;  %vm14409_vm9 = vcmp.ge.s32.totalorder %v14408_v35, 1  ;;  %v605_v54 = vpop.f32.mrf.mxu0  ;;  %v1795_v45 = vld [vmem:[#allocation2 + $0xd9] sm:$0xff]  ;;  %vm741_vm2 = vcmp.le.s32.totalorder %v7667_v1, 14 }
 0x17f   : > { %v1236_v46 = vpack.c.bf16 %v1219_v56, %v1218_v47  ;;  %v2249_v37 = vsel %vm14409_vm9, 1, %v14230_v28  ;;  %v606_v3 = vadd.f32 %v9099_v44, %v605_v54  ;;  %v7626_v47 = vld [vmem:[%s13473_s5 + $0x40] sm:$0xff]  ;;  %vm13750_vm9 = vcmp.eq.s32.totalorder %v9297_v9, 1  ;;  %vm9507_vm11 = vmand %vm741_vm2, %vm14425_vm6 }
 0x180   : > { %7174 = vmatmul.msk.bf16.gmra.mxu1 %vm965_vm7, %v1478_v27  ;;  %v9434_v61 = vpop.permute.xlu1 %1314  ;;  %v9441_v25 = vld [vmem:[#allocation2 + $0x20] sm:$0xff]  ;;  %4389 = vmatpush.bf16.msra.mxu2 %v7626_v47  ;;  %v1987_v41 = vsel %vm13750_vm9, %v1795_v45, 0.0  ;;  %v14416_v45 = vld [vmem:[#allocation6_spill] sm:$0xff]  ;;  %vm933_vm6 = vmand %vm741_vm2, %vm805_vm8 }
 0x181   : > { %7194 = vmatmul.msk.bf16.gmra.mxu2 %vm965_vm7, %v1236_v46  ;;  %14410 = vst [vmem:[#allocation117_spill] sm:$0xff] %v9434_v61  ;;  %2342 = vperm.xlu2 %7660, %v2249_v37   ;;  %vm1403_vm10 = vcmp.eq.s32.totalorder %v9434_v61, 1  ;;  %v642_v48 = vmax.f32 %v606_v3, 0.0  ;;  %v1988_v3 = vsel %vm13753_vm1, %v1796_v8, 0.0  ;;  %v9473_v8 = vld [vmem:[%s13469_s1 + $0x8] sm:$0xff]  ;;  %vm14417_vm9 = vcmp.le.s32.totalorder %v14416_v45, 14 }
 0x182   : > { %1846 = vperm.xlu0 %7658, %v1805_v31   ;;  %v9443_v0 = vpop.permute.xlu2 %2905  ;;  %v1435_v27 = vsel %vm1403_vm10, %v9441_v25, 0.0  ;;  %v14413_v31 = vld [vmem:[#allocation5_spill] sm:$0xff]  ;;  %v2878_v9 = vsel %vm14417_vm9, 1, %v14230_v28  ;;  %vm14419_vm1 = vcmp.ge.s32.totalorder %v14418_v34, 1 }
 0x183   : > { %14411 = vst [vmem:[#allocation118_spill] sm:$0xff] %v9443_v0  ;;  %v9450_v56 = vpop.permute.xlu0 %1311  ;;  %v2097_v37 = vpop.f32.mrf.mxu3  ;;  %vm14414_vm4 = vcmp.le.s32.totalorder %v14413_v31, 14  ;;  %v2250_v61 = vsel %vm14419_vm1, 1, %v14230_v28 }
 0x184   : > { %v1719_v54 = vpop.f32.mrf.mxu2  ;;  %14412 = vst [vmem:[#allocation119_spill] sm:$0xff] %v9450_v56  ;;  %v2877_v10 = vsel %vm14414_vm4, 1, %v14230_v28  ;;  %vm1402_vm13 = vcmp.eq.s32.totalorder %v9450_v56, 1  ;;  %vm742_vm4 = vcmp.le.s32.totalorder %v9473_v8, 14  ;;  %v14440_v8 = vld [vmem:[#allocation76_spill] sm:$0xff] }
 0x185   : > { %v9445_v46 = vadd.f32 %v1719_v54, %v1576_v18  ;;  %995 = vst.msk [vmem:[#allocation2 + $0x100] sm:$0xff] %vm965_vm7, %v642_v48  ;;  %v9459_v18 = vld [vmem:[#allocation2 + $0x18] sm:$0xff]  ;;  %v1578_v47 = vpop.f32.mrf.mxu1  ;;  %v9463_v54 = vadd.f32 %v2097_v37, %v9322_v20  ;;  %v2006_v37 = vpack.c.bf16 %v1988_v3, %v1987_v41  ;;  %vm9497_vm1 = vmand %vm742_vm4, %vm806_vm15 }
 0x186   : > { %v1434_v6 = vsel %vm1402_vm13, %v9459_v18, 0.0  ;;  %v7625_v48 = vld [vmem:[%s13473_s5 + $0x38] sm:$0xff]  ;;  %2938 = vperm.xlu1 %7659, %v2877_v10   ;;  %v608_v56 = vpop.f32.mrf.mxu0  ;;  %v4118_v19 = vsel %vm9497_vm1, 1, %v14230_v28  ;;  %vm13771_vm1 = vcmp.eq.s32.totalorder %v9228_v40, 1 }
 0x187   : > { %14415 = vst [vmem:[#allocation5_spill] sm:$0xff] %v9463_v54  ;;  %v1465_v20 = vpack.c.bf16 %v1435_v27, %v1434_v6  ;;  %3971 = vmatpush.bf16.msra.mxu1 %v7625_v48  ;;  %v609_v32 = vadd.f32 %v9099_v44, %v608_v56  ;;  %v1270_v6 = vld [vmem:[#allocation2 + $0xf8] sm:$0xff]  ;;  %v14423_v27 = vld [vmem:[#allocation72_spill] sm:$0xff] }
 0x188   : > { %7215 = vmatmul.msk.bf16.gmra.mxu3 %vm965_vm7, %v2006_v37  ;;  %v9491_v10 = vpop.permute.xlu1 %2896  ;;  %vm13765_vm9 = vcmp.eq.s32.totalorder %v14423_v27, 1  ;;  %v1028_v48 = vld [vmem:[#allocation2 + $0xf7] sm:$0xff] }
 0x189   : > { %7161 = vmatmul.msk.bf16.gmra.mxu0 %vm965_vm7, %v1465_v20  ;;  %14420 = vst [vmem:[#allocation120_spill] sm:$0xff] %v9491_v10  ;;  %2941 = vperm.xlu2 %7660, %v2878_v9   ;;  %v643_v44 = vmax.f32 %v609_v32, 0.0  ;;  %v14428_v37 = vld [vmem:[#allocation27_spill] sm:$0xff]  ;;  %v1220_v50 = vsel %vm13765_vm9, %v1028_v48, 0.0  ;;  %vm13770_vm9 = vcmp.eq.s32.totalorder %v9313_v11, 1 }
 0x18a   : > { %2345 = vperm.xlu0 %7658, %v2250_v61   ;;  %v9502_v3 = vpop.permute.xlu2 %2312  ;;  %vm13777_vm15 = vcmp.eq.s32.totalorder %v14428_v37, 1  ;;  %v14429_v54 = vld [vmem:[#allocation79_spill] sm:$0xff] }
 0x18b   : > { %14424 = vst [vmem:[#allocation121_spill] sm:$0xff] %v9502_v3  ;;  %vm13778_vm3 = vcmp.eq.s32.totalorder %v14429_v54, 1  ;;  %v9515_v61 = vpop.permute.xlu0 %2303  ;;  %v2100_v32 = vpop.f32.mrf.mxu3  ;;  %v14431_v3 = vld [vmem:[#allocation81_spill] sm:$0xff]  ;;  %v14447_v54 = vld [vmem:[#allocation7_spill] sm:$0xff] }
 0x18c   : > { %v1721_v56 = vpop.f32.mrf.mxu2  ;;  %14430 = vst [vmem:[#allocation122_spill] sm:$0xff] %v9515_v61  ;;  %v1271_v13 = vld [vmem:[#allocation2 + $0x100] sm:$0xff]  ;;  %vm13766_vm5 = vcmp.eq.s32.totalorder %v14431_v3, 1 }
 0x18d   : > { %v9513_v9 = vadd.f32 %v1721_v56, %v1578_v47  ;;  %v1029_v39 = vld [vmem:[#allocation2 + $0xff] sm:$0xff]  ;;  %996 = vst.msk [vmem:[#allocation2 + $0x108] sm:$0xff] %vm965_vm7, %v643_v44  ;;  %v1581_v34 = vpop.f32.mrf.mxu1  ;;  %v9526_v47 = vadd.f32 %v2100_v32, %v9361_v55  ;;  %v1462_v56 = vsel %vm13778_vm3, %v1270_v6, 0.0  ;;  %v1463_v35 = vsel %vm13777_vm15, %v1271_v13, 0.0  ;;  %v1797_v6 = vld [vmem:[#allocation2 + $0xe9] sm:$0xff] }
 0x18e   : > { %v1479_v41 = vpack.c.bf16 %v1463_v35, %v1462_v56  ;;  %v1221_v23 = vsel %vm13766_vm5, %v1029_v39, 0.0  ;;  %4153 = vperm.xlu1 %7659, %v4118_v19   ;;  %v3281_v55 = vsel %vm9507_vm11, 1, %v14230_v28  ;;  %v4117_v44 = vsel %vm933_vm6, 1, %v14230_v28  ;;  %v1798_v35 = vld [vmem:[#allocation2 + $0xf1] sm:$0xff] }
 0x18f   : > { %14432 = vst [vmem:[#allocation123_spill] sm:$0xff] %v9526_v47  ;;  %v1237_v45 = vpack.c.bf16 %v1221_v23, %v1220_v50  ;;  %v9546_v19 = vld [vmem:[#allocation2 + $0x30] sm:$0xff]  ;;  %v3699_v56 = vsel %vm741_vm2, 1, %v14230_v28  ;;  %vm14436_vm11 = vcmp.ge.s32.totalorder %v14315_v21, 1  ;;  %v1989_v21 = vsel %vm13770_vm9, %v1797_v6, 0.0 }
 0x190   : > { %7175 = vmatmul.msk.bf16.gmra.mxu1 %vm965_vm7, %v1479_v41  ;;  %v9542_v13 = vpop.permute.xlu1 %1320  ;;  %v1990_v41 = vsel %vm13771_vm1, %v1798_v35, 0.0  ;;  %vm902_vm6 = vmand %vm742_vm4, %vm14436_vm11  ;;  %vm14445_vm9 = vcmp.le.s32.totalorder %v14326_v42, 14  ;;  %vm14449_vm15 = vcmp.ge.s32.totalorder %v14326_v42, 1  ;;  %v4604_v42 = vld [vmem:[#allocation3 + $0x7] sm:$0xff] }
 0x191   : > { %7195 = vmatmul.msk.bf16.gmra.mxu2 %vm965_vm7, %v1237_v45  ;;  %14433 = vst [vmem:[#allocation124_spill] sm:$0xff] %v9542_v13  ;;  %3314 = vperm.xlu2 %7660, %v3281_v55   ;;  %vm13784_vm8 = vcmp.eq.s32.totalorder %v9542_v13, 1  ;;  %v2007_v35 = vpack.c.bf16 %v1990_v41, %v1989_v21  ;;  %v3282_v40 = vsel %vm902_vm6, 1, %v14230_v28  ;;  %v14456_v47 = vld [vmem:[#allocation86_spill] sm:$0xff] }
 0x192   : > { %4150 = vperm.xlu0 %7658, %v4117_v44   ;;  %v9548_v23 = vpop.permute.xlu2 %2911  ;;  %v1437_v45 = vsel %vm13784_vm8, %v9546_v19, 0.0 }
 0x193   : > { %14434 = vst [vmem:[#allocation125_spill] sm:$0xff] %v9548_v23  ;;  %v9555_v20 = vpop.permute.xlu0 %1317  ;;  %v2102_v32 = vpop.f32.mrf.mxu3 }
 0x194   : > { %v1724_v39 = vpop.f32.mrf.mxu2  ;;  %14435 = vst [vmem:[#allocation126_spill] sm:$0xff] %v9555_v20  ;;  %vm13797_vm5 = vcmp.eq.s32.totalorder %v9555_v20, 1  ;;  %v9570_v55 = vadd.f32 %v2102_v32, %v9403_v14  ;;  %v9584_v14 = vld [vmem:[%s13469_s1 + $0x10] sm:$0xff]  ;;  %v14438_v32 = vld [vmem:[#allocation85_spill] sm:$0xff]  ;;  %v7669_v20 = vld [vmem:[%s13469_s1 + $0x18] sm:$0xff] }
 0x195   : > { %v9550_v48 = vadd.f32 %v1724_v39, %v1581_v34  ;;  %v9566_v34 = vld [vmem:[#allocation2 + $0x28] sm:$0xff]  ;;  %v1583_v50 = vpop.f32.mrf.mxu1  ;;  %v3700_v39 = vsel %vm742_vm4, 1, %v14230_v28  ;;  %vm743_vm2 = vcmp.le.s32.totalorder %v9584_v14, 14  ;;  %vm2348_vm11 = vcmp.eq.s32.totalorder %v14438_v32, 1  ;;  %v1799_v32 = vld [vmem:[#allocation2 + $0xf9] sm:$0xff] }
 0x196   : > { %14437 = vst [vmem:[#allocation127_spill] sm:$0xff] %v9570_v55  ;;  %v1436_v1 = vsel %vm13797_vm5, %v9566_v34, 0.0  ;;  %3732 = vperm.xlu1 %7659, %v3699_v56   ;;  %vm2347_vm4 = vcmp.eq.s32.totalorder %v14440_v8, 1  ;;  %vm935_vm1 = vmand %vm743_vm2, %vm14445_vm9  ;;  %vm744_vm9 = vcmp.le.s32.totalorder %v7669_v20, 14 }
 0x197   : > { %v1466_v44 = vpack.c.bf16 %v1437_v45, %v1436_v1  ;;  %v2188_v45 = vld [vmem:[#allocation2 + $0x1f] sm:$0xff]  ;;  %v4119_v37 = vsel %vm935_vm1, 1, %v14230_v28  ;;  %vm903_vm3 = vmand %vm743_vm2, %vm14449_vm15  ;;  %vm14451_vm15 = vcmp.ge.s32.totalorder %v14328_v26, 1 }
 0x198   : > { %7216 = vmatmul.msk.bf16.gmra.mxu3 %vm965_vm7, %v2007_v35  ;;  %v9590_v6 = vpop.permute.xlu1 %2902  ;;  %v2380_v1 = vsel %vm2348_vm11, %v2188_v45, 0.0  ;;  %v14443_v35 = vld [vmem:[#allocation8_spill] sm:$0xff]  ;;  %vm904_vm14 = vmand %vm744_vm9, %vm14451_vm15  ;;  %vm14465_vm15 = vcmp.le.s32.totalorder %v14341_v49, 14 }
 0x199   : > { %7162 = vmatmul.msk.bf16.gmra.mxu0 %vm965_vm7, %v1466_v44  ;;  %14439 = vst [vmem:[#allocation128_spill] sm:$0xff] %v9590_v6  ;;  %3735 = vperm.xlu2 %7660, %v3700_v39   ;;  %vm14444_vm6 = vcmp.le.s32.totalorder %v14443_v35, 14  ;;  %vm936_vm0 = vmand %vm744_vm9, %vm14453_vm12  ;;  %vm13790_vm12 = vcmp.eq.s32.totalorder %v14456_v47, 1  ;;  %v9680_v26 = vld [vmem:[%s13469_s1 + $0x20] sm:$0xff]  ;;  %v1000_v47 = vld [vmem:[#allocation2 + $0x17] sm:$0xff] }
 0x19a   : > { %3317 = vperm.xlu0 %7658, %v3282_v40   ;;  %v9593_v41 = vpop.permute.xlu2 %2318  ;;  %v2880_v27 = vsel %vm14444_vm6, 1, %v14230_v28  ;;  %v2187_v40 = vld [vmem:[#allocation2 + $0x17] sm:$0xff]  ;;  %vm14448_vm6 = vcmp.le.s32.totalorder %v14447_v54, 14 }
 0x19b   : > { %14441 = vst [vmem:[#allocation129_spill] sm:$0xff] %v9593_v41  ;;  %v9599_v11 = vpop.permute.xlu0 %2309  ;;  %v2105_v44 = vpop.f32.mrf.mxu3  ;;  %v2879_v13 = vsel %vm14448_vm6, 1, %v14230_v28  ;;  %vm13787_vm6 = vcmp.eq.s32.totalorder %v9291_v43, 1 }
 0x19c   : > { %v1726_v56 = vpop.f32.mrf.mxu2  ;;  %14442 = vst [vmem:[#allocation130_spill] sm:$0xff] %v9599_v11  ;;  %v9609_v3 = vadd.f32 %v2105_v44, %v9445_v46  ;;  %v4605_v46 = vld [vmem:[#allocation3 + $0xf] sm:$0xff]  ;;  %v610_v41 = vpop.f32.mrf.mxu0 }
 0x19d   : > { %v9597_v21 = vadd.f32 %v1726_v56, %v1583_v50  ;;  %v1586_v39 = vpop.f32.mrf.mxu1  ;;  %v2379_v50 = vsel %vm2347_vm4, %v2187_v40, 0.0  ;;  %v2637_v56 = vpack.c.bf16 %v9441_v25, %v9459_v18  ;;  %v999_v25 = vld [vmem:[#allocation2 + $0xf] sm:$0xff] }
 0x19e   : > { %14446 = vst [vmem:[#allocation8_spill] sm:$0xff] %v9609_v3  ;;  %v2411_v45 = vpack.c.bf16 %v2380_v1, %v2379_v50  ;;  %2947 = vperm.xlu1 %7659, %v2880_v27   ;;  %v1800_v27 = vld [vmem:[#allocation2 + $0x101] sm:$0xff]  ;;  %v3283_v50 = vsel %vm903_vm3, 1, %v14230_v28  ;;  %vm13786_vm3 = vcmp.eq.s32.totalorder %v9385_v63, 1 }
 0x19f   : > { %v998_v1 = vld [vmem:[#allocation2 + $0x7] sm:$0xff]  ;;  %v1992_v8 = vsel %vm13787_vm6, %v1800_v27, 0.0 }
 0x1a0   : > { %7224 = vmatmul.msk.bf16.vlgmr.msrb.gmra.mxu1 %vm965_vm7, %v2411_v45  ;;  %v1067_v18 = vpop.permute.xlu1 %1066  ;;  %v9726_v63 = vld [vmem:[#allocation2 + $0x21] sm:$0xff] }
 0x1a1   : > { %7246 = vmatmul.msk.bf16.vlgmr.msrb.gmra.mxu2 %vm965_vm7, %v2637_v56  ;;  %4156 = vperm.xlu2 %7660, %v4119_v37   ;;  %vm1159_vm1 = vcmp.eq.s32.totalorder %v1067_v18, 1 }
 0x1a2   : > { %2944 = vperm.xlu0 %7658, %v2879_v13   ;;  %v9629_v40 = vpop.permute.xlu2 %2917  ;;  %v1191_v56 = vsel %vm1159_vm1, %v999_v25, 0.0  ;;  %v9637_v37 = vsel %vm1159_vm1, %v4605_v46, 0.0  ;;  %v1991_v46 = vsel %vm13786_vm3, %v1799_v32, 0.0  ;;  %v2190_v32 = vld [vmem:[#allocation2 + $0x2f] sm:$0xff]  ;;  %vm13948_vm3 = vcmp.eq.s32.totalorder %v9354_v5, 1 }
 0x1a3   : > { %14450 = vst [vmem:[#allocation7_spill] sm:$0xff] %v9629_v40  ;;  %v1064_v13 = vpop.permute.xlu0 %1063  ;;  %v2107_v18 = vpop.f32.mrf.mxu3  ;;  %v2008_v43 = vpack.c.bf16 %v1992_v8, %v1991_v46  ;;  %v2382_v8 = vsel %vm13790_vm12, %v2190_v32, 0.0 }
 0x1a4   : > { %v1729_v44 = vpop.f32.mrf.mxu2  ;;  %14452 = vst [vmem:[#allocation131_spill] sm:$0xff] %v9637_v37  ;;  %vm1158_vm8 = vcmp.eq.s32.totalorder %v1064_v13, 1  ;;  %v9646_v55 = vadd.f32 %v2107_v18, %v9513_v9  ;;  %v4120_v13 = vsel %vm936_vm0, 1, %v14230_v28  ;;  %v14457_v9 = vld [vmem:[#allocation51_spill] sm:$0xff]  ;;  %vm745_vm0 = vcmp.le.s32.totalorder %v9680_v26, 14  ;;  %v14470_v37 = vld [vmem:[#allocation9_spill] sm:$0xff] }
 0x1a5   : > { %v9635_v45 = vadd.f32 %v1729_v44, %v1586_v39  ;;  %v1588_v3 = vpop.f32.mrf.mxu1  ;;  %v1190_v39 = vsel %vm1158_vm8, %v998_v1, 0.0  ;;  %v9648_v25 = vsel %vm1158_vm8, %v4604_v42, 0.0  ;;  %v3284_v44 = vsel %vm904_vm14, 1, %v14230_v28  ;;  %v2189_v42 = vld [vmem:[#allocation2 + $0x27] sm:$0xff] }
 0x1a6   : > { %14454 = vst [vmem:[#allocation132_spill] sm:$0xff] %v9646_v55  ;;  %v1222_v27 = vpack.c.bf16 %v1191_v56, %v1190_v39  ;;  %3320 = vperm.xlu1 %7659, %v3283_v50   ;;  %vm13796_vm1 = vcmp.eq.s32.totalorder %v14457_v9, 1  ;;  %v14472_v55 = vld [vmem:[#allocation87_spill] sm:$0xff]  ;;  %v3703_v5 = vsel %vm745_vm0, 1, %v14230_v28 }
 0x1a7   : > { %14455 = vst [vmem:[#allocation133_spill] sm:$0xff] %v9648_v25  ;;  %v2381_v50 = vsel %vm13796_vm1, %v2189_v42, 0.0  ;;  %v14462_v42 = vld [vmem:[#allocation10_spill] sm:$0xff]  ;;  %vm14474_vm1 = vcmp.ge.s32.totalorder %v14343_v58, 1 }
 0x1a8   : > { %7217 = vmatmul.msk.bf16.gmra.mxu3 %vm965_vm7, %v2008_v43  ;;  %v9660_v1 = vpop.permute.xlu1 %2908  ;;  %v2412_v32 = vpack.c.bf16 %v2382_v8, %v2381_v50  ;;  %vm14463_vm14 = vcmp.le.s32.totalorder %v14462_v42, 14  ;;  %v1001_v8 = vld [vmem:[#allocation2 + $0x1f] sm:$0xff] }
 0x1a9   : > { %7180 = vmatmul.msk.bf16.vlgmr.msra.gmra.mxu0 %vm965_vm7, %v1222_v27  ;;  %14458 = vst [vmem:[#allocation134_spill] sm:$0xff] %v9660_v1  ;;  %3323 = vperm.xlu2 %7660, %v3284_v44   ;;  %v3702_v44 = vsel %vm744_vm9, 1, %v14230_v28  ;;  %v2881_v20 = vsel %vm14463_vm14, 1, %v14230_v28  ;;  %vm2991_vm9 = vcmp.eq.s32.totalorder %v9491_v10, 1 }
 0x1aa   : > { %4159 = vperm.xlu0 %7658, %v4120_v13   ;;  %v9662_v18 = vpop.permute.xlu2 %2324 }
 0x1ab   : > { %14459 = vst [vmem:[#allocation135_spill] sm:$0xff] %v9662_v18  ;;  %v9670_v46 = vpop.permute.xlu0 %2315  ;;  %v2110_v43 = vpop.f32.mrf.mxu3 }
 0x1ac   : > { %v1731_v56 = vpop.f32.mrf.mxu2  ;;  %14460 = vst [vmem:[#allocation136_spill] sm:$0xff] %v9670_v46  ;;  %v9675_v13 = vadd.f32 %v2110_v43, %v9550_v48  ;;  %v3701_v48 = vsel %vm743_vm2, 1, %v14230_v28  ;;  %vm937_vm2 = vmand %vm745_vm0, %vm14465_vm15  ;;  %vm14468_vm15 = vcmp.le.s32.totalorder %v14343_v58, 14  ;;  %v2610_v58 = vld [vmem:[#allocation2 + $0x40] sm:$0xff] }
 0x1ad   : > { %v9668_v39 = vadd.f32 %v1731_v56, %v1588_v3  ;;  %v1591_v27 = vpop.f32.mrf.mxu1  ;;  %v2638_v3 = vpack.c.bf16 %v9546_v19, %v9566_v34  ;;  %v9694_v56 = vld [vmem:[%s13469_s1 + $0x28] sm:$0xff]  ;;  %v9708_v34 = vld [vmem:[#allocation2 + $0x19] sm:$0xff] }
 0x1ae   : > { %14461 = vst [vmem:[#allocation137_spill] sm:$0xff] %v9675_v13  ;;  %3741 = vperm.xlu1 %7659, %v3702_v44   ;;  %vm746_vm8 = vcmp.le.s32.totalorder %v9694_v56, 14  ;;  %v3023_v43 = vsel %vm2991_vm9, %v9708_v34, 0.0  ;;  %v14490_v56 = vld [vmem:[#allocation84_spill] sm:$0xff] }
 0x1af   : > { %vm938_vm6 = vmand %vm746_vm8, %vm14468_vm15  ;;  %vm13804_vm15 = vcmp.eq.s32.totalorder %v14472_v55, 1 }
 0x1b0   : > { %7225 = vmatmul.msk.bf16.gmra.mxu1 %vm965_vm7, %v2412_v32  ;;  %v9700_v19 = vpop.permute.xlu1 %1072  ;;  %v4122_v25 = vsel %vm938_vm6, 1, %v14230_v28  ;;  %vm906_vm5 = vmand %vm746_vm8, %vm14474_vm1  ;;  %vm14478_vm1 = vcmp.ge.s32.totalorder %v14341_v49, 1 }
 0x1b1   : > { %7247 = vmatmul.msk.bf16.gmra.mxu2 %vm965_vm7, %v2638_v3  ;;  %14464 = vst [vmem:[#allocation10_spill] sm:$0xff] %v9700_v19  ;;  %2950 = vperm.xlu2 %7660, %v2881_v20   ;;  %vm13834_vm14 = vcmp.eq.s32.totalorder %v9700_v19, 1 }
 0x1b2   : > { %3738 = vperm.xlu0 %7658, %v3701_v48   ;;  %v9710_v50 = vpop.permute.xlu2 %2923  ;;  %v1193_v32 = vsel %vm13834_vm14, %v1001_v8, 0.0  ;;  %v4121_v48 = vsel %vm937_vm2, 1, %v14230_v28  ;;  %v3024_v8 = vsel %vm13948_vm3, %v9726_v63, 0.0  ;;  %vm14471_vm2 = vcmp.le.s32.totalorder %v14470_v37, 14 }
 0x1b3   : > { %14466 = vst [vmem:[#allocation138_spill] sm:$0xff] %v9710_v50  ;;  %v9719_v3 = vpop.permute.xlu0 %1069  ;;  %v2112_v20 = vpop.f32.mrf.mxu3  ;;  %v3055_v19 = vpack.c.bf16 %v3024_v8, %v3023_v43  ;;  %v2882_v13 = vsel %vm14471_vm2, 1, %v14230_v28  ;;  %v3286_v8 = vsel %vm906_vm5, 1, %v14230_v28  ;;  %vm905_vm2 = vmand %vm745_vm0, %vm14478_vm1  ;;  %vm13811_vm5 = vcmp.eq.s32.totalorder %v9590_v6, 1 }
 0x1b4   : > { %v1734_v14 = vpop.f32.mrf.mxu2  ;;  %14467 = vst [vmem:[#allocation139_spill] sm:$0xff] %v9719_v3  ;;  %vm13812_vm12 = vcmp.eq.s32.totalorder %v9719_v3, 1  ;;  %v7673_v3 = vld [vmem:[#allocation2 + $0x3f] sm:$0xff]  ;;  %v3285_v49 = vsel %vm905_vm2, 1, %v14230_v28 }
 0x1b5   : > { %v9715_v44 = vadd.f32 %v1734_v14, %v1591_v27  ;;  %v1593_v27 = vpop.f32.mrf.mxu1  ;;  %v9730_v14 = vadd.f32 %v2112_v20, %v9597_v21  ;;  %v1192_v9 = vsel %vm13812_vm12, %v1000_v47, 0.0  ;;  %v14475_v47 = vld [vmem:[#allocation47_spill] sm:$0xff] }
 0x1b6   : > { %v1223_v10 = vpack.c.bf16 %v1193_v32, %v1192_v9  ;;  %4162 = vperm.xlu1 %7659, %v4121_v48   ;;  %vm13801_vm6 = vcmp.eq.s32.totalorder %v14475_v47, 1  ;;  %v7672_v32 = vld [vmem:[#allocation2 + $0x37] sm:$0xff]  ;;  %v9801_v47 = vld [vmem:[#allocation2 + $0x27] sm:$0xff] }
 0x1b7   : > { %14469 = vst [vmem:[#allocation140_spill] sm:$0xff] %v9730_v14 }
 0x1b8   : > { %7268 = vmatmul.msk.bf16.vlgmr.msrb.gmra.mxu3 %vm965_vm7, %v3055_v19  ;;  %v9744_v21 = vpop.permute.xlu1 %2914 }
 0x1b9   : > { %7181 = vmatmul.msk.bf16.gmra.mxu0 %vm965_vm7, %v1223_v10  ;;  %14473 = vst [vmem:[#allocation9_spill] sm:$0xff] %v9744_v21  ;;  %4165 = vperm.xlu2 %7660, %v4122_v25   ;;  %v2383_v10 = vsel %vm13804_vm15, %v7672_v32, 0.0 }
 0x1ba   : > { %2953 = vperm.xlu0 %7658, %v2882_v13   ;;  %v9751_v43 = vpop.permute.xlu2 %2330 }
 0x1bb   : > { %14476 = vst [vmem:[#allocation141_spill] sm:$0xff] %v9751_v43  ;;  %v9757_v19 = vpop.permute.xlu0 %2321  ;;  %v2115_v48 = vpop.f32.mrf.mxu3 }
 0x1bc   : > { %v1736_v9 = vpop.f32.mrf.mxu2  ;;  %14477 = vst [vmem:[#allocation142_spill] sm:$0xff] %v9757_v19  ;;  %v9765_v13 = vadd.f32 %v2115_v48, %v9635_v45 }
 0x1bd   : > { %v9755_v20 = vadd.f32 %v1736_v9, %v1593_v27  ;;  %v1596_v25 = vpop.f32.mrf.mxu1  ;;  %v2384_v27 = vsel %vm13801_vm6, %v7673_v3, 0.0  ;;  %v2609_v9 = vld [vmem:[#allocation2 + $0x38] sm:$0xff]  ;;  %vm13809_vm6 = vcmp.eq.s32.totalorder %v9443_v0, 1  ;;  %v9780_v3 = vld [vmem:[#allocation2 + $0x29] sm:$0xff] }
 0x1be   : > { %14479 = vst [vmem:[#allocation143_spill] sm:$0xff] %v9765_v13  ;;  %v2413_v32 = vpack.c.bf16 %v2384_v27, %v2383_v10  ;;  %v2639_v55 = vpack.c.bf16 %v2610_v58, %v2609_v9  ;;  %3329 = vperm.xlu1 %7659, %v3286_v8   ;;  %v9782_v10 = vld [vmem:[#allocation2 + $0x2f] sm:$0xff]  ;;  %v3025_v58 = vsel %vm13811_vm5, %v9780_v3, 0.0  ;;  %v14483_v9 = vld [vmem:[#allocation11_spill] sm:$0xff]  ;;  %vm14491_vm5 = vcmp.ge.s32.totalorder %v7879_v4, 1 }
 0x1bf   : > { %vm14484_vm0 = vcmp.le.s32.totalorder %v14483_v9, 14  ;;  %v7675_v0 = vld [vmem:[%s13469_s1 + $0x30] sm:$0xff]  ;;  %v7677_v9 = vld [vmem:[#allocation2 + $0x47] sm:$0xff] }
 0x1c0   : > { %7226 = vmatmul.msk.bf16.gmra.mxu1 %vm965_vm7, %v2413_v32  ;;  %v9776_v45 = vpop.permute.xlu1 %1078  ;;  %v2883_v32 = vsel %vm14484_vm0, 1, %v14230_v28 }
 0x1c1   : > { %7248 = vmatmul.msk.bf16.gmra.mxu2 %vm965_vm7, %v2639_v55  ;;  %14480 = vst [vmem:[#allocation144_spill] sm:$0xff] %v9776_v45  ;;  %3744 = vperm.xlu2 %7660, %v3703_v5   ;;  %vm13808_vm1 = vcmp.eq.s32.totalorder %v9776_v45, 1 }
 0x1c2   : > { %3326 = vperm.xlu0 %7658, %v3285_v49   ;;  %v9784_v48 = vpop.permute.xlu2 %2929  ;;  %v1195_v5 = vsel %vm13808_vm1, %v9782_v10, 0.0  ;;  %v9799_v49 = vld [vmem:[#allocation2 + $0x31] sm:$0xff]  ;;  %vm747_vm1 = vcmp.le.s32.totalorder %v7675_v0, 14 }
 0x1c3   : > { %14481 = vst [vmem:[#allocation145_spill] sm:$0xff] %v9784_v48  ;;  %v9794_v8 = vpop.permute.xlu0 %1075  ;;  %v2117_v27 = vpop.f32.mrf.mxu3  ;;  %v3026_v45 = vsel %vm13809_vm6, %v9799_v49, 0.0  ;;  %vm13819_vm6 = vcmp.eq.s32.totalorder %v9199_v12, 1  ;;  %vm9841_vm12 = vmand %vm747_vm1, %vm14491_vm5 }
 0x1c4   : > { %v1739_v26 = vpop.f32.mrf.mxu2  ;;  %14482 = vst [vmem:[#allocation146_spill] sm:$0xff] %v9794_v8  ;;  %vm13810_vm2 = vcmp.eq.s32.totalorder %v9794_v8, 1  ;;  %v3056_v14 = vpack.c.bf16 %v3026_v45, %v3025_v58 }
 0x1c5   : > { %v9789_v55 = vadd.f32 %v1739_v26, %v1596_v25  ;;  %v1598_v6 = vpop.f32.mrf.mxu1  ;;  %v9805_v25 = vadd.f32 %v2117_v27, %v9668_v39  ;;  %v9810_v26 = vld [vmem:[%s13469_s1 + $0x38] sm:$0xff]  ;;  %v1194_v13 = vsel %vm13810_vm2, %v9801_v47, 0.0  ;;  %v14486_v39 = vld [vmem:[#allocation12_spill] sm:$0xff]  ;;  %vm14489_vm2 = vcmp.le.s32.totalorder %v7925_v17, 14 }
 0x1c6   : > { %vm748_vm15 = vcmp.le.s32.totalorder %v9810_v26, 14  ;;  %v1224_v43 = vpack.c.bf16 %v1195_v5, %v1194_v13  ;;  %2956 = vperm.xlu1 %7659, %v2883_v32   ;;  %vm14487_vm0 = vcmp.le.s32.totalorder %v14486_v39, 14  ;;  %v7680_v26 = vld [vmem:[#allocation2 + $0x5f] sm:$0xff] }
 0x1c7   : > { %14485 = vst [vmem:[#allocation147_spill] sm:$0xff] %v9805_v25  ;;  %v2884_v27 = vsel %vm14487_vm0, 1, %v14230_v28  ;;  %v3704_v25 = vsel %vm746_vm8, 1, %v14230_v28  ;;  %vm940_vm0 = vmand %vm748_vm15, %vm14489_vm2  ;;  %vm13823_vm8 = vcmp.eq.s32.totalorder %v14490_v56, 1  ;;  %vm14496_vm2 = vcmp.le.s32.totalorder %v7879_v4, 14  ;;  %v14509_v56 = vld [vmem:[#allocation13_spill] sm:$0xff] }
 0x1c8   : > { %7269 = vmatmul.msk.bf16.gmra.mxu3 %vm965_vm7, %v3056_v14  ;;  %v9831_v13 = vpop.permute.xlu1 %2920  ;;  %v7676_v14 = vld [vmem:[#allocation2 + $0x4f] sm:$0xff]  ;;  %v4124_v8 = vsel %vm940_vm0, 1, %v14230_v28  ;;  %vm939_vm5 = vmand %vm747_vm1, %vm14496_vm2  ;;  %v2385_v12 = vsel %vm13823_vm8, %v7677_v9, 0.0  ;;  %vm13832_vm0 = vcmp.eq.s32.totalorder %v9660_v1, 1  ;;  %vm13831_vm2 = vcmp.eq.s32.totalorder %v9548_v23, 1 }
 0x1c9   : > { %7182 = vmatmul.msk.bf16.gmra.mxu0 %vm965_vm7, %v1224_v43  ;;  %14488 = vst [vmem:[#allocation148_spill] sm:$0xff] %v9831_v13  ;;  %2959 = vperm.xlu2 %7660, %v2884_v27   ;;  %v2386_v43 = vsel %vm13819_vm6, %v7676_v14, 0.0  ;;  %v4123_v4 = vsel %vm939_vm5, 1, %v14230_v28  ;;  %vm14501_vm5 = vcmp.ge.s32.totalorder %v7925_v17, 1  ;;  %v3706_v17 = vsel %vm748_vm15, 1, %v14230_v28 }
 0x1ca   : > { %3747 = vperm.xlu0 %7658, %v3704_v25   ;;  %v9849_v32 = vpop.permute.xlu2 %2336  ;;  %v2612_v25 = vld [vmem:[#allocation2 + $0x50] sm:$0xff]  ;;  %v2414_v14 = vpack.c.bf16 %v2386_v43, %v2385_v12  ;;  %v7678_v12 = vld [vmem:[%s13472_s4] ss:$0 sm:$0xff]  ;;  %vm908_vm6 = vmand %vm748_vm15, %vm14501_vm5  ;;  %vm14505_vm15 = vcmp.le.s32.totalorder %v8231_v30, 14 }
 0x1cb   : > { %14494 = vst [vmem:[#allocation149_spill] sm:$0xff] %v9849_v32  ;;  %v9851_v27 = vpop.permute.xlu0 %2327  ;;  %v2120_v39 = vpop.f32.mrf.mxu3 }
 0x1cc   : > { %v1741_v45 = vpop.f32.mrf.mxu2  ;;  %14495 = vst [vmem:[#allocation150_spill] sm:$0xff] %v9851_v27  ;;  %v3287_v27 = vsel %vm9841_vm12, 1, %v14230_v28 }
 0x1cd   : > { %v9847_v5 = vadd.f32 %v1741_v45, %v1598_v6  ;;  %v1601_v18 = vpop.f32.mrf.mxu1  ;;  %v9860_v6 = vadd.f32 %v2120_v39, %v9715_v44  ;;  %v2611_v45 = vld [vmem:[#allocation2 + $0x48] sm:$0xff]  ;;  %v611_v44 = vadd.f32 %v7678_v12, %v610_v41 }
 0x1ce   : > { %v2640_v32 = vpack.c.bf16 %v2612_v25, %v2611_v45  ;;  %4171 = vperm.xlu1 %7659, %v4124_v8   ;;  %v2835_v8 = vld [vmem:[#allocation2 + $0x39] sm:$0xff]  ;;  %v1769_v45 = vld [vmem:[#allocation2 + $0x9] sm:$0xff]  ;;  %v2836_v41 = vld [vmem:[#allocation2 + $0x41] sm:$0xff] }
 0x1cf   : > { %14497 = vst [vmem:[#allocation151_spill] sm:$0xff] %v9860_v6  ;;  %v644_v39 = vmax.f32 %v611_v44, 0.0  ;;  %v3027_v58 = vsel %vm13832_vm0, %v2835_v8, 0.0  ;;  %v3028_v0 = vsel %vm13831_vm2, %v2836_v41, 0.0  ;;  %v9908_v41 = vld [vmem:[%s13469_s1 + $0x40] sm:$0xff]  ;;  %vm13864_vm2 = vcmp.eq.s32.totalorder %v9629_v40, 1 }
 0x1d0   : > { %7227 = vmatmul.msk.bf16.gmra.mxu1 %vm965_vm7, %v2414_v14  ;;  %v9869_v9 = vpop.permute.xlu1 %1837  ;;  %v3705_v14 = vsel %vm747_vm1, 1, %v14230_v28  ;;  %v3057_v8 = vpack.c.bf16 %v3028_v0, %v3027_v58  ;;  %vm749_vm5 = vcmp.le.s32.totalorder %v9908_v41, 14  ;;  %v2615_v40 = vld [vmem:[#allocation2 + $0x68] sm:$0xff] }
 0x1d1   : > { %7249 = vmatmul.msk.bf16.gmra.mxu2 %vm965_vm7, %v2640_v32  ;;  %14498 = vst [vmem:[#allocation152_spill] sm:$0xff] %v9869_v9  ;;  %3332 = vperm.xlu2 %7660, %v3287_v27   ;;  %vm13822_vm12 = vcmp.eq.s32.totalorder %v9869_v9, 1  ;;  %v1770_v32 = vld [vmem:[#allocation2 + $0x11] sm:$0xff]  ;;  %v14588_v6 = vld [vmem:[#allocation33_spill] sm:$0xff] }
 0x1d2   : > { %4168 = vperm.xlu0 %7658, %v4123_v4   ;;  %v1962_v4 = vsel %vm13822_vm12, %v1770_v32, 0.0  ;;  %997 = vst.msk [vmem:[#allocation2 + $0x110] sm:$0xff] %vm965_vm7, %v644_v39  ;;  %v3288_v39 = vsel %vm908_vm6, 1, %v14230_v28  ;;  %vm13830_vm12 = vcmp.eq.s32.totalorder %v9236_v57, 1  ;;  %vm14506_vm6 = vcmp.le.s32.totalorder %v7870_v2, 14 }
 0x1d3   : > { %v9878_v25 = vpop.permute.xlu2 %2935  ;;  %v9886_v12 = vpop.permute.xlu0 %1834  ;;  %vm941_vm8 = vmand %vm749_vm5, %vm14506_vm6  ;;  %vm13833_vm6 = vcmp.eq.s32.totalorder %v9744_v21, 1 }
 0x1d4   : > { %v1744_v43 = vpop.f32.mrf.mxu2  ;;  %14499 = vst [vmem:[#allocation153_spill] sm:$0xff] %v9878_v25  ;;  %vm13821_vm1 = vcmp.eq.s32.totalorder %v9886_v12, 1  ;;  %v4125_v57 = vsel %vm941_vm8, 1, %v14230_v28 }
 0x1d5   : > { %v9882_v27 = vadd.f32 %v1744_v43, %v1601_v18  ;;  %14500 = vst [vmem:[#allocation154_spill] sm:$0xff] %v9886_v12  ;;  %v1603_v44 = vpop.f32.mrf.mxu1  ;;  %v2122_v18 = vpop.f32.mrf.mxu3  ;;  %v1961_v43 = vsel %vm13821_vm1, %v1769_v45, 0.0  ;;  %vm13829_vm1 = vcmp.eq.s32.totalorder %v9226_v62, 1  ;;  %v7681_v45 = vld [vmem:[#allocation2 + $0x57] sm:$0xff] }
 0x1d6   : > { %v9899_v32 = vadd.f32 %v2122_v18, %v9755_v20  ;;  %3750 = vperm.xlu1 %7659, %v3705_v14   ;;  %v1993_v9 = vpack.c.bf16 %v1962_v4, %v1961_v43  ;;  %v2388_v58 = vsel %vm13829_vm1, %v7680_v26, 0.0  ;;  %v2387_v14 = vsel %vm13830_vm12, %v7681_v45, 0.0  ;;  %v2614_v18 = vld [vmem:[#allocation2 + $0x60] sm:$0xff]  ;;  %v2613_v26 = vld [vmem:[#allocation2 + $0x58] sm:$0xff] }
 0x1d7   : > { %v2415_v45 = vpack.c.bf16 %v2388_v58, %v2387_v14  ;;  %v2641_v62 = vpack.c.bf16 %v2614_v18, %v2613_v26  ;;  %vm14512_vm1 = vcmp.ge.s32.totalorder %v7870_v2, 1  ;;  %v2837_v58 = vld [vmem:[#allocation2 + $0x49] sm:$0xff]  ;;  %v2838_v18 = vld [vmem:[#allocation2 + $0x51] sm:$0xff] }
 0x1d8   : > { %14502 = vst [vmem:[#allocation155_spill] sm:$0xff] %v9899_v32  ;;  %7270 = vmatmul.msk.bf16.gmra.mxu3 %vm965_vm7, %v3057_v8  ;;  %v9914_v20 = vpop.permute.xlu1 %2926  ;;  %v2886_v8 = vsel %vm14505_vm15, 1, %v14230_v28  ;;  %vm14510_vm15 = vcmp.le.s32.totalorder %v14509_v56, 14  ;;  %vm909_vm12 = vmand %vm749_vm5, %vm14512_vm1  ;;  %vm14514_vm1 = vcmp.ge.s32.totalorder %v7917_v15, 1  ;;  %v3030_v26 = vsel %vm13864_vm2, %v2838_v18, 0.0 }
 0x1d9   : > { %14503 = vst [vmem:[#allocation156_spill] sm:$0xff] %v9914_v20  ;;  %7202 = vmatmul.msk.bf16.vlgmr.msrb.gmra.mxu0 %vm965_vm7, %v1993_v9  ;;  %3753 = vperm.xlu2 %7660, %v3706_v17   ;;  %v2885_v23 = vsel %vm14510_vm15, 1, %v14230_v28 }
 0x1da   : > { %3335 = vperm.xlu0 %7658, %v3288_v39  }
 0x1db   : > { %v9921_v0 = vpop.permute.xlu2 %2342  ;;  %v9932_v43 = vpop.permute.xlu0 %2333 }
 0x1dc   : > { %v1746_v4 = vpop.f32.mrf.mxu2  ;;  %14504 = vst [vmem:[#allocation157_spill] sm:$0xff] %v9921_v0 }
 0x1dd   : > { %v9930_v9 = vadd.f32 %v1746_v4, %v1603_v44  ;;  %14507 = vst [vmem:[#allocation158_spill] sm:$0xff] %v9932_v43  ;;  %v1606_v17 = vpop.f32.mrf.mxu1  ;;  %v2125_v39 = vpop.f32.mrf.mxu3  ;;  %v3289_v4 = vsel %vm909_vm12, 1, %v14230_v28 }
 0x1de   : > { %v9935_v12 = vadd.f32 %v2125_v39, %v9789_v55  ;;  %2965 = vperm.xlu1 %7659, %v2886_v8   ;;  %v7682_v55 = vld [vmem:[%s13469_s1 + $0x48] sm:$0xff] }
 0x1df   : > { %vm750_vm8 = vcmp.le.s32.totalorder %v7682_v55, 14 }
 0x1e0   : > { %14508 = vst [vmem:[#allocation159_spill] sm:$0xff] %v9935_v12  ;;  %7228 = vmatmul.msk.bf16.gmra.mxu1 %vm965_vm7, %v2415_v45  ;;  %v9944_v44 = vpop.permute.xlu1 %1843  ;;  %vm910_vm0 = vmand %vm750_vm8, %vm14514_vm1 }
 0x1e1   : > { %7250 = vmatmul.msk.bf16.gmra.mxu2 %vm965_vm7, %v2641_v62  ;;  %14511 = vst [vmem:[#allocation13_spill] sm:$0xff] %v9944_v44  ;;  %4174 = vperm.xlu2 %7660, %v4125_v57   ;;  %vm13841_vm15 = vcmp.eq.s32.totalorder %v9944_v44, 1  ;;  %v3029_v62 = vsel %vm13833_vm6, %v2837_v58, 0.0  ;;  %vm14516_vm6 = vcmp.le.s32.totalorder %v7917_v15, 14 }
 0x1e2   : > { %2962 = vperm.xlu0 %7658, %v2885_v23   ;;  %v1964_v8 = vsel %vm13841_vm15, %v9726_v63, 0.0  ;;  %vm942_vm14 = vmand %vm750_vm8, %vm14516_vm6  ;;  %v3058_v58 = vpack.c.bf16 %v3030_v26, %v3029_v62  ;;  %vm13843_vm6 = vcmp.eq.s32.totalorder %v9250_v53, 1  ;;  %v14519_v62 = vld [vmem:[#allocation91_spill] sm:$0xff]  ;;  %v2616_v26 = vld [vmem:[#allocation2 + $0x70] sm:$0xff]  ;;  %v3707_v53 = vsel %vm749_vm5, 1, %v14230_v28 }
 0x1e3   : > { %v9957_v2 = vpop.permute.xlu2 %2941  ;;  %v9968_v23 = vpop.permute.xlu0 %1840  ;;  %v4126_v44 = vsel %vm942_vm14, 1, %v14230_v28  ;;  %vm13842_vm1 = vcmp.eq.s32.totalorder %v14519_v62, 1  ;;  %v7624_v62 = vld [vmem:[%s13473_s5 + $0x30] sm:$0xff] }
 0x1e4   : > { %v1749_v14 = vpop.f32.mrf.mxu2  ;;  %14513 = vst [vmem:[#allocation160_spill] sm:$0xff] %v9957_v2  ;;  %vm13840_vm12 = vcmp.eq.s32.totalorder %v9968_v23, 1  ;;  %3553 = vmatpush.bf16.msra.mxu0 %v7624_v62 }
 0x1e5   : > { %v9963_v57 = vadd.f32 %v1749_v14, %v1606_v17  ;;  %14515 = vst [vmem:[#allocation161_spill] sm:$0xff] %v9968_v23  ;;  %v1608_v39 = vpop.f32.mrf.mxu1  ;;  %v2127_v45 = vpop.f32.mrf.mxu3  ;;  %v1963_v17 = vsel %vm13840_vm12, %v9708_v34, 0.0  ;;  %v3290_v14 = vsel %vm910_vm0, 1, %v14230_v28  ;;  %v7683_v34 = vld [vmem:[#allocation2 + $0x67] sm:$0xff]  ;;  %vm14523_vm0 = vcmp.le.s32.totalorder %v8253_v38, 14 }
 0x1e6   : > { %v9980_v63 = vadd.f32 %v2127_v45, %v9847_v5  ;;  %3338 = vperm.xlu1 %7659, %v3289_v4   ;;  %v1994_v15 = vpack.c.bf16 %v1964_v8, %v1963_v17  ;;  %v2389_v5 = vsel %vm13843_vm6, %v7683_v34, 0.0  ;;  %v3708_v45 = vsel %vm750_vm8, 1, %v14230_v28  ;;  %v10005_v34 = vld [vmem:[%s13469_s1 + $0x50] sm:$0xff] }
 0x1e7   : > { %vm751_vm14 = vcmp.le.s32.totalorder %v10005_v34, 14  ;;  %vm13844_vm12 = vcmp.eq.s32.totalorder %v9831_v13, 1  ;;  %vm14527_vm6 = vcmp.le.s32.totalorder %v7983_v29, 14 }
 0x1e8   : > { %14517 = vst [vmem:[#allocation162_spill] sm:$0xff] %v9980_v63  ;;  %7271 = vmatmul.msk.bf16.gmra.mxu3 %vm965_vm7, %v3058_v58  ;;  %v9986_v18 = vpop.permute.xlu1 %2932 }
 0x1e9   : > { %14518 = vst [vmem:[#allocation163_spill] sm:$0xff] %v9986_v18  ;;  %7203 = vmatmul.msk.bf16.gmra.mxu0 %vm965_vm7, %v1994_v15  ;;  %3341 = vperm.xlu2 %7660, %v3290_v14   ;;  %v7684_v15 = vld [vmem:[#allocation2 + $0x6f] sm:$0xff] }
 0x1ea   : > { %4177 = vperm.xlu0 %7658, %v4126_v44   ;;  %v2390_v14 = vsel %vm13842_vm1, %v7684_v15, 0.0  ;;  %v2887_v15 = vsel %vm14523_vm0, 1, %v14230_v28  ;;  %vm14525_vm0 = vcmp.le.s32.totalorder %v7959_v22, 14  ;;  %vm13861_vm1 = vcmp.eq.s32.totalorder %v9710_v50, 1 }
 0x1eb   : > { %v9992_v8 = vpop.permute.xlu2 %3314  ;;  %v9998_v17 = vpop.permute.xlu0 %2339  ;;  %v2416_v55 = vpack.c.bf16 %v2390_v14, %v2389_v5  ;;  %v10023_v5 = vld [vmem:[%s13469_s1 + $0x58] sm:$0xff]  ;;  %vm943_vm5 = vmand %vm751_vm14, %vm14525_vm0  ;;  %v2840_v14 = vld [vmem:[#allocation2 + $0x61] sm:$0xff] }
 0x1ec   : > { %v1751_v4 = vpop.f32.mrf.mxu2  ;;  %14520 = vst [vmem:[#allocation164_spill] sm:$0xff] %v9992_v8  ;;  %vm752_vm8 = vcmp.le.s32.totalorder %v10023_v5, 14 }
 0x1ed   : > { %v9996_v58 = vadd.f32 %v1751_v4, %v1608_v39  ;;  %14521 = vst [vmem:[#allocation165_spill] sm:$0xff] %v9998_v17  ;;  %v1611_v44 = vpop.f32.mrf.mxu1  ;;  %v2130_v23 = vpop.f32.mrf.mxu3  ;;  %v2642_v4 = vpack.c.bf16 %v2616_v26, %v2615_v40  ;;  %vm944_vm0 = vmand %vm752_vm8, %vm14527_vm6  ;;  %vm14530_vm6 = vcmp.le.s32.totalorder %v8289_v51, 14 }
 0x1ee   : > { %v10009_v39 = vadd.f32 %v2130_v23, %v9882_v27  ;;  %3759 = vperm.xlu1 %7659, %v3708_v45   ;;  %v2839_v27 = vld [vmem:[#allocation2 + $0x59] sm:$0xff]  ;;  %v4127_v45 = vsel %vm943_vm5, 1, %v14230_v28  ;;  %vm13855_vm5 = vcmp.eq.s32.totalorder %v9324_v7, 1 }
 0x1ef   : > { %v3031_v41 = vsel %vm13844_vm12, %v2839_v27, 0.0 }
 0x1f0   : > { %14522 = vst [vmem:[#allocation166_spill] sm:$0xff] %v10009_v39  ;;  %7229 = vmatmul.msk.bf16.gmra.mxu1 %vm965_vm7, %v2416_v55  ;;  %v10029_v40 = vpop.permute.xlu1 %1849 }
 0x1f1   : > { %7251 = vmatmul.msk.bf16.gmra.mxu2 %vm965_vm7, %v2642_v4  ;;  %14524 = vst [vmem:[#allocation167_spill] sm:$0xff] %v10029_v40  ;;  %2968 = vperm.xlu2 %7660, %v2887_v15   ;;  %vm13849_vm15 = vcmp.eq.s32.totalorder %v10029_v40, 1  ;;  %v3032_v4 = vsel %vm13861_vm1, %v2840_v14, 0.0  ;;  %v2888_v14 = vsel %vm14530_vm6, 1, %v14230_v28  ;;  %vm14548_vm1 = vcmp.ge.s32.totalorder %v8020_v36, 1 }
 0x1f2   : > { %3756 = vperm.xlu0 %7658, %v3707_v53   ;;  %v1966_v53 = vsel %vm13849_vm15, %v9799_v49, 0.0  ;;  %v3059_v13 = vpack.c.bf16 %v3032_v4, %v3031_v41  ;;  %v4128_v49 = vsel %vm944_vm0, 1, %v14230_v28 }
 0x1f3   : > { %v10039_v26 = vpop.permute.xlu2 %3735 }
 0x1f4   : > { %v1754_v23 = vpop.f32.mrf.mxu2  ;;  %14526 = vst [vmem:[#allocation168_spill] sm:$0xff] %v10039_v26  ;;  %v10051_v62 = vpop.permute.xlu0 %1846 }
 0x1f5   : > { %v10046_v55 = vadd.f32 %v1754_v23, %v1611_v44  ;;  %14528 = vst [vmem:[#allocation169_spill] sm:$0xff] %v10051_v62  ;;  %vm13848_vm12 = vcmp.eq.s32.totalorder %v10051_v62, 1  ;;  %v1613_v15 = vpop.f32.mrf.mxu1  ;;  %v2132_v27 = vpop.f32.mrf.mxu3  ;;  %v2617_v62 = vld [vmem:[#allocation2 + $0x78] sm:$0xff] }
 0x1f6   : > { %v1965_v21 = vsel %vm13848_vm12, %v9780_v3, 0.0  ;;  %v10060_v44 = vadd.f32 %v2132_v27, %v9930_v9  ;;  %v10062_v23 = vpop.f32.mrf.mxu0  ;;  %4180 = vperm.xlu1 %7659, %v4127_v45   ;;  %vm14532_vm12 = vcmp.ge.s32.totalorder %v7983_v29, 1  ;;  %v14533_v3 = vld [vmem:[#allocation94_spill] sm:$0xff] }
 0x1f7   : > { %v1995_v40 = vpack.c.bf16 %v1966_v53, %v1965_v21  ;;  %vm912_vm15 = vmand %vm752_vm8, %vm14532_vm12  ;;  %vm13856_vm0 = vcmp.eq.s32.totalorder %v14533_v3, 1  ;;  %v7687_v21 = vld [vmem:[#allocation2 + $0x7f] sm:$0xff]  ;;  %vm14536_vm12 = vcmp.ge.s32.totalorder %v7959_v22, 1  ;;  %v3709_v22 = vsel %vm751_vm14, 1, %v14230_v28 }
 0x1f8   : > { %14529 = vst [vmem:[#allocation170_spill] sm:$0xff] %v10060_v44  ;;  %7272 = vmatmul.msk.bf16.gmra.mxu3 %vm965_vm7, %v3059_v13  ;;  %v10070_v41 = vpop.permute.xlu1 %2938  ;;  %v2392_v9 = vsel %vm13855_vm5, %v7687_v21, 0.0  ;;  %v2618_v13 = vld [vmem:[#allocation2 + $0x80] sm:$0xff]  ;;  %v3292_v4 = vsel %vm912_vm15, 1, %v14230_v28  ;;  %vm911_vm6 = vmand %vm751_vm14, %vm14536_vm12  ;;  %vm13858_vm15 = vcmp.eq.s32.totalorder %v9914_v20, 1  ;;  %vm13857_vm12 = vcmp.eq.s32.totalorder %v9784_v48, 1 }
 0x1f9   : > { %14531 = vst [vmem:[#allocation171_spill] sm:$0xff] %v10070_v41  ;;  %7204 = vmatmul.msk.bf16.gmra.mxu0 %vm965_vm7, %v1995_v40  ;;  %4183 = vperm.xlu2 %7660, %v4128_v49   ;;  %v7688_v40 = vld [vmem:[#allocation2 + $0x77] sm:$0xff]  ;;  %v3291_v1 = vsel %vm911_vm6, 1, %v14230_v28  ;;  %vm14540_vm14 = vcmp.le.s32.totalorder %v8311_v59, 14  ;;  %vm13863_vm5 = vcmp.eq.s32.totalorder %v9405_v52, 1 }
 0x1fa   : > { %2971 = vperm.xlu0 %7658, %v2888_v14   ;;  %v2391_v49 = vsel %vm13856_vm0, %v7688_v40, 0.0 }
 0x1fb   : > { %v10080_v53 = vpop.permute.xlu2 %4156  ;;  %v2417_v7 = vpack.c.bf16 %v2392_v9, %v2391_v49 }
 0x1fc   : > { %v1756_v45 = vpop.f32.mrf.mxu2  ;;  %14534 = vst [vmem:[#allocation172_spill] sm:$0xff] %v10080_v53  ;;  %v10085_v27 = vpop.permute.xlu0 %2345 }
 0x1fd   : > { %v10083_v29 = vadd.f32 %v1756_v45, %v1613_v15  ;;  %14535 = vst [vmem:[#allocation173_spill] sm:$0xff] %v10085_v27  ;;  %v1616_v14 = vpop.f32.mrf.mxu1  ;;  %v2135_v21 = vpop.f32.mrf.mxu3  ;;  %v2643_v45 = vpack.c.bf16 %v2618_v13, %v2617_v62 }
 0x1fe   : > { %v10094_v50 = vadd.f32 %v2135_v21, %v9963_v57  ;;  %v10096_v15 = vpop.f32.mrf.mxu0  ;;  %3347 = vperm.xlu1 %7659, %v3292_v4   ;;  %v2841_v57 = vld [vmem:[#allocation2 + $0x69] sm:$0xff]  ;;  %v2889_v4 = vsel %vm14540_vm14, 1, %v14230_v28  ;;  %vm14543_vm14 = vcmp.le.s32.totalorder %v8347_v16, 14 }
 0x1ff   : > { %v3033_v62 = vsel %vm13858_vm15, %v2841_v57, 0.0 }
 0x200   : > { %14537 = vst [vmem:[#allocation174_spill] sm:$0xff] %v10094_v50  ;;  %7230 = vmatmul.msk.bf16.gmra.mxu1 %vm965_vm7, %v2417_v7  ;;  %v10105_v9 = vpop.permute.xlu1 %4153  ;;  %v2842_v7 = vld [vmem:[#allocation2 + $0x71] sm:$0xff]  ;;  %v2619_v50 = vld [vmem:[#allocation2 + $0x88] sm:$0xff] }
 0x201   : > { %7252 = vmatmul.msk.bf16.gmra.mxu2 %vm965_vm7, %v2643_v45  ;;  %14538 = vst [vmem:[#allocation175_spill] sm:$0xff] %v10105_v9  ;;  %3762 = vperm.xlu2 %7660, %v3709_v22   ;;  %v3034_v21 = vsel %vm13857_vm12, %v2842_v7, 0.0  ;;  %v10124_v22 = vld [vmem:[%s13469_s1 + $0x68] sm:$0xff]  ;;  %v3710_v7 = vsel %vm752_vm8, 1, %v14230_v28  ;;  %vm14545_vm12 = vcmp.le.s32.totalorder %v14290_v24, 14  ;;  %vm13866_vm8 = vcmp.eq.s32.totalorder %v9992_v8, 1 }
 0x202   : > { %3344 = vperm.xlu0 %7658, %v3291_v1   ;;  %vm754_vm6 = vcmp.le.s32.totalorder %v10124_v22, 14  ;;  %v3060_v57 = vpack.c.bf16 %v3034_v21, %v3033_v62  ;;  %v7690_v62 = vld [vmem:[%s13469_s1 + $0x60] sm:$0xff]  ;;  %v7691_v21 = vld [vmem:[#allocation2 + $0x8f] sm:$0xff]  ;;  %v3251_v22 = vld [vmem:[#allocation2 + $0x37] sm:$0xff] }
 0x203   : > { %v10110_v13 = vpop.permute.xlu2 %3323  ;;  %vm753_vm0 = vcmp.le.s32.totalorder %v7690_v62, 14  ;;  %v2394_v5 = vsel %vm13863_vm5, %v7691_v21, 0.0  ;;  %vm14552_vm5 = vcmp.le.s32.totalorder %v8020_v36, 14 }
 0x204   : > { %v1759_v34 = vpop.f32.mrf.mxu2  ;;  %14539 = vst [vmem:[#allocation176_spill] sm:$0xff] %v10110_v13  ;;  %v10117_v49 = vpop.permute.xlu0 %4150 }
 0x205   : > { %v10115_v40 = vadd.f32 %v1759_v34, %v1616_v14  ;;  %14541 = vst [vmem:[#allocation177_spill] sm:$0xff] %v10117_v49  ;;  %v1618_v45 = vpop.f32.mrf.mxu1  ;;  %v2137_v1 = vpop.f32.mrf.mxu3  ;;  %v2890_v34 = vsel %vm14543_vm14, 1, %v14230_v28  ;;  %vm946_vm14 = vmand %vm754_vm6, %vm14545_vm12 }
 0x206   : > { %v10128_v3 = vadd.f32 %v2137_v1, %v9996_v58  ;;  %v10130_v14 = vpop.f32.mrf.mxu0  ;;  %2974 = vperm.xlu1 %7659, %v2889_v4   ;;  %v14546_v4 = vld [vmem:[#allocation100_spill] sm:$0xff]  ;;  %v2620_v1 = vld [vmem:[#allocation2 + $0x90] sm:$0xff]  ;;  %v4130_v20 = vsel %vm946_vm14, 1, %v14230_v28  ;;  %vm10159_vm12 = vmand %vm753_vm0, %vm14548_vm1  ;;  %vm13881_vm1 = vcmp.eq.s32.totalorder %v9986_v18, 1 }
 0x207   : > { %vm13868_vm15 = vcmp.eq.s32.totalorder %v14546_v4, 1  ;;  %vm945_vm14 = vmand %vm753_vm0, %vm14552_vm5  ;;  %v2644_v12 = vpack.c.bf16 %v2620_v1, %v2619_v50  ;;  %v3441_v4 = vsel %vm13866_vm8, %v9801_v47, 0.0  ;;  %v7630_v47 = vld [vmem:[%s13475_s7 + $0x18] sm:$0xff]  ;;  %vm13869_vm5 = vcmp.eq.s32.totalorder %v9878_v25, 1 }
 0x208   : > { %14542 = vst [vmem:[#allocation178_spill] sm:$0xff] %v10128_v3  ;;  %7273 = vmatmul.msk.bf16.gmra.mxu3 %vm965_vm7, %v3060_v57  ;;  %v10143_v58 = vpop.permute.xlu1 %3732  ;;  %v4129_v50 = vsel %vm945_vm14, 1, %v14230_v28  ;;  %vm13878_vm8 = vcmp.eq.s32.totalorder %v10110_v13, 1  ;;  %v2621_v18 = vld [vmem:[#allocation2 + $0x98] sm:$0xff] }
 0x209   : > { %14544 = vst [vmem:[#allocation179_spill] sm:$0xff] %v10143_v58  ;;  %2977 = vperm.xlu2 %7660, %v2890_v34   ;;  %v7692_v34 = vld [vmem:[#allocation2 + $0x87] sm:$0xff]  ;;  %4839 = vmatpush.bf16.msra.mxu3 %v7630_v47 }
 0x20a   : > { %3765 = vperm.xlu0 %7658, %v3710_v7   ;;  %v2393_v21 = vsel %vm13868_vm15, %v7692_v34, 0.0  ;;  %vm14563_vm15 = vcmp.le.s32.totalorder %v14413_v31, 14 }
 0x20b   : > { %v10153_v57 = vpop.permute.xlu2 %2950  ;;  %v2418_v44 = vpack.c.bf16 %v2394_v5, %v2393_v21  ;;  %v3293_v5 = vsel %vm10159_vm12, 1, %v14230_v28  ;;  %vm14557_vm12 = vcmp.ge.s32.totalorder %v14290_v24, 1 }
 0x20c   : > { %v1761_v48 = vpop.f32.mrf.mxu2  ;;  %14547 = vst [vmem:[#allocation180_spill] sm:$0xff] %v10153_v57  ;;  %v10167_v52 = vpop.permute.xlu0 %3317  ;;  %vm914_vm14 = vmand %vm754_vm6, %vm14557_vm12 }
 0x20d   : > { %v10165_v7 = vadd.f32 %v1761_v48, %v1618_v45  ;;  %14551 = vst [vmem:[#allocation181_spill] sm:$0xff] %v10167_v52  ;;  %vm13867_vm2 = vcmp.eq.s32.totalorder %v10167_v52, 1  ;;  %v1621_v39 = vpop.f32.mrf.mxu1  ;;  %v2140_v63 = vpop.f32.mrf.mxu3  ;;  %v3294_v24 = vsel %vm914_vm14, 1, %v14230_v28 }
 0x20e   : > { %v3442_v48 = vsel %vm13867_vm2, %v9782_v10, 0.0  ;;  %v10180_v45 = vadd.f32 %v2140_v63, %v10046_v55  ;;  %v10182_v36 = vpop.f32.mrf.mxu0  ;;  %4189 = vperm.xlu1 %7659, %v4130_v20   ;;  %v2843_v20 = vld [vmem:[#allocation2 + $0x79] sm:$0xff]  ;;  %vm14562_vm2 = vcmp.le.s32.totalorder %v8413_v60, 14 }
 0x20f   : > { %v3473_v34 = vpack.c.bf16 %v3442_v48, %v3441_v4  ;;  %v3035_v63 = vsel %vm13881_vm1, %v2843_v20, 0.0  ;;  %v14560_v20 = vld [vmem:[#allocation106_spill] sm:$0xff] }
 0x210   : > { %14553 = vst [vmem:[#allocation182_spill] sm:$0xff] %v10180_v45  ;;  %7231 = vmatmul.msk.bf16.gmra.mxu1 %vm965_vm7, %v2418_v44  ;;  %v10194_v10 = vpop.permute.xlu1 %2947  ;;  %v3711_v44 = vsel %vm753_vm0, 1, %v14230_v28  ;;  %vm13879_vm0 = vcmp.eq.s32.totalorder %v9515_v61, 1  ;;  %vm13880_vm14 = vcmp.eq.s32.totalorder %v14560_v20, 1 }
 0x211   : > { %7253 = vmatmul.msk.bf16.gmra.mxu2 %vm965_vm7, %v2644_v12  ;;  %14554 = vst [vmem:[#allocation183_spill] sm:$0xff] %v10194_v10  ;;  %7290 = vmatmul.msk.bf16.vlgmr.msra.gmra.mxu0 %vm965_vm7, %v3473_v34  ;;  %v2844_v12 = vld [vmem:[#allocation2 + $0x81] sm:$0xff] }
 0x212   : > { %3350 = vperm.xlu2 %7660, %v3293_v5   ;;  %4186 = vperm.xlu0 %7658, %v4129_v50   ;;  %v3036_v21 = vsel %vm13869_vm5, %v2844_v12, 0.0  ;;  %v3252_v12 = vld [vmem:[#allocation2 + $0x3f] sm:$0xff] }
 0x213   : > { %v10200_v3 = vpop.permute.xlu2 %4165  ;;  %v3061_v34 = vpack.c.bf16 %v3036_v21, %v3035_v63 }
 0x214   : > { %v1764_v55 = vpop.f32.mrf.mxu2  ;;  %14555 = vst [vmem:[#allocation184_spill] sm:$0xff] %v10200_v3  ;;  %v10206_v1 = vpop.permute.xlu0 %2944 }
 0x215   : > { %v10204_v4 = vadd.f32 %v1764_v55, %v1621_v39  ;;  %14556 = vst [vmem:[#allocation185_spill] sm:$0xff] %v10206_v1  ;;  %v1623_v48 = vpop.f32.mrf.mxu1  ;;  %v2142_v5 = vpop.f32.mrf.mxu3  ;;  %v3712_v39 = vsel %vm754_vm6, 1, %v14230_v28  ;;  %v7694_v55 = vld [vmem:[#allocation2 + $0x9f] sm:$0xff] }
 0x216   : > { %v10215_v50 = vadd.f32 %v2142_v5, %v10083_v29  ;;  %v10217_v62 = vpop.f32.mrf.mxu0  ;;  %3768 = vperm.xlu1 %7659, %v3711_v44   ;;  %v10230_v29 = vld [vmem:[%s13469_s1 + $0x70] sm:$0xff]  ;;  %v2396_v44 = vsel %vm13879_vm0, %v7694_v55, 0.0 }
 0x217   : > { %vm755_vm12 = vcmp.le.s32.totalorder %v10230_v29, 14 }
 0x218   : > { %14558 = vst [vmem:[#allocation186_spill] sm:$0xff] %v10215_v50  ;;  %7274 = vmatmul.msk.bf16.gmra.mxu3 %vm965_vm7, %v3061_v34  ;;  %v10225_v47 = vpop.permute.xlu1 %3320  ;;  %v2622_v34 = vld [vmem:[#allocation2 + $0xa0] sm:$0xff]  ;;  %vm947_vm5 = vmand %vm755_vm12, %vm14563_vm15  ;;  %vm13947_vm15 = vcmp.eq.s32.totalorder %v10070_v41, 1  ;;  %v2623_v41 = vld [vmem:[#allocation2 + $0xa8] sm:$0xff]  ;;  %v3713_v3 = vsel %vm755_vm12, 1, %v14230_v28 }
 0x219   : > { %14559 = vst [vmem:[#allocation187_spill] sm:$0xff] %v10225_v47  ;;  %vm13877_vm6 = vcmp.eq.s32.totalorder %v10225_v47, 1  ;;  %v7695_v47 = vld [vmem:[#allocation2 + $0x97] sm:$0xff] }
 0x21a   : > { %3771 = vperm.xlu2 %7660, %v3712_v39   ;;  %3353 = vperm.xlu0 %7658, %v3294_v24   ;;  %v3443_v63 = vsel %vm13877_vm6, %v3251_v22, 0.0  ;;  %v2892_v39 = vsel %vm14562_vm2, 1, %v14230_v28  ;;  %v3444_v24 = vsel %vm13878_vm8, %v3252_v12, 0.0  ;;  %v2395_v8 = vsel %vm13880_vm14, %v7695_v47, 0.0 }
 0x21b   : > { %v10240_v5 = vpop.permute.xlu2 %3744  ;;  %v3474_v52 = vpack.c.bf16 %v3444_v24, %v3443_v63  ;;  %v2419_v50 = vpack.c.bf16 %v2396_v44, %v2395_v8  ;;  %v2645_v12 = vpack.c.bf16 %v2622_v34, %v2621_v18  ;;  %vm14566_vm2 = vcmp.le.s32.totalorder %v8373_v33, 14  ;;  %v2845_v18 = vld [vmem:[#allocation2 + $0x89] sm:$0xff]  ;;  %v2846_v44 = vld [vmem:[#allocation2 + $0x91] sm:$0xff] }
 0x21c   : > { %v1766_v21 = vpop.f32.mrf.mxu2  ;;  %14561 = vst [vmem:[#allocation188_spill] sm:$0xff] %v10240_v5  ;;  %v10253_v55 = vpop.permute.xlu0 %4159  ;;  %vm14568_vm6 = vcmp.ge.s32.totalorder %v14413_v31, 1  ;;  %v14570_v63 = vld [vmem:[#allocation6_spill] sm:$0xff] }
 0x21d   : > { %v10251_v22 = vadd.f32 %v1766_v21, %v1623_v48  ;;  %14564 = vst [vmem:[#allocation189_spill] sm:$0xff] %v10253_v55  ;;  %v2145_v61 = vpop.f32.mrf.mxu3  ;;  %v10257_v25 = vpop.f32.mrf.mxu1  ;;  %v4131_v48 = vsel %vm947_vm5, 1, %v14230_v28  ;;  %v2891_v21 = vsel %vm14566_vm2, 1, %v14230_v28  ;;  %vm915_vm8 = vmand %vm755_vm12, %vm14568_vm6  ;;  %vm13892_vm2 = vcmp.eq.s32.totalorder %v9957_v2, 1 }
 0x21e   : > { %v10260_v45 = vadd.f32 %v2145_v61, %v10115_v40  ;;  %v10262_v5 = vpop.f32.mrf.mxu0  ;;  %2983 = vperm.xlu1 %7659, %v2892_v39   ;;  %v7696_v61 = vld [vmem:[%s13469_s1 + $0x78] sm:$0xff]  ;;  %v3037_v40 = vsel %vm13947_vm15, %v2845_v18, 0.0  ;;  %v3295_v47 = vsel %vm915_vm8, 1, %v14230_v28  ;;  %vm14571_vm6 = vcmp.ge.s32.totalorder %v14570_v63, 1 }
 0x21f   : > { %vm756_vm5 = vcmp.le.s32.totalorder %v7696_v61, 14  ;;  %vm14573_vm14 = vcmp.le.s32.totalorder %v14570_v63, 14  ;;  %v3038_v34 = vsel %vm13892_vm2, %v2846_v44, 0.0  ;;  %vm13890_vm8 = vcmp.eq.s32.totalorder %v9599_v11, 1 }
 0x220   : > { %14565 = vst [vmem:[#allocation190_spill] sm:$0xff] %v10260_v45  ;;  %7232 = vmatmul.msk.bf16.gmra.mxu1 %vm965_vm7, %v2419_v50  ;;  %v10271_v8 = vpop.permute.xlu1 %3741  ;;  %vm916_vm0 = vmand %vm756_vm5, %vm14571_vm6  ;;  %vm13893_vm6 = vcmp.eq.s32.totalorder %v10194_v10, 1  ;;  %vm14645_vm15 = vcmp.le.s32.totalorder %v8289_v51, 14 }
 0x221   : > { %7254 = vmatmul.msk.bf16.gmra.mxu2 %vm965_vm7, %v2645_v12  ;;  %14567 = vst [vmem:[#allocation191_spill] sm:$0xff] %v10271_v8  ;;  %7291 = vmatmul.msk.bf16.gmra.mxu0 %vm965_vm7, %v3474_v52  ;;  %vm948_vm1 = vmand %vm756_vm5, %vm14573_vm14  ;;  %v3062_v12 = vpack.c.bf16 %v3038_v34, %v3037_v40  ;;  %v3296_v18 = vsel %vm916_vm0, 1, %v14230_v28  ;;  %v14576_v40 = vld [vmem:[#allocation114_spill] sm:$0xff] }
 0x222   : > { %4192 = vperm.xlu2 %7660, %v4131_v48   ;;  %2980 = vperm.xlu0 %7658, %v2891_v21   ;;  %v4132_v63 = vsel %vm948_vm1, 1, %v14230_v28  ;;  %vm13891_vm14 = vcmp.eq.s32.totalorder %v14576_v40, 1 }
 0x223   : > { %v10286_v31 = vpop.permute.xlu2 %2959 }
 0x224   : > { %v10284_v50 = vpop.f32.mrf.mxu2  ;;  %14569 = vst [vmem:[#allocation192_spill] sm:$0xff] %v10286_v31  ;;  %v10292_v52 = vpop.permute.xlu0 %3738 }
 0x225   : > { %14572 = vst [vmem:[#allocation6_spill] sm:$0xff] %v10292_v52  ;;  %v2147_v39 = vpop.f32.mrf.mxu3  ;;  %v10299_v24 = vpop.f32.mrf.mxu1 }
 0x226   : > { %v10302_v48 = vadd.f32 %v2147_v39, %v10165_v7  ;;  %v1689_v21 = vpop.f32.mrf.mxu0  ;;  %3356 = vperm.xlu1 %7659, %v3295_v47   ;;  %v7697_v7 = vld [vmem:[#allocation2 + $0xaf] sm:$0xff] }
 0x227   : > { %v10306_v13 = vadd.f32 %v1689_v21, %v10062_v23  ;;  %v2398_v47 = vsel %vm13890_vm8, %v7697_v7, 0.0  ;;  %v2624_v39 = vld [vmem:[#allocation2 + $0xb0] sm:$0xff]  ;;  %v3714_v21 = vsel %vm756_vm5, 1, %v14230_v28  ;;  %v10331_v7 = vld [vmem:[%s13469_s1 + $0x80] sm:$0xff]  ;;  %vm13905_vm8 = vcmp.eq.s32.totalorder %v10206_v1, 1 }
 0x228   : > { %14574 = vst [vmem:[#allocation193_spill] sm:$0xff] %v10302_v48  ;;  %7275 = vmatmul.msk.bf16.gmra.mxu3 %vm965_vm7, %v3062_v12  ;;  %v10311_v44 = vpop.permute.xlu1 %4162  ;;  %v7698_v12 = vld [vmem:[#allocation2 + $0xa7] sm:$0xff]  ;;  %vm757_vm1 = vcmp.le.s32.totalorder %v10331_v7, 14  ;;  %v2646_v45 = vpack.c.bf16 %v2624_v39, %v2623_v41  ;;  %v10447_v7 = vld [vmem:[%s13469_s1 + $0x98] sm:$0xff] }
 0x229   : > { %14575 = vst [vmem:[#allocation194_spill] sm:$0xff] %v10311_v44  ;;  %v10348_v44 = vld [vmem:[%s13469_s1 + $0x88] sm:$0xff] }
 0x22a   : > { %3359 = vperm.xlu2 %7660, %v3296_v18   ;;  %4195 = vperm.xlu0 %7658, %v4132_v63   ;;  %v2397_v18 = vsel %vm13891_vm14, %v7698_v12, 0.0  ;;  %v14580_v12 = vld [vmem:[#allocation28_spill] sm:$0xff]  ;;  %vm758_vm5 = vcmp.le.s32.totalorder %v10348_v44, 14 }
 0x22b   : > { %v10318_v23 = vpop.permute.xlu2 %3332  ;;  %v2420_v11 = vpack.c.bf16 %v2398_v47, %v2397_v18  ;;  %vm14581_vm0 = vcmp.le.s32.totalorder %v14580_v12, 14  ;;  %v2848_v41 = vld [vmem:[#allocation2 + $0xa1] sm:$0xff]  ;;  %v3254_v47 = vld [vmem:[#allocation2 + $0x4f] sm:$0xff] }
 0x22c   : > { %v10316_v34 = vpop.f32.mrf.mxu2  ;;  %14577 = vst [vmem:[#allocation195_spill] sm:$0xff] %v10318_v23  ;;  %v10322_v20 = vpop.permute.xlu0 %2953  ;;  %v2893_v40 = vsel %vm14581_vm0, 1, %v14230_v28  ;;  %vm14583_vm0 = vcmp.le.s32.totalorder %v14447_v54, 14  ;;  %v3040_v29 = vsel %vm13893_vm6, %v2848_v41, 0.0  ;;  %v3253_v18 = vld [vmem:[#allocation2 + $0x47] sm:$0xff] }
 0x22d   : > { %14578 = vst [vmem:[#allocation196_spill] sm:$0xff] %v10322_v20  ;;  %v2150_v2 = vpop.f32.mrf.mxu3  ;;  %v10326_v63 = vpop.f32.mrf.mxu1  ;;  %vm949_vm12 = vmand %vm757_vm1, %vm14583_vm0  ;;  %vm14585_vm0 = vcmp.le.s32.totalorder %v14443_v35, 14 }
 0x22e   : > { %v10335_v61 = vadd.f32 %v2150_v2, %v10204_v4  ;;  %v10337_v48 = vpop.f32.mrf.mxu0  ;;  %3777 = vperm.xlu1 %7659, %v3714_v21   ;;  %v2847_v4 = vld [vmem:[#allocation2 + $0x99] sm:$0xff]  ;;  %v4133_v21 = vsel %vm949_vm12, 1, %v14230_v28  ;;  %vm950_vm2 = vmand %vm758_vm5, %vm14585_vm0  ;;  %vm14589_vm12 = vcmp.le.s32.totalorder %v14588_v6, 14  ;;  %vm13901_vm0 = vcmp.eq.s32.totalorder %v9670_v46, 1 }
 0x22f   : > { %v2894_v53 = vsel %vm14589_vm12, 1, %v14230_v28  ;;  %v3715_v46 = vsel %vm757_vm1, 1, %v14230_v28 }
 0x230   : > { %14579 = vst [vmem:[#allocation197_spill] sm:$0xff] %v10335_v61  ;;  %7233 = vmatmul.msk.bf16.gmra.mxu1 %vm965_vm7, %v2420_v11  ;;  %v10355_v2 = vpop.permute.xlu1 %3329  ;;  %v3039_v11 = vsel %vm13905_vm8, %v2847_v4, 0.0 }
 0x231   : > { %7255 = vmatmul.msk.bf16.gmra.mxu2 %vm965_vm7, %v2646_v45  ;;  %14582 = vst [vmem:[#allocation198_spill] sm:$0xff] %v10355_v2  ;;  %vm13900_vm14 = vcmp.eq.s32.totalorder %v10355_v2, 1  ;;  %v3063_v10 = vpack.c.bf16 %v3040_v29, %v3039_v11  ;;  %v4134_v2 = vsel %vm950_vm2, 1, %v14230_v28 }
 0x232   : > { %2986 = vperm.xlu2 %7660, %v2893_v40   ;;  %3774 = vperm.xlu0 %7658, %v3713_v3   ;;  %v3446_v3 = vsel %vm13900_vm14, %v3254_v47, 0.0 }
 0x233   : > { %v10368_v39 = vpop.permute.xlu2 %3753 }
 0x234   : > { %v10366_v45 = vpop.f32.mrf.mxu2  ;;  %14584 = vst [vmem:[#allocation199_spill] sm:$0xff] %v10368_v39  ;;  %v10377_v40 = vpop.permute.xlu0 %3326 }
 0x235   : > { %14586 = vst [vmem:[#allocation200_spill] sm:$0xff] %v10377_v40  ;;  %vm13899_vm6 = vcmp.eq.s32.totalorder %v10377_v40, 1  ;;  %v2152_v41 = vpop.f32.mrf.mxu3  ;;  %v10380_v4 = vpop.f32.mrf.mxu1 }
 0x236   : > { %v3445_v1 = vsel %vm13899_vm6, %v3253_v18, 0.0  ;;  %v10385_v61 = vadd.f32 %v2152_v41, %v10251_v22  ;;  %v1694_v39 = vpop.f32.mrf.mxu0  ;;  %4198 = vperm.xlu1 %7659, %v4133_v21   ;;  %vm14591_vm6 = vcmp.ge.s32.totalorder %v14443_v35, 1 }
 0x237   : > { %v3475_v47 = vpack.c.bf16 %v3446_v3, %v3445_v1  ;;  %v10389_v32 = vadd.f32 %v1694_v39, %v10130_v14  ;;  %vm918_vm14 = vmand %vm758_vm5, %vm14591_vm6  ;;  %v14592_v14 = vld [vmem:[#allocation121_spill] sm:$0xff]  ;;  %v7701_v1 = vld [vmem:[#allocation2 + $0xbf] sm:$0xff]  ;;  %vm14595_vm6 = vcmp.ge.s32.totalorder %v14447_v54, 1 }
 0x238   : > { %14587 = vst [vmem:[#allocation201_spill] sm:$0xff] %v10385_v61  ;;  %7276 = vmatmul.msk.bf16.gmra.mxu3 %vm965_vm7, %v3063_v10  ;;  %v10396_v29 = vpop.permute.xlu1 %2956  ;;  %vm13904_vm2 = vcmp.eq.s32.totalorder %v14592_v14, 1  ;;  %v2400_v22 = vsel %vm13901_vm0, %v7701_v1, 0.0  ;;  %v2626_v39 = vld [vmem:[#allocation2 + $0xc0] sm:$0xff]  ;;  %v3298_v35 = vsel %vm918_vm14, 1, %v14230_v28  ;;  %vm917_vm12 = vmand %vm757_vm1, %vm14595_vm6  ;;  %vm13911_vm14 = vcmp.eq.s32.totalorder %v10322_v20, 1 }
 0x239   : > { %14590 = vst [vmem:[#allocation202_spill] sm:$0xff] %v10396_v29  ;;  %7292 = vmatmul.msk.bf16.gmra.mxu0 %vm965_vm7, %v3475_v47  ;;  %v2625_v47 = vld [vmem:[#allocation2 + $0xb8] sm:$0xff]  ;;  %v3297_v61 = vsel %vm917_vm12, 1, %v14230_v28  ;;  %vm14597_vm6 = vcmp.le.s32.totalorder %v14462_v42, 14  ;;  %vm760_vm1 = vcmp.le.s32.totalorder %v10447_v7, 14  ;;  %vm13924_vm12 = vcmp.eq.s32.totalorder %v10153_v57, 1 }
 0x23a   : > { %4201 = vperm.xlu2 %7660, %v4134_v2   ;;  %2989 = vperm.xlu0 %7658, %v2894_v53   ;;  %v10420_v53 = vld [vmem:[%s13469_s1 + $0x90] sm:$0xff]  ;;  %v2647_v40 = vpack.c.bf16 %v2626_v39, %v2625_v47  ;;  %v3257_v7 = vld [vmem:[#allocation2 + $0x67] sm:$0xff] }
 0x23b   : > { %v10408_v10 = vpop.permute.xlu2 %4174  ;;  %vm759_vm0 = vcmp.le.s32.totalorder %v10420_v53, 14  ;;  %v7703_v2 = vld [vmem:[#allocation2 + $0xb7] sm:$0xff]  ;;  %v2849_v47 = vld [vmem:[#allocation2 + $0xa9] sm:$0xff] }
 0x23c   : > { %v10406_v11 = vpop.f32.mrf.mxu2  ;;  %14593 = vst [vmem:[#allocation203_spill] sm:$0xff] %v10408_v10  ;;  %v10411_v21 = vpop.permute.xlu0 %3747  ;;  %v2399_v3 = vsel %vm13904_vm2, %v7703_v2, 0.0  ;;  %vm951_vm2 = vmand %vm759_vm0, %vm14597_vm6  ;;  %vm14599_vm6 = vcmp.le.s32.totalorder %v14470_v37, 14  ;;  %v2851_v53 = vld [vmem:[#allocation2 + $0xb9] sm:$0xff] }
 0x23d   : > { %14594 = vst [vmem:[#allocation204_spill] sm:$0xff] %v10411_v21  ;;  %v10425_v18 = vpop.f32.mrf.mxu1  ;;  %v10427_v41 = vpop.f32.mrf.mxu3  ;;  %v2421_v54 = vpack.c.bf16 %v2400_v22, %v2399_v3  ;;  %v2850_v22 = vld [vmem:[#allocation2 + $0xb1] sm:$0xff]  ;;  %v4135_v3 = vsel %vm951_vm2, 1, %v14230_v28  ;;  %vm952_vm8 = vmand %vm760_vm1, %vm14599_vm6  ;;  %vm13914_vm2 = vcmp.eq.s32.totalorder %v9757_v19, 1  ;;  %vm14602_vm6 = vcmp.ge.s32.totalorder %v14470_v37, 1  ;;  %v3256_v21 = vld [vmem:[#allocation2 + $0x5f] sm:$0xff] }
 0x23e   : > { %v10429_v1 = vpop.f32.mrf.mxu0  ;;  %3365 = vperm.xlu1 %7659, %v3298_v35   ;;  %v4136_v10 = vsel %vm952_vm8, 1, %v14230_v28  ;;  %v3255_v19 = vld [vmem:[#allocation2 + $0x57] sm:$0xff] }
 0x240   : > { %7234 = vmatmul.msk.bf16.gmra.mxu1 %vm965_vm7, %v2421_v54  ;;  %v10438_v2 = vpop.permute.xlu1 %4171 }
 0x241   : > { %7256 = vmatmul.msk.bf16.gmra.mxu2 %vm965_vm7, %v2647_v40  ;;  %14596 = vst [vmem:[#allocation205_spill] sm:$0xff] %v10438_v2  ;;  %v3042_v40 = vsel %vm13911_vm14, %v2850_v22, 0.0  ;;  %vm920_vm14 = vmand %vm760_vm1, %vm14602_vm6  ;;  %vm14606_vm6 = vcmp.ge.s32.totalorder %v14462_v42, 1 }
 0x242   : > { %3780 = vperm.xlu2 %7660, %v3715_v46   ;;  %3362 = vperm.xlu0 %7658, %v3297_v61   ;;  %v3041_v61 = vsel %vm13924_vm12, %v2849_v47, 0.0  ;;  %v3300_v37 = vsel %vm920_vm14, 1, %v14230_v28 }
 0x243   : > { %v10455_v35 = vpop.permute.xlu2 %3341  ;;  %v3064_v14 = vpack.c.bf16 %v3042_v40, %v3041_v61  ;;  %v14603_v40 = vld [vmem:[#allocation129_spill] sm:$0xff] }
 0x244   : > { %v10453_v39 = vpop.f32.mrf.mxu2  ;;  %14598 = vst [vmem:[#allocation206_spill] sm:$0xff] %v10455_v35  ;;  %v10462_v46 = vpop.permute.xlu0 %4168  ;;  %vm13920_vm8 = vcmp.eq.s32.totalorder %v14603_v40, 1  ;;  %v7706_v61 = vld [vmem:[#allocation2 + $0xc7] sm:$0xff] }
 0x245   : > { %14600 = vst [vmem:[#allocation207_spill] sm:$0xff] %v10462_v46  ;;  %v10466_v54 = vpop.f32.mrf.mxu1  ;;  %v10468_v22 = vpop.f32.mrf.mxu3  ;;  %v3716_v46 = vsel %vm758_vm5, 1, %v14230_v28  ;;  %vm13922_vm5 = vcmp.eq.s32.totalorder %v10318_v23, 1  ;;  %v2401_v57 = vsel %vm13920_vm8, %v7706_v61, 0.0  ;;  %v10512_v40 = vld [vmem:[%s13469_s1 + $0xa0] sm:$0xff] }
 0x246   : > { %v1699_v20 = vpop.f32.mrf.mxu0  ;;  %4204 = vperm.xlu1 %7659, %v4135_v3   ;;  %v7705_v3 = vld [vmem:[#allocation2 + $0xcf] sm:$0xff]  ;;  %vm761_vm8 = vcmp.le.s32.totalorder %v10512_v40, 14  ;;  %v3447_v42 = vsel %vm13922_vm5, %v3255_v19, 0.0 }
 0x247   : > { %v10473_v2 = vadd.f32 %v1699_v20, %v10217_v62  ;;  %v2402_v62 = vsel %vm13914_vm2, %v7705_v3, 0.0  ;;  %v2628_v20 = vld [vmem:[#allocation2 + $0xd0] sm:$0xff]  ;;  %vm10502_vm2 = vmand %vm759_vm0, %vm14606_vm6  ;;  %vm13932_vm6 = vcmp.eq.s32.totalorder %v10396_v29, 1 }
 0x248   : > { %7277 = vmatmul.msk.bf16.gmra.mxu3 %vm965_vm7, %v3064_v14  ;;  %v10479_v47 = vpop.permute.xlu1 %3750  ;;  %v2422_v3 = vpack.c.bf16 %v2402_v62, %v2401_v57  ;;  %v14609_v62 = vld [vmem:[#allocation108_spill] sm:$0xff]  ;;  %v3299_v12 = vsel %vm10502_vm2, 1, %v14230_v28  ;;  %vm13931_vm2 = vcmp.eq.s32.totalorder %v10286_v31, 1  ;;  %v2854_v40 = vld [vmem:[#allocation2 + $0xd1] sm:$0xff] }
 0x249   : > { %14601 = vst [vmem:[#allocation208_spill] sm:$0xff] %v10479_v47 }
 0x24a   : > { %4207 = vperm.xlu2 %7660, %v4136_v10   ;;  %3783 = vperm.xlu0 %7658, %v3716_v46   ;;  %v2627_v10 = vld [vmem:[#allocation2 + $0xc8] sm:$0xff] }
 0x24b   : > { %v10491_v14 = vpop.permute.xlu2 %2968  ;;  %v2648_v61 = vpack.c.bf16 %v2628_v20, %v2627_v10  ;;  %v3717_v20 = vsel %vm759_vm0, 1, %v14230_v28 }
 0x24c   : > { %v10489_v44 = vpop.f32.mrf.mxu2  ;;  %14604 = vst [vmem:[#allocation209_spill] sm:$0xff] %v10491_v14  ;;  %v10496_v47 = vpop.permute.xlu0 %3335 }
 0x24d   : > { %14605 = vst [vmem:[#allocation210_spill] sm:$0xff] %v10496_v47  ;;  %vm13923_vm14 = vcmp.eq.s32.totalorder %v10496_v47, 1  ;;  %v2508_v52 = vpop.f32.mrf.mxu1  ;;  %v10507_v8 = vpop.f32.mrf.mxu3  ;;  %v14617_v47 = vld [vmem:[#allocation111_spill] sm:$0xff] }
 0x24e   : > { %v3448_v57 = vsel %vm13923_vm14, %v3256_v21, 0.0  ;;  %v2579_v55 = vadd.f32 %v2508_v52, %v14609_v62  ;;  %v10520_v6 = vpop.f32.mrf.mxu0  ;;  %3371 = vperm.xlu1 %7659, %v3300_v37   ;;  %v14611_v52 = vld [vmem:[#allocation11_spill] sm:$0xff]  ;;  %v10540_v21 = vld [vmem:[%s13469_s1 + $0xa8] sm:$0xff]  ;;  %v3043_v37 = vsel %vm13932_vm6, %v2851_v53, 0.0 }
 0x24f   : > { %v3476_v10 = vpack.c.bf16 %v3448_v57, %v3447_v42  ;;  %vm14612_vm5 = vcmp.le.s32.totalorder %v14611_v52, 14  ;;  %vm762_vm0 = vcmp.le.s32.totalorder %v10540_v21, 14  ;;  %v14614_v42 = vld [vmem:[#allocation12_spill] sm:$0xff]  ;;  %v7713_v21 = vld [vmem:[#allocation2 + $0xef] sm:$0xff] }
 0x250   : > { %7235 = vmatmul.msk.bf16.gmra.mxu1 %vm965_vm7, %v2422_v3  ;;  %v10531_v19 = vpop.permute.xlu1 %2965  ;;  %vm953_vm14 = vmand %vm761_vm8, %vm14612_vm5  ;;  %vm14615_vm5 = vcmp.le.s32.totalorder %v14614_v42, 14  ;;  %v2852_v57 = vld [vmem:[#allocation2 + $0xc1] sm:$0xff] }
 0x251   : > { %7257 = vmatmul.msk.bf16.gmra.mxu2 %vm965_vm7, %v2648_v61  ;;  %14610 = vst [vmem:[#allocation108_spill] sm:$0xff] %v10531_v19  ;;  %7293 = vmatmul.msk.bf16.gmra.mxu0 %vm965_vm7, %v3476_v10  ;;  %v4137_v61 = vsel %vm953_vm14, 1, %v14230_v28  ;;  %vm954_vm12 = vmand %vm762_vm0, %vm14615_vm5  ;;  %vm14620_vm5 = vcmp.ge.s32.totalorder %v14614_v42, 1 }
 0x252   : > { %3786 = vperm.xlu2 %7660, %v3717_v20   ;;  %3368 = vperm.xlu0 %7658, %v3299_v12   ;;  %v3044_v12 = vsel %vm13931_vm2, %v2852_v57, 0.0  ;;  %v4138_v26 = vsel %vm954_vm12, 1, %v14230_v28  ;;  %vm922_vm2 = vmand %vm762_vm0, %vm14620_vm5  ;;  %vm13940_vm12 = vcmp.eq.s32.totalorder %v10455_v35, 1  ;;  %vm14624_vm5 = vcmp.ge.s32.totalorder %v14611_v52, 1  ;;  %v14627_v35 = vld [vmem:[#allocation116_spill] sm:$0xff] }
 0x253   : > { %v10547_v3 = vpop.permute.xlu2 %4183  ;;  %v3065_v23 = vpack.c.bf16 %v3044_v12, %v3043_v37  ;;  %v7709_v37 = vld [vmem:[#allocation2 + $0xdf] sm:$0xff]  ;;  %v3302_v31 = vsel %vm922_vm2, 1, %v14230_v28 }
 0x254   : > { %v2734_v46 = vpop.f32.mrf.mxu2  ;;  %14613 = vst [vmem:[#allocation11_spill] sm:$0xff] %v10547_v3  ;;  %v10556_v20 = vpop.permute.xlu0 %2962 }
 0x255   : > { %v10554_v62 = vadd.f32 %v2734_v46, %v2579_v55  ;;  %14616 = vst [vmem:[#allocation12_spill] sm:$0xff] %v10556_v20  ;;  %v2510_v10 = vpop.f32.mrf.mxu1  ;;  %v10560_v53 = vpop.f32.mrf.mxu3  ;;  %v3718_v55 = vsel %vm760_vm1, 1, %v14230_v28  ;;  %v14618_v46 = vld [vmem:[#allocation150_spill] sm:$0xff] }
 0x256   : > { %v2580_v29 = vadd.f32 %v2510_v10, %v14617_v47  ;;  %v2075_v3 = vpop.f32.mrf.mxu0  ;;  %4210 = vperm.xlu1 %7659, %v4137_v61   ;;  %vm13941_vm14 = vcmp.eq.s32.totalorder %v14618_v46, 1  ;;  %v14621_v47 = vld [vmem:[#allocation135_spill] sm:$0xff]  ;;  %v3258_v61 = vld [vmem:[#allocation2 + $0x6f] sm:$0xff]  ;;  %v2630_v10 = vld [vmem:[#allocation2 + $0xe0] sm:$0xff] }
 0x257   : > { %v2155_v58 = vadd.f32 %v2075_v3, %v10306_v13  ;;  %vm13942_vm6 = vcmp.eq.s32.totalorder %v14621_v47, 1  ;;  %v2404_v3 = vsel %vm13941_vm14, %v7709_v37, 0.0  ;;  %vm13946_vm14 = vcmp.eq.s32.totalorder %v10556_v20, 1  ;;  %v2862_v20 = vld [vmem:[#allocation2 + $0x111] sm:$0xff] }
 0x258   : > { %7278 = vmatmul.msk.bf16.gmra.mxu3 %vm965_vm7, %v3065_v23  ;;  %v10570_v57 = vpop.permute.xlu1 %3338 }
 0x259   : > { %14619 = vst [vmem:[#allocation111_spill] sm:$0xff] %v10570_v57  ;;  %v2573_v13 = vadd.f32 %v10257_v25, %v2155_v58  ;;  %vm13935_vm1 = vcmp.eq.s32.totalorder %v10570_v57, 1 }
 0x25a   : > { %4213 = vperm.xlu2 %7660, %v4138_v26   ;;  %3789 = vperm.xlu0 %7658, %v3718_v55   ;;  %v3449_v23 = vsel %vm13935_vm1, %v3257_v7, 0.0  ;;  %v7710_v26 = vld [vmem:[#allocation2 + $0xd7] sm:$0xff]  ;;  %v3450_v55 = vsel %vm13940_vm12, %v3258_v61, 0.0  ;;  %vm10600_vm1 = vmand %vm761_vm8, %vm14624_vm5  ;;  %vm13943_vm12 = vcmp.eq.s32.totalorder %v10531_v19, 1 }
 0x25b   : > { %v10584_v12 = vpop.permute.xlu2 %3762  ;;  %v2799_v25 = vadd.f32 %v10284_v50, %v2573_v13  ;;  %v2403_v58 = vsel %vm13942_vm6, %v7710_v26, 0.0  ;;  %v1692_v50 = vadd.f32 %v10337_v48, %v10096_v15  ;;  %v3477_v13 = vpack.c.bf16 %v3450_v55, %v3449_v23  ;;  %v2629_v61 = vld [vmem:[#allocation2 + $0xd8] sm:$0xff] }
 0x25c   : > { %v2736_v42 = vpop.f32.mrf.mxu2  ;;  %14622 = vst [vmem:[#allocation211_spill] sm:$0xff] %v10584_v12  ;;  %v10594_v57 = vpop.permute.xlu0 %4177  ;;  %v2649_v15 = vpack.c.bf16 %v2630_v10, %v2629_v61  ;;  %v3719_v48 = vsel %vm761_vm8, 1, %v14230_v28  ;;  %v3301_v55 = vsel %vm10600_vm1, 1, %v14230_v28  ;;  %vm14629_vm8 = vcmp.le.s32.totalorder %v14509_v56, 14 }
 0x25d   : > { %v10592_v7 = vadd.f32 %v2736_v42, %v2580_v29  ;;  %14623 = vst [vmem:[#allocation212_spill] sm:$0xff] %v10594_v57  ;;  %v2513_v26 = vpop.f32.mrf.mxu1  ;;  %v10606_v46 = vpop.f32.mrf.mxu3  ;;  %v10611_v29 = vld [vmem:[%s13469_s1 + $0xb0] sm:$0xff]  ;;  %v10615_v52 = vadd.f32 %v10427_v41, %v2799_v25  ;;  %v2423_v42 = vpack.c.bf16 %v2404_v3, %v2403_v58  ;;  %v10627_v41 = vld [vmem:[%s13469_s1 + $0xb8] sm:$0xff] }
 0x25e   : > { %vm763_vm2 = vcmp.le.s32.totalorder %v10611_v29, 14  ;;  %v2581_v47 = vadd.f32 %v2513_v26, %v14627_v35  ;;  %v2077_v12 = vpop.f32.mrf.mxu0  ;;  %3377 = vperm.xlu1 %7659, %v3302_v31   ;;  %vm764_vm5 = vcmp.le.s32.totalorder %v10627_v41, 14  ;;  %v2853_v3 = vld [vmem:[#allocation2 + $0xc9] sm:$0xff]  ;;  %v7717_v41 = vld [vmem:[#allocation2 + $0xff] sm:$0xff] }
 0x25f   : > { %v2156_v23 = vadd.f32 %v2077_v12, %v1692_v50  ;;  %vm955_vm1 = vmand %vm763_vm2, %vm14629_vm8  ;;  %v3046_v12 = vsel %vm13943_vm12, %v2854_v40, 0.0  ;;  %v3045_v10 = vsel %vm13946_vm14, %v2853_v3, 0.0  ;;  %vm14631_vm8 = vcmp.le.s32.totalorder %v8231_v30, 14 }
 0x260   : > { %7236 = vmatmul.msk.bf16.gmra.mxu1 %vm965_vm7, %v2423_v42  ;;  %v10634_v31 = vpop.permute.xlu1 %3759  ;;  %v4139_v37 = vsel %vm955_vm1, 1, %v14230_v28  ;;  %vm956_vm6 = vmand %vm764_vm5, %vm14631_vm8  ;;  %vm13944_vm1 = vcmp.eq.s32.totalorder %v9932_v43, 1  ;;  %vm14635_vm8 = vcmp.ge.s32.totalorder %v8231_v30, 1 }
 0x261   : > { %7258 = vmatmul.msk.bf16.gmra.mxu2 %vm965_vm7, %v2649_v15  ;;  %14628 = vst [vmem:[#allocation116_spill] sm:$0xff] %v10634_v31  ;;  %v2574_v35 = vadd.f32 %v10299_v24, %v2156_v23  ;;  %7294 = vmatmul.msk.bf16.gmra.mxu0 %vm965_vm7, %v3477_v13  ;;  %v3066_v15 = vpack.c.bf16 %v3046_v12, %v3045_v10  ;;  %v4140_v40 = vsel %vm956_vm6, 1, %v14230_v28  ;;  %vm924_vm12 = vmand %vm764_vm5, %vm14635_vm8  ;;  %v2406_v12 = vsel %vm13944_vm1, %v7713_v21, 0.0 }
 0x262   : > { %3792 = vperm.xlu2 %7660, %v3719_v48   ;;  %3374 = vperm.xlu0 %7658, %v3301_v55   ;;  %v14633_v48 = vld [vmem:[#allocation5_spill] sm:$0xff]  ;;  %v3304_v30 = vsel %vm924_vm12, 1, %v14230_v28 }
 0x263   : > { %v10646_v58 = vpop.permute.xlu2 %2977  ;;  %v2800_v24 = vadd.f32 %v10316_v34, %v2574_v35  ;;  %v3720_v34 = vsel %vm762_vm0, 1, %v14230_v28  ;;  %v2632_v35 = vld [vmem:[#allocation2 + $0xf0] sm:$0xff]  ;;  %vm14639_vm0 = vcmp.ge.s32.totalorder %v14509_v56, 1 }
 0x264   : > { %v2739_v25 = vpop.f32.mrf.mxu2  ;;  %14630 = vst [vmem:[#allocation213_spill] sm:$0xff] %v10646_v58  ;;  %v10656_v13 = vpop.permute.xlu0 %3756  ;;  %vm10693_vm8 = vmand %vm763_vm2, %vm14639_vm0 }
 0x265   : > { %v10654_v50 = vadd.f32 %v2739_v25, %v2581_v47  ;;  %14632 = vst [vmem:[#allocation214_spill] sm:$0xff] %v10656_v13  ;;  %v2515_v26 = vpop.f32.mrf.mxu1  ;;  %v10658_v61 = vpop.f32.mrf.mxu3  ;;  %v10661_v42 = vadd.f32 %v10468_v22, %v2800_v24 }
 0x266   : > { %v2582_v23 = vadd.f32 %v2515_v26, %v14633_v48  ;;  %v2080_v55 = vpop.f32.mrf.mxu0  ;;  %4216 = vperm.xlu1 %7659, %v4139_v37   ;;  %v2631_v37 = vld [vmem:[#allocation2 + $0xe8] sm:$0xff] }
 0x267   : > { %v2157_v3 = vadd.f32 %v2080_v55, %v10389_v32  ;;  %v14636_v32 = vld [vmem:[#allocation141_spill] sm:$0xff] }
 0x268   : > { %7279 = vmatmul.msk.bf16.gmra.mxu3 %vm965_vm7, %v3066_v15  ;;  %v10671_v47 = vpop.permute.xlu1 %4180  ;;  %vm13945_vm6 = vcmp.eq.s32.totalorder %v14636_v32, 1  ;;  %v2650_v15 = vpack.c.bf16 %v2632_v35, %v2631_v37  ;;  %v7714_v55 = vld [vmem:[#allocation2 + $0xe7] sm:$0xff]  ;;  %v14642_v35 = vld [vmem:[#allocation123_spill] sm:$0xff] }
 0x269   : > { %14634 = vst [vmem:[#allocation5_spill] sm:$0xff] %v10671_v47  ;;  %v2575_v22 = vadd.f32 %v10326_v63, %v2157_v3 }
 0x26a   : > { %4219 = vperm.xlu2 %7660, %v4140_v40   ;;  %3795 = vperm.xlu0 %7658, %v3720_v34   ;;  %v2405_v40 = vsel %vm13945_vm6, %v7714_v55, 0.0  ;;  %v10704_v34 = vld [vmem:[%s13469_s1 + $0xc0] sm:$0xff] }
 0x26b   : > { %v2801_v24 = vadd.f32 %v10366_v45, %v2575_v22  ;;  %v1697_v45 = vadd.f32 %v10429_v1, %v10182_v36  ;;  %vm765_vm12 = vcmp.le.s32.totalorder %v10704_v34, 14  ;;  %v2424_v22 = vpack.c.bf16 %v2406_v12, %v2405_v40  ;;  %v10720_v1 = vld [vmem:[%s13469_s1 + $0xc8] sm:$0xff] }
 0x26c   : > { %v2741_v10 = vpop.f32.mrf.mxu2  ;;  %v10681_v25 = vpop.permute.xlu2 %3350  ;;  %v3721_v36 = vsel %vm763_vm2, 1, %v14230_v28  ;;  %vm766_vm0 = vcmp.le.s32.totalorder %v10720_v1, 14  ;;  %v3303_v12 = vsel %vm10693_vm8, 1, %v14230_v28  ;;  %vm14644_vm2 = vcmp.le.s32.totalorder %v8253_v38, 14  ;;  %v2217_v1 = vld [vmem:[#allocation2 + $0x107] sm:$0xff] }
 0x26d   : > { %14637 = vst [vmem:[#allocation215_spill] sm:$0xff] %v10681_v25  ;;  %v10685_v26 = vadd.f32 %v2741_v10, %v2582_v23  ;;  %v10687_v63 = vpop.permute.xlu0 %2971  ;;  %v2518_v23 = vpop.f32.mrf.mxu1  ;;  %v10708_v56 = vadd.f32 %v10507_v8, %v2801_v24  ;;  %vm957_vm6 = vmand %vm765_vm12, %vm14644_vm2  ;;  %vm13965_vm8 = vcmp.eq.s32.totalorder %v10491_v14, 1  ;;  %v3722_v24 = vsel %vm764_vm5, 1, %v14230_v28 }
 0x26e   : > { %14638 = vst [vmem:[#allocation216_spill] sm:$0xff] %v10687_v63  ;;  %v3152_v3 = vpop.f32.mrf.mxu3  ;;  %v2583_v21 = vadd.f32 %v2518_v23, %v14642_v35  ;;  %v2082_v37 = vpop.f32.mrf.mxu0  ;;  %3383 = vperm.xlu1 %7659, %v3304_v30   ;;  %vm13964_vm1 = vcmp.eq.s32.totalorder %v10687_v63, 1  ;;  %v2856_v30 = vld [vmem:[#allocation2 + $0xe1] sm:$0xff]  ;;  %vm10742_vm3 = vmand %vm766_vm0, %vm14645_vm15  ;;  %v4141_v40 = vsel %vm957_vm6, 1, %v14230_v28  ;;  %v2855_v23 = vld [vmem:[#allocation2 + $0xd9] sm:$0xff]  ;;  %vm14652_vm6 = vcmp.ge.s32.totalorder %v8289_v51, 1 }
 0x26f   : > { %v10712_v10 = vadd.f32 %v3152_v3, %v10554_v62  ;;  %v2158_v8 = vadd.f32 %v2082_v37, %v1697_v45  ;;  %v3047_v37 = vsel %vm13965_vm8, %v2855_v23, 0.0  ;;  %vm926_vm2 = vmand %vm766_vm0, %vm14652_vm6  ;;  %v2633_v51 = vld [vmem:[#allocation2 + $0xf8] sm:$0xff]  ;;  %vm14657_vm5 = vcmp.ge.s32.totalorder %v8253_v38, 1 }
 0x270   : > { %7237 = vmatmul.msk.bf16.gmra.mxu1 %vm965_vm7, %v2424_v22  ;;  %v10729_v62 = vpop.permute.xlu1 %3347  ;;  %vm10802_vm6 = vmand %vm765_vm12, %vm14657_vm5 }
 0x271   : > { %7259 = vmatmul.msk.bf16.gmra.mxu2 %vm965_vm7, %v2650_v15  ;;  %14643 = vst [vmem:[#allocation123_spill] sm:$0xff] %v10729_v62  ;;  %v2576_v29 = vadd.f32 %v10380_v4, %v2158_v8  ;;  %vm13953_vm14 = vcmp.eq.s32.totalorder %v10729_v62, 1  ;;  %v3048_v15 = vsel %vm13964_vm1, %v2856_v30, 0.0  ;;  %v3260_v4 = vld [vmem:[#allocation2 + $0x7f] sm:$0xff] }
 0x272   : > { %3798 = vperm.xlu2 %7660, %v3721_v36   ;;  %3380 = vperm.xlu0 %7658, %v3303_v12   ;;  %v3452_v22 = vsel %vm13953_vm14, %v3260_v4, 0.0  ;;  %v3259_v36 = vld [vmem:[#allocation2 + $0x77] sm:$0xff] }
 0x273   : > { %v2802_v45 = vadd.f32 %v10406_v11, %v2576_v29  ;;  %v4142_v11 = vsel %vm10742_vm3, 1, %v14230_v28  ;;  %v3067_v29 = vpack.c.bf16 %v3048_v15, %v3047_v37  ;;  %vm13954_vm3 = vcmp.eq.s32.totalorder %v9998_v17, 1  ;;  %v7728_v17 = vld [vmem:[#allocation2 + $0x40] sm:$0xff] }
 0x274   : > { %v2744_v48 = vpop.f32.mrf.mxu2  ;;  %v10748_v55 = vpop.permute.xlu2 %3771  ;;  %v2408_v15 = vsel %vm13954_vm3, %v7717_v41, 0.0  ;;  %v3305_v41 = vsel %vm10802_vm6, 1, %v14230_v28  ;;  %vm13956_vm3 = vcmp.eq.s32.totalorder %v10646_v58, 1 }
 0x275   : > { %14648 = vst [vmem:[#allocation217_spill] sm:$0xff] %v10748_v55  ;;  %v10752_v3 = vadd.f32 %v2744_v48, %v2583_v21  ;;  %v10756_v35 = vpop.permute.xlu0 %3344  ;;  %v2520_v8 = vpop.f32.mrf.mxu1  ;;  %v10765_v21 = vadd.f32 %v10560_v53, %v2802_v45  ;;  %v14650_v48 = vld [vmem:[#allocation127_spill] sm:$0xff] }
 0x276   : > { %14649 = vst [vmem:[#allocation218_spill] sm:$0xff] %v10756_v35  ;;  %vm13952_vm15 = vcmp.eq.s32.totalorder %v10756_v35, 1  ;;  %v3154_v12 = vpop.f32.mrf.mxu3  ;;  %v2584_v4 = vadd.f32 %v2520_v8, %v14650_v48  ;;  %v2085_v62 = vpop.f32.mrf.mxu0  ;;  %4222 = vperm.xlu1 %7659, %v4141_v40   ;;  %v7718_v8 = vld [vmem:[#allocation2 + $0xf7] sm:$0xff] }
 0x277   : > { %v3451_v30 = vsel %vm13952_vm15, %v3259_v36, 0.0  ;;  %v10771_v23 = vadd.f32 %v3154_v12, %v10592_v7  ;;  %v2159_v32 = vadd.f32 %v2085_v62, %v10473_v2  ;;  %v2634_v2 = vld [vmem:[#allocation2 + $0x100] sm:$0xff]  ;;  %v14653_v62 = vld [vmem:[#allocation149_spill] sm:$0xff] }
 0x278   : > { %v3478_v43 = vpack.c.bf16 %v3452_v22, %v3451_v30  ;;  %7280 = vmatmul.msk.bf16.gmra.mxu3 %vm965_vm7, %v3067_v29  ;;  %v10779_v53 = vpop.permute.xlu1 %2974  ;;  %vm13955_vm15 = vcmp.eq.s32.totalorder %v14653_v62, 1  ;;  %v3306_v22 = vsel %vm926_vm2, 1, %v14230_v28  ;;  %v10813_v30 = vld [vmem:[%s13469_s1 + $0xd0] sm:$0xff] }
 0x279   : > { %14651 = vst [vmem:[#allocation127_spill] sm:$0xff] %v10779_v53  ;;  %v2577_v7 = vadd.f32 %v10425_v18, %v2159_v32  ;;  %v2651_v32 = vpack.c.bf16 %v2634_v2, %v2633_v51  ;;  %v2407_v12 = vsel %vm13955_vm15, %v7718_v8, 0.0  ;;  %vm767_vm2 = vcmp.le.s32.totalorder %v10813_v30, 14 }
 0x27a   : > { %7295 = vmatmul.msk.bf16.gmra.mxu0 %vm965_vm7, %v3478_v43  ;;  %4225 = vperm.xlu2 %7660, %v4142_v11   ;;  %v2425_v48 = vpack.c.bf16 %v2408_v15, %v2407_v12  ;;  %vm13957_vm14 = vcmp.eq.s32.totalorder %v10779_v53, 1  ;;  %v2857_v15 = vld [vmem:[#allocation2 + $0xe9] sm:$0xff]  ;;  %vm14665_vm15 = vcmp.le.s32.totalorder %v8347_v16, 14 }
 0x27b   : > { %3801 = vperm.xlu0 %7658, %v3722_v24   ;;  %v2803_v37 = vadd.f32 %v10453_v39, %v2577_v7  ;;  %v1702_v39 = vadd.f32 %v10520_v6, %v10262_v5  ;;  %v3723_v6 = vsel %vm765_vm12, 1, %v14230_v28  ;;  %vm14663_vm12 = vcmp.le.s32.totalorder %v8311_v59, 14 }
 0x27c   : > { %v2746_v40 = vpop.f32.mrf.mxu2  ;;  %v10790_v45 = vpop.permute.xlu2 %4192  ;;  %vm959_vm6 = vmand %vm767_vm2, %vm14663_vm12 }
 0x27d   : > { %14654 = vst [vmem:[#allocation219_spill] sm:$0xff] %v10790_v45  ;;  %v10794_v18 = vadd.f32 %v2746_v40, %v2584_v4  ;;  %v10796_v43 = vpop.permute.xlu0 %3765  ;;  %v2523_v11 = vpop.f32.mrf.mxu1  ;;  %v10817_v38 = vadd.f32 %v10606_v46, %v2803_v37  ;;  %v14660_v4 = vld [vmem:[#allocation8_spill] sm:$0xff]  ;;  %v10832_v46 = vld [vmem:[%s13469_s1 + $0xd8] sm:$0xff]  ;;  %v3049_v40 = vsel %vm13957_vm14, %v2857_v15, 0.0  ;;  %v4143_v37 = vsel %vm959_vm6, 1, %v14230_v28 }
 0x27e   : > { %14656 = vst [vmem:[#allocation221_spill] sm:$0xff] %v10796_v43  ;;  %v3157_v29 = vpop.f32.mrf.mxu3  ;;  %v2585_v24 = vadd.f32 %v2523_v11, %v14660_v4  ;;  %v2087_v2 = vpop.f32.mrf.mxu0  ;;  %3389 = vperm.xlu1 %7659, %v3306_v22   ;;  %vm768_vm5 = vcmp.le.s32.totalorder %v10832_v46, 14  ;;  %v14667_v4 = vld [vmem:[#allocation132_spill] sm:$0xff]  ;;  %vm14670_vm6 = vcmp.ge.s32.totalorder %v8347_v16, 1  ;;  %vm13958_vm14 = vcmp.eq.s32.totalorder %v9921_v0, 1  ;;  %v3263_v46 = vld [vmem:[#allocation2 + $0x97] sm:$0xff] }
 0x27f   : > { %14655 = vst [vmem:[#allocation220_spill] sm:$0xff] %v10794_v18  ;;  %v10821_v7 = vadd.f32 %v3157_v29, %v10654_v50  ;;  %v2160_v5 = vadd.f32 %v2087_v2, %v1702_v39  ;;  %vm960_vm12 = vmand %vm768_vm5, %vm14665_vm15  ;;  %vm13961_vm15 = vcmp.eq.s32.totalorder %v10085_v27, 1 }
 0x280   : > { %7238 = vmatmul.msk.bf16.gmra.mxu1 %vm965_vm7, %v2425_v48  ;;  %v10838_v50 = vpop.permute.xlu1 %4189 }
 0x281   : > { %14661 = vst [vmem:[#allocation8_spill] sm:$0xff] %v10821_v7  ;;  %7260 = vmatmul.msk.bf16.gmra.mxu2 %vm965_vm7, %v2651_v32  ;;  %v2578_v34 = vadd.f32 %v10466_v54, %v2160_v5  ;;  %v2858_v32 = vld [vmem:[#allocation2 + $0xf1] sm:$0xff]  ;;  %v3724_v5 = vsel %vm766_vm0, 1, %v14230_v28  ;;  %vm14674_vm0 = vcmp.ge.s32.totalorder %v8311_v59, 1 }
 0x282   : > { %14662 = vst [vmem:[#allocation222_spill] sm:$0xff] %v10838_v50  ;;  %3804 = vperm.xlu2 %7660, %v3723_v6   ;;  %v3050_v12 = vsel %vm13956_vm3, %v2858_v32, 0.0  ;;  %vm928_vm3 = vmand %vm768_vm5, %vm14670_vm6 }
 0x283   : > { %3386 = vperm.xlu0 %7658, %v3305_v41   ;;  %v2804_v54 = vadd.f32 %v10489_v44, %v2578_v34  ;;  %v3068_v48 = vpack.c.bf16 %v3050_v12, %v3049_v40  ;;  %v4144_v44 = vsel %vm960_vm12, 1, %v14230_v28  ;;  %v2636_v41 = vld [vmem:[#allocation2 + $0x110] sm:$0xff]  ;;  %vm13959_vm12 = vcmp.eq.s32.totalorder %v10681_v25, 1  ;;  %vm927_vm6 = vmand %vm767_vm2, %vm14674_vm0  ;;  %v7724_v25 = vld [vmem:[#allocation2 + $0x28] sm:$0xff] }
 0x284   : > { %v2749_v51 = vpop.f32.mrf.mxu2  ;;  %v10848_v22 = vpop.permute.xlu2 %3359  ;;  %v3308_v16 = vsel %vm928_vm3, 1, %v14230_v28 }
 0x285   : > { %14664 = vst [vmem:[#allocation223_spill] sm:$0xff] %v10848_v22  ;;  %v10856_v36 = vadd.f32 %v2749_v51, %v2585_v24  ;;  %v10858_v8 = vpop.permute.xlu0 %4186  ;;  %v2525_v39 = vpop.f32.mrf.mxu1  ;;  %v10863_v29 = vadd.f32 %v10658_v61, %v2804_v54  ;;  %v2218_v24 = vld [vmem:[#allocation2 + $0x10f] sm:$0xff]  ;;  %v2409_v51 = vsel %vm13958_vm14, %v2217_v1, 0.0  ;;  %v3307_v1 = vsel %vm927_vm6, 1, %v14230_v28 }
 0x286   : > { %14666 = vst [vmem:[#allocation224_spill] sm:$0xff] %v10858_v8  ;;  %v3159_v11 = vpop.f32.mrf.mxu3  ;;  %v2586_v2 = vadd.f32 %v2525_v39, %v14667_v4  ;;  %4228 = vperm.xlu1 %7659, %v4143_v37   ;;  %v2410_v34 = vsel %vm13961_vm15, %v2218_v24, 0.0  ;;  %v3261_v37 = vld [vmem:[#allocation2 + $0x87] sm:$0xff] }
 0x287   : > { %v10867_v6 = vadd.f32 %v3159_v11, %v10685_v26  ;;  %v2635_v26 = vld [vmem:[#allocation2 + $0x108] sm:$0xff]  ;;  %v2426_v39 = vpack.c.bf16 %v2410_v34, %v2409_v51  ;;  %v3453_v11 = vsel %vm13959_vm12, %v3261_v37, 0.0 }
 0x288   : > { %7281 = vmatmul.msk.bf16.gmra.mxu3 %vm965_vm7, %v3068_v48  ;;  %v10875_v61 = vpop.permute.xlu1 %3768  ;;  %v2652_v12 = vpack.c.bf16 %v2636_v41, %v2635_v26  ;;  %v3262_v48 = vld [vmem:[#allocation2 + $0x8f] sm:$0xff]  ;;  %v3725_v41 = vsel %vm767_vm2, 1, %v14230_v28  ;;  %vm14678_vm2 = vcmp.le.s32.totalorder %v8373_v33, 14 }
 0x289   : > { %14668 = vst [vmem:[#allocation132_spill] sm:$0xff] %v10867_v6  ;;  %v14675_v24 = vld [vmem:[#allocation137_spill] sm:$0xff] }
 0x28a   : > { %14669 = vst [vmem:[#allocation225_spill] sm:$0xff] %v10875_v61  ;;  %4231 = vperm.xlu2 %7660, %v4144_v44   ;;  %v10923_v51 = vld [vmem:[%s13469_s1 + $0xe8] sm:$0xff] }
 0x28b   : > { %3807 = vperm.xlu0 %7658, %v3724_v5   ;;  %vm770_vm0 = vcmp.le.s32.totalorder %v10923_v51, 14  ;;  %v7729_v51 = vld [vmem:[#allocation2 + $0x38] sm:$0xff] }
 0x28c   : > { %v2751_v15 = vpop.f32.mrf.mxu2  ;;  %v10885_v40 = vpop.permute.xlu2 %2986 }
 0x28d   : > { %14671 = vst [vmem:[#allocation226_spill] sm:$0xff] %v10885_v40  ;;  %v10890_v54 = vadd.f32 %v2751_v15, %v2586_v2  ;;  %v10892_v32 = vpop.permute.xlu0 %3353  ;;  %v2528_v4 = vpop.f32.mrf.mxu1  ;;  %v10904_v2 = vld [vmem:[%s13469_s1 + $0xe0] sm:$0xff]  ;;  %v7629_v15 = vld [vmem:[%s13475_s7 + $0x10] sm:$0xff] }
 0x28e   : > { %14673 = vst [vmem:[#allocation228_spill] sm:$0xff] %v10892_v32  ;;  %vm13960_vm3 = vcmp.eq.s32.totalorder %v10892_v32, 1  ;;  %v3162_v44 = vpop.f32.mrf.mxu3  ;;  %vm769_vm14 = vcmp.le.s32.totalorder %v10904_v2, 14  ;;  %v2587_v5 = vadd.f32 %v2528_v4, %v14675_v24  ;;  %3395 = vperm.xlu1 %7659, %v3308_v16   ;;  %4840 = vmatpush.bf16.msra.mxu3 %v7629_v15  ;;  %v2860_v16 = vld [vmem:[#allocation2 + $0x101] sm:$0xff]  ;;  %v2859_v4 = vld [vmem:[#allocation2 + $0xf9] sm:$0xff]  ;;  %v3726_v15 = vsel %vm768_vm5, 1, %v14230_v28 }
 0x28f   : > { %14672 = vst [vmem:[#allocation227_spill] sm:$0xff] %v10890_v54  ;;  %v3454_v59 = vsel %vm13960_vm3, %v3262_v48, 0.0  ;;  %v10911_v26 = vadd.f32 %v3162_v44, %v10752_v3  ;;  %vm961_vm6 = vmand %vm769_vm14, %vm14678_vm2  ;;  %vm14680_vm3 = vcmp.le.s32.totalorder %v8413_v60, 14 }
 0x290   : > { %v3479_v34 = vpack.c.bf16 %v3454_v59, %v3453_v11  ;;  %7239 = vmatmul.msk.bf16.gmra.mxu1 %vm965_vm7, %v2426_v39  ;;  %v10928_v3 = vpop.permute.xlu1 %2983  ;;  %vm962_vm15 = vmand %vm770_vm0, %vm14680_vm3  ;;  %vm13976_vm3 = vcmp.eq.s32.totalorder %v10105_v9, 1 }
 0x291   : > { %14676 = vst [vmem:[#allocation137_spill] sm:$0xff] %v10911_v26  ;;  %7261 = vmatmul.msk.bf16.gmra.mxu2 %vm965_vm7, %v2652_v12  ;;  %vm13962_vm12 = vcmp.eq.s32.totalorder %v10928_v3, 1  ;;  %v4145_v12 = vsel %vm961_vm6, 1, %v14230_v28  ;;  %vm13970_vm6 = vcmp.eq.s32.totalorder %v10117_v49, 1 }
 0x292   : > { %14677 = vst [vmem:[#allocation229_spill] sm:$0xff] %v10928_v3  ;;  %7296 = vmatmul.msk.bf16.gmra.mxu0 %vm965_vm7, %v3479_v34  ;;  %3810 = vperm.xlu2 %7660, %v3725_v41   ;;  %v3052_v11 = vsel %vm13962_vm12, %v2860_v16, 0.0  ;;  %v14683_v41 = vld [vmem:[#allocation140_spill] sm:$0xff]  ;;  %v14705_v3 = vld [vmem:[#allocation191_spill] sm:$0xff] }
 0x293   : > { %3392 = vperm.xlu0 %7658, %v3307_v1  }
 0x294   : > { %v2754_v30 = vpop.f32.mrf.mxu2  ;;  %v10936_v37 = vpop.permute.xlu2 %4201 }
 0x295   : > { %14679 = vst [vmem:[#allocation230_spill] sm:$0xff] %v10936_v37  ;;  %v10943_v39 = vadd.f32 %v2754_v30, %v2587_v5  ;;  %v10947_v48 = vpop.permute.xlu0 %2980  ;;  %v2530_v44 = vpop.f32.mrf.mxu1  ;;  %v4146_v5 = vsel %vm962_vm15, 1, %v14230_v28  ;;  %v14684_v30 = vld [vmem:[#allocation179_spill] sm:$0xff]  ;;  %vm13980_vm15 = vcmp.eq.s32.totalorder %v10848_v22, 1 }
 0x296   : > { %14681 = vst [vmem:[#allocation231_spill] sm:$0xff] %v10947_v48  ;;  %vm13963_vm2 = vcmp.eq.s32.totalorder %v10947_v48, 1  ;;  %v10950_v59 = vpop.f32.mrf.mxu3  ;;  %v2588_v34 = vadd.f32 %v2530_v44, %v14683_v41  ;;  %4234 = vperm.xlu1 %7659, %v4145_v12   ;;  %vm13982_vm12 = vcmp.eq.s32.totalorder %v14684_v30, 1  ;;  %v7723_v44 = vld [vmem:[#allocation2 + $0x29] sm:$0xff] }
 0x297   : > { %14682 = vst [vmem:[#allocation232_spill] sm:$0xff] %v10950_v59  ;;  %v3051_v24 = vsel %vm13963_vm2, %v2859_v4, 0.0  ;;  %vm14686_vm2 = vcmp.ge.s32.totalorder %v8413_v60, 1  ;;  %v4086_v4 = vld [vmem:[#allocation2 + $0x31] sm:$0xff] }
 0x298   : > { %v3069_v1 = vpack.c.bf16 %v3052_v11, %v3051_v24  ;;  %v10962_v16 = vpop.permute.xlu1 %3356  ;;  %vm10968_vm1 = vmand %vm770_vm0, %vm14686_vm2  ;;  %v14689_v11 = vld [vmem:[#allocation168_spill] sm:$0xff]  ;;  %v4278_v60 = vsel %vm13976_vm3, %v4086_v4, 0.0  ;;  %v4277_v24 = vsel %vm13970_vm6, %v7723_v44, 0.0  ;;  %v10991_v44 = vpop.f32.mrf.mxu0  ;;  %vm14692_vm2 = vcmp.ge.s32.totalorder %v8373_v33, 1  ;;  %v14693_v33 = vld [vmem:[#allocation143_spill] sm:$0xff] }
 0x299   : > { %14685 = vst [vmem:[#allocation140_spill] sm:$0xff] %v10962_v16  ;;  %vm13977_vm5 = vcmp.eq.s32.totalorder %v10962_v16, 1  ;;  %vm13981_vm8 = vcmp.eq.s32.totalorder %v14689_v11, 1  ;;  %v3310_v4 = vsel %vm10968_vm1, 1, %v14230_v28  ;;  %vm929_vm6 = vmand %vm769_vm14, %vm14692_vm2  ;;  %v4309_v12 = vpack.c.bf16 %v4278_v60, %v4277_v24  ;;  %v11020_v24 = vld [vmem:[%s13469_s1 + $0xf8] sm:$0xff]  ;;  %v14706_v48 = vld [vmem:[#allocation6_spill] sm:$0xff] }
 0x29a   : > { %7282 = vmatmul.msk.bf16.gmra.mxu3 %vm965_vm7, %v3069_v1  ;;  %4237 = vperm.xlu2 %7660, %v4146_v5   ;;  %v3455_v41 = vsel %vm13977_vm5, %v3263_v46, 0.0  ;;  %v3859_v5 = vsel %vm13982_vm12, %v7724_v25, 0.0  ;;  %v3264_v1 = vld [vmem:[#allocation2 + $0x9f] sm:$0xff]  ;;  %v7725_v25 = vld [vmem:[#allocation2 + $0x30] sm:$0xff]  ;;  %v3309_v60 = vsel %vm929_vm6, 1, %v14230_v28  ;;  %vm772_vm2 = vcmp.le.s32.totalorder %v11020_v24, 14 }
 0x29b   : > { %3813 = vperm.xlu0 %7658, %v3726_v15   ;;  %v3456_v49 = vsel %vm13980_vm15, %v3264_v1, 0.0  ;;  %v3860_v9 = vsel %vm13981_vm8, %v7725_v25, 0.0 }
 0x29c   : > { %v2756_v32 = vpop.f32.mrf.mxu2  ;;  %v10984_v35 = vpop.permute.xlu2 %3780  ;;  %v3480_v16 = vpack.c.bf16 %v3456_v49, %v3455_v41  ;;  %v3727_v49 = vsel %vm769_vm14, 1, %v14230_v28  ;;  %v14699_v41 = vld [vmem:[#allocation33_spill] sm:$0xff] }
 0x29d   : > { %v10993_v15 = vadd.f32 %v2756_v32, %v2588_v34  ;;  %v10995_v46 = vpop.permute.xlu0 %4195  ;;  %v2533_v0 = vpop.f32.mrf.mxu1  ;;  %v11006_v32 = vld [vmem:[%s13469_s1 + $0xf0] sm:$0xff]  ;;  %v3891_v34 = vpack.c.bf16 %v3860_v9, %v3859_v5  ;;  %v14696_v9 = vld [vmem:[#allocation28_spill] sm:$0xff]  ;;  %vm14700_vm6 = vcmp.le.s32.totalorder %v14699_v41, 14  ;;  %vm14708_vm15 = vcmp.ge.s32.totalorder %v14699_v41, 1 }
 0x29e   : > { %14691 = vst [vmem:[#allocation168_spill] sm:$0xff] %v10995_v46  ;;  %v3167_v22 = vpop.f32.mrf.mxu3  ;;  %vm771_vm1 = vcmp.le.s32.totalorder %v11006_v32, 14  ;;  %v2589_v1 = vadd.f32 %v2533_v0, %v14693_v33  ;;  %3401 = vperm.xlu1 %7659, %v3310_v4   ;;  %vm14697_vm3 = vcmp.le.s32.totalorder %v14696_v9, 14  ;;  %vm964_vm5 = vmand %vm772_vm2, %vm14700_vm6  ;;  %vm3829_vm6 = vcmp.eq.s32.totalorder %v14706_v48, 1 }
 0x29f   : > { %14690 = vst [vmem:[#allocation179_spill] sm:$0xff] %v10993_v15  ;;  %v11011_v27 = vadd.f32 %v3167_v22, %v10856_v36  ;;  %vm963_vm14 = vmand %vm771_vm1, %vm14697_vm3  ;;  %v3861_v58 = vsel %vm3829_vm6, %v7729_v51, 0.0 }
 0x2a0   : > { %7312 = vmatmul.msk.bf16.vlgmr.msra.gmra.mxu1 %vm965_vm7, %v3891_v34  ;;  %v11025_v0 = vpop.permute.xlu1 %3777  ;;  %v4147_v2 = vsel %vm963_vm14, 1, %v14230_v28  ;;  %v14703_v34 = vld [vmem:[#allocation147_spill] sm:$0xff]  ;;  %vm3830_vm14 = vcmp.eq.s32.totalorder %v14705_v3, 1  ;;  %vm932_vm8 = vmand %vm772_vm2, %vm14708_vm15  ;;  %vm14712_vm15 = vcmp.ge.s32.totalorder %v14696_v9, 1  ;;  %v14754_v3 = vld [vmem:[#allocation174_spill] sm:$0xff] }
 0x2a1   : > { %14694 = vst [vmem:[#allocation143_spill] sm:$0xff] %v11011_v27  ;;  %7334 = vmatmul.msk.bf16.vlgmr.msra.gmra.mxu2 %vm965_vm7, %v4309_v12  ;;  %v3862_v62 = vsel %vm3830_vm14, %v7728_v17, 0.0  ;;  %v3312_v63 = vsel %vm932_vm8, 1, %v14230_v28 }
 0x2a2   : > { %14695 = vst [vmem:[#allocation233_spill] sm:$0xff] %v11025_v0  ;;  %7297 = vmatmul.msk.bf16.gmra.mxu0 %vm965_vm7, %v3480_v16  ;;  %3816 = vperm.xlu2 %7660, %v3727_v49   ;;  %v11045_v16 = vpop.f32.mrf.mxu0  ;;  %v4148_v49 = vsel %vm964_vm5, 1, %v14230_v28  ;;  %vm931_vm5 = vmand %vm771_vm1, %vm14712_vm15  ;;  %v3892_v51 = vpack.c.bf16 %v3862_v62, %v3861_v58  ;;  %v3729_v58 = vsel %vm771_vm1, 1, %v14230_v28 }
 0x2a3   : > { %3398 = vperm.xlu0 %7658, %v3309_v60   ;;  %v14704_v60 = vld [vmem:[#allocation189_spill] sm:$0xff] }
 0x2a4   : > { %v2759_v22 = vpop.f32.mrf.mxu2  ;;  %v11032_v36 = vpop.permute.xlu2 %4207  ;;  %vm13995_vm3 = vcmp.eq.s32.totalorder %v14704_v60, 1  ;;  %v2861_v60 = vld [vmem:[#allocation2 + $0x109] sm:$0xff] }
 0x2a5   : > { %14698 = vst [vmem:[#allocation28_spill] sm:$0xff] %v11032_v36  ;;  %v11039_v5 = vadd.f32 %v2759_v22, %v2589_v1  ;;  %v11041_v4 = vpop.permute.xlu0 %3774  ;;  %v2535_v25 = vpop.f32.mrf.mxu1  ;;  %v3728_v1 = vsel %vm770_vm0, 1, %v14230_v28  ;;  %vm14004_vm0 = vcmp.eq.s32.totalorder %v10885_v40, 1  ;;  %v14724_v40 = vld [vmem:[#allocation188_spill] sm:$0xff] }
 0x2a6   : > { %14701 = vst [vmem:[#allocation33_spill] sm:$0xff] %v11041_v4  ;;  %v11043_v12 = vpop.f32.mrf.mxu3  ;;  %v2590_v33 = vadd.f32 %v2535_v25, %v14703_v34  ;;  %4240 = vperm.xlu1 %7659, %v4147_v2   ;;  %v14709_v2 = vld [vmem:[#allocation172_spill] sm:$0xff]  ;;  %v3053_v19 = vsel %vm14004_vm0, %v2861_v60, 0.0  ;;  %v3311_v60 = vsel %vm931_vm5, 1, %v14230_v28 }
 0x2a7   : > { %14702 = vst [vmem:[#allocation234_spill] sm:$0xff] %v11043_v12  ;;  %vm13993_vm12 = vcmp.eq.s32.totalorder %v14709_v2, 1  ;;  %v4088_v25 = vld [vmem:[#allocation2 + $0x41] sm:$0xff] }
 0x2a8   : > { %v11055_v22 = vpop.permute.xlu1 %4198  ;;  %v4280_v34 = vsel %vm13995_vm3, %v4088_v25, 0.0 }
 0x2a9   : > { %14707 = vst [vmem:[#allocation147_spill] sm:$0xff] %v11055_v22 }
 0x2aa   : > { %4243 = vperm.xlu2 %7660, %v4148_v49   ;;  %v7730_v49 = vld [vmem:[#allocation2 + $0x39] sm:$0xff] }
 0x2ab   : > { %3819 = vperm.xlu0 %7658, %v3728_v1   ;;  %v4279_v25 = vsel %vm13993_vm12, %v7730_v49, 0.0 }
 0x2ac   : > { %v2761_v41 = vpop.f32.mrf.mxu2  ;;  %v11069_v53 = vpop.permute.xlu2 %3786  ;;  %v4310_v1 = vpack.c.bf16 %v4280_v34, %v4279_v25 }
 0x2ad   : > { %v11074_v14 = vadd.f32 %v2761_v41, %v2590_v33  ;;  %v11076_v17 = vpop.permute.xlu0 %2989  ;;  %v2538_v2 = vpop.f32.mrf.mxu1  ;;  %v14713_v41 = vld [vmem:[#allocation151_spill] sm:$0xff] }
 0x2ae   : > { %14711 = vst [vmem:[#allocation236_spill] sm:$0xff] %v11076_v17  ;;  %vm13997_vm8 = vcmp.eq.s32.totalorder %v11076_v17, 1  ;;  %v3172_v49 = vpop.f32.mrf.mxu3  ;;  %3407 = vperm.xlu1 %7659, %v3312_v63   ;;  %v11095_v34 = vpop.f32.mrf.mxu0  ;;  %v14723_v17 = vld [vmem:[#allocation184_spill] sm:$0xff] }
 0x2af   : > { %14710 = vst [vmem:[#allocation235_spill] sm:$0xff] %v11074_v14  ;;  %v3054_v33 = vsel %vm13997_vm8, %v2862_v20, 0.0  ;;  %v2591_v14 = vadd.f32 %v2538_v2, %v14713_v41  ;;  %v11089_v9 = vadd.f32 %v3172_v49, %v10943_v39  ;;  %v3266_v39 = vld [vmem:[#allocation2 + $0xaf] sm:$0xff]  ;;  %v14719_v41 = vld [vmem:[#allocation155_spill] sm:$0xff]  ;;  %vm14003_vm3 = vcmp.eq.s32.totalorder %v14723_v17, 1 }
 0x2b0   : > { %v3070_v62 = vpack.c.bf16 %v3054_v33, %v3053_v19  ;;  %7313 = vmatmul.msk.bf16.gmra.mxu1 %vm965_vm7, %v3892_v51  ;;  %v11099_v20 = vpop.permute.xlu1 %3365  ;;  %vm3831_vm8 = vcmp.eq.s32.totalorder %v14724_v40, 1 }
 0x2b1   : > { %14714 = vst [vmem:[#allocation151_spill] sm:$0xff] %v11089_v9  ;;  %7335 = vmatmul.msk.bf16.gmra.mxu2 %vm965_vm7, %v4310_v1  ;;  %vm14008_vm15 = vcmp.eq.s32.totalorder %v11099_v20, 1  ;;  %v3265_v1 = vld [vmem:[#allocation2 + $0xa7] sm:$0xff] }
 0x2b2   : > { %14715 = vst [vmem:[#allocation237_spill] sm:$0xff] %v11099_v20  ;;  %7283 = vmatmul.msk.bf16.gmra.mxu3 %vm965_vm7, %v3070_v62  ;;  %3822 = vperm.xlu2 %7660, %v3729_v58   ;;  %v3458_v2 = vsel %vm14008_vm15, %v3266_v39, 0.0  ;;  %v14720_v62 = vld [vmem:[#allocation194_spill] sm:$0xff] }
 0x2b3   : > { %3404 = vperm.xlu0 %7658, %v3311_v60   ;;  %vm14002_vm5 = vcmp.eq.s32.totalorder %v14720_v62, 1  ;;  %v3730_v60 = vsel %vm772_vm2, 1, %v14230_v28  ;;  %v7734_v62 = vld [vmem:[#allocation2 + $0x48] sm:$0xff]  ;;  %vm4571_vm2 = vcmask 261120  }
 0x2b4   : > { %v2764_v63 = vpop.f32.mrf.mxu2  ;;  %v11103_v32 = vpop.permute.xlu2 %4213 }
 0x2b5   : > { %14716 = vst [vmem:[#allocation238_spill] sm:$0xff] %v11103_v32  ;;  %v11105_v19 = vadd.f32 %v2764_v63, %v2591_v14  ;;  %v11109_v25 = vpop.permute.xlu0 %3362  ;;  %v2540_v51 = vpop.f32.mrf.mxu1  ;;  %v14721_v63 = vld [vmem:[#allocation204_spill] sm:$0xff] }
 0x2b6   : > { %14717 = vst [vmem:[#allocation239_spill] sm:$0xff] %v11109_v25  ;;  %vm14006_vm1 = vcmp.eq.s32.totalorder %v11109_v25, 1  ;;  %v11112_v49 = vpop.f32.mrf.mxu3  ;;  %v2592_v58 = vadd.f32 %v2540_v51, %v14719_v41  ;;  %vm14078_vm12 = vcmp.eq.s32.totalorder %v14721_v63, 1  ;;  %v11129_v41 = vpop.f32.mrf.mxu0  ;;  %v7733_v25 = vld [vmem:[#allocation2 + $0x51] sm:$0xff] }
 0x2b7   : > { %14718 = vst [vmem:[#allocation240_spill] sm:$0xff] %v11112_v49  ;;  %v3457_v33 = vsel %vm14006_vm1, %v3265_v1, 0.0  ;;  %v7731_v1 = vld [vmem:[#allocation2 + $0x49] sm:$0xff] }
 0x2b8   : > { %v3481_v14 = vpack.c.bf16 %v3458_v2, %v3457_v33  ;;  %v11122_v39 = vpop.permute.xlu1 %4204  ;;  %v4281_v51 = vsel %vm14002_vm5, %v7731_v1, 0.0  ;;  %v7732_v2 = vld [vmem:[#allocation2 + $0x50] sm:$0xff]  ;;  %v3863_v1 = vsel %vm3831_vm8, %v7734_v62, 0.0 }
 0x2b9   : > { %14722 = vst [vmem:[#allocation155_spill] sm:$0xff] %v11122_v39  ;;  %v3864_v28 = vsel %vm14078_vm12, %v7732_v2, 0.0  ;;  %v14727_v2 = vld [vmem:[#allocation159_spill] sm:$0xff]  ;;  %vm14087_vm12 = vcmp.eq.s32.totalorder %v10984_v35, 1 }
 0x2ba   : > { %7298 = vmatmul.msk.bf16.gmra.mxu0 %vm965_vm7, %v3481_v14  ;;  %v4282_v14 = vsel %vm14003_vm3, %v7733_v25, 0.0  ;;  %v3893_v12 = vpack.c.bf16 %v3864_v28, %v3863_v1 }
 0x2bb   : > { %3825 = vperm.xlu0 %7658, %v3730_v60   ;;  %v4311_v60 = vpack.c.bf16 %v4282_v14, %v4281_v51  ;;  %v3268_v51 = vld [vmem:[#allocation2 + $0xbf] sm:$0xff]  ;;  %v3267_v14 = vld [vmem:[#allocation2 + $0xb7] sm:$0xff] }
 0x2bc   : > { %v2766_v24 = vpop.f32.mrf.mxu2  ;;  %v11133_v33 = vpop.permute.xlu2 %3792 }
 0x2bd   : > { %v11137_v20 = vadd.f32 %v2766_v24, %v2592_v58  ;;  %v11139_v49 = vpop.permute.xlu0 %3783  ;;  %v2543_v15 = vpop.f32.mrf.mxu1  ;;  %v14730_v58 = vld [vmem:[#allocation110_spill] sm:$0xff]  ;;  %v14731_v24 = vld [vmem:[#allocation112_spill] sm:$0xff] }
 0x2be   : > { %14726 = vst [vmem:[#allocation242_spill] sm:$0xff] %v11139_v49  ;;  %v3177_v9 = vpop.f32.mrf.mxu3  ;;  %v2593_v54 = vadd.f32 %v2543_v15, %v14727_v2  ;;  %v14732_v17 = vpack.c.bf16 %v14730_v58, %v14731_v24  ;;  %v11156_v62 = vpop.f32.mrf.mxu0  ;;  %v14736_v2 = vld [vmem:[#allocation162_spill] sm:$0xff]  ;;  %v14737_v24 = vld [vmem:[#allocation205_spill] sm:$0xff] }
 0x2bf   : > { %14725 = vst [vmem:[#allocation241_spill] sm:$0xff] %v11137_v20  ;;  %v11145_v27 = vadd.f32 %v3177_v9, %v11039_v5  ;;  %vm14016_vm0 = vcmp.eq.s32.totalorder %v14737_v24, 1  ;;  %v14741_v20 = vld [vmem:[#allocation199_spill] sm:$0xff] }
 0x2c0   : > { %7314 = vmatmul.msk.bf16.gmra.mxu1 %vm965_vm7, %v3893_v12  ;;  %v11149_v25 = vpop.permute.xlu1 %3371  ;;  %vm14019_vm15 = vcmp.eq.s32.totalorder %v14741_v20, 1 }
 0x2c1   : > { %14728 = vst [vmem:[#allocation159_spill] sm:$0xff] %v11145_v27  ;;  %7336 = vmatmul.msk.bf16.gmra.mxu2 %vm965_vm7, %v4311_v60  ;;  %vm14005_vm5 = vcmp.eq.s32.totalorder %v11149_v25, 1  ;;  %v4092_v27 = vld [vmem:[#allocation2 + $0x61] sm:$0xff] }
 0x2c2   : > { %14729 = vst [vmem:[#allocation243_spill] sm:$0xff] %v11149_v25  ;;  %7362 = vmatmul.msk.bf16.vlgmr.msra.gmra.mxu3 %vm4571_vm2, %v14732_v17  ;;  %v3460_v12 = vsel %vm14005_vm5, %v3268_v51, 0.0  ;;  %v14739_v51 = vld [vmem:[#allocation208_spill] sm:$0xff] }
 0x2c3   : > { %vm14021_vm1 = vcmp.eq.s32.totalorder %v14739_v51, 1 }
 0x2c4   : > { %v2769_v15 = vpop.f32.mrf.mxu2  ;;  %v11162_v9 = vpop.permute.xlu2 %4219 }
 0x2c5   : > { %v11158_v5 = vadd.f32 %v2769_v15, %v2593_v54  ;;  %14733 = vst [vmem:[#allocation110_spill] sm:$0xff] %v11162_v9  ;;  %v11164_v28 = vpop.permute.xlu0 %3368  ;;  %v2545_v1 = vpop.f32.mrf.mxu1  ;;  %v14738_v15 = vld [vmem:[#allocation207_spill] sm:$0xff] }
 0x2c6   : > { %14734 = vst [vmem:[#allocation112_spill] sm:$0xff] %v11164_v28  ;;  %vm14017_vm3 = vcmp.eq.s32.totalorder %v11164_v28, 1  ;;  %v11167_v17 = vpop.f32.mrf.mxu3  ;;  %v2594_v58 = vadd.f32 %v2545_v1, %v14736_v2  ;;  %vm14015_vm5 = vcmp.eq.s32.totalorder %v14738_v15, 1  ;;  %v4284_v28 = vsel %vm14016_vm0, %v4092_v27, 0.0  ;;  %v7736_v1 = vld [vmem:[#allocation2 + $0x58] sm:$0xff] }
 0x2c7   : > { %14735 = vst [vmem:[#allocation244_spill] sm:$0xff] %v11167_v17  ;;  %v3459_v60 = vsel %vm14017_vm3, %v3267_v14, 0.0  ;;  %v7735_v14 = vld [vmem:[#allocation2 + $0x59] sm:$0xff]  ;;  %vm14027_vm3 = vcmp.eq.s32.totalorder %v10594_v57, 1 }
 0x2c8   : > { %v3482_v54 = vpack.c.bf16 %v3460_v12, %v3459_v60  ;;  %v11175_v25 = vpop.permute.xlu1 %4210  ;;  %v4283_v12 = vsel %vm14015_vm5, %v7735_v14, 0.0  ;;  %v3865_v60 = vsel %vm14021_vm1, %v7736_v1, 0.0  ;;  %v14744_v14 = vld [vmem:[#allocation166_spill] sm:$0xff]  ;;  %v11197_v1 = vpop.f32.mrf.mxu0 }
 0x2c9   : > { %14740 = vst [vmem:[#allocation162_spill] sm:$0xff] %v11175_v25  ;;  %v4312_v27 = vpack.c.bf16 %v4284_v28, %v4283_v12  ;;  %v3270_v28 = vld [vmem:[#allocation2 + $0xcf] sm:$0xff] }
 0x2ca   : > { %7299 = vmatmul.msk.bf16.gmra.mxu0 %vm965_vm7, %v3482_v54  ;;  %v7737_v54 = vld [vmem:[#allocation2 + $0x60] sm:$0xff] }
 0x2cb   : > { %v3866_v18 = vsel %vm14019_vm15, %v7737_v54, 0.0  ;;  %v14749_v54 = vld [vmem:[#allocation170_spill] sm:$0xff]  ;;  %vm14033_vm15 = vcmp.eq.s32.totalorder %v10656_v13, 1  ;;  %v7744_v13 = vld [vmem:[#allocation2 + $0x78] sm:$0xff] }
 0x2cc   : > { %v2771_v2 = vpop.f32.mrf.mxu2  ;;  %v3894_v63 = vpack.c.bf16 %v3866_v18, %v3865_v60  ;;  %v11191_v40 = vpop.permute.xlu2 %3798 }
 0x2cd   : > { %v11185_v17 = vadd.f32 %v2771_v2, %v2594_v58  ;;  %v11187_v59 = vpop.permute.xlu0 %3789  ;;  %v2548_v26 = vpop.f32.mrf.mxu1  ;;  %14743 = vst [vmem:[#allocation246_spill] sm:$0xff] %v11191_v40 }
 0x2ce   : > { %v3182_v24 = vpop.f32.mrf.mxu3  ;;  %v2595_v15 = vadd.f32 %v2548_v26, %v14744_v14 }
 0x2cf   : > { %14742 = vst [vmem:[#allocation245_spill] sm:$0xff] %v11185_v17  ;;  %v11195_v51 = vadd.f32 %v3182_v24, %v11105_v19  ;;  %v3269_v19 = vld [vmem:[#allocation2 + $0xc7] sm:$0xff] }
 0x2d0   : > { %7315 = vmatmul.msk.bf16.gmra.mxu1 %vm965_vm7, %v3894_v63  ;;  %v11201_v58 = vpop.permute.xlu1 %3377  ;;  %v11216_v14 = vpop.f32.mrf.mxu0 }
 0x2d1   : > { %14745 = vst [vmem:[#allocation166_spill] sm:$0xff] %v11195_v51  ;;  %7337 = vmatmul.msk.bf16.gmra.mxu2 %vm965_vm7, %v4312_v27  ;;  %vm14018_vm5 = vcmp.eq.s32.totalorder %v11201_v58, 1 }
 0x2d2   : > { %14746 = vst [vmem:[#allocation247_spill] sm:$0xff] %v11201_v58  ;;  %v3462_v26 = vsel %vm14018_vm5, %v3270_v28, 0.0  ;;  %vm14031_vm5 = vcmp.eq.s32.totalorder %v10634_v31, 1  ;;  %v14752_v58 = vld [vmem:[#allocation203_spill] sm:$0xff] }
 0x2d3   : > { %vm14028_vm1 = vcmp.eq.s32.totalorder %v14752_v58, 1 }
 0x2d4   : > { %v2774_v2 = vpop.f32.mrf.mxu2 }
 0x2d5   : > { %v11204_v18 = vadd.f32 %v2774_v2, %v2595_v15  ;;  %v11208_v12 = vpop.permute.xlu0 %3374  ;;  %v2550_v24 = vpop.f32.mrf.mxu1 }
 0x2d6   : > { %14747 = vst [vmem:[#allocation248_spill] sm:$0xff] %v11208_v12  ;;  %vm14030_vm0 = vcmp.eq.s32.totalorder %v11208_v12, 1  ;;  %v11211_v63 = vpop.f32.mrf.mxu3  ;;  %v2596_v27 = vadd.f32 %v2550_v24, %v14749_v54  ;;  %v11221_v2 = vpop.permute.xlu2 %4225  ;;  %v7738_v54 = vld [vmem:[#allocation2 + $0x70] sm:$0xff] }
 0x2d7   : > { %14748 = vst [vmem:[#allocation249_spill] sm:$0xff] %v11211_v63  ;;  %v3461_v60 = vsel %vm14030_vm0, %v3269_v19, 0.0  ;;  %v4094_v19 = vld [vmem:[#allocation2 + $0x71] sm:$0xff]  ;;  %vm14042_vm0 = vcmp.eq.s32.totalorder %v10671_v47, 1 }
 0x2d8   : > { %v3483_v15 = vpack.c.bf16 %v3462_v26, %v3461_v60  ;;  %14750 = vst [vmem:[#allocation170_spill] sm:$0xff] %v11221_v2  ;;  %v11223_v28 = vpop.permute.xlu1 %4216  ;;  %v4286_v24 = vsel %vm14027_vm3, %v4094_v19, 0.0  ;;  %v3868_v26 = vsel %vm14031_vm5, %v7738_v54, 0.0  ;;  %v7739_v60 = vld [vmem:[#allocation2 + $0x68] sm:$0xff]  ;;  %vm14046_vm5 = vcmp.eq.s32.totalorder %v10796_v43, 1 }
 0x2d9   : > { %14751 = vst [vmem:[#allocation250_spill] sm:$0xff] %v11223_v28  ;;  %v3867_v12 = vsel %vm14033_vm15, %v7739_v60, 0.0 }
 0x2da   : > { %7300 = vmatmul.msk.bf16.gmra.mxu0 %vm965_vm7, %v3483_v15  ;;  %v7740_v15 = vld [vmem:[#allocation2 + $0x69] sm:$0xff]  ;;  %v3895_v7 = vpack.c.bf16 %v3868_v26, %v3867_v12 }
 0x2db   : > { %v4285_v20 = vsel %vm14028_vm1, %v7740_v15, 0.0  ;;  %v14760_v26 = vld [vmem:[#allocation178_spill] sm:$0xff] }
 0x2dc   : > { %v2776_v17 = vpop.f32.mrf.mxu2  ;;  %v4313_v19 = vpack.c.bf16 %v4286_v24, %v4285_v20  ;;  %v3272_v20 = vld [vmem:[#allocation2 + $0xdf] sm:$0xff] }
 0x2dd   : > { %v11233_v63 = vadd.f32 %v2776_v17, %v2596_v27  ;;  %v11235_v51 = vpop.permute.xlu0 %3795  ;;  %v2553_v6 = vpop.f32.mrf.mxu1 }
 0x2de   : > { %v3187_v57 = vpop.f32.mrf.mxu3  ;;  %v2597_v31 = vadd.f32 %v2553_v6, %v14754_v3  ;;  %v11247_v27 = vpop.f32.mrf.mxu0 }
 0x2df   : > { %14753 = vst [vmem:[#allocation251_spill] sm:$0xff] %v11233_v63  ;;  %v11241_v54 = vadd.f32 %v3187_v57, %v11158_v5  ;;  %v11250_v60 = vpop.permute.xlu2 %3804 }
 0x2e0   : > { %7316 = vmatmul.msk.bf16.gmra.mxu1 %vm965_vm7, %v3895_v7  ;;  %v11245_v17 = vpop.permute.xlu1 %3383  ;;  %14757 = vst [vmem:[#allocation253_spill] sm:$0xff] %v11250_v60  ;;  %v3271_v7 = vld [vmem:[#allocation2 + $0xd7] sm:$0xff] }
 0x2e1   : > { %14755 = vst [vmem:[#allocation174_spill] sm:$0xff] %v11241_v54  ;;  %7338 = vmatmul.msk.bf16.gmra.mxu2 %vm965_vm7, %v4313_v19  ;;  %vm14032_vm3 = vcmp.eq.s32.totalorder %v11245_v17, 1 }
 0x2e2   : > { %14756 = vst [vmem:[#allocation252_spill] sm:$0xff] %v11245_v17  ;;  %v3464_v57 = vsel %vm14032_vm3, %v3272_v20, 0.0  ;;  %v14763_v20 = vld [vmem:[#allocation211_spill] sm:$0xff] }
 0x2e3   : > { %vm14047_vm15 = vcmp.eq.s32.totalorder %v14763_v20, 1  ;;  %v7741_v17 = vld [vmem:[#allocation2 + $0x79] sm:$0xff] }
 0x2e4   : > { %v2779_v15 = vpop.f32.mrf.mxu2 }
 0x2e5   : > { %v11252_v12 = vadd.f32 %v2779_v15, %v2597_v31  ;;  %v11256_v6 = vpop.permute.xlu0 %3380  ;;  %v2555_v3 = vpop.f32.mrf.mxu1  ;;  %v14762_v15 = vld [vmem:[#allocation11_spill] sm:$0xff] }
 0x2e6   : > { %14758 = vst [vmem:[#allocation254_spill] sm:$0xff] %v11256_v6  ;;  %vm14045_vm1 = vcmp.eq.s32.totalorder %v11256_v6, 1  ;;  %v11259_v5 = vpop.f32.mrf.mxu3  ;;  %v2598_v19 = vadd.f32 %v2555_v3, %v14760_v26  ;;  %vm14043_vm3 = vcmp.eq.s32.totalorder %v14762_v15, 1  ;;  %v4287_v6 = vsel %vm14042_vm0, %v7741_v17, 0.0  ;;  %v11275_v3 = vpop.f32.mrf.mxu0  ;;  %v4097_v15 = vld [vmem:[#allocation2 + $0x89] sm:$0xff] }
 0x2e7   : > { %14759 = vst [vmem:[#allocation255_spill] sm:$0xff] %v11259_v5  ;;  %v3463_v24 = vsel %vm14045_vm1, %v3271_v7, 0.0  ;;  %v7742_v7 = vld [vmem:[#allocation2 + $0x80] sm:$0xff]  ;;  %v11277_v26 = vpop.permute.xlu2 %4231  ;;  %v3869_v17 = vsel %vm14047_vm15, %v7744_v13, 0.0  ;;  %vm14055_vm1 = vcmp.eq.s32.totalorder %v10858_v8, 1  ;;  %vm14058_vm15 = vcmp.eq.s32.totalorder %v10748_v55, 1 }
 0x2e8   : > { %v3484_v58 = vpack.c.bf16 %v3464_v57, %v3463_v24  ;;  %v11266_v31 = vpop.permute.xlu1 %4222  ;;  %v3870_v57 = vsel %vm14046_vm5, %v7742_v7, 0.0  ;;  %14764 = vst [vmem:[#allocation256_spill] sm:$0xff] %v11275_v3  ;;  %v7743_v5 = vld [vmem:[#allocation2 + $0x81] sm:$0xff]  ;;  %v14768_v3 = vld [vmem:[#allocation182_spill] sm:$0xff]  ;;  %vm14060_vm5 = vcmp.eq.s32.totalorder %v10875_v61, 1 }
 0x2e9   : > { %14761 = vst [vmem:[#allocation178_spill] sm:$0xff] %v11266_v31  ;;  %v4288_v54 = vsel %vm14043_vm3, %v7743_v5, 0.0  ;;  %v3896_v48 = vpack.c.bf16 %v3870_v57, %v3869_v17 }
 0x2ea   : > { %7301 = vmatmul.msk.bf16.gmra.mxu0 %vm965_vm7, %v3484_v58  ;;  %14765 = vst [vmem:[#allocation257_spill] sm:$0xff] %v11277_v26  ;;  %v4314_v7 = vpack.c.bf16 %v4288_v54, %v4287_v6 }
 0x2ec   : > { %v2781_v24 = vpop.f32.mrf.mxu2 }
 0x2ed   : > { %v11279_v63 = vadd.f32 %v2781_v24, %v2598_v19  ;;  %v11281_v58 = vpop.permute.xlu0 %3801  ;;  %v2558_v47 = vpop.f32.mrf.mxu1  ;;  %v3274_v24 = vld [vmem:[#allocation2 + $0xef] sm:$0xff] }
 0x2ee   : > { %14767 = vst [vmem:[#allocation259_spill] sm:$0xff] %v11281_v58  ;;  %v3192_v43 = vpop.f32.mrf.mxu3  ;;  %v2599_v60 = vadd.f32 %v2558_v47, %v14768_v3  ;;  %v3273_v47 = vld [vmem:[#allocation2 + $0xe7] sm:$0xff] }
 0x2ef   : > { %14766 = vst [vmem:[#allocation258_spill] sm:$0xff] %v11279_v63  ;;  %v11289_v26 = vadd.f32 %v3192_v43, %v11204_v18  ;;  %v11305_v18 = vpop.f32.mrf.mxu0  ;;  %v11307_v57 = vpop.permute.xlu2 %3810 }
 0x2f0   : > { %7317 = vmatmul.msk.bf16.gmra.mxu1 %vm965_vm7, %v3896_v48  ;;  %v11293_v19 = vpop.permute.xlu1 %3389  ;;  %14773 = vst [vmem:[#allocation263_spill] sm:$0xff] %v11307_v57 }
 0x2f1   : > { %14769 = vst [vmem:[#allocation182_spill] sm:$0xff] %v11289_v26  ;;  %7339 = vmatmul.msk.bf16.gmra.mxu2 %vm965_vm7, %v4314_v7  ;;  %vm14044_vm0 = vcmp.eq.s32.totalorder %v11293_v19, 1 }
 0x2f2   : > { %14770 = vst [vmem:[#allocation260_spill] sm:$0xff] %v11293_v19  ;;  %v3466_v54 = vsel %vm14044_vm0, %v3274_v24, 0.0  ;;  %vm14056_vm0 = vcmp.eq.s32.totalorder %v10838_v50, 1  ;;  %v4098_v24 = vld [vmem:[#allocation2 + $0x91] sm:$0xff] }
 0x2f4   : > { %v2784_v5 = vpop.f32.mrf.mxu2 }
 0x2f5   : > { %v11296_v13 = vadd.f32 %v2784_v5, %v2599_v60  ;;  %v11300_v6 = vpop.permute.xlu0 %3386  ;;  %v2560_v43 = vpop.f32.mrf.mxu1  ;;  %v14774_v60 = vld [vmem:[#allocation186_spill] sm:$0xff] }
 0x2f6   : > { %14771 = vst [vmem:[#allocation261_spill] sm:$0xff] %v11300_v6  ;;  %vm14057_vm3 = vcmp.eq.s32.totalorder %v11300_v6, 1  ;;  %v11303_v48 = vpop.f32.mrf.mxu3  ;;  %v2600_v17 = vadd.f32 %v2560_v43, %v14774_v60  ;;  %v7745_v43 = vld [vmem:[#allocation2 + $0x88] sm:$0xff] }
 0x2f7   : > { %14772 = vst [vmem:[#allocation262_spill] sm:$0xff] %v11303_v48  ;;  %v3465_v3 = vsel %vm14057_vm3, %v3273_v47, 0.0  ;;  %v4290_v47 = vsel %vm14056_vm0, %v4098_v24, 0.0  ;;  %v11331_v20 = vpop.f32.mrf.mxu0  ;;  %vm14069_vm3 = vcmp.eq.s32.totalorder %v10995_v46, 1 }
 0x2f8   : > { %v3485_v7 = vpack.c.bf16 %v3466_v54, %v3465_v3  ;;  %v11315_v5 = vpop.permute.xlu1 %4228  ;;  %v4289_v54 = vsel %vm14055_vm1, %v4097_v15, 0.0  ;;  %v3871_v3 = vsel %vm14060_vm5, %v7745_v43, 0.0  ;;  %v14778_v15 = vld [vmem:[#allocation190_spill] sm:$0xff]  ;;  %v11337_v43 = vpop.permute.xlu2 %4237  ;;  %vm14070_vm5 = vcmp.eq.s32.totalorder %v10790_v45, 1 }
 0x2f9   : > { %14775 = vst [vmem:[#allocation186_spill] sm:$0xff] %v11315_v5  ;;  %v4315_v50 = vpack.c.bf16 %v4290_v47, %v4289_v54  ;;  %v3276_v47 = vld [vmem:[#allocation2 + $0xff] sm:$0xff] }
 0x2fa   : > { %7302 = vmatmul.msk.bf16.gmra.mxu0 %vm965_vm7, %v3485_v7  ;;  %v7746_v7 = vld [vmem:[#allocation2 + $0x90] sm:$0xff]  ;;  %14780 = vst [vmem:[#allocation266_spill] sm:$0xff] %v11337_v43 }
 0x2fb   : > { %v3872_v63 = vsel %vm14058_vm15, %v7746_v7, 0.0  ;;  %v14784_v7 = vld [vmem:[#allocation193_spill] sm:$0xff]  ;;  %vm14075_vm15 = vcmp.eq.s32.totalorder %v11025_v0, 1 }
 0x2fc   : > { %v2786_v60 = vpop.f32.mrf.mxu2  ;;  %v3897_v24 = vpack.c.bf16 %v3872_v63, %v3871_v3 }
 0x2fd   : > { %v11325_v6 = vadd.f32 %v2786_v60, %v2600_v17  ;;  %v11327_v19 = vpop.permute.xlu0 %3807  ;;  %v2563_v48 = vpop.f32.mrf.mxu1 }
 0x2fe   : > { %14777 = vst [vmem:[#allocation265_spill] sm:$0xff] %v11327_v19  ;;  %v3197_v26 = vpop.f32.mrf.mxu3  ;;  %v2601_v8 = vadd.f32 %v2563_v48, %v14778_v15 }
 0x2ff   : > { %14776 = vst [vmem:[#allocation264_spill] sm:$0xff] %v11325_v6  ;;  %v11335_v61 = vadd.f32 %v3197_v26, %v11252_v12  ;;  %v3275_v12 = vld [vmem:[#allocation2 + $0xf7] sm:$0xff] }
 0x300   : > { %7318 = vmatmul.msk.bf16.gmra.mxu1 %vm965_vm7, %v3897_v24  ;;  %v11341_v17 = vpop.permute.xlu1 %3395 }
 0x301   : > { %14779 = vst [vmem:[#allocation190_spill] sm:$0xff] %v11335_v61  ;;  %7340 = vmatmul.msk.bf16.gmra.mxu2 %vm965_vm7, %v4315_v50  ;;  %vm14059_vm1 = vcmp.eq.s32.totalorder %v11341_v17, 1 }
 0x302   : > { %14781 = vst [vmem:[#allocation267_spill] sm:$0xff] %v11341_v17  ;;  %v3468_v48 = vsel %vm14059_vm1, %v3276_v47, 0.0  ;;  %vm14077_vm1 = vcmp.eq.s32.totalorder %v11041_v4, 1  ;;  %v4100_v47 = vld [vmem:[#allocation2 + $0xa1] sm:$0xff]  ;;  %v11365_v17 = vpop.permute.xlu2 %3816 }
 0x303   : > { %14786 = vst [vmem:[#allocation270_spill] sm:$0xff] %v11365_v17  ;;  %v7749_v4 = vld [vmem:[#allocation2 + $0xa8] sm:$0xff] }
 0x304   : > { %v2789_v60 = vpop.f32.mrf.mxu2 }
 0x305   : > { %v11344_v63 = vadd.f32 %v2789_v60, %v2601_v8  ;;  %v11348_v54 = vpop.permute.xlu0 %3392  ;;  %v2565_v26 = vpop.f32.mrf.mxu1 }
 0x306   : > { %14782 = vst [vmem:[#allocation268_spill] sm:$0xff] %v11348_v54  ;;  %vm14074_vm0 = vcmp.eq.s32.totalorder %v11348_v54, 1  ;;  %v11351_v3 = vpop.f32.mrf.mxu3  ;;  %v2602_v24 = vadd.f32 %v2565_v26, %v14784_v7  ;;  %v11359_v8 = vpop.f32.mrf.mxu0  ;;  %v3682_v54 = vld [vmem:[#allocation2 + $0xa0] sm:$0xff] }
 0x307   : > { %14783 = vst [vmem:[#allocation269_spill] sm:$0xff] %v11351_v3  ;;  %v3467_v50 = vsel %vm14074_vm0, %v3275_v12, 0.0  ;;  %v3681_v12 = vld [vmem:[#allocation2 + $0x98] sm:$0xff]  ;;  %v3874_v26 = vsel %vm14075_vm15, %v3682_v54, 0.0  ;;  %vm14084_vm0 = vcmp.eq.s32.totalorder %v11055_v22, 1  ;;  %vm14086_vm15 = vcmp.eq.s32.totalorder %v11139_v49, 1 }
 0x308   : > { %v3486_v15 = vpack.c.bf16 %v3468_v48, %v3467_v50  ;;  %v11361_v60 = vpop.permute.xlu1 %4234  ;;  %v4292_v48 = vsel %vm14069_vm3, %v4100_v47, 0.0  ;;  %v3873_v50 = vsel %vm14077_vm1, %v3681_v12, 0.0  ;;  %v7747_v3 = vld [vmem:[#allocation2 + $0x99] sm:$0xff]  ;;  %v14789_v47 = vld [vmem:[#allocation197_spill] sm:$0xff]  ;;  %vm14085_vm1 = vcmp.eq.s32.totalorder %v10936_v37, 1 }
 0x309   : > { %14785 = vst [vmem:[#allocation193_spill] sm:$0xff] %v11361_v60  ;;  %v4291_v61 = vsel %vm14070_vm5, %v7747_v3, 0.0  ;;  %v3898_v46 = vpack.c.bf16 %v3874_v26, %v3873_v50  ;;  %v3277_v50 = vld [vmem:[#allocation2 + $0x107] sm:$0xff] }
 0x30a   : > { %7303 = vmatmul.msk.bf16.gmra.mxu0 %vm965_vm7, %v3486_v15  ;;  %v4316_v43 = vpack.c.bf16 %v4292_v48, %v4291_v61  ;;  %v7634_v61 = vld [vmem:[%s13475_s7 + $0x38] sm:$0xff]  ;;  %v11402_v3 = vpop.permute.xlu2 %4243 }
 0x30b   : > { %14792 = vst [vmem:[#allocation274_spill] sm:$0xff] %v11402_v3  ;;  %5488 = vmatpush.bf16.msrb.mxu2 %v7634_v61 }
 0x30c   : > { %v2791_v7 = vpop.f32.mrf.mxu2 }
 0x30d   : > { %v11373_v6 = vadd.f32 %v2791_v7, %v2602_v24  ;;  %v11375_v15 = vpop.permute.xlu0 %3813  ;;  %v2568_v55 = vpop.f32.mrf.mxu1 }
 0x30e   : > { %14788 = vst [vmem:[#allocation272_spill] sm:$0xff] %v11375_v15  ;;  %v3202_v17 = vpop.f32.mrf.mxu3  ;;  %v2603_v60 = vadd.f32 %v2568_v55, %v14789_v47  ;;  %v7628_v55 = vld [vmem:[%s13475_s7 + $0x8] sm:$0xff] }
 0x30f   : > { %14787 = vst [vmem:[#allocation271_spill] sm:$0xff] %v11373_v6  ;;  %v11381_v54 = vadd.f32 %v3202_v17, %v11296_v13  ;;  %v11383_v0 = vpop.f32.mrf.mxu0  ;;  %v7636_v13 = vld [vmem:[%s13475_s7 + $0x48] sm:$0xff]  ;;  %4988 = vmatpush.bf16.msrb.mxu0 %v7628_v55  ;;  %v6666_v6 = vld [vmem:[#allocation3 + $0x121] sm:$0xff]  ;;  %v7627_v55 = vld [vmem:[%s13475_s7] sm:$0xff] }
 0x310   : > { %7319 = vmatmul.msk.bf16.gmra.mxu1 %vm965_vm7, %v3898_v46  ;;  %v11387_v24 = vpop.permute.xlu1 %3401  ;;  %v3278_v46 = vld [vmem:[#allocation2 + $0x10f] sm:$0xff]  ;;  %5722 = vmatpush.bf16.msrb.mxu3 %v7636_v13 }
 0x311   : > { %14790 = vst [vmem:[#allocation197_spill] sm:$0xff] %v11381_v54  ;;  %7341 = vmatmul.msk.bf16.gmra.mxu2 %vm965_vm7, %v4316_v43  ;;  %vm14072_vm3 = vcmp.eq.s32.totalorder %v11387_v24, 1  ;;  %v7632_v43 = vld [vmem:[%s13475_s7 + $0x28] sm:$0xff]  ;;  %v3684_v13 = vld [vmem:[#allocation2 + $0xb0] sm:$0xff] }
 0x312   : > { %14791 = vst [vmem:[#allocation273_spill] sm:$0xff] %v11387_v24  ;;  %v3470_v48 = vsel %vm14072_vm3, %v3278_v46, 0.0  ;;  %5222 = vmatpush.bf16.msrb.mxu1 %v7632_v43  ;;  %vm14089_vm3 = vcmp.eq.s32.totalorder %v11402_v3, 1  ;;  %v6665_v24 = vld [vmem:[#allocation3 + $0x119] sm:$0xff]  ;;  %v7748_v54 = vld [vmem:[#allocation2 + $0xb1] sm:$0xff] }
 0x313   : > { %v11430_v43 = vsel %vm14089_vm3, %v6666_v6, 0.0  ;;  %4989 = vmatpush.bf16.msrb.mxu0 %v7627_v55  ;;  %v3875_v55 = vsel %vm14087_vm12, %v7749_v4, 0.0  ;;  %vm14099_vm12 = vcmp.eq.s32.totalorder %v11187_v59, 1  ;;  %vm14100_vm3 = vcmp.eq.s32.totalorder %v11069_v53, 1 }
 0x314   : > { %v2794_v17 = vpop.f32.mrf.mxu2 }
 0x315   : > { %v11404_v12 = vadd.f32 %v2794_v17, %v2603_v60  ;;  %v11408_v26 = vpop.permute.xlu0 %3398  ;;  %v2570_v7 = vpop.f32.mrf.mxu1  ;;  %v14795_v60 = vld [vmem:[#allocation201_spill] sm:$0xff] }
 0x316   : > { %14793 = vst [vmem:[#allocation275_spill] sm:$0xff] %v11408_v26  ;;  %vm14076_vm5 = vcmp.eq.s32.totalorder %v11408_v26, 1  ;;  %v11411_v47 = vpop.f32.mrf.mxu3  ;;  %v2604_v17 = vadd.f32 %v2570_v7, %v14795_v60  ;;  %v3876_v60 = vsel %vm14086_vm15, %v3684_v13, 0.0  ;;  %vm14094_vm15 = vcmp.eq.s32.totalorder %v11122_v39, 1  ;;  %v6400_v26 = vld [vmem:[#allocation3 + $0x120] sm:$0xff]  ;;  %v7750_v39 = vld [vmem:[#allocation2 + $0xb8] sm:$0xff] }
 0x317   : > { %14794 = vst [vmem:[#allocation276_spill] sm:$0xff] %v11411_v47  ;;  %v3469_v45 = vsel %vm14076_vm5, %v3277_v50, 0.0  ;;  %v3899_v13 = vpack.c.bf16 %v3876_v60, %v3875_v55 }
 0x318   : > { %v3487_v46 = vpack.c.bf16 %v3470_v48, %v3469_v45  ;;  %v11419_v61 = vpop.permute.xlu1 %4240  ;;  %v4101_v45 = vld [vmem:[#allocation2 + $0xa9] sm:$0xff]  ;;  %14796 = vst [vmem:[#allocation201_spill] sm:$0xff] %v11430_v43  ;;  %v11432_v48 = vpop.f32.mrf.mxu0 }
 0x319   : > { %vm4275_vm5 = vcmp.eq.s32.totalorder %v11419_v61, 1  ;;  %v4293_v7 = vsel %vm14084_vm0, %v4101_v45, 0.0 }
 0x31a   : > { %7304 = vmatmul.msk.bf16.gmra.mxu0 %vm965_vm7, %v3487_v46  ;;  %v11436_v50 = vsel %vm4275_vm5, %v6665_v24, 0.0  ;;  %v4294_v24 = vsel %vm14085_vm1, %v7748_v54, 0.0  ;;  %v3280_v54 = vld [vmem:[#allocation2 + $0x11f] sm:$0xff] }
 0x31b   : > { %14797 = vst [vmem:[#allocation277_spill] sm:$0xff] %v11436_v50  ;;  %v4317_v49 = vpack.c.bf16 %v4294_v24, %v4293_v7  ;;  %v11465_v7 = vld [vmem:[%s13474_s6] ss:$0 sm:$0xff] }
 0x31c   : > { %v2796_v46 = vpop.f32.mrf.mxu2 }
 0x31d   : > { %v11444_v47 = vadd.f32 %v2796_v46, %v2604_v17  ;;  %v11446_v6 = vpop.permute.xlu0 %3819  ;;  %v3973_v22 = vpop.f32.mrf.mxu1  ;;  %v3635_v17 = vadd.f32 %v10991_v44, %v10615_v52 }
 0x31e   : > { %14799 = vst [vmem:[#allocation279_spill] sm:$0xff] %v11446_v6  ;;  %v3207_v45 = vpop.f32.mrf.mxu3 }
 0x31f   : > { %14798 = vst [vmem:[#allocation278_spill] sm:$0xff] %v11444_v47  ;;  %v11453_v3 = vadd.f32 %v3207_v45, %v11344_v63  ;;  %v4053_v4 = vadd.f32 %v3973_v22, %v3635_v17  ;;  %v3636_v17 = vadd.f32 %v11045_v16, %v10661_v42  ;;  %v4104_v42 = vld [vmem:[#allocation2 + $0xc1] sm:$0xff] }
 0x320   : > { %7320 = vmatmul.msk.bf16.gmra.mxu1 %vm965_vm7, %v3899_v13  ;;  %v11459_v46 = vpop.permute.xlu1 %3407  ;;  %v11467_v60 = vpop.f32.mrf.mxu0  ;;  %v7759_v47 = vld [vmem:[#allocation2 + $0xe8] sm:$0xff] }
 0x321   : > { %14800 = vst [vmem:[#allocation280_spill] sm:$0xff] %v11453_v3  ;;  %7342 = vmatmul.msk.bf16.gmra.mxu2 %vm965_vm7, %v4317_v49  ;;  %vm14088_vm0 = vcmp.eq.s32.totalorder %v11459_v46, 1  ;;  %v3279_v49 = vld [vmem:[#allocation2 + $0x117] sm:$0xff] }
 0x322   : > { %14801 = vst [vmem:[#allocation281_spill] sm:$0xff] %v11459_v46  ;;  %v3472_v52 = vsel %vm14088_vm0, %v3280_v54, 0.0  ;;  %v11481_v54 = vpop.permute.xlu2 %3822  ;;  %vm14098_vm0 = vcmp.eq.s32.totalorder %v11032_v36, 1  ;;  %v7753_v46 = vld [vmem:[#allocation2 + $0xc8] sm:$0xff]  ;;  %v14912_v3 = vld [vmem:[#allocation199_spill] sm:$0xff] }
 0x324   : > { %v4391_v63 = vpop.f32.mrf.mxu2 }
 0x325   : > { %v4471_v24 = vadd.f32 %v4391_v63, %v4053_v4  ;;  %v11471_v44 = vpop.permute.xlu0 %3404  ;;  %v3975_v55 = vpop.f32.mrf.mxu1  ;;  %v4103_v63 = vld [vmem:[#allocation2 + $0xb9] sm:$0xff] }
 0x326   : > { %14802 = vst [vmem:[#allocation282_spill] sm:$0xff] %v11471_v44  ;;  %vm14090_vm1 = vcmp.eq.s32.totalorder %v11471_v44, 1  ;;  %v11494_v50 = vpop.f32.mrf.mxu3 }
 0x327   : > { %v4507_v22 = vadd.f32 %v11465_v7, %v4471_v24  ;;  %v3471_v45 = vsel %vm14090_vm1, %v3279_v49, 0.0  ;;  %v4295_v24 = vsel %vm14094_vm15, %v4103_v63, 0.0  ;;  %v3686_v49 = vld [vmem:[#allocation2 + $0xc0] sm:$0xff]  ;;  %vm14101_vm1 = vcmp.eq.s32.totalorder %v11481_v54, 1  ;;  %14803 = vst [vmem:[#allocation283_spill] sm:$0xff] %v11494_v50  ;;  %v7764_v50 = vld [vmem:[#allocation2 + $0x109] sm:$0xff] }
 0x328   : > { %v3488_v13 = vpack.c.bf16 %v3472_v52, %v3471_v45  ;;  %v4054_v52 = vadd.f32 %v3975_v55, %v3636_v17  ;;  %v3878_v16 = vsel %vm14099_vm12, %v3686_v49, 0.0  ;;  %v6399_v45 = vld [vmem:[#allocation3 + $0x118] sm:$0xff]  ;;  %v3877_v55 = vsel %vm14100_vm3, %v7750_v39, 0.0  ;;  %v11505_v36 = vpop.f32.mrf.mxu0 }
 0x329   : > { %v4539_v4 = vmax.f32 %v4507_v22, 0.0  ;;  %v3900_v49 = vpack.c.bf16 %v3878_v16, %v3877_v55  ;;  %v11503_v37 = vsel %vm14101_vm1, %v6399_v45, 0.0  ;;  %vm14110_vm12 = vcmp.eq.s32.totalorder %v11235_v51, 1 }
 0x32a   : > { %7305 = vmatmul.msk.bf16.gmra.mxu0 %vm965_vm7, %v3488_v13  ;;  %v4296_v13 = vsel %vm14098_vm0, %v4104_v42, 0.0  ;;  %14804 = vst [vmem:[#allocation284_spill] sm:$0xff] %v11503_v37  ;;  %vm14106_vm0 = vcmp.eq.s32.totalorder %v11175_v25, 1  ;;  %vm14107_vm3 = vcmp.eq.s32.totalorder %v11103_v32, 1  ;;  %vm3847_vm1 = vcmp.eq.s32.totalorder %v11133_v33, 1 }
 0x32b   : > { %4572 = vst.msk [vmem:[#allocation3 + $0x18] sm:$0xff] %vm4571_vm2, %v4539_v4  ;;  %v4318_v17 = vpack.c.bf16 %v4296_v13, %v4295_v24  ;;  %v3637_v24 = vadd.f32 %v11095_v34, %v10708_v56 }
 0x32c   : > { %v4393_v22 = vpop.f32.mrf.mxu2 }
 0x32d   : > { %v4472_v43 = vadd.f32 %v4393_v22, %v4054_v52  ;;  %v11496_v63 = vpop.permute.xlu0 %3825  ;;  %v3978_v4 = vpop.f32.mrf.mxu1 }
 0x32e   : > { %vm3858_vm15 = vcmp.eq.s32.totalorder %v11496_v63, 1  ;;  %v4055_v16 = vadd.f32 %v3978_v4, %v3637_v24  ;;  %v14808_v4 = vld [vmem:[#allocation133_spill] sm:$0xff] }
 0x32f   : > { %v4508_v42 = vadd.f32 %v11465_v7, %v4472_v43  ;;  %v11510_v52 = vsel %vm3858_vm15, %v6400_v26, 0.0 }
 0x330   : > { %14805 = vst [vmem:[#allocation285_spill] sm:$0xff] %v11510_v52  ;;  %7321 = vmatmul.msk.bf16.gmra.mxu1 %vm965_vm7, %v3900_v49  ;;  %v3638_v49 = vadd.f32 %v11129_v41, %v10765_v21  ;;  %v3688_v21 = vld [vmem:[#allocation2 + $0xd0] sm:$0xff] }
 0x331   : > { %v4540_v22 = vmax.f32 %v4508_v42, 0.0  ;;  %7343 = vmatmul.msk.bf16.gmra.mxu2 %vm965_vm7, %v4318_v17 }
 0x332   : > { %v4690_v56 = vld [vmem:[#allocation3 + $0x18] sm:$0xff] }
 0x333   : > { %4573 = vst.msk [vmem:[#allocation3 + $0x20] sm:$0xff] %vm4571_vm2, %v4540_v22  ;;  %v4606_v34 = vld [vmem:[#allocation3 + $0x17] sm:$0xff]  ;;  %v7752_v22 = vld [vmem:[#allocation2 + $0xd1] sm:$0xff] }
 0x334   : > { %v4396_v45 = vpop.f32.mrf.mxu2  ;;  %v11542_v52 = vsel %vm2347_vm4, %v4606_v34, 0.0  ;;  %vm14113_vm4 = vcmp.eq.s32.totalorder %v11223_v28, 1  ;;  %v7755_v28 = vld [vmem:[#allocation2 + $0xd8] sm:$0xff] }
 0x335   : > { %v4473_v43 = vadd.f32 %v4396_v45, %v4055_v16  ;;  %v3212_v13 = vpop.f32.mrf.mxu3  ;;  %v3980_v55 = vpop.f32.mrf.mxu1  ;;  %v4722_v16 = vsel %vm1402_vm13, %v4690_v56, 0.0 }
 0x336   : > { %v11520_v26 = vadd.f32 %v3212_v13, %v11404_v12  ;;  %v14807_v12 = vld [vmem:[#allocation131_spill] sm:$0xff]  ;;  %v4056_v41 = vadd.f32 %v3980_v55, %v3638_v49  ;;  %v3879_v13 = vsel %vm3847_vm1, %v7753_v46, 0.0 }
 0x337   : > { %v4509_v39 = vadd.f32 %v11465_v7, %v4473_v43  ;;  %v11523_v37 = vpop.f32.mrf.mxu0  ;;  %v14809_v42 = vpack.c.bf16 %v14807_v12, %v14808_v4  ;;  %v7751_v4 = vld [vmem:[#allocation2 + $0xc9] sm:$0xff]  ;;  %v4298_v43 = vsel %vm14107_vm3, %v7752_v22, 0.0 }
 0x338   : > { %14806 = vst [vmem:[#allocation286_spill] sm:$0xff] %v11520_v26  ;;  %v4297_v56 = vsel %vm14106_vm0, %v7751_v4, 0.0  ;;  %v7760_v26 = vld [vmem:[#allocation2 + $0xf9] sm:$0xff] }
 0x339   : > { %v4541_v17 = vmax.f32 %v4509_v39, 0.0  ;;  %v4319_v4 = vpack.c.bf16 %v4298_v43, %v4297_v56  ;;  %v14819_v43 = vld [vmem:[#allocation10_spill] sm:$0xff] }
 0x33a   : > { %7386 = vmatmul.msk.bf16.vlgmr.msrb.gmra.mxu0 %vm4571_vm2, %v14809_v42  ;;  %v4691_v24 = vld [vmem:[#allocation3 + $0x20] sm:$0xff]  ;;  %v3880_v42 = vsel %vm14110_vm12, %v3688_v21, 0.0 }
 0x33b   : > { %v4607_v45 = vld [vmem:[#allocation3 + $0x1f] sm:$0xff]  ;;  %4574 = vst.msk [vmem:[#allocation3 + $0x28] sm:$0xff] %vm4571_vm2, %v4541_v17  ;;  %v4723_v39 = vsel %vm1403_vm10, %v4691_v24, 0.0  ;;  %v3901_v25 = vpack.c.bf16 %v3880_v42, %v3879_v13  ;;  %vm14820_vm10 = vcmp.eq.s32.totalorder %v14819_v43, 1 }
 0x33c   : > { %v11546_v12 = vsel %vm2348_vm11, %v4607_v45, 0.0  ;;  %v4398_v17 = vpop.f32.mrf.mxu2  ;;  %v4753_v55 = vpack.c.bf16 %v4723_v39, %v4722_v16  ;;  %v4639_v46 = vsel %vm14820_vm10, %v4607_v45, 0.0  ;;  %vm14117_vm10 = vcmp.eq.s32.totalorder %v11191_v40, 1  ;;  %v3697_v40 = vld [vmem:[#allocation2 + $0x118] sm:$0xff] }
 0x33d   : > { %v4474_v24 = vadd.f32 %v4398_v17, %v4056_v41  ;;  %v3983_v44 = vpop.f32.mrf.mxu1  ;;  %v3639_v41 = vadd.f32 %v11156_v62, %v10817_v38  ;;  %v11566_v17 = vld [vmem:[#allocation3 + $0x19] sm:$0xff] }
 0x33e   : > { %7363 = vmatmul.msk.bf16.gmra.mxu3 %vm4571_vm2, %v4753_v55  ;;  %v14816_v38 = vld [vmem:[#allocation109_spill] sm:$0xff] }
 0x33f   : > { %v4510_v21 = vadd.f32 %v11465_v7, %v4474_v24  ;;  %v11560_v16 = vpop.f32.mrf.mxu0  ;;  %v4057_v56 = vadd.f32 %v3983_v44, %v3639_v41  ;;  %v11574_v24 = vsel %vm2991_vm9, %v11566_v17, 0.0  ;;  %vm14817_vm13 = vcmp.eq.s32.totalorder %v14816_v38, 1  ;;  %v14821_v41 = vld [vmem:[#allocation139_spill] sm:$0xff] }
 0x340   : > { %7322 = vmatmul.msk.bf16.gmra.mxu1 %vm965_vm7, %v3901_v25  ;;  %14815 = vst [vmem:[#allocation131_spill] sm:$0xff] %v11574_v24  ;;  %vm14822_vm11 = vcmp.eq.s32.totalorder %v14821_v41, 1  ;;  %vm14115_vm9 = vcmp.eq.s32.totalorder %v11281_v58, 1  ;;  %v14829_v24 = vld [vmem:[#allocation86_spill] sm:$0xff] }
 0x341   : > { %v4542_v39 = vmax.f32 %v4510_v21, 0.0  ;;  %7344 = vmatmul.msk.bf16.gmra.mxu2 %vm965_vm7, %v4319_v4  ;;  %vm14830_vm12 = vcmp.eq.s32.totalorder %v14829_v24, 1 }
 0x342   : > { %v11568_v22 = vld [vmem:[#allocation3 + $0x21] sm:$0xff] }
 0x343   : > { %4575 = vst.msk [vmem:[#allocation3 + $0x30] sm:$0xff] %vm4571_vm2, %v4542_v39  ;;  %v11579_v62 = vsel %vm14817_vm13, %v11568_v22, 0.0  ;;  %v4638_v39 = vsel %vm14822_vm11, %v4606_v34, 0.0  ;;  %v4692_v55 = vld [vmem:[#allocation3 + $0x28] sm:$0xff]  ;;  %vm14114_vm13 = vcmp.eq.s32.totalorder %v11162_v9, 1  ;;  %v14823_v34 = vld [vmem:[#allocation126_spill] sm:$0xff] }
 0x344   : > { %v4401_v42 = vpop.f32.mrf.mxu2  ;;  %14818 = vst [vmem:[#allocation133_spill] sm:$0xff] %v11579_v62  ;;  %v4669_v49 = vpack.c.bf16 %v4639_v46, %v4638_v39  ;;  %v4608_v38 = vld [vmem:[#allocation3 + $0x27] sm:$0xff]  ;;  %vm14824_vm11 = vcmp.eq.s32.totalorder %v14823_v34, 1  ;;  %v3690_v39 = vld [vmem:[#allocation2 + $0xe0] sm:$0xff] }
 0x345   : > { %v4475_v25 = vadd.f32 %v4401_v42, %v4057_v56  ;;  %v3985_v4 = vpop.f32.mrf.mxu1  ;;  %v3640_v56 = vadd.f32 %v11197_v1, %v10863_v29  ;;  %v4107_v42 = vld [vmem:[#allocation2 + $0xd9] sm:$0xff]  ;;  %v4724_v43 = vsel %vm14824_vm11, %v4692_v55, 0.0  ;;  %v3882_v34 = vsel %vm14115_vm9, %v3690_v39, 0.0 }
 0x346   : > { %v5605_v41 = vld [vmem:[#allocation3 + $0x28] sm:$0xff]  ;;  %v14825_v1 = vld [vmem:[#allocation124_spill] sm:$0xff]  ;;  %v4299_v55 = vsel %vm14113_vm4, %v4107_v42, 0.0 }
 0x347   : > { %v4511_v44 = vadd.f32 %v11465_v7, %v4475_v25  ;;  %v11586_v21 = vpop.f32.mrf.mxu0  ;;  %v4058_v29 = vadd.f32 %v3985_v4, %v3640_v56  ;;  %vm14826_vm0 = vcmp.eq.s32.totalorder %v14825_v1, 1  ;;  %v14852_v9 = vld [vmem:[#allocation47_spill] sm:$0xff] }
 0x349   : > { %v4543_v45 = vmax.f32 %v4511_v44, 0.0  ;;  %v14827_v44 = vld [vmem:[#allocation51_spill] sm:$0xff] }
 0x34a   : > { %7387 = vmatmul.msk.bf16.gmra.mxu0 %vm4571_vm2, %v4669_v49  ;;  %v4693_v25 = vld [vmem:[#allocation3 + $0x30] sm:$0xff]  ;;  %vm14828_vm3 = vcmp.eq.s32.totalorder %v14827_v44, 1 }
 0x34b   : > { %v4609_v46 = vld [vmem:[#allocation3 + $0x2f] sm:$0xff]  ;;  %4576 = vst.msk [vmem:[#allocation3 + $0x38] sm:$0xff] %vm4571_vm2, %v4543_v45  ;;  %v4725_v13 = vsel %vm14826_vm0, %v4693_v25, 0.0  ;;  %v11604_v32 = vsel %vm14828_vm3, %v4608_v38, 0.0  ;;  %vm14831_vm3 = vcmp.eq.s32.totalorder %v14684_v30, 1 }
 0x34c   : > { %v11608_v49 = vsel %vm14830_vm12, %v4609_v46, 0.0  ;;  %v5606_v62 = vld [vmem:[#allocation3 + $0x30] sm:$0xff]  ;;  %v4403_v45 = vpop.f32.mrf.mxu2  ;;  %v4754_v4 = vpack.c.bf16 %v4725_v13, %v4724_v43  ;;  %v11618_v1 = vsel %vm14831_vm3, %v5605_v41, 0.0  ;;  %vm14833_vm12 = vcmp.eq.s32.totalorder %v14689_v11, 1 }
 0x34d   : > { %v4476_v25 = vadd.f32 %v4403_v45, %v4058_v29  ;;  %14832 = vst [vmem:[#allocation119_spill] sm:$0xff] %v11618_v1  ;;  %v11622_v24 = vsel %vm14833_vm12, %v5606_v62, 0.0  ;;  %v7754_v44 = vld [vmem:[#allocation2 + $0xe1] sm:$0xff]  ;;  %v3881_v13 = vsel %vm14117_vm10, %v7755_v28, 0.0  ;;  %v3988_v43 = vpop.f32.mrf.mxu1  ;;  %v3641_v29 = vadd.f32 %v11216_v14, %v10712_v10  ;;  %v11638_v28 = vld [vmem:[#allocation3 + $0x29] sm:$0xff]  ;;  %v14838_v10 = vld [vmem:[#allocation118_spill] sm:$0xff] }
 0x34e   : > { %14834 = vst [vmem:[#allocation117_spill] sm:$0xff] %v11622_v24  ;;  %v4300_v42 = vsel %vm14114_vm13, %v7754_v44, 0.0  ;;  %7364 = vmatmul.msk.bf16.gmra.mxu3 %vm4571_vm2, %v4754_v4  ;;  %v3902_v39 = vpack.c.bf16 %v3882_v34, %v3881_v13  ;;  %vm14839_vm11 = vcmp.eq.s32.totalorder %v14838_v10, 1  ;;  %v14841_v13 = vld [vmem:[#allocation144_spill] sm:$0xff]  ;;  %vm14853_vm10 = vcmp.eq.s32.totalorder %v14852_v9, 1  ;;  %v7756_v24 = vld [vmem:[#allocation2 + $0xe9] sm:$0xff] }
 0x34f   : > { %v4320_v41 = vpack.c.bf16 %v4300_v42, %v4299_v55  ;;  %v4512_v11 = vadd.f32 %v11465_v7, %v4476_v25  ;;  %v11632_v62 = vpop.f32.mrf.mxu0  ;;  %v4059_v55 = vadd.f32 %v3988_v43, %v3641_v29  ;;  %v14835_v25 = vld [vmem:[#allocation128_spill] sm:$0xff]  ;;  %vm14842_vm3 = vcmp.eq.s32.totalorder %v14841_v13, 1  ;;  %v14846_v13 = vld [vmem:[#allocation17_spill] sm:$0xff] }
 0x350   : > { %7323 = vmatmul.msk.bf16.gmra.mxu1 %vm965_vm7, %v3902_v39  ;;  %vm14836_vm0 = vcmp.eq.s32.totalorder %v14835_v25, 1  ;;  %v14850_v39 = vld [vmem:[#allocation87_spill] sm:$0xff] }
 0x351   : > { %v4544_v45 = vmax.f32 %v4512_v11, 0.0  ;;  %7345 = vmatmul.msk.bf16.gmra.mxu2 %vm965_vm7, %v4320_v41  ;;  %v11646_v44 = vsel %vm14836_vm0, %v11638_v28, 0.0  ;;  %v4641_v41 = vsel %vm14842_vm3, %v4609_v46, 0.0  ;;  %vm14126_vm0 = vcmp.eq.s32.totalorder %v11266_v31, 1  ;;  %v7758_v31 = vld [vmem:[#allocation2 + $0xf1] sm:$0xff] }
 0x352   : > { %v11640_v4 = vld [vmem:[#allocation3 + $0x31] sm:$0xff]  ;;  %14837 = vst [vmem:[#allocation76_spill] sm:$0xff] %v11646_v44  ;;  %vm14128_vm3 = vcmp.eq.s32.totalorder %v11221_v2, 1  ;;  %vm14851_vm9 = vcmp.eq.s32.totalorder %v14850_v39, 1 }
 0x353   : > { %4577 = vst.msk [vmem:[#allocation3 + $0x40] sm:$0xff] %vm4571_vm2, %v4544_v45  ;;  %v11651_v14 = vsel %vm14839_vm11, %v11640_v4, 0.0  ;;  %v14843_v45 = vld [vmem:[#allocation146_spill] sm:$0xff]  ;;  %v4694_v30 = vld [vmem:[#allocation3 + $0x38] sm:$0xff]  ;;  %vm3852_vm11 = vcmp.eq.s32.totalorder %v11327_v19, 1  ;;  %v14882_v19 = vld [vmem:[#allocation204_spill] sm:$0xff] }
 0x354   : > { %v4406_v34 = vpop.f32.mrf.mxu2  ;;  %14840 = vst [vmem:[#allocation85_spill] sm:$0xff] %v11651_v14  ;;  %vm14844_vm12 = vcmp.eq.s32.totalorder %v14843_v45, 1  ;;  %v4610_v10 = vld [vmem:[#allocation3 + $0x37] sm:$0xff] }
 0x355   : > { %v4477_v42 = vadd.f32 %v4406_v34, %v4059_v55  ;;  %v3990_v11 = vpop.f32.mrf.mxu1  ;;  %v4640_v25 = vsel %vm14844_vm12, %v4608_v38, 0.0  ;;  %v3642_v55 = vadd.f32 %v11247_v27, %v10771_v23  ;;  %v14845_v34 = vld [vmem:[#allocation253_spill] sm:$0xff]  ;;  %vm14847_vm12 = vcmp.eq.s32.totalorder %v14846_v13, 1  ;;  %v14848_v27 = vld [vmem:[#allocation20_spill] sm:$0xff]  ;;  %v7757_v13 = vld [vmem:[#allocation2 + $0xf0] sm:$0xff] }
 0x356   : > { %v4670_v56 = vpack.c.bf16 %v4641_v41, %v4640_v25  ;;  %vm3851_vm4 = vcmp.eq.s32.totalorder %v14845_v34, 1  ;;  %v4726_v38 = vsel %vm14847_vm12, %v4694_v30, 0.0  ;;  %v5607_v45 = vld [vmem:[#allocation3 + $0x38] sm:$0xff]  ;;  %vm14849_vm13 = vcmp.eq.s32.totalorder %v14848_v27, 1  ;;  %v14859_v27 = vld [vmem:[#allocation256_spill] sm:$0xff] }
 0x357   : > { %v4513_v43 = vadd.f32 %v11465_v7, %v4477_v42  ;;  %v11658_v29 = vpop.f32.mrf.mxu0  ;;  %v4060_v23 = vadd.f32 %v3990_v11, %v3642_v55  ;;  %v4301_v30 = vsel %vm14126_vm0, %v7756_v24, 0.0  ;;  %v3884_v11 = vsel %vm3852_vm11, %v7757_v13, 0.0 }
 0x358   : > { %v11690_v9 = vsel %vm3829_vm6, %v5607_v45, 0.0  ;;  %v4302_v24 = vsel %vm14128_vm3, %v7758_v31, 0.0  ;;  %vm14141_vm12 = vcmp.eq.s32.totalorder %v11375_v15, 1  ;;  %v7763_v15 = vld [vmem:[#allocation2 + $0xf8] sm:$0xff] }
 0x359   : > { %v4545_v46 = vmax.f32 %v4513_v43, 0.0  ;;  %v11676_v43 = vsel %vm14851_vm9, %v4610_v10, 0.0  ;;  %14855 = vst [vmem:[#allocation120_spill] sm:$0xff] %v11690_v9  ;;  %v4321_v45 = vpack.c.bf16 %v4302_v24, %v4301_v30 }
 0x35a   : > { %7388 = vmatmul.msk.bf16.gmra.mxu0 %vm4571_vm2, %v4670_v56  ;;  %v4695_v42 = vld [vmem:[#allocation3 + $0x40] sm:$0xff] }
 0x35b   : > { %v4611_v41 = vld [vmem:[#allocation3 + $0x3f] sm:$0xff]  ;;  %4578 = vst.msk [vmem:[#allocation3 + $0x48] sm:$0xff] %vm4571_vm2, %v4545_v46  ;;  %v4727_v25 = vsel %vm14849_vm13, %v4695_v42, 0.0 }
 0x35c   : > { %v11680_v1 = vsel %vm14853_vm10, %v4611_v41, 0.0  ;;  %v5608_v56 = vld [vmem:[#allocation3 + $0x40] sm:$0xff]  ;;  %v4408_v55 = vpop.f32.mrf.mxu2  ;;  %v4755_v46 = vpack.c.bf16 %v4727_v25, %v4726_v38  ;;  %v3883_v38 = vsel %vm3851_vm4, %v7759_v47, 0.0  ;;  %vm14137_vm10 = vcmp.eq.s32.totalorder %v11315_v5, 1  ;;  %v7762_v5 = vld [vmem:[#allocation2 + $0x101] sm:$0xff] }
 0x35d   : > { %v4478_v42 = vadd.f32 %v4408_v55, %v4060_v23  ;;  %v11694_v14 = vsel %vm3830_vm14, %v5608_v56, 0.0  ;;  %v3993_v25 = vpop.f32.mrf.mxu1  ;;  %v3903_v13 = vpack.c.bf16 %v3884_v11, %v3883_v38  ;;  %v14858_v55 = vld [vmem:[#allocation8_spill] sm:$0xff]  ;;  %v11710_v47 = vld [vmem:[#allocation3 + $0x39] sm:$0xff] }
 0x35e   : > { %14857 = vst [vmem:[#allocation109_spill] sm:$0xff] %v11694_v14  ;;  %7365 = vmatmul.msk.bf16.gmra.mxu3 %vm4571_vm2, %v4755_v46  ;;  %v3643_v39 = vadd.f32 %v14859_v27, %v14858_v55  ;;  %v14863_v38 = vld [vmem:[#allocation125_spill] sm:$0xff]  ;;  %v14870_v14 = vld [vmem:[#allocation132_spill] sm:$0xff] }
 0x35f   : > { %v4514_v44 = vadd.f32 %v11465_v7, %v4478_v42  ;;  %v11704_v56 = vpop.f32.mrf.mxu0  ;;  %v14860_v42 = vld [vmem:[#allocation134_spill] sm:$0xff]  ;;  %vm14864_vm6 = vcmp.eq.s32.totalorder %v14863_v38, 1  ;;  %v14876_v27 = vld [vmem:[#allocation84_spill] sm:$0xff] }
 0x360   : > { %7324 = vmatmul.msk.bf16.gmra.mxu1 %vm965_vm7, %v3903_v13  ;;  %v4061_v30 = vadd.f32 %v3993_v25, %v3643_v39  ;;  %vm14861_vm14 = vcmp.eq.s32.totalorder %v14860_v42, 1  ;;  %v14868_v42 = vld [vmem:[#allocation19_spill] sm:$0xff]  ;;  %vm14877_vm0 = vcmp.eq.s32.totalorder %v14876_v27, 1 }
 0x361   : > { %v4546_v31 = vmax.f32 %v4514_v44, 0.0  ;;  %7346 = vmatmul.msk.bf16.gmra.mxu2 %vm965_vm7, %v4321_v45  ;;  %v11718_v24 = vsel %vm14861_vm14, %v11710_v47, 0.0  ;;  %v14866_v45 = vld [vmem:[#allocation22_spill] sm:$0xff]  ;;  %vm14869_vm13 = vcmp.eq.s32.totalorder %v14868_v42, 1 }
 0x362   : > { %v11712_v46 = vld [vmem:[#allocation3 + $0x41] sm:$0xff]  ;;  %14862 = vst [vmem:[#allocation10_spill] sm:$0xff] %v11718_v24  ;;  %vm14867_vm9 = vcmp.eq.s32.totalorder %v14866_v45, 1  ;;  %v4642_v23 = vsel %vm14869_vm13, %v4610_v10, 0.0 }
 0x363   : > { %4579 = vst.msk [vmem:[#allocation3 + $0x50] sm:$0xff] %vm4571_vm2, %v4546_v31  ;;  %v11723_v44 = vsel %vm14864_vm6, %v11712_v46, 0.0  ;;  %v4643_v55 = vsel %vm14867_vm9, %v4611_v41, 0.0  ;;  %v4696_v2 = vld [vmem:[#allocation3 + $0x48] sm:$0xff]  ;;  %vm3853_vm6 = vcmp.eq.s32.totalorder %v11307_v57, 1  ;;  %v14872_v45 = vld [vmem:[#allocation26_spill] sm:$0xff] }
 0x364   : > { %v4411_v11 = vpop.f32.mrf.mxu2  ;;  %14865 = vst [vmem:[#allocation139_spill] sm:$0xff] %v11723_v44  ;;  %v4671_v9 = vpack.c.bf16 %v4643_v55, %v4642_v23  ;;  %v4612_v38 = vld [vmem:[#allocation3 + $0x47] sm:$0xff]  ;;  %vm14873_vm9 = vcmp.eq.s32.totalorder %v14872_v45, 1  ;;  %v7761_v45 = vld [vmem:[#allocation2 + $0x100] sm:$0xff] }
 0x365   : > { %v4479_v13 = vadd.f32 %v4411_v11, %v4061_v30  ;;  %v3995_v31 = vpop.f32.mrf.mxu1  ;;  %v3644_v30 = vadd.f32 %v11305_v18, %v14870_v14  ;;  %v14871_v11 = vld [vmem:[#allocation257_spill] sm:$0xff]  ;;  %v4728_v10 = vsel %vm14873_vm9, %v4696_v2, 0.0  ;;  %v5609_v55 = vld [vmem:[#allocation3 + $0x48] sm:$0xff]  ;;  %v14874_v14 = vld [vmem:[#allocation24_spill] sm:$0xff]  ;;  %v4303_v2 = vsel %vm14137_vm10, %v7760_v26, 0.0 }
 0x366   : > { %vm14139_vm14 = vcmp.eq.s32.totalorder %v14871_v11, 1  ;;  %vm14875_vm13 = vcmp.eq.s32.totalorder %v14874_v14, 1  ;;  %v14878_v24 = vld [vmem:[#allocation95_spill] sm:$0xff]  ;;  %v14896_v11 = vld [vmem:[#allocation14_spill] sm:$0xff] }
 0x367   : > { %v4515_v39 = vadd.f32 %v11465_v7, %v4479_v13  ;;  %v11730_v25 = vpop.f32.mrf.mxu0  ;;  %v4062_v18 = vadd.f32 %v3995_v31, %v3644_v30  ;;  %vm14879_vm3 = vcmp.eq.s32.totalorder %v14878_v24, 1  ;;  %v3886_v31 = vsel %vm14141_vm12, %v7761_v45, 0.0 }
 0x368   : > { %v11762_v24 = vsel %vm3831_vm8, %v5609_v55, 0.0  ;;  %v4304_v26 = vsel %vm14139_vm14, %v7762_v5, 0.0 }
 0x369   : > { %v4547_v41 = vmax.f32 %v4515_v39, 0.0  ;;  %v11748_v39 = vsel %vm14877_vm0, %v4612_v38, 0.0  ;;  %14881 = vst [vmem:[#allocation126_spill] sm:$0xff] %v11762_v24  ;;  %vm14883_vm0 = vcmp.eq.s32.totalorder %v14882_v19, 1  ;;  %v4322_v55 = vpack.c.bf16 %v4304_v26, %v4303_v2 }
 0x36a   : > { %7389 = vmatmul.msk.bf16.gmra.mxu0 %vm4571_vm2, %v4671_v9  ;;  %v4697_v13 = vld [vmem:[#allocation3 + $0x50] sm:$0xff] }
 0x36b   : > { %v4613_v23 = vld [vmem:[#allocation3 + $0x4f] sm:$0xff]  ;;  %4580 = vst.msk [vmem:[#allocation3 + $0x58] sm:$0xff] %vm4571_vm2, %v4547_v41  ;;  %v4729_v42 = vsel %vm14875_vm13, %v4697_v13, 0.0  ;;  %vm14897_vm13 = vcmp.eq.s32.totalorder %v14896_v11, 1 }
 0x36c   : > { %v11752_v44 = vsel %vm14879_vm3, %v4613_v23, 0.0  ;;  %v5610_v9 = vld [vmem:[#allocation3 + $0x50] sm:$0xff]  ;;  %v4413_v30 = vpop.f32.mrf.mxu2  ;;  %v4756_v41 = vpack.c.bf16 %v4729_v42, %v4728_v10  ;;  %v3885_v10 = vsel %vm3853_vm6, %v7763_v15, 0.0 }
 0x36d   : > { %v4480_v13 = vadd.f32 %v4413_v30, %v4062_v18  ;;  %v11766_v34 = vsel %vm14883_vm0, %v5610_v9, 0.0  ;;  %v3998_v42 = vpop.f32.mrf.mxu1  ;;  %v3904_v45 = vpack.c.bf16 %v3886_v31, %v3885_v10  ;;  %v14885_v30 = vld [vmem:[#allocation137_spill] sm:$0xff]  ;;  %v11782_v15 = vld [vmem:[#allocation3 + $0x49] sm:$0xff] }
 0x36e   : > { %14884 = vst [vmem:[#allocation124_spill] sm:$0xff] %v11766_v34  ;;  %7366 = vmatmul.msk.bf16.gmra.mxu3 %vm4571_vm2, %v4756_v41  ;;  %v3645_v14 = vadd.f32 %v11331_v20, %v14885_v30  ;;  %v14889_v20 = vld [vmem:[#allocation7_spill] sm:$0xff]  ;;  %v14899_v30 = vld [vmem:[#allocation266_spill] sm:$0xff] }
 0x36f   : > { %v4516_v19 = vadd.f32 %v11465_v7, %v4480_v13  ;;  %v11776_v9 = vpop.f32.mrf.mxu0  ;;  %v14886_v13 = vld [vmem:[#allocation9_spill] sm:$0xff]  ;;  %vm14890_vm3 = vcmp.eq.s32.totalorder %v14889_v20, 1  ;;  %v4644_v20 = vsel %vm14897_vm13, %v4612_v38, 0.0 }
 0x370   : > { %7325 = vmatmul.msk.bf16.gmra.mxu1 %vm965_vm7, %v3904_v45  ;;  %v4063_v2 = vadd.f32 %v3998_v42, %v3645_v14  ;;  %vm14887_vm8 = vcmp.eq.s32.totalorder %v14886_v13, 1  ;;  %v14894_v42 = vld [vmem:[#allocation220_spill] sm:$0xff] }
 0x371   : > { %v4548_v5 = vmax.f32 %v4516_v19, 0.0  ;;  %7347 = vmatmul.msk.bf16.gmra.mxu2 %vm965_vm7, %v4322_v55  ;;  %v11790_v26 = vsel %vm14887_vm8, %v11782_v15, 0.0  ;;  %v14892_v55 = vld [vmem:[#allocation15_spill] sm:$0xff]  ;;  %v14895_v14 = vld [vmem:[#allocation232_spill] sm:$0xff]  ;;  %vm3856_vm8 = vcmp.eq.s32.totalorder %v11446_v6, 1  ;;  %v7767_v6 = vld [vmem:[#allocation2 + $0x108] sm:$0xff] }
 0x372   : > { %v11784_v41 = vld [vmem:[#allocation3 + $0x51] sm:$0xff]  ;;  %14888 = vst [vmem:[#allocation51_spill] sm:$0xff] %v11790_v26  ;;  %vm14893_vm9 = vcmp.eq.s32.totalorder %v14892_v55, 1  ;;  %v3228_v18 = vadd.f32 %v14895_v14, %v14894_v42  ;;  %v14900_v42 = vld [vmem:[#allocation270_spill] sm:$0xff] }
 0x373   : > { %4581 = vst.msk [vmem:[#allocation3 + $0x60] sm:$0xff] %vm4571_vm2, %v4548_v5  ;;  %v11795_v10 = vsel %vm14890_vm3, %v11784_v41, 0.0  ;;  %v4645_v19 = vsel %vm14893_vm9, %v4613_v23, 0.0  ;;  %v4698_v24 = vld [vmem:[#allocation3 + $0x58] sm:$0xff]  ;;  %vm4274_vm3 = vcmp.eq.s32.totalorder %v14899_v30, 1  ;;  %vm3855_vm9 = vcmp.eq.s32.totalorder %v14900_v42, 1 }
 0x374   : > { %v4416_v31 = vpop.f32.mrf.mxu2  ;;  %14891 = vst [vmem:[#allocation86_spill] sm:$0xff] %v11795_v10  ;;  %v4672_v34 = vpack.c.bf16 %v4645_v19, %v4644_v20  ;;  %v14898_v23 = vld [vmem:[#allocation193_spill] sm:$0xff]  ;;  %v14905_v26 = vld [vmem:[#allocation98_spill] sm:$0xff]  ;;  %v14907_v10 = vld [vmem:[#allocation96_spill] sm:$0xff] }
 0x375   : > { %v4481_v45 = vadd.f32 %v4416_v31, %v4063_v2  ;;  %v4000_v5 = vpop.f32.mrf.mxu1  ;;  %v4614_v2 = vld [vmem:[#allocation3 + $0x57] sm:$0xff]  ;;  %v3646_v31 = vadd.f32 %v11359_v8, %v3228_v18  ;;  %vm4273_vm0 = vcmp.eq.s32.totalorder %v14898_v23, 1  ;;  %v14903_v18 = vld [vmem:[#allocation18_spill] sm:$0xff]  ;;  %vm14906_vm14 = vcmp.eq.s32.totalorder %v14905_v26, 1 }
 0x376   : > { %v14901_v14 = vld [vmem:[#allocation29_spill] sm:$0xff]  ;;  %vm14904_vm13 = vcmp.eq.s32.totalorder %v14903_v18, 1  ;;  %vm14908_vm12 = vcmp.eq.s32.totalorder %v14907_v10, 1  ;;  %v14909_v18 = vld [vmem:[#allocation208_spill] sm:$0xff]  ;;  %v7766_v23 = vld [vmem:[#allocation2 + $0x111] sm:$0xff] }
 0x377   : > { %v4517_v13 = vadd.f32 %v11465_v7, %v4481_v45  ;;  %v11804_v27 = vpop.f32.mrf.mxu0  ;;  %vm14902_vm10 = vcmp.eq.s32.totalorder %v14901_v14, 1  ;;  %v5611_v19 = vld [vmem:[#allocation3 + $0x58] sm:$0xff]  ;;  %v4064_v8 = vadd.f32 %v4000_v5, %v3646_v31  ;;  %v7765_v14 = vld [vmem:[#allocation2 + $0x110] sm:$0xff]  ;;  %v3698_v42 = vld [vmem:[#allocation2 + $0x120] sm:$0xff] }
 0x378   : > { %v4730_v38 = vsel %vm14902_vm10, %v4698_v24, 0.0  ;;  %v4305_v24 = vsel %vm4273_vm0, %v7764_v50, 0.0  ;;  %v3888_v5 = vsel %vm3856_vm8, %v7765_v14, 0.0  ;;  %vm14910_vm10 = vcmp.eq.s32.totalorder %v14909_v18, 1 }
 0x379   : > { %v4549_v55 = vmax.f32 %v4517_v13, 0.0  ;;  %v11821_v13 = vsel %vm14906_vm14, %v4614_v2, 0.0  ;;  %v11835_v10 = vsel %vm14910_vm10, %v5611_v19, 0.0  ;;  %v4306_v50 = vsel %vm4274_vm3, %v7766_v23, 0.0  ;;  %v7631_v23 = vld [vmem:[%s13475_s7 + $0x20] sm:$0xff] }
 0x37a   : > { %7390 = vmatmul.msk.bf16.gmra.mxu0 %vm4571_vm2, %v4672_v34  ;;  %v4699_v45 = vld [vmem:[#allocation3 + $0x60] sm:$0xff]  ;;  %14911 = vst [vmem:[#allocation128_spill] sm:$0xff] %v11835_v10  ;;  %v4323_v19 = vpack.c.bf16 %v4306_v50, %v4305_v24  ;;  %5223 = vmatpush.bf16.msrb.mxu1 %v7631_v23  ;;  %v14928_v10 = vld [vmem:[#allocation16_spill] sm:$0xff] }
 0x37b   : > { %v4615_v11 = vld [vmem:[#allocation3 + $0x5f] sm:$0xff]  ;;  %4582 = vst.msk [vmem:[#allocation3 + $0x68] sm:$0xff] %vm4571_vm2, %v4549_v55  ;;  %v4731_v20 = vsel %vm14904_vm13, %v4699_v45, 0.0 }
 0x37c   : > { %v11825_v57 = vsel %vm14908_vm12, %v4615_v11, 0.0  ;;  %v5612_v34 = vld [vmem:[#allocation3 + $0x60] sm:$0xff]  ;;  %v4418_v31 = vpop.f32.mrf.mxu2  ;;  %v4757_v55 = vpack.c.bf16 %v4731_v20, %v4730_v38  ;;  %vm14913_vm12 = vcmp.eq.s32.totalorder %v14912_v3, 1  ;;  %v3887_v38 = vsel %vm3855_vm9, %v7767_v6, 0.0 }
 0x37d   : > { %v4482_v45 = vadd.f32 %v4418_v31, %v4064_v8  ;;  %v11839_v58 = vsel %vm14913_vm12, %v5612_v34, 0.0  ;;  %v4003_v20 = vpop.f32.mrf.mxu1  ;;  %v3905_v14 = vpack.c.bf16 %v3888_v5, %v3887_v38  ;;  %v7633_v6 = vld [vmem:[%s13475_s7 + $0x30] sm:$0xff]  ;;  %v14915_v31 = vld [vmem:[#allocation143_spill] sm:$0xff]  ;;  %v14917_v38 = vld [vmem:[#allocation148_spill] sm:$0xff]  ;;  %vm14929_vm12 = vcmp.eq.s32.totalorder %v14928_v10, 1 }
 0x37e   : > { %14914 = vst [vmem:[#allocation118_spill] sm:$0xff] %v11839_v58  ;;  %7367 = vmatmul.msk.bf16.gmra.mxu3 %vm4571_vm2, %v4757_v55  ;;  %v3647_v55 = vadd.f32 %v11383_v0, %v14915_v31  ;;  %v11861_v24 = vld [vmem:[#allocation3 + $0x59] sm:$0xff]  ;;  %5489 = vmatpush.bf16.msrb.mxu2 %v7633_v6  ;;  %vm14918_vm14 = vcmp.eq.s32.totalorder %v14917_v38, 1  ;;  %v14932_v10 = vld [vmem:[#allocation40_spill] sm:$0xff] }
 0x37f   : > { %v4518_v3 = vadd.f32 %v11465_v7, %v4482_v45  ;;  %v11849_v34 = vpop.f32.mrf.mxu0  ;;  %14916 = vst [vmem:[#allocation144_spill] sm:$0xff] %v11861_v24  ;;  %v11869_v8 = vsel %vm14918_vm14, %v11861_v24, 0.0  ;;  %v14920_v0 = vld [vmem:[#allocation138_spill] sm:$0xff] }
 0x380   : > { %7326 = vmatmul.msk.bf16.gmra.mxu1 %vm965_vm7, %v3905_v14  ;;  %v4065_v45 = vadd.f32 %v4003_v20, %v3647_v55  ;;  %14919 = vst [vmem:[#allocation146_spill] sm:$0xff] %v11869_v8  ;;  %vm14921_vm13 = vcmp.eq.s32.totalorder %v14920_v0, 1  ;;  %v14925_v20 = vld [vmem:[#allocation227_spill] sm:$0xff]  ;;  %v14926_v55 = vld [vmem:[#allocation234_spill] sm:$0xff]  ;;  %v4646_v0 = vsel %vm14929_vm12, %v4614_v2, 0.0 }
 0x381   : > { %v4550_v18 = vmax.f32 %v4518_v3, 0.0  ;;  %7348 = vmatmul.msk.bf16.gmra.mxu2 %vm965_vm7, %v4323_v19  ;;  %v14923_v3 = vld [vmem:[#allocation31_spill] sm:$0xff]  ;;  %v14944_v24 = vld [vmem:[#allocation274_spill] sm:$0xff] }
 0x382   : > { %v11863_v5 = vld [vmem:[#allocation3 + $0x61] sm:$0xff]  ;;  %vm14924_vm10 = vcmp.eq.s32.totalorder %v14923_v3, 1  ;;  %v4115_v3 = vld [vmem:[#allocation2 + $0x119] sm:$0xff] }
 0x383   : > { %4583 = vst.msk [vmem:[#allocation3 + $0x70] sm:$0xff] %vm4571_vm2, %v4550_v18  ;;  %v11874_v14 = vsel %vm14921_vm13, %v11863_v5, 0.0  ;;  %v4647_v23 = vsel %vm14924_vm10, %v4615_v11, 0.0  ;;  %v3230_v18 = vadd.f32 %v14926_v55, %v14925_v20  ;;  %v4700_v58 = vld [vmem:[#allocation3 + $0x68] sm:$0xff]  ;;  %v14930_v20 = vld [vmem:[#allocation21_spill] sm:$0xff]  ;;  %vm14933_vm13 = vcmp.eq.s32.totalorder %v14932_v10, 1 }
 0x384   : > { %v4421_v50 = vpop.f32.mrf.mxu2  ;;  %14922 = vst [vmem:[#allocation17_spill] sm:$0xff] %v11874_v14  ;;  %v4673_v30 = vpack.c.bf16 %v4647_v23, %v4646_v0  ;;  %vm14931_vm14 = vcmp.eq.s32.totalorder %v14930_v20, 1  ;;  %v5613_v14 = vld [vmem:[#allocation3 + $0x68] sm:$0xff]  ;;  %v3890_v20 = vsel %vm3858_vm15, %v3698_v42, 0.0  ;;  %v14938_v10 = vld [vmem:[#allocation214_spill] sm:$0xff] }
 0x385   : > { %v4483_v19 = vadd.f32 %v4421_v50, %v4065_v45  ;;  %v4005_v31 = vpop.f32.mrf.mxu1  ;;  %v4616_v45 = vld [vmem:[#allocation3 + $0x67] sm:$0xff]  ;;  %v4116_v50 = vld [vmem:[#allocation2 + $0x121] sm:$0xff]  ;;  %v3648_v11 = vadd.f32 %v11432_v48, %v3230_v18 }
 0x386   : > { %v14934_v0 = vld [vmem:[#allocation99_spill] sm:$0xff] }
 0x387   : > { %v4519_v38 = vadd.f32 %v11465_v7, %v4483_v19  ;;  %v11883_v26 = vpop.f32.mrf.mxu0  ;;  %v4732_v19 = vsel %vm14931_vm14, %v4700_v58, 0.0  ;;  %v4066_v2 = vadd.f32 %v4005_v31, %v3648_v11  ;;  %vm14935_vm10 = vcmp.eq.s32.totalorder %v14934_v0, 1  ;;  %v14936_v18 = vld [vmem:[#allocation91_spill] sm:$0xff] }
 0x388   : > { %14927 = vst [vmem:[#allocation20_spill] sm:$0xff] %v11883_v26  ;;  %v11896_v48 = vsel %vm14935_vm10, %v4616_v45, 0.0  ;;  %vm14937_vm12 = vcmp.eq.s32.totalorder %v14936_v18, 1  ;;  %v4307_v58 = vsel %vm4275_vm5, %v4115_v3, 0.0  ;;  %vm14939_vm14 = vcmp.eq.s32.totalorder %v14938_v10, 1  ;;  %v14941_v18 = vld [vmem:[#allocation116_spill] sm:$0xff] }
 0x389   : > { %v4551_v6 = vmax.f32 %v4519_v38, 0.0  ;;  %v11910_v0 = vsel %vm14939_vm14, %v5613_v14, 0.0  ;;  %vm14945_vm10 = vcmp.eq.s32.totalorder %v14944_v24, 1  ;;  %vm14946_vm5 = vcmp.eq.s32.totalorder %v11481_v54, 1 }
 0x38a   : > { %7391 = vmatmul.msk.bf16.gmra.mxu0 %vm4571_vm2, %v4673_v30  ;;  %v4701_v8 = vld [vmem:[#allocation3 + $0x70] sm:$0xff]  ;;  %14940 = vst [vmem:[#allocation87_spill] sm:$0xff] %v11910_v0  ;;  %v4308_v61 = vsel %vm14945_vm10, %v4116_v50, 0.0  ;;  %v3889_v63 = vsel %vm14946_vm5, %v3697_v40, 0.0 }
 0x38b   : > { %v4617_v55 = vld [vmem:[#allocation3 + $0x6f] sm:$0xff]  ;;  %4584 = vst.msk [vmem:[#allocation3 + $0x78] sm:$0xff] %vm4571_vm2, %v4551_v6  ;;  %v4733_v23 = vsel %vm14933_vm13, %v4701_v8, 0.0  ;;  %vm14942_vm13 = vcmp.eq.s32.totalorder %v14941_v18, 1 }
 0x38c   : > { %v11900_v30 = vsel %vm14937_vm12, %v4617_v55, 0.0  ;;  %v5614_v38 = vld [vmem:[#allocation3 + $0x70] sm:$0xff]  ;;  %v4423_v6 = vpop.f32.mrf.mxu2  ;;  %v4758_v31 = vpack.c.bf16 %v4733_v23, %v4732_v19  ;;  %v4324_v19 = vpack.c.bf16 %v4308_v61, %v4307_v58  ;;  %v14954_v61 = vld [vmem:[#allocation34_spill] sm:$0xff] }
 0x38d   : > { %v4484_v11 = vadd.f32 %v4423_v6, %v4066_v2  ;;  %v11914_v26 = vsel %vm14942_vm13, %v5614_v38, 0.0  ;;  %v4008_v42 = vpop.f32.mrf.mxu1  ;;  %v3906_v2 = vpack.c.bf16 %v3890_v20, %v3889_v63  ;;  %v14947_v38 = vld [vmem:[#allocation151_spill] sm:$0xff]  ;;  %v7635_v58 = vld [vmem:[%s13475_s7 + $0x40] sm:$0xff]  ;;  %vm14955_vm12 = vcmp.eq.s32.totalorder %v14954_v61, 1 }
 0x38e   : > { %14943 = vst [vmem:[#allocation47_spill] sm:$0xff] %v11914_v26  ;;  %7368 = vmatmul.msk.bf16.gmra.mxu3 %vm4571_vm2, %v4758_v31  ;;  %v3649_v6 = vadd.f32 %v11467_v60, %v14947_v38  ;;  %v11930_v40 = vld [vmem:[#allocation3 + $0x69] sm:$0xff]  ;;  %v4649_v63 = vsel %vm14955_vm12, %v4617_v55, 0.0  ;;  %v5072_v61 = vld [vmem:[#allocation3 + $0x11] sm:$0xff] }
 0x38f   : > { %v4520_v14 = vadd.f32 %v11465_v7, %v4484_v11  ;;  %v11924_v23 = vpop.f32.mrf.mxu0  ;;  %v14948_v31 = vld [vmem:[#allocation156_spill] sm:$0xff]  ;;  %v14951_v11 = vld [vmem:[#allocation145_spill] sm:$0xff]  ;;  %5723 = vmatpush.bf16.msrb.mxu3 %v7635_v58 }
 0x390   : > { %7327 = vmatmul.msk.bf16.gmra.mxu1 %vm965_vm7, %v3906_v2  ;;  %v4067_v50 = vadd.f32 %v4008_v42, %v3649_v6  ;;  %vm14949_vm15 = vcmp.eq.s32.totalorder %v14948_v31, 1  ;;  %v14956_v2 = vld [vmem:[#allocation179_spill] sm:$0xff]  ;;  %v14959_v31 = vld [vmem:[#allocation36_spill] sm:$0xff] }
 0x391   : > { %v4552_v24 = vmax.f32 %v4520_v14, 0.0  ;;  %7349 = vmatmul.msk.bf16.gmra.mxu2 %vm965_vm7, %v4324_v19  ;;  %v11941_v60 = vsel %vm14949_vm15, %v11930_v40, 0.0  ;;  %vm14952_vm7 = vcmp.eq.s32.totalorder %v14951_v11, 1  ;;  %v14957_v14 = vld [vmem:[#allocation240_spill] sm:$0xff]  ;;  %vm14960_vm14 = vcmp.eq.s32.totalorder %v14959_v31, 1 }
 0x392   : > { %v11932_v54 = vld [vmem:[#allocation3 + $0x71] sm:$0xff]  ;;  %14950 = vst [vmem:[#allocation6_spill] sm:$0xff] %v11941_v60  ;;  %v3232_v38 = vadd.f32 %v14957_v14, %v14956_v2  ;;  %v4648_v11 = vsel %vm14960_vm14, %v4616_v45, 0.0  ;;  %v5071_v0 = vld [vmem:[#allocation3 + $0x9] sm:$0xff] }
 0x393   : > { %4585 = vst.msk [vmem:[#allocation3 + $0x80] sm:$0xff] %vm4571_vm2, %v4552_v24  ;;  %v11946_v10 = vsel %vm14952_vm7, %v11932_v54, 0.0  ;;  %v4702_v3 = vld [vmem:[#allocation3 + $0x78] sm:$0xff]  ;;  %v14961_v8 = vld [vmem:[#allocation44_spill] sm:$0xff] }
 0x394   : > { %v4426_v20 = vpop.f32.mrf.mxu2  ;;  %14953 = vst [vmem:[#allocation191_spill] sm:$0xff] %v11946_v10  ;;  %v3650_v55 = vadd.f32 %v11505_v36, %v3232_v38  ;;  %vm14962_vm13 = vcmp.eq.s32.totalorder %v14961_v8, 1  ;;  %v14963_v45 = vld [vmem:[#allocation41_spill] sm:$0xff]  ;;  %v14967_v38 = vld [vmem:[#allocation107_spill] sm:$0xff]  ;;  %v14969_v26 = vld [vmem:[#allocation152_spill] sm:$0xff] }
 0x395   : > { %v4485_v18 = vadd.f32 %v4426_v20, %v4067_v50  ;;  %v4010_v19 = vpop.f32.mrf.mxu1  ;;  %v4674_v50 = vpack.c.bf16 %v4649_v63, %v4648_v11  ;;  %v4618_v20 = vld [vmem:[#allocation3 + $0x77] sm:$0xff]  ;;  %v4734_v2 = vsel %vm14962_vm13, %v4702_v3, 0.0  ;;  %vm14964_vm10 = vcmp.eq.s32.totalorder %v14963_v45, 1  ;;  %v14965_v11 = vld [vmem:[#allocation94_spill] sm:$0xff] }
 0x396   : > { %v4068_v31 = vadd.f32 %v4010_v19, %v3650_v55  ;;  %vm14966_vm5 = vcmp.eq.s32.totalorder %v14965_v11, 1  ;;  %vm14968_vm15 = vcmp.eq.s32.totalorder %v14967_v38, 1  ;;  %vm14970_vm7 = vcmp.eq.s32.totalorder %v14969_v26, 1  ;;  %v14974_v45 = vld [vmem:[#allocation221_spill] sm:$0xff]  ;;  %v14977_v38 = vld [vmem:[#allocation154_spill] sm:$0xff] }
 0x397   : > { %v4521_v6 = vadd.f32 %v11465_v7, %v4485_v18  ;;  %v11955_v24 = vpop.f32.mrf.mxu0  ;;  %v5615_v18 = vld [vmem:[#allocation3 + $0x78] sm:$0xff]  ;;  %v11968_v36 = vsel %vm14966_vm5, %v4618_v20, 0.0  ;;  %v5104_v60 = vsel %vm14970_vm7, %v5072_v61, 0.0  ;;  %vm14975_vm14 = vcmp.eq.s32.totalorder %v14974_v45, 1 }
 0x398   : > { %14958 = vst [vmem:[#allocation8_spill] sm:$0xff] %v11955_v24  ;;  %vm14978_vm13 = vcmp.eq.s32.totalorder %v14977_v38, 1  ;;  %v14987_v38 = vld [vmem:[#allocation25_spill] sm:$0xff] }
 0x399   : > { %v4553_v58 = vmax.f32 %v4521_v6, 0.0  ;;  %v5103_v10 = vsel %vm14978_vm13, %v5071_v0, 0.0  ;;  %v14980_v0 = vpack.c.bf16 %v11546_v12, %v11542_v52  ;;  %v12016_v52 = vpop.f32.mrf.mxu3 }
 0x39a   : > { %7392 = vmatmul.msk.bf16.gmra.mxu0 %vm4571_vm2, %v4674_v50  ;;  %v4703_v42 = vld [vmem:[#allocation3 + $0x80] sm:$0xff] }
 0x39b   : > { %v4619_v14 = vld [vmem:[#allocation3 + $0x7f] sm:$0xff]  ;;  %4586 = vst.msk [vmem:[#allocation3 + $0x88] sm:$0xff] %vm4571_vm2, %v4553_v58  ;;  %v4735_v63 = vsel %vm14964_vm10, %v4703_v42, 0.0  ;;  %v14971_v58 = vld [vmem:[#allocation211_spill] sm:$0xff] }
 0x39c   : > { %v11972_v6 = vsel %vm14968_vm15, %v4619_v14, 0.0  ;;  %v5616_v50 = vld [vmem:[#allocation3 + $0x80] sm:$0xff]  ;;  %v4428_v8 = vpop.f32.mrf.mxu2  ;;  %v4759_v3 = vpack.c.bf16 %v4735_v63, %v4734_v2  ;;  %vm14972_vm12 = vcmp.eq.s32.totalorder %v14971_v58, 1  ;;  %vm14988_vm15 = vcmp.eq.s32.totalorder %v14987_v38, 1 }
 0x39d   : > { %v4486_v55 = vadd.f32 %v4428_v8, %v4068_v31  ;;  %v11980_v42 = vsel %vm14972_vm12, %v5615_v18, 0.0  ;;  %v11984_v11 = vsel %vm14975_vm14, %v5616_v50, 0.0  ;;  %v4013_v24 = vpop.f32.mrf.mxu1  ;;  %v5135_v31 = vpack.c.bf16 %v5104_v60, %v5103_v10  ;;  %v14979_v18 = vld [vmem:[#allocation159_spill] sm:$0xff]  ;;  %v12001_v50 = vld [vmem:[#allocation3 + $0x79] sm:$0xff] }
 0x39e   : > { %14973 = vst [vmem:[#allocation256_spill] sm:$0xff] %v11980_v42  ;;  %7369 = vmatmul.msk.bf16.gmra.mxu3 %vm4571_vm2, %v4759_v3  ;;  %v3651_v63 = vadd.f32 %v11523_v37, %v14979_v18  ;;  %v14981_v60 = vld [vmem:[#allocation163_spill] sm:$0xff]  ;;  %v14984_v10 = vld [vmem:[#allocation153_spill] sm:$0xff] }
 0x39f   : > { %14976 = vst [vmem:[#allocation134_spill] sm:$0xff] %v11984_v11  ;;  %v4522_v61 = vadd.f32 %v11465_v7, %v4486_v55  ;;  %v11992_v2 = vpop.f32.mrf.mxu0  ;;  %vm14982_vm10 = vcmp.eq.s32.totalorder %v14981_v60, 1  ;;  %vm14985_vm5 = vcmp.eq.s32.totalorder %v14984_v10, 1  ;;  %v14989_v18 = vld [vmem:[#allocation235_spill] sm:$0xff]  ;;  %v14991_v10 = vld [vmem:[#allocation38_spill] sm:$0xff] }
 0x3a0   : > { %7414 = vmatmul.msk.bf16.vlgmr.msrb.gmra.mxu1 %vm4571_vm2, %v5135_v31  ;;  %v4069_v55 = vadd.f32 %v4013_v24, %v3651_v63  ;;  %v12009_v37 = vsel %vm14982_vm10, %v12001_v50, 0.0  ;;  %v14990_v63 = vld [vmem:[#allocation244_spill] sm:$0xff]  ;;  %vm14992_vm7 = vcmp.eq.s32.totalorder %v14991_v10, 1  ;;  %v14993_v24 = vld [vmem:[#allocation46_spill] sm:$0xff] }
 0x3a1   : > { %v4554_v8 = vmax.f32 %v4522_v61, 0.0  ;;  %7442 = vmatmul.msk.bf16.vlgmr.msrb.gmra.mxu2 %vm4571_vm2, %v14980_v0  ;;  %14983 = vst [vmem:[#allocation125_spill] sm:$0xff] %v12009_v37  ;;  %v4651_v61 = vsel %vm14988_vm15, %v4619_v14, 0.0  ;;  %v4650_v26 = vsel %vm14992_vm7, %v4618_v20, 0.0  ;;  %vm14994_vm12 = vcmp.eq.s32.totalorder %v14993_v24, 1  ;;  %v14995_v37 = vld [vmem:[#allocation35_spill] sm:$0xff] }
 0x3a2   : > { %v12003_v3 = vld [vmem:[#allocation3 + $0x81] sm:$0xff]  ;;  %v4675_v42 = vpack.c.bf16 %v4651_v61, %v4650_v26  ;;  %vm14996_vm14 = vcmp.eq.s32.totalorder %v14995_v37, 1  ;;  %v14997_v10 = vld [vmem:[#allocation100_spill] sm:$0xff] }
 0x3a3   : > { %4587 = vst.msk [vmem:[#allocation3 + $0x90] sm:$0xff] %vm4571_vm2, %v4554_v8  ;;  %v12014_v45 = vsel %vm14985_vm5, %v12003_v3, 0.0  ;;  %v3234_v8 = vadd.f32 %v14990_v63, %v14989_v18  ;;  %v4704_v19 = vld [vmem:[#allocation3 + $0x88] sm:$0xff]  ;;  %vm14998_vm13 = vcmp.eq.s32.totalorder %v14997_v10, 1 }
 0x3a4   : > { %v4431_v58 = vpop.f32.mrf.mxu2  ;;  %14986 = vst [vmem:[#allocation22_spill] sm:$0xff] %v12014_v45  ;;  %v4736_v11 = vsel %vm14994_vm12, %v4704_v19, 0.0  ;;  %v5617_v63 = vld [vmem:[#allocation3 + $0x88] sm:$0xff]  ;;  %v15001_v19 = vld [vmem:[#allocation13_spill] sm:$0xff] }
 0x3a5   : > { %v4487_v12 = vadd.f32 %v4431_v58, %v4069_v55  ;;  %v4015_v31 = vpop.f32.mrf.mxu1  ;;  %v4620_v55 = vld [vmem:[#allocation3 + $0x87] sm:$0xff]  ;;  %v3652_v58 = vadd.f32 %v11560_v16, %v3234_v8  ;;  %vm15002_vm5 = vcmp.eq.s32.totalorder %v15001_v19, 1  ;;  %v12063_v19 = vpop.f32.mrf.mxu3 }
 0x3a6   : > { %v12038_v26 = vsel %vm14998_vm13, %v4620_v55, 0.0  ;;  %v14999_v16 = vld [vmem:[#allocation115_spill] sm:$0xff] }
 0x3a7   : > { %v4523_v0 = vadd.f32 %v11465_v7, %v4487_v12  ;;  %v12025_v60 = vpop.f32.mrf.mxu0  ;;  %v4070_v12 = vadd.f32 %v4015_v31, %v3652_v58  ;;  %vm15000_vm10 = vcmp.eq.s32.totalorder %v14999_v16, 1  ;;  %v15003_v58 = vld [vmem:[#allocation225_spill] sm:$0xff] }
 0x3a8   : > { %vm15004_vm15 = vcmp.eq.s32.totalorder %v15003_v58, 1  ;;  %v15011_v58 = vld [vmem:[#allocation166_spill] sm:$0xff] }
 0x3a9   : > { %v4555_v14 = vmax.f32 %v4523_v0, 0.0  ;;  %v5106_v0 = vsel %vm15002_vm5, %v11568_v22, 0.0 }
 0x3aa   : > { %7393 = vmatmul.msk.bf16.gmra.mxu0 %vm4571_vm2, %v4675_v42  ;;  %v4705_v38 = vld [vmem:[#allocation3 + $0x90] sm:$0xff] }
 0x3ab   : > { %v4621_v18 = vld [vmem:[#allocation3 + $0x8f] sm:$0xff]  ;;  %4588 = vst.msk [vmem:[#allocation3 + $0x98] sm:$0xff] %vm4571_vm2, %v4555_v14  ;;  %v4737_v20 = vsel %vm14996_vm14, %v4705_v38, 0.0  ;;  %v12051_v14 = vsel %vm15004_vm15, %v5617_v63, 0.0  ;;  %v15006_v38 = vld [vmem:[#allocation217_spill] sm:$0xff] }
 0x3ac   : > { %v12042_v61 = vsel %vm15000_vm10, %v4621_v18, 0.0  ;;  %v5618_v42 = vld [vmem:[#allocation3 + $0x90] sm:$0xff]  ;;  %v4433_v8 = vpop.f32.mrf.mxu2  ;;  %v4760_v24 = vpack.c.bf16 %v4737_v20, %v4736_v11  ;;  %15005 = vst [vmem:[#allocation19_spill] sm:$0xff] %v12051_v14  ;;  %vm15007_vm7 = vcmp.eq.s32.totalorder %v15006_v38, 1  ;;  %v15009_v11 = vld [vmem:[#allocation161_spill] sm:$0xff]  ;;  %v15023_v14 = vld [vmem:[#allocation30_spill] sm:$0xff] }
 0x3ad   : > { %v4488_v37 = vadd.f32 %v4433_v8, %v4070_v12  ;;  %v12055_v10 = vsel %vm15007_vm7, %v5618_v42, 0.0  ;;  %v4018_v16 = vpop.f32.mrf.mxu1  ;;  %vm15010_vm12 = vcmp.eq.s32.totalorder %v15009_v11, 1  ;;  %v3653_v42 = vadd.f32 %v11586_v21, %v15011_v58 }
 0x3ae   : > { %15008 = vst [vmem:[#allocation132_spill] sm:$0xff] %v12055_v10  ;;  %7370 = vmatmul.msk.bf16.gmra.mxu3 %vm4571_vm2, %v4760_v24  ;;  %v5105_v20 = vsel %vm15010_vm12, %v11566_v17, 0.0  ;;  %v15012_v24 = vpack.c.bf16 %v11608_v49, %v11604_v32  ;;  %v12075_v17 = vld [vmem:[#allocation3 + $0x89] sm:$0xff]  ;;  %v15019_v49 = vld [vmem:[#allocation49_spill] sm:$0xff]  ;;  %vm15024_vm5 = vcmp.eq.s32.totalorder %v15023_v14, 1 }
 0x3af   : > { %v4524_v12 = vadd.f32 %v11465_v7, %v4488_v37  ;;  %v12066_v63 = vpop.f32.mrf.mxu0  ;;  %v5136_v8 = vpack.c.bf16 %v5106_v0, %v5105_v20  ;;  %v4071_v37 = vadd.f32 %v4018_v16, %v3653_v42  ;;  %v15013_v0 = vld [vmem:[#allocation171_spill] sm:$0xff]  ;;  %v15016_v20 = vld [vmem:[#allocation160_spill] sm:$0xff]  ;;  %vm15020_vm10 = vcmp.eq.s32.totalorder %v15019_v49, 1  ;;  %v15021_v16 = vld [vmem:[#allocation241_spill] sm:$0xff] }
 0x3b0   : > { %vm15014_vm14 = vcmp.eq.s32.totalorder %v15013_v0, 1  ;;  %vm15017_vm13 = vcmp.eq.s32.totalorder %v15016_v20, 1  ;;  %v15022_v42 = vld [vmem:[#allocation249_spill] sm:$0xff]  ;;  %v4652_v20 = vsel %vm15024_vm5, %v4620_v55, 0.0 }
 0x3b1   : > { %v4556_v38 = vmax.f32 %v4524_v12, 0.0  ;;  %7415 = vmatmul.msk.bf16.gmra.mxu1 %vm4571_vm2, %v5136_v8  ;;  %7443 = vmatmul.msk.bf16.gmra.mxu2 %vm4571_vm2, %v15012_v24  ;;  %v12083_v21 = vsel %vm15014_vm14, %v12075_v17, 0.0  ;;  %v4653_v8 = vsel %vm15020_vm10, %v4621_v18, 0.0  ;;  %v3236_v24 = vadd.f32 %v15022_v42, %v15021_v16  ;;  %v15027_v14 = vld [vmem:[#allocation57_spill] sm:$0xff] }
 0x3b2   : > { %v12077_v11 = vld [vmem:[#allocation3 + $0x91] sm:$0xff]  ;;  %15015 = vst [vmem:[#allocation26_spill] sm:$0xff] %v12083_v21  ;;  %v4676_v45 = vpack.c.bf16 %v4653_v8, %v4652_v20  ;;  %v15025_v21 = vld [vmem:[#allocation39_spill] sm:$0xff]  ;;  %vm15028_vm7 = vcmp.eq.s32.totalorder %v15027_v14, 1  ;;  %v15029_v8 = vld [vmem:[#allocation106_spill] sm:$0xff] }
 0x3b3   : > { %4589 = vst.msk [vmem:[#allocation3 + $0xa0] sm:$0xff] %vm4571_vm2, %v4556_v38  ;;  %v12088_v12 = vsel %vm15017_vm13, %v12077_v11, 0.0  ;;  %v4706_v10 = vld [vmem:[#allocation3 + $0x98] sm:$0xff]  ;;  %v3654_v18 = vadd.f32 %v11632_v62, %v3236_v24  ;;  %vm15026_vm15 = vcmp.eq.s32.totalorder %v15025_v21, 1  ;;  %vm15030_vm12 = vcmp.eq.s32.totalorder %v15029_v8, 1  ;;  %v15031_v62 = vld [vmem:[#allocation122_spill] sm:$0xff] }
 0x3b4   : > { %v4436_v22 = vpop.f32.mrf.mxu2  ;;  %15018 = vst [vmem:[#allocation24_spill] sm:$0xff] %v12088_v12  ;;  %v4738_v16 = vsel %vm15026_vm15, %v4706_v10, 0.0  ;;  %vm15032_vm14 = vcmp.eq.s32.totalorder %v15031_v62, 1  ;;  %v15033_v10 = vld [vmem:[#allocation167_spill] sm:$0xff]  ;;  %v15038_v14 = vld [vmem:[#allocation233_spill] sm:$0xff] }
 0x3b5   : > { %v4489_v32 = vadd.f32 %v4436_v22, %v4071_v37  ;;  %v4020_v38 = vpop.f32.mrf.mxu1  ;;  %v4622_v22 = vld [vmem:[#allocation3 + $0x97] sm:$0xff]  ;;  %v4844_v37 = vpop.f32.mrf.mxu3  ;;  %vm15034_vm13 = vcmp.eq.s32.totalorder %v15033_v10, 1  ;;  %vm15039_vm5 = vcmp.eq.s32.totalorder %v15038_v14, 1 }
 0x3b6   : > { %v12110_v20 = vsel %vm15030_vm12, %v4622_v22, 0.0  ;;  %v5108_v12 = vsel %vm15034_vm13, %v11640_v4, 0.0 }
 0x3b7   : > { %v4525_v0 = vadd.f32 %v11465_v7, %v4489_v32  ;;  %v12097_v31 = vpop.f32.mrf.mxu0  ;;  %v5619_v7 = vld [vmem:[#allocation3 + $0x98] sm:$0xff]  ;;  %v4072_v32 = vadd.f32 %v4020_v38, %v3654_v18 }
 0x3b9   : > { %v4557_v49 = vmax.f32 %v4525_v0, 0.0 }
 0x3ba   : > { %7394 = vmatmul.msk.bf16.gmra.mxu0 %vm4571_vm2, %v4676_v45  ;;  %v4707_v58 = vld [vmem:[#allocation3 + $0xa0] sm:$0xff] }
 0x3bb   : > { %v4623_v42 = vld [vmem:[#allocation3 + $0x9f] sm:$0xff]  ;;  %4590 = vst.msk [vmem:[#allocation3 + $0xa8] sm:$0xff] %vm4571_vm2, %v4557_v49  ;;  %v4739_v55 = vsel %vm15028_vm7, %v4707_v58, 0.0 }
 0x3bc   : > { %v12114_v24 = vsel %vm15032_vm14, %v4623_v42, 0.0  ;;  %v5620_v45 = vld [vmem:[#allocation3 + $0xa0] sm:$0xff]  ;;  %v4438_v0 = vpop.f32.mrf.mxu2  ;;  %v4761_v21 = vpack.c.bf16 %v4739_v55, %v4738_v16  ;;  %v15035_v58 = vld [vmem:[#allocation33_spill] sm:$0xff] }
 0x3bd   : > { %v4490_v18 = vadd.f32 %v4438_v0, %v4072_v32  ;;  %vm15036_vm10 = vcmp.eq.s32.totalorder %v15035_v58, 1  ;;  %v12127_v8 = vsel %vm15039_vm5, %v5620_v45, 0.0  ;;  %v4023_v62 = vpop.f32.mrf.mxu1  ;;  %v15041_v16 = vld [vmem:[#allocation169_spill] sm:$0xff]  ;;  %v12138_v32 = vld [vmem:[%s13474_s6] ss:$0 sm:$0xff]  ;;  %v15043_v58 = vld [vmem:[#allocation174_spill] sm:$0xff] }
 0x3be   : > { %v12123_v49 = vsel %vm15036_vm10, %v5619_v7, 0.0  ;;  %15040 = vst [vmem:[#allocation95_spill] sm:$0xff] %v12127_v8  ;;  %7371 = vmatmul.msk.bf16.gmra.mxu3 %vm4571_vm2, %v4761_v21  ;;  %vm15042_vm15 = vcmp.eq.s32.totalorder %v15041_v16, 1  ;;  %v3655_v21 = vadd.f32 %v11658_v29, %v15043_v58  ;;  %v12150_v4 = vld [vmem:[#allocation3 + $0x99] sm:$0xff] }
 0x3bf   : > { %15037 = vst [vmem:[#allocation84_spill] sm:$0xff] %v12123_v49  ;;  %v5107_v55 = vsel %vm15042_vm15, %v11638_v28, 0.0  ;;  %v4526_v7 = vadd.f32 %v12138_v32, %v4490_v18  ;;  %v4993_v0 = vpop.f32.mrf.mxu0  ;;  %v15044_v28 = vpack.c.bf16 %v11680_v1, %v11676_v43  ;;  %v15047_v18 = vld [vmem:[#allocation185_spill] sm:$0xff]  ;;  %v15052_v43 = vld [vmem:[#allocation52_spill] sm:$0xff]  ;;  %v15056_v49 = vld [vmem:[#allocation54_spill] sm:$0xff] }
 0x3c0   : > { %v5137_v45 = vpack.c.bf16 %v5108_v12, %v5107_v55  ;;  %v12141_v10 = vadd.f32 %v4993_v0, %v4844_v37  ;;  %15045 = vst [vmem:[#allocation188_spill] sm:$0xff] %v12150_v4  ;;  %v4073_v12 = vadd.f32 %v4023_v62, %v3655_v21  ;;  %vm15048_vm7 = vcmp.eq.s32.totalorder %v15047_v18, 1  ;;  %v15050_v55 = vld [vmem:[#allocation183_spill] sm:$0xff]  ;;  %v15054_v62 = vld [vmem:[#allocation245_spill] sm:$0xff] }
 0x3c1   : > { %v4558_v14 = vmax.f32 %v4526_v7, 0.0  ;;  %v4847_v16 = vpop.f32.mrf.mxu3  ;;  %7444 = vmatmul.msk.bf16.gmra.mxu2 %vm4571_vm2, %v15044_v28  ;;  %v12158_v29 = vsel %vm15048_vm7, %v12150_v4, 0.0  ;;  %vm15051_vm12 = vcmp.eq.s32.totalorder %v15050_v55, 1  ;;  %vm15053_vm14 = vcmp.eq.s32.totalorder %v15052_v43, 1  ;;  %v15055_v21 = vld [vmem:[#allocation255_spill] sm:$0xff] }
 0x3c2   : > { %7416 = vmatmul.msk.bf16.gmra.mxu1 %vm4571_vm2, %v5137_v45  ;;  %v12152_v38 = vld [vmem:[#allocation3 + $0xa1] sm:$0xff]  ;;  %15049 = vst [vmem:[#allocation137_spill] sm:$0xff] %v12158_v29  ;;  %v4655_v0 = vsel %vm15053_vm14, %v4623_v42, 0.0  ;;  %vm15057_vm13 = vcmp.eq.s32.totalorder %v15056_v49, 1  ;;  %v15058_v29 = vld [vmem:[#allocation60_spill] sm:$0xff]  ;;  %vm15068_vm14 = vcmp.eq.s32.totalorder %v10984_v35, 1 }
 0x3c3   : > { %15046 = vst [vmem:[#allocation204_spill] sm:$0xff] %v12152_v38  ;;  %v12163_v7 = vsel %vm15051_vm12, %v12152_v38, 0.0  ;;  %v4654_v8 = vsel %vm15057_vm13, %v4622_v22, 0.0  ;;  %v4708_v55 = vld [vmem:[#allocation3 + $0xa8] sm:$0xff]  ;;  %vm15059_vm10 = vcmp.eq.s32.totalorder %v15058_v29, 1  ;;  %v15060_v49 = vld [vmem:[#allocation58_spill] sm:$0xff] }
 0x3c4   : > { %4591 = vst.msk [vmem:[#allocation3 + $0xb0] sm:$0xff] %vm4571_vm2, %v4558_v14  ;;  %v4441_v37 = vpop.f32.mrf.mxu2  ;;  %v3238_v14 = vadd.f32 %v15055_v21, %v15054_v62  ;;  %v4740_v62 = vsel %vm15059_vm10, %v4708_v55, 0.0  ;;  %v5621_v21 = vld [vmem:[#allocation3 + $0xa8] sm:$0xff]  ;;  %vm15061_vm5 = vcmp.eq.s32.totalorder %v15060_v49, 1  ;;  %v15066_v55 = vld [vmem:[#allocation64_spill] sm:$0xff] }
 0x3c5   : > { %v4491_v1 = vadd.f32 %v4441_v37, %v4073_v12  ;;  %v4025_v58 = vpop.f32.mrf.mxu1  ;;  %v4677_v12 = vpack.c.bf16 %v4655_v0, %v4654_v8  ;;  %v4624_v37 = vld [vmem:[#allocation3 + $0xa7] sm:$0xff]  ;;  %vm15067_vm12 = vcmp.eq.s32.totalorder %v15066_v55, 1 }
 0x3c6   : > { %v3656_v42 = vadd.f32 %v11704_v56, %v3238_v14  ;;  %v15062_v8 = vld [vmem:[#allocation114_spill] sm:$0xff] }
 0x3c7   : > { %v4527_v28 = vadd.f32 %v12138_v32, %v4491_v1  ;;  %v4996_v18 = vpop.f32.mrf.mxu0  ;;  %vm15063_vm15 = vcmp.eq.s32.totalorder %v15062_v8, 1  ;;  %v15064_v56 = vld [vmem:[#allocation130_spill] sm:$0xff] }
 0x3c8   : > { %v12174_v4 = vadd.f32 %v4996_v18, %v4847_v16  ;;  %v4074_v22 = vadd.f32 %v4025_v58, %v3656_v42  ;;  %v12185_v0 = vsel %vm15063_vm15, %v4624_v37, 0.0  ;;  %vm15065_vm7 = vcmp.eq.s32.totalorder %v15064_v56, 1 }
 0x3c9   : > { %v4559_v43 = vmax.f32 %v4527_v28, 0.0  ;;  %v4849_v38 = vpop.f32.mrf.mxu3 }
 0x3ca   : > { %7395 = vmatmul.msk.bf16.gmra.mxu0 %vm4571_vm2, %v4677_v12  ;;  %v5110_v12 = vsel %vm15067_vm12, %v11712_v46, 0.0  ;;  %v15086_v46 = vld [vmem:[#allocation55_spill] sm:$0xff] }
 0x3cb   : > { %v4709_v45 = vld [vmem:[#allocation3 + $0xb0] sm:$0xff]  ;;  %4592 = vst.msk [vmem:[#allocation3 + $0xb8] sm:$0xff] %vm4571_vm2, %v4559_v43  ;;  %v15070_v43 = vld [vmem:[#allocation242_spill] sm:$0xff]  ;;  %vm15087_vm12 = vcmp.eq.s32.totalorder %v15086_v46, 1  ;;  %v15090_v46 = vld [vmem:[#allocation53_spill] sm:$0xff] }
 0x3cc   : > { %v4625_v1 = vld [vmem:[#allocation3 + $0xaf] sm:$0xff]  ;;  %v4741_v16 = vsel %vm15061_vm5, %v4709_v45, 0.0  ;;  %v4443_v18 = vpop.f32.mrf.mxu2  ;;  %v12198_v45 = vsel %vm15068_vm14, %v5621_v21, 0.0  ;;  %vm15071_vm13 = vcmp.eq.s32.totalorder %v15070_v43, 1  ;;  %v4656_v58 = vsel %vm15087_vm12, %v4624_v37, 0.0 }
 0x3cd   : > { %v12189_v14 = vsel %vm15065_vm7, %v4625_v1, 0.0  ;;  %v5622_v28 = vld [vmem:[#allocation3 + $0xb0] sm:$0xff]  ;;  %v4762_v29 = vpack.c.bf16 %v4741_v16, %v4740_v62  ;;  %v4492_v42 = vadd.f32 %v4443_v18, %v4074_v22  ;;  %15069 = vst [vmem:[#allocation9_spill] sm:$0xff] %v12198_v45  ;;  %v4028_v8 = vpop.f32.mrf.mxu1  ;;  %v15073_v62 = vld [vmem:[#allocation66_spill] sm:$0xff]  ;;  %vm15100_vm12 = vcmp.eq.s32.totalorder %v11187_v59, 1 }
 0x3ce   : > { %v12202_v49 = vsel %vm15071_vm13, %v5622_v28, 0.0  ;;  %vm15074_vm10 = vcmp.eq.s32.totalorder %v15073_v62, 1  ;;  %v15075_v18 = vld [vmem:[#allocation182_spill] sm:$0xff]  ;;  %vm15091_vm13 = vcmp.eq.s32.totalorder %v15090_v46, 1 }
 0x3cf   : > { %15072 = vst [vmem:[#allocation7_spill] sm:$0xff] %v12202_v49  ;;  %7372 = vmatmul.msk.bf16.gmra.mxu3 %vm4571_vm2, %v4762_v29  ;;  %v5109_v16 = vsel %vm15074_vm10, %v11710_v47, 0.0  ;;  %v4528_v22 = vadd.f32 %v12138_v32, %v4492_v42  ;;  %v4998_v56 = vpop.f32.mrf.mxu0  ;;  %v3657_v28 = vadd.f32 %v11730_v25, %v15075_v18  ;;  %v15076_v29 = vpack.c.bf16 %v11752_v44, %v11748_v39  ;;  %v12220_v47 = vld [vmem:[#allocation3 + $0xa9] sm:$0xff] }
 0x3d0   : > { %v5138_v35 = vpack.c.bf16 %v5110_v12, %v5109_v16  ;;  %v12211_v21 = vadd.f32 %v4998_v56, %v4849_v38  ;;  %v15077_v42 = vld [vmem:[#allocation180_spill] sm:$0xff]  ;;  %v15082_v39 = vld [vmem:[#allocation43_spill] sm:$0xff] }
 0x3d1   : > { %v4560_v55 = vmax.f32 %v4528_v22, 0.0  ;;  %v4852_v43 = vpop.f32.mrf.mxu3  ;;  %7445 = vmatmul.msk.bf16.gmra.mxu2 %vm4571_vm2, %v15076_v29  ;;  %v4075_v38 = vadd.f32 %v4028_v8, %v3657_v28  ;;  %vm15078_vm5 = vcmp.eq.s32.totalorder %v15077_v42, 1  ;;  %v15080_v16 = vld [vmem:[#allocation196_spill] sm:$0xff]  ;;  %vm15083_vm7 = vcmp.eq.s32.totalorder %v15082_v39, 1  ;;  %v15084_v8 = vld [vmem:[#allocation251_spill] sm:$0xff]  ;;  %v15085_v28 = vld [vmem:[#allocation262_spill] sm:$0xff] }
 0x3d2   : > { %7417 = vmatmul.msk.bf16.gmra.mxu1 %vm4571_vm2, %v5138_v35  ;;  %v12222_v62 = vld [vmem:[#allocation3 + $0xb1] sm:$0xff]  ;;  %v12228_v25 = vsel %vm15078_vm5, %v12220_v47, 0.0  ;;  %vm15081_vm15 = vcmp.eq.s32.totalorder %v15080_v16, 1  ;;  %v4657_v56 = vsel %vm15083_vm7, %v4625_v1, 0.0  ;;  %vm15098_vm7 = vcmp.eq.s32.totalorder %v11069_v53, 1 }
 0x3d3   : > { %4593 = vst.msk [vmem:[#allocation3 + $0xc0] sm:$0xff] %vm4571_vm2, %v4560_v55  ;;  %v12233_v22 = vsel %vm15081_vm15, %v12222_v62, 0.0  ;;  %v3240_v55 = vadd.f32 %v15085_v28, %v15084_v8  ;;  %v4710_v16 = vld [vmem:[#allocation3 + $0xb8] sm:$0xff] }
 0x3d4   : > { %v4446_v12 = vpop.f32.mrf.mxu2  ;;  %15079 = vst [vmem:[#allocation15_spill] sm:$0xff] %v12228_v25  ;;  %v15088_v25 = vld [vmem:[#allocation61_spill] sm:$0xff] }
 0x3d5   : > { %v4493_v44 = vadd.f32 %v4446_v12, %v4075_v38  ;;  %v4030_v18 = vpop.f32.mrf.mxu1  ;;  %v4678_v38 = vpack.c.bf16 %v4657_v56, %v4656_v58  ;;  %v4626_v12 = vld [vmem:[#allocation3 + $0xb7] sm:$0xff]  ;;  %v3658_v1 = vadd.f32 %v11776_v9, %v3240_v55  ;;  %vm15089_vm14 = vcmp.eq.s32.totalorder %v15088_v25, 1 }
 0x3d6   : > { %v4742_v8 = vsel %vm15089_vm14, %v4710_v16, 0.0  ;;  %v5623_v28 = vld [vmem:[#allocation3 + $0xb8] sm:$0xff]  ;;  %v15094_v9 = vld [vmem:[#allocation136_spill] sm:$0xff]  ;;  %v15096_v16 = vld [vmem:[#allocation70_spill] sm:$0xff] }
 0x3d7   : > { %v4529_v29 = vadd.f32 %v12138_v32, %v4493_v44  ;;  %v5001_v42 = vpop.f32.mrf.mxu0  ;;  %v4076_v37 = vadd.f32 %v4030_v18, %v3658_v1  ;;  %v15092_v58 = vld [vmem:[#allocation121_spill] sm:$0xff]  ;;  %vm15095_vm5 = vcmp.eq.s32.totalorder %v15094_v9, 1  ;;  %vm15097_vm15 = vcmp.eq.s32.totalorder %v15096_v16, 1  ;;  %v15104_v9 = vld [vmem:[#allocation190_spill] sm:$0xff] }
 0x3d8   : > { %v12244_v45 = vadd.f32 %v5001_v42, %v4852_v43  ;;  %vm15093_vm10 = vcmp.eq.s32.totalorder %v15092_v58, 1  ;;  %v3659_v59 = vadd.f32 %v11804_v27, %v15104_v9  ;;  %v15115_v9 = vld [vmem:[#allocation269_spill] sm:$0xff] }
 0x3d9   : > { %v4561_v39 = vmax.f32 %v4529_v29, 0.0  ;;  %v4854_v49 = vpop.f32.mrf.mxu3  ;;  %v12255_v56 = vsel %vm15093_vm10, %v4626_v12, 0.0 }
 0x3da   : > { %7396 = vmatmul.msk.bf16.gmra.mxu0 %vm4571_vm2, %v4678_v38  ;;  %v4711_v35 = vld [vmem:[#allocation3 + $0xc0] sm:$0xff]  ;;  %v5112_v38 = vsel %vm15097_vm15, %v11784_v41, 0.0 }
 0x3db   : > { %v4627_v44 = vld [vmem:[#allocation3 + $0xbf] sm:$0xff]  ;;  %4594 = vst.msk [vmem:[#allocation3 + $0xc8] sm:$0xff] %vm4571_vm2, %v4561_v39  ;;  %v4743_v43 = vsel %vm15091_vm13, %v4711_v35, 0.0  ;;  %v12268_v35 = vsel %vm15098_vm7, %v5623_v28, 0.0 }
 0x3dc   : > { %v12259_v55 = vsel %vm15095_vm5, %v4627_v44, 0.0  ;;  %v5624_v29 = vld [vmem:[#allocation3 + $0xc0] sm:$0xff]  ;;  %v4448_v42 = vpop.f32.mrf.mxu2  ;;  %v4763_v25 = vpack.c.bf16 %v4743_v43, %v4742_v8  ;;  %15099 = vst [vmem:[#allocation220_spill] sm:$0xff] %v12268_v35  ;;  %v15102_v8 = vld [vmem:[#allocation23_spill] sm:$0xff] }
 0x3dd   : > { %v4494_v1 = vadd.f32 %v4448_v42, %v4076_v37  ;;  %v12272_v39 = vsel %vm15100_vm12, %v5624_v29, 0.0  ;;  %v4033_v46 = vpop.f32.mrf.mxu1  ;;  %vm15103_vm14 = vcmp.eq.s32.totalorder %v15102_v8, 1  ;;  %v15109_v8 = vld [vmem:[#allocation192_spill] sm:$0xff] }
 0x3de   : > { %15101 = vst [vmem:[#allocation232_spill] sm:$0xff] %v12272_v39  ;;  %v5111_v43 = vsel %vm15103_vm14, %v11782_v15, 0.0  ;;  %v12290_v15 = vld [vmem:[#allocation3 + $0xb9] sm:$0xff]  ;;  %vm15110_vm10 = vcmp.eq.s32.totalorder %v15109_v8, 1  ;;  %v15118_v39 = vld [vmem:[#allocation67_spill] sm:$0xff] }
 0x3df   : > { %7373 = vmatmul.msk.bf16.gmra.mxu3 %vm4571_vm2, %v4763_v25  ;;  %v4530_v37 = vadd.f32 %v12138_v32, %v4494_v1  ;;  %v5003_v58 = vpop.f32.mrf.mxu0  ;;  %v5139_v53 = vpack.c.bf16 %v5112_v38, %v5111_v43  ;;  %v15105_v25 = vpack.c.bf16 %v11825_v57, %v11821_v13  ;;  %v15106_v1 = vld [vmem:[#allocation202_spill] sm:$0xff]  ;;  %v15112_v13 = vld [vmem:[#allocation63_spill] sm:$0xff]  ;;  %vm15119_vm7 = vcmp.eq.s32.totalorder %v15118_v39, 1 }
 0x3e0   : > { %v12281_v28 = vadd.f32 %v5003_v58, %v4854_v49  ;;  %v4077_v49 = vadd.f32 %v4033_v46, %v3659_v59  ;;  %vm15107_vm13 = vcmp.eq.s32.totalorder %v15106_v1, 1  ;;  %vm15113_vm5 = vcmp.eq.s32.totalorder %v15112_v13, 1  ;;  %v15114_v46 = vld [vmem:[#allocation258_spill] sm:$0xff]  ;;  %v15116_v1 = vld [vmem:[#allocation48_spill] sm:$0xff] }
 0x3e1   : > { %v4562_v29 = vmax.f32 %v4530_v37, 0.0  ;;  %v4857_v42 = vpop.f32.mrf.mxu3  ;;  %7446 = vmatmul.msk.bf16.gmra.mxu2 %vm4571_vm2, %v15105_v25  ;;  %v12298_v27 = vsel %vm15107_vm13, %v12290_v15, 0.0  ;;  %v4659_v37 = vsel %vm15113_vm5, %v4627_v44, 0.0  ;;  %v3242_v59 = vadd.f32 %v15115_v9, %v15114_v46 }
 0x3e2   : > { %7418 = vmatmul.msk.bf16.gmra.mxu1 %vm4571_vm2, %v5139_v53  ;;  %v12292_v16 = vld [vmem:[#allocation3 + $0xc1] sm:$0xff]  ;;  %15108 = vst [vmem:[#allocation14_spill] sm:$0xff] %v12298_v27  ;;  %vm15117_vm15 = vcmp.eq.s32.totalorder %v15116_v1, 1  ;;  %vm15131_vm5 = vcmp.eq.s32.totalorder %v11235_v51, 1  ;;  %v15137_v51 = vld [vmem:[#allocation20_spill] sm:$0xff] }
 0x3e3   : > { %4595 = vst.msk [vmem:[#allocation3 + $0xd0] sm:$0xff] %vm4571_vm2, %v4562_v29  ;;  %v12303_v43 = vsel %vm15110_vm10, %v12292_v16, 0.0  ;;  %v4658_v41 = vsel %vm15117_vm15, %v4626_v12, 0.0  ;;  %v4712_v8 = vld [vmem:[#allocation3 + $0xc8] sm:$0xff]  ;;  %v3660_v44 = vadd.f32 %v11849_v34, %v3242_v59  ;;  %v15125_v59 = vld [vmem:[#allocation142_spill] sm:$0xff] }
 0x3e4   : > { %v4451_v38 = vpop.f32.mrf.mxu2  ;;  %15111 = vst [vmem:[#allocation29_spill] sm:$0xff] %v12303_v43  ;;  %v4744_v46 = vsel %vm15119_vm7, %v4712_v8, 0.0  ;;  %v12320_v9 = vld [vmem:[#allocation3 + $0xc8] sm:$0xff]  ;;  %vm15126_vm13 = vcmp.eq.s32.totalorder %v15125_v59, 1  ;;  %v15128_v8 = vld [vmem:[#allocation74_spill] sm:$0xff] }
 0x3e5   : > { %v4495_v57 = vadd.f32 %v4451_v38, %v4077_v49  ;;  %v4035_v53 = vpop.f32.mrf.mxu1  ;;  %v4679_v49 = vpack.c.bf16 %v4659_v37, %v4658_v41  ;;  %v4628_v38 = vld [vmem:[#allocation3 + $0xc7] sm:$0xff]  ;;  %15120 = vst [vmem:[#allocation18_spill] sm:$0xff] %v12320_v9  ;;  %v15123_v37 = vld [vmem:[#allocation129_spill] sm:$0xff]  ;;  %vm15129_vm10 = vcmp.eq.s32.totalorder %v15128_v8, 1 }
 0x3e6   : > { %v4078_v12 = vadd.f32 %v4035_v53, %v3660_v44  ;;  %vm15124_vm14 = vcmp.eq.s32.totalorder %v15123_v37, 1  ;;  %v12343_v44 = vsel %vm3847_vm1, %v12320_v9, 0.0  ;;  %v15136_v8 = vld [vmem:[#allocation197_spill] sm:$0xff] }
 0x3e7   : > { %v4531_v29 = vadd.f32 %v12138_v32, %v4495_v57  ;;  %v5006_v25 = vpop.f32.mrf.mxu0  ;;  %v12327_v34 = vsel %vm15124_vm14, %v4628_v38, 0.0  ;;  %15130 = vst [vmem:[#allocation96_spill] sm:$0xff] %v12343_v44  ;;  %v3661_v53 = vadd.f32 %v15137_v51, %v15136_v8 }
 0x3e8   : > { %v12314_v18 = vadd.f32 %v5006_v25, %v4857_v42  ;;  %v15121_v42 = vld [vmem:[#allocation59_spill] sm:$0xff] }
 0x3e9   : > { %v4563_v13 = vmax.f32 %v4531_v29, 0.0  ;;  %v4859_v35 = vpop.f32.mrf.mxu3  ;;  %vm15122_vm12 = vcmp.eq.s32.totalorder %v15121_v42, 1 }
 0x3ea   : > { %7397 = vmatmul.msk.bf16.gmra.mxu0 %vm4571_vm2, %v4679_v49  ;;  %v4713_v58 = vld [vmem:[#allocation3 + $0xd0] sm:$0xff]  ;;  %v5114_v49 = vsel %vm15129_vm10, %v11863_v5, 0.0 }
 0x3eb   : > { %v4629_v57 = vld [vmem:[#allocation3 + $0xcf] sm:$0xff]  ;;  %4596 = vst.msk [vmem:[#allocation3 + $0xd8] sm:$0xff] %vm4571_vm2, %v4563_v13  ;;  %v4745_v41 = vsel %vm15122_vm12, %v4713_v58, 0.0 }
 0x3ec   : > { %v12331_v29 = vsel %vm15126_vm13, %v4629_v57, 0.0  ;;  %v12333_v25 = vld [vmem:[#allocation3 + $0xd0] sm:$0xff]  ;;  %v4453_v39 = vpop.f32.mrf.mxu2  ;;  %v4764_v1 = vpack.c.bf16 %v4745_v41, %v4744_v46 }
 0x3ed   : > { %15127 = vst [vmem:[#allocation98_spill] sm:$0xff] %v12333_v25  ;;  %v4496_v58 = vadd.f32 %v4453_v39, %v4078_v12  ;;  %v12348_v13 = vsel %vm15131_vm5, %v12333_v25, 0.0  ;;  %v4038_v42 = vpop.f32.mrf.mxu1  ;;  %v15133_v46 = vld [vmem:[#allocation144_spill] sm:$0xff] }
 0x3ee   : > { %15132 = vst [vmem:[#allocation208_spill] sm:$0xff] %v12348_v13  ;;  %v15134_v41 = vld [vmem:[#allocation32_spill] sm:$0xff] }
 0x3ef   : > { %7374 = vmatmul.msk.bf16.gmra.mxu3 %vm4571_vm2, %v4764_v1  ;;  %vm15135_vm15 = vcmp.eq.s32.totalorder %v15134_v41, 1  ;;  %v4532_v37 = vadd.f32 %v12138_v32, %v4496_v58  ;;  %v5008_v33 = vpop.f32.mrf.mxu0  ;;  %v15138_v1 = vpack.c.bf16 %v11900_v30, %v11896_v48  ;;  %v15139_v58 = vld [vmem:[#allocation12_spill] sm:$0xff]  ;;  %v15145_v30 = vld [vmem:[#allocation69_spill] sm:$0xff] }
 0x3f0   : > { %v5113_v5 = vsel %vm15135_vm15, %v15133_v46, 0.0  ;;  %v12357_v39 = vadd.f32 %v5008_v33, %v4859_v35  ;;  %v12366_v46 = vld [vmem:[#allocation3 + $0xc9] sm:$0xff]  ;;  %v4079_v35 = vadd.f32 %v4038_v42, %v3661_v53  ;;  %vm15140_vm1 = vcmp.eq.s32.totalorder %v15139_v58, 1 }
 0x3f1   : > { %v5140_v59 = vpack.c.bf16 %v5114_v49, %v5113_v5  ;;  %v4564_v25 = vmax.f32 %v4532_v37, 0.0  ;;  %v4862_v9 = vpop.f32.mrf.mxu3  ;;  %7447 = vmatmul.msk.bf16.gmra.mxu2 %vm4571_vm2, %v15138_v1  ;;  %v12374_v5 = vsel %vm15140_vm1, %v12366_v46, 0.0  ;;  %v15142_v37 = vld [vmem:[#allocation108_spill] sm:$0xff]  ;;  %vm15146_vm12 = vcmp.eq.s32.totalorder %v15145_v30, 1 }
 0x3f2   : > { %v12368_v41 = vld [vmem:[#allocation3 + $0xd1] sm:$0xff]  ;;  %15141 = vst [vmem:[#allocation199_spill] sm:$0xff] %v12374_v5  ;;  %vm15143_vm7 = vcmp.eq.s32.totalorder %v15142_v37, 1 }
 0x3f3   : > { %7419 = vmatmul.msk.bf16.gmra.mxu1 %vm4571_vm2, %v5140_v59  ;;  %4597 = vst.msk [vmem:[#allocation3 + $0xe0] sm:$0xff] %vm4571_vm2, %v4564_v25  ;;  %v12379_v33 = vsel %vm15143_vm7, %v12368_v41, 0.0  ;;  %v4661_v59 = vsel %vm15146_vm12, %v4629_v57, 0.0  ;;  %v15147_v53 = vld [vmem:[#allocation264_spill] sm:$0xff]  ;;  %v4714_v37 = vld [vmem:[#allocation3 + $0xd8] sm:$0xff] }
 0x3f4   : > { %v4456_v49 = vpop.f32.mrf.mxu2  ;;  %15144 = vst [vmem:[#allocation143_spill] sm:$0xff] %v12379_v33  ;;  %v15148_v42 = vld [vmem:[#allocation276_spill] sm:$0xff] }
 0x3f5   : > { %v4497_v48 = vadd.f32 %v4456_v49, %v4079_v35  ;;  %v4040_v25 = vpop.f32.mrf.mxu1  ;;  %v3244_v51 = vadd.f32 %v15148_v42, %v15147_v53  ;;  %v15149_v12 = vld [vmem:[#allocation56_spill] sm:$0xff]  ;;  %v12396_v42 = vld [vmem:[#allocation3 + $0xd8] sm:$0xff] }
 0x3f6   : > { %vm15150_vm14 = vcmp.eq.s32.totalorder %v15149_v12, 1  ;;  %v4630_v49 = vld [vmem:[#allocation3 + $0xd7] sm:$0xff]  ;;  %15153 = vst [vmem:[#allocation148_spill] sm:$0xff] %v12396_v42  ;;  %v15156_v12 = vld [vmem:[#allocation135_spill] sm:$0xff] }
 0x3f7   : > { %v4533_v1 = vadd.f32 %v12138_v32, %v4497_v48  ;;  %v5011_v58 = vpop.f32.mrf.mxu0  ;;  %v4660_v44 = vsel %vm15150_vm14, %v4628_v38, 0.0  ;;  %v3662_v57 = vadd.f32 %v11924_v23, %v3244_v51  ;;  %v15151_v5 = vld [vmem:[#allocation4_spill] sm:$0xff]  ;;  %vm15157_vm5 = vcmp.eq.s32.totalorder %v15156_v12, 1 }
 0x3f8   : > { %v12390_v13 = vadd.f32 %v5011_v58, %v4862_v9  ;;  %v4680_v35 = vpack.c.bf16 %v4661_v59, %v4660_v44  ;;  %vm15152_vm13 = vcmp.eq.s32.totalorder %v15151_v5, 1  ;;  %v15154_v9 = vld [vmem:[#allocation65_spill] sm:$0xff]  ;;  %v12403_v23 = vsel %vm15157_vm5, %v4630_v49, 0.0  ;;  %v15158_v59 = vld [vmem:[#allocation150_spill] sm:$0xff] }
 0x3f9   : > { %v4565_v30 = vmax.f32 %v4533_v1, 0.0  ;;  %v4864_v27 = vpop.f32.mrf.mxu3  ;;  %v4746_v53 = vsel %vm15152_vm13, %v4714_v37, 0.0  ;;  %v4080_v38 = vadd.f32 %v4040_v25, %v3662_v57  ;;  %vm15155_vm10 = vcmp.eq.s32.totalorder %v15154_v9, 1  ;;  %v15161_v37 = vld [vmem:[#allocation78_spill] sm:$0xff]  ;;  %v15166_v9 = vld [vmem:[#allocation259_spill] sm:$0xff]  ;;  %v15171_v25 = vld [vmem:[#allocation280_spill] sm:$0xff] }
 0x3fa   : > { %7398 = vmatmul.msk.bf16.gmra.mxu0 %vm4571_vm2, %v4680_v35  ;;  %v4715_v8 = vld [vmem:[#allocation3 + $0xe0] sm:$0xff]  ;;  %vm15159_vm15 = vcmp.eq.s32.totalorder %v15158_v59, 1  ;;  %vm15162_vm1 = vcmp.eq.s32.totalorder %v15161_v37, 1  ;;  %vm15167_vm12 = vcmp.eq.s32.totalorder %v15166_v9, 1  ;;  %v15172_v9 = vld [vmem:[#allocation8_spill] sm:$0xff] }
 0x3fb   : > { %v4631_v48 = vld [vmem:[#allocation3 + $0xdf] sm:$0xff]  ;;  %4598 = vst.msk [vmem:[#allocation3 + $0xe8] sm:$0xff] %vm4571_vm2, %v4565_v30  ;;  %v4747_v44 = vsel %vm15155_vm10, %v4715_v8, 0.0  ;;  %v5116_v35 = vsel %vm15162_vm1, %v11932_v54, 0.0 }
 0x3fc   : > { %v12407_v51 = vsel %vm15159_vm15, %v4631_v48, 0.0  ;;  %v12409_v1 = vld [vmem:[#allocation3 + $0xe0] sm:$0xff]  ;;  %v4458_v5 = vpop.f32.mrf.mxu2  ;;  %v4765_v58 = vpack.c.bf16 %v4747_v44, %v4746_v53 }
 0x3fd   : > { %15160 = vst [vmem:[#allocation138_spill] sm:$0xff] %v12409_v1  ;;  %v4498_v8 = vadd.f32 %v4458_v5, %v4080_v38  ;;  %v15163_v57 = vld [vmem:[#allocation246_spill] sm:$0xff]  ;;  %v12424_v12 = vsel %vm15167_vm12, %v12409_v1, 0.0  ;;  %v4043_v59 = vpop.f32.mrf.mxu1  ;;  %v3663_v1 = vadd.f32 %v15172_v9, %v15171_v25 }
 0x3fe   : > { %vm15164_vm7 = vcmp.eq.s32.totalorder %v15163_v57, 1  ;;  %15168 = vst [vmem:[#allocation227_spill] sm:$0xff] %v12424_v12  ;;  %v15169_v53 = vld [vmem:[#allocation42_spill] sm:$0xff] }
 0x3ff   : > { %v12419_v30 = vsel %vm15164_vm7, %v12396_v42, 0.0  ;;  %7375 = vmatmul.msk.bf16.gmra.mxu3 %vm4571_vm2, %v4765_v58  ;;  %vm15170_vm14 = vcmp.eq.s32.totalorder %v15169_v53, 1  ;;  %v4534_v44 = vadd.f32 %v12138_v32, %v4498_v8  ;;  %v5013_v5 = vpop.f32.mrf.mxu0  ;;  %v15173_v58 = vpack.c.bf16 %v11972_v6, %v11968_v36  ;;  %v15174_v8 = vld [vmem:[#allocation209_spill] sm:$0xff]  ;;  %v15183_v38 = vld [vmem:[#allocation62_spill] sm:$0xff] }
 0x400   : > { %15165 = vst [vmem:[#allocation31_spill] sm:$0xff] %v12419_v30  ;;  %v5115_v54 = vsel %vm15170_vm14, %v11930_v40, 0.0  ;;  %v12433_v57 = vadd.f32 %v5013_v5, %v4864_v27  ;;  %v12442_v40 = vld [vmem:[#allocation3 + $0xd9] sm:$0xff]  ;;  %v4081_v27 = vadd.f32 %v4043_v59, %v3663_v1  ;;  %vm15175_vm13 = vcmp.eq.s32.totalorder %v15174_v8, 1  ;;  %v15181_v1 = vld [vmem:[#allocation271_spill] sm:$0xff] }
 0x401   : > { %v5141_v37 = vpack.c.bf16 %v5116_v35, %v5115_v54  ;;  %v4566_v42 = vmax.f32 %v4534_v44, 0.0  ;;  %v4867_v33 = vpop.f32.mrf.mxu3  ;;  %7448 = vmatmul.msk.bf16.gmra.mxu2 %vm4571_vm2, %v15173_v58  ;;  %v12450_v25 = vsel %vm15175_vm13, %v12442_v40, 0.0  ;;  %v15177_v54 = vld [vmem:[#allocation216_spill] sm:$0xff]  ;;  %v15179_v6 = vld [vmem:[#allocation73_spill] sm:$0xff]  ;;  %v15182_v59 = vld [vmem:[#allocation283_spill] sm:$0xff]  ;;  %vm15184_vm15 = vcmp.eq.s32.totalorder %v15183_v38, 1 }
 0x402   : > { %v12444_v53 = vld [vmem:[#allocation3 + $0xe1] sm:$0xff]  ;;  %15176 = vst [vmem:[#allocation234_spill] sm:$0xff] %v12450_v25  ;;  %vm15178_vm10 = vcmp.eq.s32.totalorder %v15177_v54, 1  ;;  %vm15180_vm5 = vcmp.eq.s32.totalorder %v15179_v6, 1  ;;  %v3246_v9 = vadd.f32 %v15182_v59, %v15181_v1  ;;  %v4662_v30 = vsel %vm15184_vm15, %v4630_v49, 0.0  ;;  %v15189_v38 = vld [vmem:[#allocation141_spill] sm:$0xff] }
 0x403   : > { %7420 = vmatmul.msk.bf16.gmra.mxu1 %vm4571_vm2, %v5141_v37  ;;  %4599 = vst.msk [vmem:[#allocation3 + $0xf0] sm:$0xff] %vm4571_vm2, %v4566_v42  ;;  %v12455_v44 = vsel %vm15178_vm10, %v12444_v53, 0.0  ;;  %v4663_v5 = vsel %vm15180_vm5, %v4631_v48, 0.0  ;;  %v4716_v54 = vld [vmem:[#allocation3 + $0xe8] sm:$0xff]  ;;  %vm15190_vm12 = vcmp.eq.s32.totalorder %v15189_v38, 1 }
 0x404   : > { %v4461_v35 = vpop.f32.mrf.mxu2  ;;  %v3664_v48 = vadd.f32 %v11992_v2, %v3246_v9  ;;  %v15185_v25 = vld [vmem:[#allocation75_spill] sm:$0xff] }
 0x405   : > { %v4499_v36 = vadd.f32 %v4461_v35, %v4081_v27  ;;  %v4045_v42 = vpop.f32.mrf.mxu1  ;;  %v4681_v27 = vpack.c.bf16 %v4663_v5, %v4662_v30  ;;  %v4632_v35 = vld [vmem:[#allocation3 + $0xe7] sm:$0xff]  ;;  %vm15186_vm1 = vcmp.eq.s32.totalorder %v15185_v25, 1 }
 0x406   : > { %v4748_v1 = vsel %vm15186_vm1, %v4716_v54, 0.0  ;;  %v12472_v59 = vld [vmem:[#allocation3 + $0xe8] sm:$0xff]  ;;  %v4082_v49 = vadd.f32 %v4045_v42, %v3664_v48  ;;  %v12479_v2 = vsel %vm15190_vm12, %v4632_v35, 0.0  ;;  %v15191_v5 = vld [vmem:[#allocation158_spill] sm:$0xff] }
 0x407   : > { %v4535_v58 = vadd.f32 %v12138_v32, %v4499_v36  ;;  %v5016_v8 = vpop.f32.mrf.mxu0  ;;  %vm15192_vm14 = vcmp.eq.s32.totalorder %v15191_v5, 1  ;;  %v15194_v54 = vld [vmem:[#allocation82_spill] sm:$0xff]  ;;  %v7642_v48 = vld [vmem:[%s13475_s7 + $0x78] sm:$0xff] }
 0x408   : > { %v12466_v12 = vadd.f32 %v5016_v8, %v4867_v33  ;;  %v15187_v33 = vld [vmem:[#allocation71_spill] sm:$0xff]  ;;  %vm15195_vm13 = vcmp.eq.s32.totalorder %v15194_v54, 1  ;;  %6520 = vmatpush.bf16.msra.mxu2 %v7642_v48  ;;  %v15203_v48 = vpack.c.bf16 %v12042_v61, %v12038_v26  ;;  %v15207_v26 = vld [vmem:[#allocation213_spill] sm:$0xff] }
 0x409   : > { %v4567_v6 = vmax.f32 %v4535_v58, 0.0  ;;  %v4869_v43 = vpop.f32.mrf.mxu3  ;;  %vm15188_vm7 = vcmp.eq.s32.totalorder %v15187_v33, 1  ;;  %v12498_v33 = vsel %vm3851_vm4, %v12472_v59, 0.0  ;;  %v7638_v38 = vld [vmem:[%s13475_s7 + $0x58] sm:$0xff] }
 0x40a   : > { %7399 = vmatmul.msk.bf16.gmra.mxu0 %vm4571_vm2, %v4681_v27  ;;  %v4717_v37 = vld [vmem:[#allocation3 + $0xf0] sm:$0xff]  ;;  %v5118_v27 = vsel %vm15195_vm13, %v12003_v3, 0.0  ;;  %15197 = vst [vmem:[#allocation21_spill] sm:$0xff] %v12498_v33  ;;  %v15200_v3 = vld [vmem:[#allocation45_spill] sm:$0xff] }
 0x40b   : > { %v4633_v36 = vld [vmem:[#allocation3 + $0xef] sm:$0xff]  ;;  %4600 = vst.msk [vmem:[#allocation3 + $0xf8] sm:$0xff] %vm4571_vm2, %v4567_v6  ;;  %v4749_v30 = vsel %vm15188_vm7, %v4717_v37, 0.0  ;;  %vm15201_vm10 = vcmp.eq.s32.totalorder %v15200_v3, 1  ;;  %v15202_v3 = vld [vmem:[#allocation286_spill] sm:$0xff]  ;;  %5988 = vmatpush.bf16.msra.mxu0 %v7638_v38  ;;  %v15210_v38 = vld [vmem:[#allocation77_spill] sm:$0xff] }
 0x40c   : > { %v12483_v9 = vsel %vm15192_vm14, %v4633_v36, 0.0  ;;  %v12485_v58 = vld [vmem:[#allocation3 + $0xf0] sm:$0xff]  ;;  %v4463_v25 = vpop.f32.mrf.mxu2  ;;  %v4766_v8 = vpack.c.bf16 %v4749_v30, %v4748_v1  ;;  %vm15211_vm5 = vcmp.eq.s32.totalorder %v15210_v38, 1 }
 0x40d   : > { %15193 = vst [vmem:[#allocation16_spill] sm:$0xff] %v12485_v58  ;;  %v4500_v37 = vadd.f32 %v4463_v25, %v4082_v49  ;;  %v12503_v1 = vsel %vm3852_vm11, %v12485_v58, 0.0  ;;  %v4048_v30 = vpop.f32.mrf.mxu1  ;;  %v5117_v49 = vsel %vm15201_vm10, %v12001_v50, 0.0  ;;  %v7640_v50 = vld [vmem:[%s13475_s7 + $0x68] sm:$0xff]  ;;  %vm15208_vm11 = vcmp.eq.s32.totalorder %v15207_v26, 1  ;;  %v15213_v33 = vld [vmem:[#allocation68_spill] sm:$0xff] }
 0x40e   : > { %15199 = vst [vmem:[#allocation40_spill] sm:$0xff] %v12503_v1  ;;  %v5142_v6 = vpack.c.bf16 %v5118_v27, %v5117_v49  ;;  %v12530_v49 = vld [vmem:[#allocation3 + $0xe9] sm:$0xff]  ;;  %6254 = vmatpush.bf16.msra.mxu1 %v7640_v50  ;;  %v15212_v50 = vld [vmem:[#allocation278_spill] sm:$0xff]  ;;  %vm15214_vm15 = vcmp.eq.s32.totalorder %v15213_v33, 1 }
 0x40f   : > { %7376 = vmatmul.msk.bf16.gmra.mxu3 %vm4571_vm2, %v4766_v8  ;;  %v4536_v25 = vadd.f32 %v12138_v32, %v4500_v37  ;;  %v5018_v54 = vpop.f32.mrf.mxu0  ;;  %v7644_v8 = vld [vmem:[%s13475_s7 + $0x88] sm:$0xff]  ;;  %v3665_v37 = vadd.f32 %v12025_v60, %v15202_v3  ;;  %v4664_v1 = vsel %vm15214_vm15, %v4632_v35, 0.0 }
 0x410   : > { %v12518_v42 = vadd.f32 %v5018_v54, %v4869_v43  ;;  %6786 = vmatpush.bf16.msra.mxu3 %v7644_v8  ;;  %v4665_v8 = vsel %vm15211_vm5, %v4633_v36, 0.0  ;;  %v7637_v36 = vld [vmem:[%s13475_s7 + $0x50] sm:$0xff] }
 0x411   : > { %v4568_v5 = vmax.f32 %v4536_v25, 0.0  ;;  %v4872_v27 = vpop.f32.mrf.mxu3  ;;  %7449 = vmatmul.msk.bf16.gmra.mxu2 %vm4571_vm2, %v15203_v48  ;;  %v4083_v54 = vadd.f32 %v4048_v30, %v3665_v37  ;;  %v15204_v25 = vld [vmem:[#allocation127_spill] sm:$0xff]  ;;  %v3248_v37 = vadd.f32 %v12016_v52, %v15212_v50  ;;  %5989 = vmatpush.bf16.msra.mxu0 %v7637_v36  ;;  %v4992_v36 = vadd.f32 %v12097_v31, %v12063_v19 }
 0x412   : > { %v12532_v43 = vld [vmem:[#allocation3 + $0xf1] sm:$0xff]  ;;  %vm15205_vm4 = vcmp.eq.s32.totalorder %v15204_v25, 1 }
 0x413   : > { %7421 = vmatmul.msk.bf16.gmra.mxu1 %vm4571_vm2, %v5142_v6  ;;  %4601 = vst.msk [vmem:[#allocation3 + $0x100] sm:$0xff] %vm4571_vm2, %v4568_v5  ;;  %v12538_v6 = vsel %vm15205_vm4, %v12530_v49, 0.0  ;;  %v12543_v61 = vsel %vm15208_vm11, %v12532_v43, 0.0  ;;  %v4718_v26 = vld [vmem:[#allocation3 + $0xf8] sm:$0xff]  ;;  %v3666_v38 = vadd.f32 %v12066_v63, %v3248_v37 }
 0x414   : > { %v4466_v60 = vpop.f32.mrf.mxu2  ;;  %15206 = vst [vmem:[#allocation99_spill] sm:$0xff] %v12538_v6  ;;  %v12563_v50 = vld [vmem:[#allocation3 + $0xf8] sm:$0xff] }
 0x415   : > { %15209 = vst [vmem:[#allocation91_spill] sm:$0xff] %v12543_v61  ;;  %v4501_v3 = vadd.f32 %v4466_v60, %v4083_v54  ;;  %v4050_v30 = vpop.f32.mrf.mxu1  ;;  %v4682_v54 = vpack.c.bf16 %v4665_v8, %v4664_v1  ;;  %v4634_v60 = vld [vmem:[#allocation3 + $0xf7] sm:$0xff] }
 0x416   : > { %v4084_v1 = vadd.f32 %v4050_v30, %v3666_v38  ;;  %v15221_v37 = vld [vmem:[#allocation165_spill] sm:$0xff] }
 0x417   : > { %v4537_v48 = vadd.f32 %v12138_v32, %v4501_v3  ;;  %v5021_v25 = vpop.f32.mrf.mxu0  ;;  %v15215_v3 = vld [vmem:[#allocation79_spill] sm:$0xff]  ;;  %vm15222_vm14 = vcmp.eq.s32.totalorder %v15221_v37, 1  ;;  %v15224_v61 = vld [vmem:[#allocation37_spill] sm:$0xff] }
 0x418   : > { %v12554_v58 = vadd.f32 %v5021_v25, %v4872_v27  ;;  %vm15216_vm1 = vcmp.eq.s32.totalorder %v15215_v3, 1  ;;  %v15217_v27 = vld [vmem:[#allocation27_spill] sm:$0xff]  ;;  %v15219_v25 = vld [vmem:[#allocation149_spill] sm:$0xff]  ;;  %vm15225_vm13 = vcmp.eq.s32.totalorder %v15224_v61, 1 }
 0x419   : > { %v4569_v5 = vmax.f32 %v4537_v48, 0.0  ;;  %v4874_v6 = vpop.f32.mrf.mxu3  ;;  %v4750_v33 = vsel %vm15216_vm1, %v4718_v26, 0.0  ;;  %vm15218_vm7 = vcmp.eq.s32.totalorder %v15217_v27, 1  ;;  %vm15220_vm12 = vcmp.eq.s32.totalorder %v15219_v25, 1  ;;  %v15228_v25 = vld [vmem:[#allocation272_spill] sm:$0xff]  ;;  %v15231_v61 = vld [vmem:[#allocation83_spill] sm:$0xff] }
 0x41a   : > { %7400 = vmatmul.msk.bf16.gmra.mxu0 %vm4571_vm2, %v4682_v54  ;;  %v4719_v52 = vld [vmem:[#allocation3 + $0x100] sm:$0xff]  ;;  %v12570_v63 = vsel %vm15220_vm12, %v4634_v60, 0.0  ;;  %v12588_v27 = vsel %vm3853_vm6, %v12563_v50, 0.0  ;;  %vm15229_vm10 = vcmp.eq.s32.totalorder %v15228_v25, 1  ;;  %vm15232_vm4 = vcmp.eq.s32.totalorder %v15231_v61, 1 }
 0x41b   : > { %v4635_v35 = vld [vmem:[#allocation3 + $0xff] sm:$0xff]  ;;  %4602 = vst.msk [vmem:[#allocation3 + $0x108] sm:$0xff] %vm4571_vm2, %v4569_v5  ;;  %v4751_v8 = vsel %vm15218_vm7, %v4719_v52, 0.0  ;;  %v5120_v5 = vsel %vm15225_vm13, %v12077_v11, 0.0 }
 0x41c   : > { %v12574_v48 = vsel %vm15222_vm14, %v4635_v35, 0.0  ;;  %v12576_v54 = vld [vmem:[#allocation3 + $0x100] sm:$0xff]  ;;  %v4468_v26 = vpop.f32.mrf.mxu2  ;;  %v4767_v3 = vpack.c.bf16 %v4751_v8, %v4750_v33  ;;  %15227 = vst [vmem:[#allocation116_spill] sm:$0xff] %v12588_v27  ;;  %v5119_v8 = vsel %vm15232_vm4, %v12075_v17, 0.0 }
 0x41d   : > { %15223 = vst [vmem:[#allocation214_spill] sm:$0xff] %v12576_v54  ;;  %v4502_v38 = vadd.f32 %v4468_v26, %v4084_v1  ;;  %v12593_v33 = vsel %vm15229_vm10, %v12576_v54, 0.0  ;;  %v5225_v11 = vpop.f32.mrf.mxu1  ;;  %v5143_v26 = vpack.c.bf16 %v5120_v5, %v5119_v8  ;;  %v12604_v25 = vld [vmem:[#allocation3 + $0xf9] sm:$0xff] }
 0x41e   : > { %15230 = vst [vmem:[#allocation274_spill] sm:$0xff] %v12593_v33  ;;  %v5305_v1 = vadd.f32 %v5225_v11, %v4992_v36  ;;  %v15237_v5 = vld [vmem:[#allocation229_spill] sm:$0xff]  ;;  %v5604_v27 = vld [vmem:[#allocation3 + $0x20] sm:$0xff] }
 0x41f   : > { %7377 = vmatmul.msk.bf16.gmra.mxu3 %vm4571_vm2, %v4767_v3  ;;  %v4538_v19 = vadd.f32 %v12138_v32, %v4502_v38  ;;  %v5023_v37 = vpop.f32.mrf.mxu0  ;;  %v15233_v3 = vpack.c.bf16 %v12114_v24, %v12110_v20  ;;  %v15234_v32 = vld [vmem:[#allocation231_spill] sm:$0xff]  ;;  %vm15238_vm11 = vcmp.eq.s32.totalorder %v15237_v5, 1  ;;  %v15239_v11 = vld [vmem:[#allocation81_spill] sm:$0xff] }
 0x420   : > { %v12602_v52 = vadd.f32 %v5023_v37, %v4874_v6  ;;  %vm15235_vm6 = vcmp.eq.s32.totalorder %v15234_v32, 1  ;;  %vm15240_vm5 = vcmp.eq.s32.totalorder %v15239_v11, 1  ;;  %v15241_v37 = vld [vmem:[#allocation72_spill] sm:$0xff] }
 0x421   : > { %v4570_v30 = vmax.f32 %v4538_v19, 0.0  ;;  %v4877_v54 = vpop.f32.mrf.mxu3  ;;  %7450 = vmatmul.msk.bf16.gmra.mxu2 %vm4571_vm2, %v15233_v3  ;;  %v12617_v6 = vsel %vm15235_vm6, %v12604_v25, 0.0  ;;  %v4667_v61 = vsel %vm15240_vm5, %v4635_v35, 0.0  ;;  %vm15242_vm15 = vcmp.eq.s32.totalorder %v15241_v37, 1  ;;  %v15248_v37 = vld [vmem:[#allocation204_spill] sm:$0xff] }
 0x422   : > { %v12611_v17 = vld [vmem:[#allocation3 + $0x101] sm:$0xff]  ;;  %15236 = vst [vmem:[#allocation151_spill] sm:$0xff] %v12617_v6 }
 0x423   : > { %7422 = vmatmul.msk.bf16.gmra.mxu1 %vm4571_vm2, %v5143_v26  ;;  %4603 = vst.msk [vmem:[#allocation3 + $0x110] sm:$0xff] %vm4571_vm2, %v4570_v30  ;;  %v12622_v36 = vsel %vm15238_vm11, %v12611_v17, 0.0  ;;  %v4666_v26 = vsel %vm15242_vm15, %v4634_v60, 0.0  ;;  %v12635_v5 = vld [vmem:[#allocation3 + $0x108] sm:$0xff] }
 0x424   : > { %v5491_v38 = vpop.f32.mrf.mxu2  ;;  %v4683_v32 = vpack.c.bf16 %v4667_v61, %v4666_v26  ;;  %15243 = vst [vmem:[#allocation156_spill] sm:$0xff] %v12635_v5  ;;  %v12647_v60 = vsel %vm3855_vm9, %v12635_v5, 0.0  ;;  %v15249_v26 = vld [vmem:[#allocation89_spill] sm:$0xff]  ;;  %v15252_v5 = vld [vmem:[#allocation80_spill] sm:$0xff] }
 0x425   : > { %v12626_v24 = vadd.f32 %v5491_v38, %v5305_v1  ;;  %v5227_v30 = vpop.f32.mrf.mxu1  ;;  %v5603_v38 = vld [vmem:[#allocation3 + $0x18] sm:$0xff]  ;;  %15246 = vst [vmem:[#allocation34_spill] sm:$0xff] %v12647_v60  ;;  %vm15250_vm1 = vcmp.eq.s32.totalorder %v15249_v26, 1  ;;  %vm15253_vm9 = vcmp.eq.s32.totalorder %v15252_v5, 1 }
 0x426   : > { %v5306_v8 = vadd.f32 %v5227_v30, %v12141_v10  ;;  %v15251_v10 = vld [vmem:[#allocation188_spill] sm:$0xff] }
 0x427   : > { %v5026_v19 = vpop.f32.mrf.mxu0 }
 0x428   : > { %v12633_v3 = vadd.f32 %v5026_v19, %v4877_v54  ;;  %v5635_v19 = vpack.c.bf16 %v5604_v27, %v5603_v38  ;;  %v5121_v54 = vsel %vm15253_vm9, %v15251_v10, 0.0 }
 0x429   : > { %v4879_v31 = vpop.f32.mrf.mxu3 }
 0x42a   : > { %7401 = vmatmul.msk.bf16.gmra.mxu0 %vm4571_vm2, %v4683_v32  ;;  %v12638_v1 = vld [vmem:[#allocation3 + $0x110] sm:$0xff]  ;;  %v5122_v32 = vsel %vm15250_vm1, %v15248_v37, 0.0 }
 0x42b   : > { %15244 = vst [vmem:[#allocation145_spill] sm:$0xff] %v12638_v1  ;;  %v12640_v35 = vld [vmem:[#allocation3 + $0x109] sm:$0xff]  ;;  %v12642_v11 = vld [vmem:[#allocation3 + $0x111] sm:$0xff]  ;;  %v12652_v61 = vsel %vm3856_vm8, %v12638_v1, 0.0  ;;  %v5144_v26 = vpack.c.bf16 %v5122_v32, %v5121_v54  ;;  %v15257_v1 = vpack.c.bf16 %v12189_v14, %v12185_v0 }
 0x42c   : > { %v5493_v30 = vpop.f32.mrf.mxu2  ;;  %v12668_v27 = vsel %vm4273_vm0, %v12640_v35, 0.0  ;;  %v12673_v37 = vsel %vm4274_vm3, %v12642_v11, 0.0  ;;  %v7770_v0 = vld [vmem:[#allocation3 + $0x30] sm:$0xff] }
 0x42d   : > { %v12659_v33 = vadd.f32 %v5493_v30, %v5306_v8  ;;  %15255 = vst [vmem:[#allocation179_spill] sm:$0xff] %v12668_v27  ;;  %v7769_v27 = vld [vmem:[#allocation3 + $0x28] sm:$0xff] }
 0x42e   : > { %v5230_v6 = vpop.f32.mrf.mxu1  ;;  %v5636_v14 = vpack.c.bf16 %v7770_v0, %v7769_v27 }
 0x42f   : > { %7470 = vmatmul.msk.bf16.vlgmr.msrb.gmra.mxu3 %vm4571_vm2, %v5635_v19  ;;  %v5307_v8 = vadd.f32 %v5230_v6, %v12174_v4  ;;  %v5028_v30 = vpop.f32.mrf.mxu0 }
 0x430   : > { %v12678_v20 = vadd.f32 %v5028_v30, %v4879_v31  ;;  %v15258_v31 = vld [vmem:[#allocation133_spill] sm:$0xff]  ;;  %v15259_v30 = vld [vmem:[#allocation131_spill] sm:$0xff] }
 0x431   : > { %v4882_v5 = vpop.f32.mrf.mxu3  ;;  %7451 = vmatmul.msk.bf16.gmra.mxu2 %vm4571_vm2, %v15257_v1  ;;  %v15260_v19 = vpack.c.bf16 %v15258_v31, %v15259_v30  ;;  %v15261_v1 = vld [vmem:[#allocation90_spill] sm:$0xff] }
 0x432   : > { %vm15262_vm0 = vcmp.eq.s32.totalorder %v15261_v1, 1 }
 0x433   : > { %7423 = vmatmul.msk.bf16.gmra.mxu1 %vm4571_vm2, %v5144_v26 }
 0x434   : > { %v5496_v10 = vpop.f32.mrf.mxu2 }
 0x435   : > { %v12685_v38 = vadd.f32 %v5496_v10, %v5307_v8  ;;  %v5124_v8 = vsel %vm15262_vm0, %v12222_v62, 0.0  ;;  %v15265_v62 = vpack.c.bf16 %v12259_v55, %v12255_v56  ;;  %v7772_v56 = vld [vmem:[#allocation3 + $0x40] sm:$0xff] }
 0x436   : > { %v5232_v60 = vpop.f32.mrf.mxu1 }
 0x437   : > { %v5308_v4 = vadd.f32 %v5232_v60, %v12211_v21  ;;  %v5031_v6 = vpop.f32.mrf.mxu0  ;;  %v15263_v60 = vld [vmem:[#allocation92_spill] sm:$0xff] }
 0x438   : > { %v12688_v32 = vadd.f32 %v5031_v6, %v4882_v5  ;;  %vm15264_vm8 = vcmp.eq.s32.totalorder %v15263_v60, 1 }
 0x439   : > { %v4884_v54 = vpop.f32.mrf.mxu3  ;;  %v5123_v5 = vsel %vm15264_vm8, %v12220_v47, 0.0 }
 0x43a   : > { %7498 = vmatmul.msk.bf16.vlgmr.msra.gmra.mxu0 %vm4571_vm2, %v15260_v19  ;;  %v5145_v31 = vpack.c.bf16 %v5124_v8, %v5123_v5  ;;  %v15267_v8 = vld [vmem:[#allocation76_spill] sm:$0xff]  ;;  %v7771_v5 = vld [vmem:[#allocation3 + $0x38] sm:$0xff] }
 0x43b   : > { %v5637_v55 = vpack.c.bf16 %v7772_v56, %v7771_v5 }
 0x43c   : > { %v5498_v26 = vpop.f32.mrf.mxu2 }
 0x43d   : > { %v12697_v10 = vadd.f32 %v5498_v26, %v5308_v4 }
 0x43f   : > { %v5235_v21 = vpop.f32.mrf.mxu1  ;;  %7471 = vmatmul.msk.bf16.gmra.mxu3 %vm4571_vm2, %v5636_v14  ;;  %v5033_v19 = vpop.f32.mrf.mxu0 }
 0x440   : > { %v5309_v6 = vadd.f32 %v5235_v21, %v12244_v45  ;;  %v12704_v30 = vadd.f32 %v5033_v19, %v4884_v54  ;;  %v15266_v54 = vld [vmem:[#allocation85_spill] sm:$0xff]  ;;  %v15269_v19 = vld [vmem:[#allocation50_spill] sm:$0xff] }
 0x441   : > { %v4887_v27 = vpop.f32.mrf.mxu3  ;;  %7452 = vmatmul.msk.bf16.gmra.mxu2 %vm4571_vm2, %v15265_v62  ;;  %v15268_v21 = vpack.c.bf16 %v15266_v54, %v15267_v8  ;;  %vm15270_vm3 = vcmp.eq.s32.totalorder %v15269_v19, 1 }
 0x443   : > { %7424 = vmatmul.msk.bf16.gmra.mxu1 %vm4571_vm2, %v5145_v31 }
 0x444   : > { %v5501_v4 = vpop.f32.mrf.mxu2 }
 0x445   : > { %v12711_v26 = vadd.f32 %v5501_v4, %v5309_v6  ;;  %v5126_v6 = vsel %vm15270_vm3, %v12292_v16, 0.0  ;;  %v15273_v16 = vpack.c.bf16 %v12331_v29, %v12327_v34  ;;  %v7774_v34 = vld [vmem:[#allocation3 + $0x50] sm:$0xff] }
 0x447   : > { %v5237_v0 = vpop.f32.mrf.mxu1  ;;  %v5036_v14 = vpop.f32.mrf.mxu0 }
 0x448   : > { %v5310_v47 = vadd.f32 %v5237_v0, %v12281_v28  ;;  %v12714_v45 = vadd.f32 %v5036_v14, %v4887_v27  ;;  %v15271_v27 = vld [vmem:[#allocation93_spill] sm:$0xff] }
 0x449   : > { %v4889_v1 = vpop.f32.mrf.mxu3  ;;  %vm15272_vm7 = vcmp.eq.s32.totalorder %v15271_v27, 1  ;;  %v15277_v27 = vld [vmem:[#allocation101_spill] sm:$0xff] }
 0x44a   : > { %7499 = vmatmul.msk.bf16.gmra.mxu0 %vm4571_vm2, %v15268_v21  ;;  %v5125_v62 = vsel %vm15272_vm7, %v12290_v15, 0.0  ;;  %vm15278_vm12 = vcmp.eq.s32.totalorder %v15277_v27, 1  ;;  %v7775_v27 = vld [vmem:[#allocation3 + $0x58] sm:$0xff] }
 0x44b   : > { %v5146_v14 = vpack.c.bf16 %v5126_v6, %v5125_v62  ;;  %v5128_v62 = vsel %vm15278_vm12, %v12368_v41, 0.0  ;;  %v15281_v41 = vpack.c.bf16 %v12407_v51, %v12403_v23  ;;  %v7776_v23 = vld [vmem:[#allocation3 + $0x60] sm:$0xff] }
 0x44c   : > { %v5503_v60 = vpop.f32.mrf.mxu2  ;;  %v5639_v51 = vpack.c.bf16 %v7776_v23, %v7775_v27  ;;  %v7777_v23 = vld [vmem:[#allocation3 + $0x68] sm:$0xff] }
 0x44d   : > { %v12723_v31 = vadd.f32 %v5503_v60, %v5310_v47 }
 0x44f   : > { %v5240_v28 = vpop.f32.mrf.mxu1  ;;  %7472 = vmatmul.msk.bf16.gmra.mxu3 %vm4571_vm2, %v5637_v55  ;;  %v5038_v0 = vpop.f32.mrf.mxu0  ;;  %v15275_v55 = vld [vmem:[#allocation10_spill] sm:$0xff] }
 0x450   : > { %v5311_v4 = vadd.f32 %v5240_v28, %v12314_v18  ;;  %v12730_v54 = vadd.f32 %v5038_v0, %v4889_v1  ;;  %v15274_v1 = vld [vmem:[#allocation139_spill] sm:$0xff]  ;;  %v15279_v0 = vld [vmem:[#allocation88_spill] sm:$0xff] }
 0x451   : > { %7453 = vmatmul.msk.bf16.gmra.mxu2 %vm4571_vm2, %v15273_v16  ;;  %v15276_v19 = vpack.c.bf16 %v15274_v1, %v15275_v55  ;;  %v7773_v28 = vld [vmem:[#allocation3 + $0x48] sm:$0xff]  ;;  %vm15280_vm14 = vcmp.eq.s32.totalorder %v15279_v0, 1 }
 0x452   : > { %v4892_v8 = vpop.f32.mrf.mxu3  ;;  %v5638_v29 = vpack.c.bf16 %v7774_v34, %v7773_v28  ;;  %v15283_v28 = vld [vmem:[#allocation51_spill] sm:$0xff] }
 0x453   : > { %7425 = vmatmul.msk.bf16.gmra.mxu1 %vm4571_vm2, %v5146_v14  ;;  %v5127_v14 = vsel %vm15280_vm14, %v12366_v46, 0.0 }
 0x454   : > { %v5506_v47 = vpop.f32.mrf.mxu2 }
 0x455   : > { %v12737_v21 = vadd.f32 %v5506_v47, %v5311_v4  ;;  %v5147_v47 = vpack.c.bf16 %v5128_v62, %v5127_v14  ;;  %v15285_v62 = vld [vmem:[#allocation102_spill] sm:$0xff]  ;;  %v15287_v14 = vld [vmem:[#allocation104_spill] sm:$0xff] }
 0x456   : > { %vm15286_vm13 = vcmp.eq.s32.totalorder %v15285_v62, 1  ;;  %vm15288_vm10 = vcmp.eq.s32.totalorder %v15287_v14, 1 }
 0x457   : > { %v5242_v60 = vpop.f32.mrf.mxu1  ;;  %v5041_v5 = vpop.f32.mrf.mxu0 }
 0x458   : > { %v5312_v15 = vadd.f32 %v5242_v60, %v12357_v39  ;;  %v12740_v18 = vadd.f32 %v5041_v5, %v4892_v8 }
 0x45a   : > { %v4894_v56 = vpop.f32.mrf.mxu3  ;;  %7500 = vmatmul.msk.bf16.gmra.mxu0 %vm4571_vm2, %v15276_v19 }
 0x45c   : > { %v5508_v6 = vpop.f32.mrf.mxu2 }
 0x45d   : > { %v12749_v4 = vadd.f32 %v5508_v6, %v5312_v15 }
 0x45f   : > { %v5245_v39 = vpop.f32.mrf.mxu1  ;;  %7473 = vmatmul.msk.bf16.gmra.mxu3 %vm4571_vm2, %v5638_v29  ;;  %v5043_v16 = vpop.f32.mrf.mxu0 }
 0x460   : > { %v5313_v8 = vadd.f32 %v5245_v39, %v12390_v13  ;;  %v12756_v60 = vadd.f32 %v5043_v16, %v4894_v56  ;;  %v15282_v56 = vld [vmem:[#allocation86_spill] sm:$0xff]  ;;  %v5130_v39 = vsel %vm15286_vm13, %v12444_v53, 0.0  ;;  %v15289_v53 = vpack.c.bf16 %v12483_v9, %v12479_v2  ;;  %v7778_v2 = vld [vmem:[#allocation3 + $0x70] sm:$0xff] }
 0x461   : > { %7454 = vmatmul.msk.bf16.gmra.mxu2 %vm4571_vm2, %v15281_v41  ;;  %v15284_v34 = vpack.c.bf16 %v15282_v56, %v15283_v28  ;;  %v5640_v9 = vpack.c.bf16 %v7778_v2, %v7777_v23  ;;  %v7779_v2 = vld [vmem:[#allocation3 + $0x78] sm:$0xff] }
 0x462   : > { %v4897_v5 = vpop.f32.mrf.mxu3 }
 0x463   : > { %7426 = vmatmul.msk.bf16.gmra.mxu1 %vm4571_vm2, %v5147_v47 }
 0x464   : > { %v5511_v15 = vpop.f32.mrf.mxu2 }
 0x465   : > { %v12763_v1 = vadd.f32 %v5511_v15, %v5313_v8  ;;  %v5129_v8 = vsel %vm15288_vm10, %v12442_v40, 0.0 }
 0x467   : > { %v5247_v55 = vpop.f32.mrf.mxu1  ;;  %v5046_v19 = vpop.f32.mrf.mxu0 }
 0x468   : > { %v5314_v46 = vadd.f32 %v5247_v55, %v12433_v57  ;;  %v12766_v13 = vadd.f32 %v5046_v19, %v4897_v5  ;;  %v5148_v5 = vpack.c.bf16 %v5130_v39, %v5129_v8 }
 0x46a   : > { %v4899_v6 = vpop.f32.mrf.mxu3  ;;  %7501 = vmatmul.msk.bf16.gmra.mxu0 %vm4571_vm2, %v15284_v34  ;;  %v15291_v34 = vld [vmem:[#allocation146_spill] sm:$0xff] }
 0x46c   : > { %v5513_v29 = vpop.f32.mrf.mxu2 }
 0x46d   : > { %v12775_v0 = vadd.f32 %v5513_v29, %v5314_v46 }
 0x46f   : > { %7474 = vmatmul.msk.bf16.gmra.mxu3 %vm4571_vm2, %v5639_v51  ;;  %v5048_v47 = vpop.f32.mrf.mxu0  ;;  %v15293_v51 = vld [vmem:[#allocation97_spill] sm:$0xff] }
 0x470   : > { %v5250_v57 = vpop.f32.mrf.mxu1  ;;  %v12782_v41 = vadd.f32 %v5048_v47, %v4899_v6  ;;  %v15290_v6 = vld [vmem:[#allocation17_spill] sm:$0xff]  ;;  %vm15294_vm4 = vcmp.eq.s32.totalorder %v15293_v51, 1 }
 0x471   : > { %v5315_v16 = vadd.f32 %v5250_v57, %v12466_v12  ;;  %7455 = vmatmul.msk.bf16.gmra.mxu2 %vm4571_vm2, %v15289_v53  ;;  %v15292_v29 = vpack.c.bf16 %v15290_v6, %v15291_v34  ;;  %v5132_v62 = vsel %vm15294_vm4, %v12532_v43, 0.0  ;;  %v15295_v57 = vld [vmem:[#allocation105_spill] sm:$0xff]  ;;  %v7641_v43 = vld [vmem:[%s13475_s7 + $0x70] sm:$0xff]  ;;  %v5368_v34 = vld [vmem:[#allocation3 + $0x10f] sm:$0xff] }
 0x472   : > { %v4902_v15 = vpop.f32.mrf.mxu3  ;;  %vm15296_vm6 = vcmp.eq.s32.totalorder %v15295_v57, 1  ;;  %6521 = vmatpush.bf16.msra.mxu2 %v7641_v43 }
 0x473   : > { %7427 = vmatmul.msk.bf16.gmra.mxu1 %vm4571_vm2, %v5148_v5  ;;  %v5131_v14 = vsel %vm15296_vm6, %v12530_v49, 0.0  ;;  %v7639_v5 = vld [vmem:[%s13475_s7 + $0x60] sm:$0xff]  ;;  %v15297_v49 = vpack.c.bf16 %v12574_v48, %v12570_v63  ;;  %v5367_v63 = vld [vmem:[#allocation3 + $0x107] sm:$0xff] }
 0x474   : > { %v5516_v55 = vpop.f32.mrf.mxu2  ;;  %v5149_v47 = vpack.c.bf16 %v5132_v62, %v5131_v14  ;;  %6255 = vmatpush.bf16.msra.mxu1 %v7639_v5  ;;  %v15301_v62 = vld [vmem:[#allocation103_spill] sm:$0xff]  ;;  %v15307_v5 = vld [vmem:[#allocation157_spill] sm:$0xff] }
 0x475   : > { %v12789_v46 = vadd.f32 %v5516_v55, %v5315_v16  ;;  %vm15302_vm11 = vcmp.eq.s32.totalorder %v15301_v62, 1  ;;  %vm15308_vm1 = vcmp.eq.s32.totalorder %v15307_v5, 1  ;;  %v15314_v5 = vld [vmem:[#allocation164_spill] sm:$0xff] }
 0x476   : > { %v5399_v43 = vsel %vm15308_vm1, %v5367_v63, 0.0  ;;  %vm15315_vm0 = vcmp.eq.s32.totalorder %v15314_v5, 1  ;;  %v15322_v5 = vld [vmem:[#allocation176_spill] sm:$0xff] }
 0x477   : > { %v5051_v56 = vpop.f32.mrf.mxu0  ;;  %vm15323_vm8 = vcmp.eq.s32.totalorder %v15322_v5, 1 }
 0x478   : > { %v5252_v19 = vpop.f32.mrf.mxu1  ;;  %v12792_v12 = vadd.f32 %v5051_v56, %v4902_v15 }
 0x479   : > { %v5316_v40 = vadd.f32 %v5252_v19, %v12518_v42 }
 0x47a   : > { %v4904_v28 = vpop.f32.mrf.mxu3  ;;  %7502 = vmatmul.msk.bf16.gmra.mxu0 %vm4571_vm2, %v15292_v29  ;;  %v15298_v29 = vld [vmem:[#allocation191_spill] sm:$0xff] }
 0x47c   : > { %v5518_v27 = vpop.f32.mrf.mxu2 }
 0x47d   : > { %v12801_v39 = vadd.f32 %v5518_v27, %v5316_v40  ;;  %v15299_v27 = vld [vmem:[#allocation6_spill] sm:$0xff] }
 0x47e   : > { %v15300_v23 = vpack.c.bf16 %v15298_v29, %v15299_v27 }
 0x47f   : > { %7475 = vmatmul.msk.bf16.gmra.mxu3 %vm4571_vm2, %v5640_v9  ;;  %v5053_v16 = vpop.f32.mrf.mxu0  ;;  %v7780_v9 = vld [vmem:[#allocation3 + $0x80] sm:$0xff] }
 0x480   : > { %v5255_v42 = vpop.f32.mrf.mxu1  ;;  %v12814_v15 = vadd.f32 %v5053_v16, %v4904_v28  ;;  %v5641_v51 = vpack.c.bf16 %v7780_v9, %v7779_v2  ;;  %v15305_v16 = vld [vmem:[#allocation113_spill] sm:$0xff]  ;;  %v15309_v2 = vld [vmem:[#allocation22_spill] sm:$0xff] }
 0x481   : > { %v5317_v8 = vadd.f32 %v5255_v42, %v12554_v58  ;;  %7456 = vmatmul.msk.bf16.gmra.mxu2 %vm4571_vm2, %v15297_v49  ;;  %v5134_v42 = vsel %vm15302_vm11, %v12611_v17, 0.0  ;;  %vm15306_vm15 = vcmp.eq.s32.totalorder %v15305_v16, 1 }
 0x482   : > { %v4907_v53 = vpop.f32.mrf.mxu3 }
 0x483   : > { %7428 = vmatmul.msk.bf16.gmra.mxu1 %vm4571_vm2, %v5149_v47  ;;  %v5133_v47 = vsel %vm15306_vm15, %v12604_v25, 0.0 }
 0x484   : > { %v5521_v58 = vpop.f32.mrf.mxu2 }
 0x485   : > { %v12821_v55 = vadd.f32 %v5521_v58, %v5317_v8  ;;  %v5150_v58 = vpack.c.bf16 %v5134_v42, %v5133_v47  ;;  %v7781_v42 = vld [vmem:[#allocation3 + $0x88] sm:$0xff] }
 0x487   : > { %v5056_v56 = vpop.f32.mrf.mxu0 }
 0x488   : > { %v5257_v19 = vpop.f32.mrf.mxu1  ;;  %v12824_v6 = vadd.f32 %v5056_v56, %v4907_v53 }
 0x489   : > { %v5318_v40 = vadd.f32 %v5257_v19, %v12602_v52  ;;  %v15303_v52 = vld [vmem:[#allocation173_spill] sm:$0xff]  ;;  %v7643_v19 = vld [vmem:[%s13475_s7 + $0x80] sm:$0xff] }
 0x48a   : > { %v4909_v28 = vpop.f32.mrf.mxu3  ;;  %7503 = vmatmul.msk.bf16.gmra.mxu0 %vm4571_vm2, %v15300_v23  ;;  %vm15304_vm5 = vcmp.eq.s32.totalorder %v15303_v52, 1  ;;  %6787 = vmatpush.bf16.msra.mxu3 %v7643_v19  ;;  %v7782_v52 = vld [vmem:[#allocation3 + $0x90] sm:$0xff] }
 0x48b   : > { %v5400_v57 = vsel %vm15304_vm5, %v5368_v34, 0.0 }
 0x48c   : > { %v5523_v48 = vpop.f32.mrf.mxu2  ;;  %v5416_v17 = vpack.c.bf16 %v5400_v57, %v5399_v43  ;;  %v5642_v57 = vpack.c.bf16 %v7782_v52, %v7781_v42  ;;  %v6105_v52 = vld [vmem:[#allocation3 + $0x37] sm:$0xff] }
 0x48d   : > { %v12835_v14 = vadd.f32 %v5523_v48, %v5318_v40  ;;  %v6104_v48 = vld [vmem:[#allocation3 + $0x2f] sm:$0xff] }
 0x48f   : > { %7476 = vmatmul.msk.bf16.gmra.mxu3 %vm4571_vm2, %v5641_v51  ;;  %v5058_v49 = vpop.f32.mrf.mxu0  ;;  %v6103_v51 = vld [vmem:[#allocation3 + $0x27] sm:$0xff] }
 0x490   : > { %v5260_v8 = vpop.f32.mrf.mxu1  ;;  %v12847_v40 = vadd.f32 %v5058_v49, %v4909_v28  ;;  %v15310_v28 = vld [vmem:[#allocation125_spill] sm:$0xff]  ;;  %v6135_v43 = vsel %vm15315_vm0, %v6103_v51, 0.0  ;;  %v15319_v51 = vld [vmem:[#allocation24_spill] sm:$0xff] }
 0x491   : > { %v5319_v53 = vadd.f32 %v5260_v8, %v12633_v3  ;;  %7457 = vmatmul.msk.bf16.gmra.mxu2 %vm4571_vm2, %v5416_v17  ;;  %v15311_v9 = vpack.c.bf16 %v15309_v2, %v15310_v28  ;;  %v15312_v8 = vld [vmem:[#allocation181_spill] sm:$0xff] }
 0x492   : > { %v4912_v56 = vpop.f32.mrf.mxu3  ;;  %vm15313_vm9 = vcmp.eq.s32.totalorder %v15312_v8, 1  ;;  %v7783_v8 = vld [vmem:[#allocation3 + $0x98] sm:$0xff] }
 0x493   : > { %7429 = vmatmul.msk.bf16.gmra.mxu1 %vm4571_vm2, %v5150_v58  ;;  %v6136_v16 = vsel %vm15313_vm9, %v6104_v48, 0.0 }
 0x494   : > { %v5526_v25 = vpop.f32.mrf.mxu2  ;;  %v6167_v58 = vpack.c.bf16 %v6136_v16, %v6135_v43  ;;  %v7784_v16 = vld [vmem:[#allocation3 + $0xa0] sm:$0xff] }
 0x495   : > { %v12851_v34 = vadd.f32 %v5526_v25, %v5319_v53  ;;  %v15317_v25 = vld [vmem:[#allocation119_spill] sm:$0xff] }
 0x497   : > { %v5061_v27 = vpop.f32.mrf.mxu0 }
 0x498   : > { %v5262_v29 = vpop.f32.mrf.mxu1  ;;  %v12854_v23 = vadd.f32 %v5061_v27, %v4912_v56  ;;  %v15316_v56 = vld [vmem:[#allocation117_spill] sm:$0xff] }
 0x499   : > { %v5320_v3 = vadd.f32 %v5262_v29, %v12678_v20  ;;  %v15318_v29 = vpack.c.bf16 %v15316_v56, %v15317_v25 }
 0x49a   : > { %v4914_v63 = vpop.f32.mrf.mxu3  ;;  %7504 = vmatmul.msk.bf16.gmra.mxu0 %vm4571_vm2, %v15311_v9 }
 0x49c   : > { %v5528_v62 = vpop.f32.mrf.mxu2 }
 0x49d   : > { %v12862_v47 = vadd.f32 %v5528_v62, %v5320_v3  ;;  %v15320_v62 = vld [vmem:[#allocation26_spill] sm:$0xff] }
 0x49e   : > { %v15321_v42 = vpack.c.bf16 %v15319_v51, %v15320_v62 }
 0x49f   : > { %7477 = vmatmul.msk.bf16.gmra.mxu3 %vm4571_vm2, %v5642_v57  ;;  %v5063_v49 = vpop.f32.mrf.mxu0 }
 0x4a0   : > { %v5265_v20 = vpop.f32.mrf.mxu1  ;;  %v12868_v17 = vadd.f32 %v5063_v49, %v4914_v63  ;;  %v6106_v63 = vld [vmem:[#allocation3 + $0x3f] sm:$0xff]  ;;  %v15324_v49 = vld [vmem:[#allocation187_spill] sm:$0xff] }
 0x4a1   : > { %v5321_v53 = vadd.f32 %v5265_v20, %v12688_v32  ;;  %7554 = vmatmul.msk.bf16.vlgmr.msra.gmra.mxu2 %vm4571_vm2, %v15318_v29  ;;  %v5643_v20 = vpack.c.bf16 %v7784_v16, %v7783_v8  ;;  %v6138_v43 = vsel %vm15323_vm8, %v6106_v63, 0.0  ;;  %vm15325_vm3 = vcmp.eq.s32.totalorder %v15324_v49, 1  ;;  %v6108_v8 = vld [vmem:[#allocation3 + $0x4f] sm:$0xff] }
 0x4a2   : > { %v4917_v19 = vpop.f32.mrf.mxu3  ;;  %v7786_v49 = vld [vmem:[#allocation3 + $0xb0] sm:$0xff] }
 0x4a3   : > { %7526 = vmatmul.msk.bf16.vlgmr.msra.gmra.mxu1 %vm4571_vm2, %v6167_v58  ;;  %v6137_v58 = vsel %vm15325_vm3, %v6105_v52, 0.0 }
 0x4a4   : > { %v5531_v3 = vpop.f32.mrf.mxu2  ;;  %v6168_v25 = vpack.c.bf16 %v6138_v43, %v6137_v58  ;;  %v6107_v43 = vld [vmem:[#allocation3 + $0x47] sm:$0xff] }
 0x4a5   : > { %v12875_v27 = vadd.f32 %v5531_v3, %v5321_v53 }
 0x4a7   : > { %v5066_v28 = vpop.f32.mrf.mxu0 }
 0x4a8   : > { %v5267_v48 = vpop.f32.mrf.mxu1  ;;  %v12878_v32 = vadd.f32 %v5066_v28, %v4917_v19  ;;  %v15327_v28 = vld [vmem:[#allocation120_spill] sm:$0xff] }
 0x4a9   : > { %v5322_v2 = vadd.f32 %v5267_v48, %v12704_v30  ;;  %v15326_v48 = vld [vmem:[#allocation109_spill] sm:$0xff] }
 0x4aa   : > { %v4919_v9 = vpop.f32.mrf.mxu3  ;;  %7505 = vmatmul.msk.bf16.gmra.mxu0 %vm4571_vm2, %v15321_v42  ;;  %v15328_v63 = vpack.c.bf16 %v15326_v48, %v15327_v28 }
 0x4ac   : > { %v5533_v57 = vpop.f32.mrf.mxu2 }
 0x4ad   : > { %v12886_v53 = vadd.f32 %v5533_v57, %v5322_v2 }
 0x4af   : > { %7478 = vmatmul.msk.bf16.gmra.mxu3 %vm4571_vm2, %v5643_v20  ;;  %v5068_v56 = vpop.f32.mrf.mxu0  ;;  %v15329_v20 = vld [vmem:[#allocation137_spill] sm:$0xff] }
 0x4b0   : > { %v5270_v30 = vpop.f32.mrf.mxu1  ;;  %v12892_v29 = vadd.f32 %v5068_v56, %v4919_v9  ;;  %v15330_v5 = vpack.c.bf16 %v12163_v7, %v15329_v20 }
 0x4b1   : > { %v5323_v19 = vadd.f32 %v5270_v30, %v12714_v45  ;;  %7555 = vmatmul.msk.bf16.gmra.mxu2 %vm4571_vm2, %v15328_v63  ;;  %v7785_v30 = vld [vmem:[#allocation3 + $0xa8] sm:$0xff] }
 0x4b2   : > { %v5725_v3 = vpop.f32.mrf.mxu3  ;;  %v5644_v58 = vpack.c.bf16 %v7786_v49, %v7785_v30  ;;  %v15338_v49 = vld [vmem:[#allocation15_spill] sm:$0xff] }
 0x4b3   : > { %7527 = vmatmul.msk.bf16.gmra.mxu1 %vm4571_vm2, %v6168_v25  ;;  %v5805_v2 = vadd.f32 %v5725_v3, %v12626_v24  ;;  %v15333_v3 = vld [vmem:[#allocation200_spill] sm:$0xff] }
 0x4b4   : > { %v5536_v51 = vpop.f32.mrf.mxu2  ;;  %vm15334_vm12 = vcmp.eq.s32.totalorder %v15333_v3, 1 }
 0x4b5   : > { %v12900_v62 = vadd.f32 %v5536_v51, %v5323_v19  ;;  %v15331_v19 = vld [vmem:[#allocation198_spill] sm:$0xff]  ;;  %v15335_v51 = vld [vmem:[#allocation124_spill] sm:$0xff] }
 0x4b6   : > { %vm15332_vm7 = vcmp.eq.s32.totalorder %v15331_v19, 1  ;;  %v6109_v19 = vld [vmem:[#allocation3 + $0x57] sm:$0xff] }
 0x4b7   : > { %v5991_v52 = vpop.f32.mrf.mxu0 }
 0x4b8   : > { %v5272_v42 = vpop.f32.mrf.mxu1  ;;  %v12903_v57 = vadd.f32 %v5991_v52, %v5805_v2 }
 0x4b9   : > { %v5324_v45 = vadd.f32 %v5272_v42, %v12730_v54  ;;  %v6140_v54 = vsel %vm15332_vm7, %v6108_v8, 0.0  ;;  %v15336_v42 = vld [vmem:[#allocation126_spill] sm:$0xff] }
 0x4ba   : > { %v5727_v9 = vpop.f32.mrf.mxu3  ;;  %7506 = vmatmul.msk.bf16.gmra.mxu0 %vm4571_vm2, %v15330_v5  ;;  %v15337_v52 = vpack.c.bf16 %v15335_v51, %v15336_v42 }
 0x4bb   : > { %v5806_v16 = vadd.f32 %v5727_v9, %v12659_v33  ;;  %v6139_v33 = vsel %vm15334_vm12, %v6107_v43, 0.0 }
 0x4bc   : > { %v5538_v24 = vpop.f32.mrf.mxu2  ;;  %v6169_v28 = vpack.c.bf16 %v6140_v54, %v6139_v33  ;;  %v7787_v54 = vld [vmem:[#allocation3 + $0xb8] sm:$0xff]  ;;  %v15340_v33 = vld [vmem:[#allocation210_spill] sm:$0xff] }
 0x4bd   : > { %v12912_v56 = vadd.f32 %v5538_v24, %v5324_v45  ;;  %v6110_v24 = vld [vmem:[#allocation3 + $0x5f] sm:$0xff]  ;;  %vm15341_vm14 = vcmp.eq.s32.totalorder %v15340_v33, 1  ;;  %v6111_v33 = vld [vmem:[#allocation3 + $0x67] sm:$0xff] }
 0x4bf   : > { %7479 = vmatmul.msk.bf16.gmra.mxu3 %vm4571_vm2, %v5644_v58  ;;  %v5993_v48 = vpop.f32.mrf.mxu0  ;;  %v15339_v58 = vpack.c.bf16 %v12233_v22, %v15338_v49 }
 0x4c0   : > { %v5275_v25 = vpop.f32.mrf.mxu1  ;;  %v12918_v63 = vadd.f32 %v5993_v48, %v5806_v16 }
 0x4c1   : > { %v5325_v7 = vadd.f32 %v5275_v25, %v12740_v18  ;;  %7556 = vmatmul.msk.bf16.gmra.mxu2 %vm4571_vm2, %v15337_v52  ;;  %v7788_v25 = vld [vmem:[#allocation3 + $0xc0] sm:$0xff] }
 0x4c2   : > { %v5730_v2 = vpop.f32.mrf.mxu3  ;;  %v5645_v3 = vpack.c.bf16 %v7788_v25, %v7787_v54  ;;  %v15347_v54 = vld [vmem:[#allocation29_spill] sm:$0xff]  ;;  %v15348_v25 = vld [vmem:[#allocation14_spill] sm:$0xff] }
 0x4c3   : > { %7528 = vmatmul.msk.bf16.gmra.mxu1 %vm4571_vm2, %v6169_v28  ;;  %v5807_v45 = vadd.f32 %v5730_v2, %v12685_v38  ;;  %v15342_v28 = vld [vmem:[#allocation195_spill] sm:$0xff] }
 0x4c4   : > { %v5541_v9 = vpop.f32.mrf.mxu2  ;;  %vm15343_vm13 = vcmp.eq.s32.totalorder %v15342_v28, 1 }
 0x4c5   : > { %v12926_v8 = vadd.f32 %v5541_v9, %v5325_v7  ;;  %v15345_v9 = vld [vmem:[#allocation128_spill] sm:$0xff] }
 0x4c7   : > { %v5996_v5 = vpop.f32.mrf.mxu0 }
 0x4c8   : > { %v5277_v20 = vpop.f32.mrf.mxu1  ;;  %v12929_v43 = vadd.f32 %v5996_v5, %v5807_v45  ;;  %v15344_v45 = vld [vmem:[#allocation118_spill] sm:$0xff] }
 0x4c9   : > { %v5326_v18 = vadd.f32 %v5277_v20, %v12756_v60  ;;  %v6142_v60 = vsel %vm15341_vm14, %v6110_v24, 0.0  ;;  %v15346_v20 = vpack.c.bf16 %v15344_v45, %v15345_v9 }
 0x4ca   : > { %v5732_v16 = vpop.f32.mrf.mxu3  ;;  %7507 = vmatmul.msk.bf16.gmra.mxu0 %vm4571_vm2, %v15339_v58 }
 0x4cb   : > { %v5808_v30 = vadd.f32 %v5732_v16, %v12697_v10  ;;  %v6141_v10 = vsel %vm15343_vm13, %v6109_v19, 0.0  ;;  %v6112_v19 = vld [vmem:[#allocation3 + $0x6f] sm:$0xff] }
 0x4cc   : > { %v5543_v38 = vpop.f32.mrf.mxu2  ;;  %v6170_v51 = vpack.c.bf16 %v6142_v60, %v6141_v10  ;;  %v15350_v60 = vld [vmem:[#allocation18_spill] sm:$0xff] }
 0x4cd   : > { %v12938_v7 = vadd.f32 %v5543_v38, %v5326_v18  ;;  %v15352_v10 = vld [vmem:[#allocation206_spill] sm:$0xff] }
 0x4ce   : > { %vm15353_vm10 = vcmp.eq.s32.totalorder %v15352_v10, 1  ;;  %v6113_v10 = vld [vmem:[#allocation3 + $0x77] sm:$0xff] }
 0x4cf   : > { %7480 = vmatmul.msk.bf16.gmra.mxu3 %vm4571_vm2, %v5645_v3  ;;  %v5998_v2 = vpop.f32.mrf.mxu0  ;;  %v15349_v3 = vpack.c.bf16 %v15347_v54, %v15348_v25 }
 0x4d0   : > { %v5280_v48 = vpop.f32.mrf.mxu1  ;;  %v12944_v42 = vadd.f32 %v5998_v2, %v5808_v30 }
 0x4d1   : > { %v5327_v22 = vadd.f32 %v5280_v48, %v12766_v13  ;;  %7557 = vmatmul.msk.bf16.gmra.mxu2 %vm4571_vm2, %v15346_v20  ;;  %v15351_v48 = vld [vmem:[#allocation98_spill] sm:$0xff] }
 0x4d2   : > { %v5735_v52 = vpop.f32.mrf.mxu3  ;;  %v5646_v28 = vpack.c.bf16 %v15351_v48, %v15350_v60  ;;  %v15359_v60 = vld [vmem:[#allocation143_spill] sm:$0xff] }
 0x4d3   : > { %7529 = vmatmul.msk.bf16.gmra.mxu1 %vm4571_vm2, %v6170_v51  ;;  %v5809_v18 = vadd.f32 %v5735_v52, %v12711_v26  ;;  %v15354_v51 = vld [vmem:[#allocation111_spill] sm:$0xff] }
 0x4d4   : > { %v5546_v5 = vpop.f32.mrf.mxu2  ;;  %vm15355_vm4 = vcmp.eq.s32.totalorder %v15354_v51, 1  ;;  %v15360_v48 = vld [vmem:[#allocation199_spill] sm:$0xff] }
 0x4d5   : > { %v12952_v16 = vadd.f32 %v5546_v5, %v5327_v22  ;;  %v15356_v5 = vld [vmem:[#allocation47_spill] sm:$0xff] }
 0x4d7   : > { %v6001_v49 = vpop.f32.mrf.mxu0 }
 0x4d8   : > { %v5282_v24 = vpop.f32.mrf.mxu1  ;;  %v12955_v58 = vadd.f32 %v6001_v49, %v5809_v18 }
 0x4d9   : > { %v5328_v13 = vadd.f32 %v5282_v24, %v12782_v41  ;;  %v6144_v41 = vsel %vm15353_vm10, %v6112_v19, 0.0  ;;  %v15357_v24 = vld [vmem:[#allocation87_spill] sm:$0xff] }
 0x4da   : > { %v5737_v30 = vpop.f32.mrf.mxu3  ;;  %7508 = vmatmul.msk.bf16.gmra.mxu0 %vm4571_vm2, %v15349_v3  ;;  %v15358_v49 = vpack.c.bf16 %v15356_v5, %v15357_v24 }
 0x4db   : > { %v5810_v38 = vadd.f32 %v5737_v30, %v12723_v31  ;;  %v6143_v31 = vsel %vm15355_vm4, %v6111_v33, 0.0  ;;  %v6114_v33 = vld [vmem:[#allocation3 + $0x7f] sm:$0xff] }
 0x4dc   : > { %v5548_v26 = vpop.f32.mrf.mxu2  ;;  %v6171_v9 = vpack.c.bf16 %v6144_v41, %v6143_v31  ;;  %v15362_v41 = vld [vmem:[#allocation148_spill] sm:$0xff]  ;;  %v15364_v31 = vld [vmem:[#allocation123_spill] sm:$0xff] }
 0x4dd   : > { %v12966_v22 = vadd.f32 %v5548_v26, %v5328_v13  ;;  %vm15365_vm6 = vcmp.eq.s32.totalorder %v15364_v31, 1  ;;  %v15374_v31 = vld [vmem:[#allocation228_spill] sm:$0xff] }
 0x4de   : > { %vm15375_vm5 = vcmp.eq.s32.totalorder %v15374_v31, 1 }
 0x4df   : > { %7481 = vmatmul.msk.bf16.gmra.mxu3 %vm4571_vm2, %v5646_v28  ;;  %v6003_v45 = vpop.f32.mrf.mxu0  ;;  %v15361_v28 = vpack.c.bf16 %v15359_v60, %v15360_v48 }
 0x4e0   : > { %v5285_v2 = vpop.f32.mrf.mxu1  ;;  %v12972_v20 = vadd.f32 %v6003_v45, %v5810_v38 }
 0x4e1   : > { %v5329_v52 = vadd.f32 %v5285_v2, %v12792_v12  ;;  %7558 = vmatmul.msk.bf16.gmra.mxu2 %vm4571_vm2, %v15358_v49  ;;  %v15363_v2 = vld [vmem:[#allocation138_spill] sm:$0xff] }
 0x4e2   : > { %v5740_v18 = vpop.f32.mrf.mxu3  ;;  %v5647_v51 = vpack.c.bf16 %v15363_v2, %v15362_v41  ;;  %v6115_v41 = vld [vmem:[#allocation3 + $0x87] sm:$0xff] }
 0x4e3   : > { %7530 = vmatmul.msk.bf16.gmra.mxu1 %vm4571_vm2, %v6171_v9  ;;  %v5811_v13 = vadd.f32 %v5740_v18, %v12737_v21  ;;  %v15366_v9 = vld [vmem:[#allocation218_spill] sm:$0xff] }
 0x4e4   : > { %v5551_v30 = vpop.f32.mrf.mxu2  ;;  %vm15367_vm11 = vcmp.eq.s32.totalorder %v15366_v9, 1 }
 0x4e5   : > { %v12980_v19 = vadd.f32 %v5551_v30, %v5329_v52  ;;  %v15368_v30 = vld [vmem:[#allocation134_spill] sm:$0xff] }
 0x4e7   : > { %v6006_v25 = vpop.f32.mrf.mxu0 }
 0x4e8   : > { %v5287_v54 = vpop.f32.mrf.mxu1  ;;  %v12983_v3 = vadd.f32 %v6006_v25, %v5811_v13 }
 0x4e9   : > { %v5330_v12 = vadd.f32 %v5287_v54, %v12814_v15  ;;  %v6146_v15 = vsel %vm15365_vm6, %v6114_v33, 0.0  ;;  %v15369_v54 = vld [vmem:[#allocation256_spill] sm:$0xff] }
 0x4ea   : > { %v5742_v38 = vpop.f32.mrf.mxu3  ;;  %7509 = vmatmul.msk.bf16.gmra.mxu0 %vm4571_vm2, %v15361_v28  ;;  %v15370_v25 = vpack.c.bf16 %v15368_v30, %v15369_v54 }
 0x4eb   : > { %v5812_v26 = vadd.f32 %v5742_v38, %v12749_v4  ;;  %v6145_v4 = vsel %vm15367_vm11, %v6113_v10, 0.0  ;;  %v15371_v10 = vld [vmem:[#allocation234_spill] sm:$0xff] }
 0x4ec   : > { %v5553_v21 = vpop.f32.mrf.mxu2  ;;  %v6172_v24 = vpack.c.bf16 %v6146_v15, %v6145_v4 }
 0x4ed   : > { %v12994_v52 = vadd.f32 %v5553_v21, %v5330_v12  ;;  %v15372_v21 = vpack.c.bf16 %v12455_v44, %v15371_v10 }
 0x4ef   : > { %7482 = vmatmul.msk.bf16.gmra.mxu3 %vm4571_vm2, %v5647_v51  ;;  %v6008_v5 = vpop.f32.mrf.mxu0 }
 0x4f0   : > { %v5290_v45 = vpop.f32.mrf.mxu1  ;;  %v13000_v49 = vadd.f32 %v6008_v5, %v5812_v26  ;;  %v6116_v26 = vld [vmem:[#allocation3 + $0x8f] sm:$0xff] }
 0x4f1   : > { %v5331_v18 = vadd.f32 %v5290_v45, %v12824_v6  ;;  %7559 = vmatmul.msk.bf16.gmra.mxu2 %vm4571_vm2, %v15370_v25  ;;  %v6148_v15 = vsel %vm15375_vm5, %v6116_v26, 0.0  ;;  %v15378_v5 = vld [vmem:[#allocation132_spill] sm:$0xff]  ;;  %v15382_v26 = vld [vmem:[#allocation99_spill] sm:$0xff] }
 0x4f2   : > { %v5745_v13 = vpop.f32.mrf.mxu3 }
 0x4f3   : > { %7531 = vmatmul.msk.bf16.gmra.mxu1 %vm4571_vm2, %v6172_v24  ;;  %v13008_v12 = vadd.f32 %v5745_v13, %v12763_v1  ;;  %v15373_v1 = vld [vmem:[#allocation16_spill] sm:$0xff]  ;;  %v15379_v24 = vld [vmem:[#allocation19_spill] sm:$0xff] }
 0x4f4   : > { %v5556_v38 = vpop.f32.mrf.mxu2  ;;  %v5648_v51 = vpack.c.bf16 %v15373_v1, %v12472_v59  ;;  %v15380_v59 = vpack.c.bf16 %v15378_v5, %v15379_v24  ;;  %v15385_v1 = vld [vmem:[#allocation223_spill] sm:$0xff] }
 0x4f5   : > { %v13010_v33 = vadd.f32 %v5556_v38, %v5331_v18  ;;  %vm15386_vm1 = vcmp.eq.s32.totalorder %v15385_v1, 1 }
 0x4f8   : > { %v5292_v60 = vpop.f32.mrf.mxu1 }
 0x4f9   : > { %v5332_v6 = vadd.f32 %v5292_v60, %v12847_v40 }
 0x4fa   : > { %v5747_v48 = vpop.f32.mrf.mxu3  ;;  %7510 = vmatmul.msk.bf16.gmra.mxu0 %vm4571_vm2, %v15372_v21  ;;  %v6117_v21 = vld [vmem:[#allocation3 + $0x97] sm:$0xff] }
 0x4fb   : > { %v13014_v28 = vadd.f32 %v5747_v48, %v12775_v0  ;;  %v15376_v0 = vld [vmem:[#allocation215_spill] sm:$0xff] }
 0x4fc   : > { %v5558_v2 = vpop.f32.mrf.mxu2  ;;  %vm15377_vm15 = vcmp.eq.s32.totalorder %v15376_v0, 1  ;;  %v15381_v48 = vld [vmem:[#allocation91_spill] sm:$0xff] }
 0x4fd   : > { %v13024_v45 = vadd.f32 %v5558_v2, %v5332_v6  ;;  %v6147_v9 = vsel %vm15377_vm15, %v6115_v41, 0.0  ;;  %v15383_v10 = vpack.c.bf16 %v15381_v48, %v15382_v26  ;;  %v6119_v48 = vld [vmem:[#allocation3 + $0xa7] sm:$0xff] }
 0x4fe   : > { %v6173_v4 = vpack.c.bf16 %v6148_v15, %v6147_v9 }
 0x4ff   : > { %7483 = vmatmul.msk.bf16.gmra.mxu3 %vm4571_vm2, %v5648_v51 }
 0x500   : > { %v5295_v40 = vpop.f32.mrf.mxu1 }
 0x501   : > { %v5333_v44 = vadd.f32 %v5295_v40, %v12854_v23  ;;  %7560 = vmatmul.msk.bf16.gmra.mxu2 %vm4571_vm2, %v15380_v59  ;;  %v6118_v23 = vld [vmem:[#allocation3 + $0x9f] sm:$0xff] }
 0x502   : > { %v5750_v18 = vpop.f32.mrf.mxu3  ;;  %v6150_v51 = vsel %vm15386_vm1, %v6118_v23, 0.0 }
 0x503   : > { %7532 = vmatmul.msk.bf16.gmra.mxu1 %vm4571_vm2, %v6173_v4  ;;  %v13036_v13 = vadd.f32 %v5750_v18, %v12789_v46  ;;  %v15384_v46 = vld [vmem:[#allocation214_spill] sm:$0xff]  ;;  %v15390_v4 = vld [vmem:[#allocation84_spill] sm:$0xff] }
 0x504   : > { %v5561_v30 = vpop.f32.mrf.mxu2  ;;  %v5649_v2 = vpack.c.bf16 %v15384_v46, %v12563_v50 }
 0x505   : > { %v13038_v54 = vadd.f32 %v5561_v30, %v5333_v44  ;;  %v15389_v44 = vld [vmem:[#allocation95_spill] sm:$0xff] }
 0x506   : > { %v15391_v50 = vpack.c.bf16 %v15389_v44, %v15390_v4  ;;  %v15403_v4 = vld [vmem:[#allocation226_spill] sm:$0xff] }
 0x507   : > { %vm15404_vm3 = vcmp.eq.s32.totalorder %v15403_v4, 1 }
 0x508   : > { %v5297_v25 = vpop.f32.mrf.mxu1 }
 0x509   : > { %v5334_v38 = vadd.f32 %v5297_v25, %v12868_v17 }
 0x50a   : > { %v5752_v60 = vpop.f32.mrf.mxu3  ;;  %7511 = vmatmul.msk.bf16.gmra.mxu0 %vm4571_vm2, %v15383_v10  ;;  %v15395_v10 = vld [vmem:[#allocation145_spill] sm:$0xff] }
 0x50b   : > { %v13042_v6 = vadd.f32 %v5752_v60, %v12801_v39  ;;  %v15387_v39 = vld [vmem:[#allocation140_spill] sm:$0xff]  ;;  %v15392_v60 = vld [vmem:[#allocation151_spill] sm:$0xff] }
 0x50c   : > { %v5563_v41 = vpop.f32.mrf.mxu2  ;;  %vm15388_vm9 = vcmp.eq.s32.totalorder %v15387_v39, 1  ;;  %v15393_v23 = vpack.c.bf16 %v12622_v36, %v15392_v60  ;;  %v15400_v39 = vld [vmem:[#allocation7_spill] sm:$0xff] }
 0x50d   : > { %v13052_v31 = vadd.f32 %v5563_v41, %v5334_v38  ;;  %v6149_v15 = vsel %vm15388_vm9, %v6117_v21, 0.0  ;;  %v15396_v41 = vld [vmem:[#allocation237_spill] sm:$0xff]  ;;  %v6635_v60 = vld [vmem:[#allocation3 + $0x29] sm:$0xff] }
 0x50e   : > { %v6174_v0 = vpack.c.bf16 %v6150_v51, %v6149_v15  ;;  %vm15397_vm0 = vcmp.eq.s32.totalorder %v15396_v41, 1  ;;  %v15401_v15 = vld [vmem:[#allocation9_spill] sm:$0xff] }
 0x50f   : > { %7484 = vmatmul.msk.bf16.gmra.mxu3 %vm4571_vm2, %v5649_v2 }
 0x510   : > { %v5300_v17 = vpop.f32.mrf.mxu1 }
 0x511   : > { %v5335_v40 = vadd.f32 %v5300_v17, %v12878_v32  ;;  %7561 = vmatmul.msk.bf16.gmra.mxu2 %vm4571_vm2, %v15391_v50  ;;  %v6120_v32 = vld [vmem:[#allocation3 + $0xaf] sm:$0xff]  ;;  %v5899_v50 = vsel %vm15404_vm3, %v12640_v35, 0.0  ;;  %v15409_v35 = vld [vmem:[#allocation177_spill] sm:$0xff] }
 0x512   : > { %v5755_v9 = vpop.f32.mrf.mxu3  ;;  %v6152_v46 = vsel %vm15397_vm0, %v6120_v32, 0.0  ;;  %vm15410_vm14 = vcmp.eq.s32.totalorder %v15409_v35, 1 }
 0x513   : > { %7533 = vmatmul.msk.bf16.gmra.mxu1 %vm4571_vm2, %v6174_v0  ;;  %v13064_v18 = vadd.f32 %v5755_v9, %v12821_v55  ;;  %v15394_v55 = vld [vmem:[#allocation156_spill] sm:$0xff] }
 0x514   : > { %v5566_v5 = vpop.f32.mrf.mxu2  ;;  %v5650_v21 = vpack.c.bf16 %v15395_v10, %v15394_v55  ;;  %v6667_v10 = vsel %vm15410_vm14, %v6635_v60, 0.0  ;;  %v6124_v60 = vld [vmem:[#allocation3 + $0xcf] sm:$0xff] }
 0x515   : > { %v13066_v24 = vadd.f32 %v5566_v5, %v5335_v40  ;;  %v15402_v40 = vpack.c.bf16 %v15400_v39, %v15401_v15  ;;  %v15415_v39 = vld [vmem:[#allocation232_spill] sm:$0xff] }
 0x516   : > { %v15416_v15 = vld [vmem:[#allocation220_spill] sm:$0xff] }
 0x518   : > { %v5302_v59 = vpop.f32.mrf.mxu1 }
 0x519   : > { %v5336_v30 = vadd.f32 %v5302_v59, %v12892_v29 }
 0x51a   : > { %v5757_v25 = vpop.f32.mrf.mxu3  ;;  %7512 = vmatmul.msk.bf16.gmra.mxu0 %vm4571_vm2, %v15393_v23 }
 0x51b   : > { %v13070_v38 = vadd.f32 %v5757_v25, %v12835_v14  ;;  %v15398_v14 = vld [vmem:[#allocation239_spill] sm:$0xff] }
 0x51c   : > { %v5568_v26 = vpop.f32.mrf.mxu2  ;;  %vm15399_vm8 = vcmp.eq.s32.totalorder %v15398_v14, 1 }
 0x51d   : > { %v13080_v2 = vadd.f32 %v5568_v26, %v5336_v30  ;;  %v6151_v1 = vsel %vm15399_vm8, %v6119_v48, 0.0  ;;  %v6636_v30 = vld [vmem:[#allocation3 + $0x31] sm:$0xff]  ;;  %v6122_v26 = vld [vmem:[#allocation3 + $0xbf] sm:$0xff] }
 0x51e   : > { %v6175_v51 = vpack.c.bf16 %v6152_v46, %v6151_v1  ;;  %v15411_v46 = vld [vmem:[#allocation243_spill] sm:$0xff]  ;;  %v15413_v1 = vld [vmem:[#allocation112_spill] sm:$0xff] }
 0x51f   : > { %7485 = vmatmul.msk.bf16.gmra.mxu3 %vm4571_vm2, %v5650_v21  ;;  %vm15412_vm13 = vcmp.eq.s32.totalorder %v15411_v46, 1  ;;  %vm15414_vm10 = vcmp.eq.s32.totalorder %v15413_v1, 1  ;;  %v15426_v1 = vld [vmem:[#allocation208_spill] sm:$0xff] }
 0x520   : > { %v6257_v29 = vpop.f32.mrf.mxu1 }
 0x521   : > { %v6337_v36 = vadd.f32 %v6257_v29, %v12903_v57  ;;  %7562 = vmatmul.msk.bf16.gmra.mxu2 %vm4571_vm2, %v15402_v40  ;;  %v15405_v57 = vld [vmem:[#allocation236_spill] sm:$0xff]  ;;  %v15417_v40 = vpack.c.bf16 %v15415_v39, %v15416_v15 }
 0x522   : > { %v5760_v17 = vpop.f32.mrf.mxu3  ;;  %vm15406_vm7 = vcmp.eq.s32.totalorder %v15405_v57, 1 }
 0x523   : > { %7534 = vmatmul.msk.bf16.gmra.mxu1 %vm4571_vm2, %v6175_v51  ;;  %v13092_v0 = vadd.f32 %v5760_v17, %v12851_v34  ;;  %v5900_v5 = vsel %vm15406_vm7, %v12642_v11, 0.0  ;;  %v15407_v34 = vld [vmem:[#allocation175_spill] sm:$0xff]  ;;  %v6121_v11 = vld [vmem:[#allocation3 + $0xb7] sm:$0xff] }
 0x524   : > { %v6523_v9 = vpop.f32.mrf.mxu2  ;;  %v5916_v32 = vpack.c.bf16 %v5900_v5, %v5899_v50  ;;  %vm15408_vm12 = vcmp.eq.s32.totalorder %v15407_v34, 1  ;;  %v6638_v5 = vld [vmem:[#allocation3 + $0x41] sm:$0xff]  ;;  %v15420_v34 = vld [vmem:[#allocation172_spill] sm:$0xff] }
 0x525   : > { %v13094_v44 = vadd.f32 %v6523_v9, %v6337_v36  ;;  %v6668_v48 = vsel %vm15408_vm12, %v6636_v30, 0.0  ;;  %vm15421_vm6 = vcmp.eq.s32.totalorder %v15420_v34, 1 }
 0x526   : > { %v6699_v41 = vpack.c.bf16 %v6668_v48, %v6667_v10  ;;  %v6123_v48 = vld [vmem:[#allocation3 + $0xc7] sm:$0xff] }
 0x527   : > { %v15422_v10 = vld [vmem:[#allocation247_spill] sm:$0xff] }
 0x528   : > { %v6259_v59 = vpop.f32.mrf.mxu1  ;;  %vm15423_vm11 = vcmp.eq.s32.totalorder %v15422_v10, 1 }
 0x529   : > { %v6338_v25 = vadd.f32 %v6259_v59, %v12918_v63  ;;  %v6154_v63 = vsel %vm15412_vm13, %v6122_v26, 0.0 }
 0x52a   : > { %v5762_v23 = vpop.f32.mrf.mxu3  ;;  %7513 = vmatmul.msk.bf16.gmra.mxu0 %vm4571_vm2, %v5916_v32 }
 0x52b   : > { %v13106_v55 = vadd.f32 %v5762_v23, %v12862_v47  ;;  %v6153_v47 = vsel %vm15414_vm10, %v6121_v11, 0.0  ;;  %v6156_v11 = vsel %vm15423_vm11, %v6124_v60, 0.0 }
 0x52c   : > { %v6525_v21 = vpop.f32.mrf.mxu2  ;;  %v6176_v51 = vpack.c.bf16 %v6154_v63, %v6153_v47  ;;  %v15427_v47 = vld [vmem:[#allocation96_spill] sm:$0xff] }
 0x52d   : > { %v13113_v29 = vadd.f32 %v6525_v21, %v6338_v25  ;;  %v15418_v25 = vld [vmem:[#allocation189_spill] sm:$0xff] }
 0x52e   : > { %vm15419_vm4 = vcmp.eq.s32.totalorder %v15418_v25, 1  ;;  %v15431_v25 = vld [vmem:[#allocation194_spill] sm:$0xff] }
 0x52f   : > { %7582 = vmatmul.msk.bf16.vlgmr.msra.gmra.mxu3 %vm4571_vm2, %v6699_v41  ;;  %v6670_v32 = vsel %vm15419_vm4, %v6638_v5, 0.0  ;;  %v15424_v41 = vld [vmem:[#allocation248_spill] sm:$0xff]  ;;  %vm15432_vm1 = vcmp.eq.s32.totalorder %v15431_v25, 1 }
 0x530   : > { %v6262_v14 = vpop.f32.mrf.mxu1  ;;  %vm15425_vm5 = vcmp.eq.s32.totalorder %v15424_v41, 1  ;;  %v15429_v5 = vld [vmem:[#allocation184_spill] sm:$0xff]  ;;  %v15437_v41 = vld [vmem:[#allocation227_spill] sm:$0xff] }
 0x531   : > { %v6339_v36 = vadd.f32 %v6262_v14, %v12929_v43  ;;  %7563 = vmatmul.msk.bf16.gmra.mxu2 %vm4571_vm2, %v15417_v40  ;;  %v6637_v43 = vld [vmem:[#allocation3 + $0x39] sm:$0xff]  ;;  %v6155_v46 = vsel %vm15425_vm5, %v6123_v48, 0.0  ;;  %v6640_v40 = vld [vmem:[#allocation3 + $0x51] sm:$0xff]  ;;  %vm15430_vm15 = vcmp.eq.s32.totalorder %v15429_v5, 1  ;;  %v15442_v5 = vld [vmem:[#allocation207_spill] sm:$0xff] }
 0x532   : > { %v5765_v17 = vpop.f32.mrf.mxu3  ;;  %v6177_v63 = vpack.c.bf16 %v6156_v11, %v6155_v46  ;;  %v15438_v46 = vld [vmem:[#allocation31_spill] sm:$0xff]  ;;  %vm15443_vm3 = vcmp.eq.s32.totalorder %v15442_v5, 1 }
 0x533   : > { %7535 = vmatmul.msk.bf16.gmra.mxu1 %vm4571_vm2, %v6176_v51  ;;  %v13125_v9 = vadd.f32 %v5765_v17, %v12875_v27  ;;  %v6669_v27 = vsel %vm15421_vm6, %v6637_v43, 0.0  ;;  %v6126_v43 = vld [vmem:[#allocation3 + $0xdf] sm:$0xff] }
 0x534   : > { %v6528_v4 = vpop.f32.mrf.mxu2  ;;  %v6700_v35 = vpack.c.bf16 %v6670_v32, %v6669_v27  ;;  %v6125_v32 = vld [vmem:[#allocation3 + $0xd7] sm:$0xff] }
 0x535   : > { %v13127_v50 = vadd.f32 %v6528_v4, %v6339_v36  ;;  %v15428_v36 = vpack.c.bf16 %v15426_v1, %v15427_v47  ;;  %v15433_v27 = vld [vmem:[#allocation252_spill] sm:$0xff] }
 0x536   : > { %vm15434_vm9 = vcmp.eq.s32.totalorder %v15433_v27, 1 }
 0x537   : > { %v6158_v48 = vsel %vm15434_vm9, %v6126_v43, 0.0 }
 0x538   : > { %v6264_v57 = vpop.f32.mrf.mxu1 }
 0x539   : > { %v6340_v59 = vadd.f32 %v6264_v57, %v12944_v42 }
 0x53a   : > { %v5767_v30 = vpop.f32.mrf.mxu3 }
 0x53b   : > { %v13133_v23 = vadd.f32 %v5767_v30, %v12886_v53 }
 0x53c   : > { %v6530_v26 = vpop.f32.mrf.mxu2 }
 0x53d   : > { %v13139_v21 = vadd.f32 %v6530_v26, %v6340_v59  ;;  %v6672_v59 = vsel %vm15430_vm15, %v6640_v40, 0.0  ;;  %v15440_v40 = vld [vmem:[#allocation205_spill] sm:$0xff] }
 0x53e   : > { %vm15441_vm8 = vcmp.eq.s32.totalorder %v15440_v40, 1 }
 0x53f   : > { %7583 = vmatmul.msk.bf16.gmra.mxu3 %vm4571_vm2, %v6700_v35  ;;  %v15435_v35 = vld [vmem:[#allocation254_spill] sm:$0xff] }
 0x540   : > { %v6267_v42 = vpop.f32.mrf.mxu1  ;;  %vm15436_vm0 = vcmp.eq.s32.totalorder %v15435_v35, 1 }
 0x541   : > { %v6341_v53 = vadd.f32 %v6267_v42, %v12955_v58  ;;  %7564 = vmatmul.msk.bf16.gmra.mxu2 %vm4571_vm2, %v15428_v36  ;;  %v6639_v58 = vld [vmem:[#allocation3 + $0x49] sm:$0xff]  ;;  %v6157_v10 = vsel %vm15436_vm0, %v6125_v32, 0.0  ;;  %v6642_v36 = vld [vmem:[#allocation3 + $0x61] sm:$0xff] }
 0x542   : > { %v5770_v14 = vpop.f32.mrf.mxu3  ;;  %v6178_v11 = vpack.c.bf16 %v6158_v48, %v6157_v10 }
 0x543   : > { %7536 = vmatmul.msk.bf16.gmra.mxu1 %vm4571_vm2, %v6177_v63  ;;  %v13151_v51 = vadd.f32 %v5770_v14, %v12900_v62  ;;  %v6671_v62 = vsel %vm15432_vm1, %v6639_v58, 0.0  ;;  %v6128_v58 = vld [vmem:[#allocation3 + $0xef] sm:$0xff] }
 0x544   : > { %v6533_v17 = vpop.f32.mrf.mxu2  ;;  %v6701_v34 = vpack.c.bf16 %v6672_v59, %v6671_v62  ;;  %v6127_v59 = vld [vmem:[#allocation3 + $0xe7] sm:$0xff]  ;;  %v15444_v62 = vld [vmem:[#allocation260_spill] sm:$0xff] }
 0x545   : > { %v13153_v39 = vadd.f32 %v6533_v17, %v6341_v53  ;;  %v15439_v53 = vpack.c.bf16 %v15437_v41, %v15438_v46  ;;  %vm15445_vm7 = vcmp.eq.s32.totalorder %v15444_v62, 1  ;;  %v15451_v41 = vld [vmem:[#allocation212_spill] sm:$0xff]  ;;  %v6645_v62 = vld [vmem:[#allocation3 + $0x79] sm:$0xff] }
 0x546   : > { %v6160_v32 = vsel %vm15445_vm7, %v6128_v58, 0.0  ;;  %vm15452_vm14 = vcmp.eq.s32.totalorder %v15451_v41, 1 }
 0x548   : > { %v6269_v15 = vpop.f32.mrf.mxu1 }
 0x549   : > { %v6342_v4 = vadd.f32 %v6269_v15, %v12972_v20 }
 0x54a   : > { %v5772_v57 = vpop.f32.mrf.mxu3 }
 0x54b   : > { %v13159_v30 = vadd.f32 %v5772_v57, %v12912_v56 }
 0x54c   : > { %v6535_v60 = vpop.f32.mrf.mxu2 }
 0x54d   : > { %v13165_v26 = vadd.f32 %v6535_v60, %v6342_v4  ;;  %v6674_v4 = vsel %vm15441_vm8, %v6642_v36, 0.0 }
 0x54f   : > { %7584 = vmatmul.msk.bf16.gmra.mxu3 %vm4571_vm2, %v6701_v34 }
 0x550   : > { %v6272_v20 = vpop.f32.mrf.mxu1 }
 0x551   : > { %v6343_v56 = vadd.f32 %v6272_v20, %v12983_v3  ;;  %7565 = vmatmul.msk.bf16.gmra.mxu2 %vm4571_vm2, %v15439_v53  ;;  %v6641_v3 = vld [vmem:[#allocation3 + $0x59] sm:$0xff] }
 0x552   : > { %v5775_v42 = vpop.f32.mrf.mxu3  ;;  %v15449_v20 = vld [vmem:[#allocation21_spill] sm:$0xff] }
 0x553   : > { %7537 = vmatmul.msk.bf16.gmra.mxu1 %vm4571_vm2, %v6178_v11  ;;  %v13177_v63 = vadd.f32 %v5775_v42, %v12926_v8  ;;  %v6673_v8 = vsel %vm15443_vm3, %v6641_v3, 0.0  ;;  %v6643_v11 = vld [vmem:[#allocation3 + $0x69] sm:$0xff]  ;;  %v6130_v53 = vld [vmem:[#allocation3 + $0xff] sm:$0xff] }
 0x554   : > { %v6538_v14 = vpop.f32.mrf.mxu2  ;;  %v6702_v25 = vpack.c.bf16 %v6674_v4, %v6673_v8  ;;  %v15459_v8 = vld [vmem:[#allocation274_spill] sm:$0xff] }
 0x555   : > { %v13179_v1 = vadd.f32 %v6538_v14, %v6343_v56  ;;  %v6644_v56 = vld [vmem:[#allocation3 + $0x71] sm:$0xff] }
 0x556   : > { %v6676_v46 = vsel %vm15452_vm14, %v6644_v56, 0.0 }
 0x558   : > { %v6274_v47 = vpop.f32.mrf.mxu1 }
 0x559   : > { %v6344_v17 = vadd.f32 %v6274_v47, %v13000_v49  ;;  %v15446_v49 = vld [vmem:[#allocation261_spill] sm:$0xff]  ;;  %v15453_v47 = vld [vmem:[#allocation203_spill] sm:$0xff] }
 0x55a   : > { %v5777_v15 = vpop.f32.mrf.mxu3  ;;  %vm15447_vm12 = vcmp.eq.s32.totalorder %v15446_v49, 1  ;;  %vm15454_vm13 = vcmp.eq.s32.totalorder %v15453_v47, 1  ;;  %v15462_v49 = vld [vmem:[#allocation11_spill] sm:$0xff] }
 0x55b   : > { %v13185_v57 = vadd.f32 %v5777_v15, %v12938_v7  ;;  %v6159_v34 = vsel %vm15447_vm12, %v6127_v59, 0.0  ;;  %v15448_v7 = vld [vmem:[#allocation40_spill] sm:$0xff]  ;;  %v6675_v36 = vsel %vm15454_vm13, %v6643_v11, 0.0  ;;  %v15455_v15 = vld [vmem:[#allocation267_spill] sm:$0xff]  ;;  %vm15463_vm6 = vcmp.eq.s32.totalorder %v15462_v49, 1  ;;  %v15466_v11 = vld [vmem:[#allocation273_spill] sm:$0xff] }
 0x55c   : > { %v6540_v43 = vpop.f32.mrf.mxu2  ;;  %v6179_v27 = vpack.c.bf16 %v6160_v32, %v6159_v34  ;;  %v15450_v35 = vpack.c.bf16 %v15448_v7, %v15449_v20  ;;  %v6703_v3 = vpack.c.bf16 %v6676_v46, %v6675_v36  ;;  %vm15456_vm10 = vcmp.eq.s32.totalorder %v15455_v15, 1  ;;  %v15464_v7 = vld [vmem:[#allocation5_spill] sm:$0xff] }
 0x55d   : > { %v13191_v60 = vadd.f32 %v6540_v43, %v6344_v17  ;;  %v6129_v17 = vld [vmem:[#allocation3 + $0xf7] sm:$0xff]  ;;  %v6162_v40 = vsel %vm15456_vm10, %v6130_v53, 0.0  ;;  %vm15465_vm11 = vcmp.eq.s32.totalorder %v15464_v7, 1  ;;  %vm15467_vm5 = vcmp.eq.s32.totalorder %v15466_v11, 1 }
 0x55e   : > { %v6677_v20 = vsel %vm15465_vm11, %v6645_v62, 0.0  ;;  %v15483_v11 = vld [vmem:[#allocation168_spill] sm:$0xff] }
 0x55f   : > { %7585 = vmatmul.msk.bf16.gmra.mxu3 %vm4571_vm2, %v6702_v25  ;;  %v6646_v25 = vld [vmem:[#allocation3 + $0x81] sm:$0xff]  ;;  %vm15484_vm3 = vcmp.eq.s32.totalorder %v15483_v11, 1 }
 0x560   : > { %v6678_v34 = vsel %vm15463_vm6, %v6646_v25, 0.0 }
 0x561   : > { %7566 = vmatmul.msk.bf16.gmra.mxu2 %vm4571_vm2, %v15450_v35  ;;  %v6131_v35 = vld [vmem:[#allocation3 + $0x107] sm:$0xff]  ;;  %v6704_v56 = vpack.c.bf16 %v6678_v34, %v6677_v20  ;;  %v15480_v34 = vld [vmem:[#allocation285_spill] sm:$0xff] }
 0x562   : > { %v5780_v48 = vpop.f32.mrf.mxu3  ;;  %v6650_v20 = vld [vmem:[#allocation3 + $0xa1] sm:$0xff] }
 0x563   : > { %7538 = vmatmul.msk.bf16.gmra.mxu1 %vm4571_vm2, %v6179_v27  ;;  %v13202_v10 = vadd.f32 %v5780_v48, %v12952_v16  ;;  %v15457_v16 = vld [vmem:[#allocation268_spill] sm:$0xff] }
 0x564   : > { %vm15458_vm4 = vcmp.eq.s32.totalorder %v15457_v16, 1  ;;  %v6132_v27 = vld [vmem:[#allocation3 + $0x10f] sm:$0xff]  ;;  %v13308_v11 = vpop.f32.mrf.mxu2 }
 0x565   : > { %v6161_v4 = vsel %vm15458_vm4, %v6129_v17, 0.0  ;;  %v6648_v17 = vld [vmem:[#allocation3 + $0x91] sm:$0xff] }
 0x566   : > { %v6180_v58 = vpack.c.bf16 %v6162_v40, %v6161_v4  ;;  %v15472_v40 = vld [vmem:[#allocation222_spill] sm:$0xff]  ;;  %v6133_v4 = vld [vmem:[#allocation3 + $0x117] sm:$0xff] }
 0x567   : > { %vm15473_vm1 = vcmp.eq.s32.totalorder %v15472_v40, 1 }
 0x568   : > { %v6680_v16 = vsel %vm15473_vm1, %v6648_v17, 0.0  ;;  %v6651_v17 = vld [vmem:[#allocation3 + $0xa9] sm:$0xff] }
 0x56a   : > { %v5782_v42 = vpop.f32.mrf.mxu3 }
 0x56b   : > { %v13207_v14 = vadd.f32 %v5782_v42, %v12966_v22  ;;  %v15460_v22 = vld [vmem:[#allocation116_spill] sm:$0xff]  ;;  %v6164_v42 = vsel %vm15467_vm5, %v6132_v27, 0.0 }
 0x56c   : > { %v15461_v59 = vpack.c.bf16 %v15459_v8, %v15460_v22  ;;  %v15474_v8 = vld [vmem:[#allocation224_spill] sm:$0xff] }
 0x56d   : > { %vm15475_vm9 = vcmp.eq.s32.totalorder %v15474_v8, 1 }
 0x56f   : > { %7586 = vmatmul.msk.bf16.gmra.mxu3 %vm4571_vm2, %v6703_v3  ;;  %v6647_v3 = vld [vmem:[#allocation3 + $0x89] sm:$0xff] }
 0x570   : > { %v6679_v22 = vsel %vm15475_vm9, %v6647_v3, 0.0 }
 0x571   : > { %7567 = vmatmul.msk.bf16.gmra.mxu2 %vm4571_vm2, %v15461_v59  ;;  %v15476_v59 = vld [vmem:[#allocation282_spill] sm:$0xff] }
 0x572   : > { %v5785_v5 = vpop.f32.mrf.mxu3  ;;  %vm15477_vm0 = vcmp.eq.s32.totalorder %v15476_v59, 1  ;;  %v6654_v59 = vld [vmem:[#allocation3 + $0xc1] sm:$0xff] }
 0x573   : > { %7539 = vmatmul.msk.bf16.gmra.mxu1 %vm4571_vm2, %v6180_v58  ;;  %v13222_v43 = vadd.f32 %v5785_v5, %v12980_v19  ;;  %v15468_v19 = vld [vmem:[#allocation275_spill] sm:$0xff]  ;;  %v6134_v5 = vld [vmem:[#allocation3 + $0x11f] sm:$0xff]  ;;  %v6165_v25 = vsel %vm15477_vm0, %v6133_v4, 0.0 }
 0x574   : > { %vm15469_vm15 = vcmp.eq.s32.totalorder %v15468_v19, 1 }
 0x575   : > { %v6163_v41 = vsel %vm15469_vm15, %v6131_v35, 0.0  ;;  %v6649_v35 = vld [vmem:[#allocation3 + $0x99] sm:$0xff] }
 0x576   : > { %v6181_v46 = vpack.c.bf16 %v6164_v42, %v6163_v41  ;;  %v6682_v42 = vsel %vm15484_vm3, %v6650_v20, 0.0  ;;  %v15485_v41 = vld [vmem:[#allocation219_spill] sm:$0xff] }
 0x577   : > { %vm15486_vm7 = vcmp.eq.s32.totalorder %v15485_v41, 1 }
 0x57a   : > { %v5787_v32 = vpop.f32.mrf.mxu3 }
 0x57b   : > { %v13227_v48 = vadd.f32 %v5787_v32, %v12994_v52  ;;  %v15470_v52 = vld [vmem:[#allocation34_spill] sm:$0xff] }
 0x57c   : > { %v15471_v47 = vpack.c.bf16 %v12652_v61, %v15470_v52  ;;  %v6705_v61 = vpack.c.bf16 %v6680_v16, %v6679_v22  ;;  %v15489_v16 = vld [vmem:[#allocation147_spill] sm:$0xff] }
 0x57d   : > { %vm15490_vm14 = vcmp.eq.s32.totalorder %v15489_v16, 1 }
 0x57e   : > { %v6683_v4 = vsel %vm15490_vm14, %v6651_v17, 0.0  ;;  %v6655_v17 = vld [vmem:[#allocation3 + $0xc9] sm:$0xff] }
 0x57f   : > { %7587 = vmatmul.msk.bf16.gmra.mxu3 %vm4571_vm2, %v6704_v56 }
 0x581   : > { %7568 = vmatmul.msk.bf16.gmra.mxu2 %vm4571_vm2, %v15471_v47  ;;  %v6652_v47 = vld [vmem:[#allocation3 + $0xb1] sm:$0xff] }
 0x582   : > { %v5790_v53 = vpop.f32.mrf.mxu3 }
 0x583   : > { %7540 = vmatmul.msk.bf16.gmra.mxu1 %vm4571_vm2, %v6181_v46  ;;  %v13242_v36 = vadd.f32 %v5790_v53, %v13010_v33  ;;  %v15478_v33 = vld [vmem:[#allocation281_spill] sm:$0xff]  ;;  %v6681_v46 = vsel %vm15486_vm7, %v6649_v35, 0.0  ;;  %v13305_v35 = vpop.f32.mrf.mxu1 }
 0x584   : > { %vm15479_vm8 = vcmp.eq.s32.totalorder %v15478_v33, 1  ;;  %v6706_v53 = vpack.c.bf16 %v6682_v42, %v6681_v46 }
 0x585   : > { %v6166_v62 = vsel %vm15479_vm8, %v6134_v5, 0.0 }
 0x586   : > { %v6182_v32 = vpack.c.bf16 %v6166_v62, %v6165_v25  ;;  %v6653_v25 = vld [vmem:[#allocation3 + $0xb9] sm:$0xff]  ;;  %v15491_v62 = vld [vmem:[#allocation28_spill] sm:$0xff] }
 0x587   : > { %vm15492_vm13 = vcmp.eq.s32.totalorder %v15491_v62, 1 }
 0x58a   : > { %v5792_v15 = vpop.f32.mrf.mxu3 }
 0x58b   : > { %v13247_v58 = vadd.f32 %v5792_v15, %v13024_v45  ;;  %v15481_v45 = vld [vmem:[#allocation284_spill] sm:$0xff]  ;;  %v15487_v15 = vld [vmem:[#allocation230_spill] sm:$0xff] }
 0x58c   : > { %v15482_v27 = vpack.c.bf16 %v15480_v34, %v15481_v45  ;;  %vm15488_vm12 = vcmp.eq.s32.totalorder %v15487_v15, 1  ;;  %v15493_v34 = vld [vmem:[#allocation155_spill] sm:$0xff] }
 0x58d   : > { %v6684_v40 = vsel %vm15488_vm12, %v6652_v47, 0.0  ;;  %vm15494_vm10 = vcmp.eq.s32.totalorder %v15493_v34, 1  ;;  %v13315_v47 = vpop.f32.mrf.mxu1  ;;  %v6657_v34 = vld [vmem:[#allocation3 + $0xd9] sm:$0xff] }
 0x58e   : > { %v6707_v5 = vpack.c.bf16 %v6684_v40, %v6683_v4  ;;  %v6685_v45 = vsel %vm15494_vm10, %v6653_v25, 0.0  ;;  %v15495_v40 = vld [vmem:[#allocation238_spill] sm:$0xff] }
 0x58f   : > { %7588 = vmatmul.msk.bf16.gmra.mxu3 %vm4571_vm2, %v6705_v61  ;;  %vm15496_vm4 = vcmp.eq.s32.totalorder %v15495_v40, 1  ;;  %v15497_v4 = vld [vmem:[#allocation162_spill] sm:$0xff] }
 0x590   : > { %vm15498_vm6 = vcmp.eq.s32.totalorder %v15497_v4, 1 }
 0x591   : > { %7569 = vmatmul.msk.bf16.gmra.mxu2 %vm4571_vm2, %v15482_v27 }
 0x592   : > { %v5795_v49 = vpop.f32.mrf.mxu3 }
 0x593   : > { %7541 = vmatmul.msk.bf16.gmra.mxu1 %vm4571_vm2, %v6182_v32  ;;  %v13262_v7 = vadd.f32 %v5795_v49, %v13038_v54  ;;  %v6686_v32 = vsel %vm15492_vm13, %v6654_v59, 0.0 }
 0x594   : > { %v6708_v20 = vpack.c.bf16 %v6686_v32, %v6685_v45 }
 0x595   : > { %v13330_v59 = vpop.f32.mrf.mxu1 }
 0x59a   : > { %v5797_v56 = vpop.f32.mrf.mxu3 }
 0x59b   : > { %v13267_v19 = vadd.f32 %v5797_v56, %v13052_v31 }
 0x59f   : > { %7589 = vmatmul.msk.bf16.gmra.mxu3 %vm4571_vm2, %v6706_v53 }
 0x5a2   : > { %v5800_v52 = vpop.f32.mrf.mxu3 }
 0x5a3   : > { %v13273_v54 = vadd.f32 %v5800_v52, %v13066_v24  ;;  %v13286_v24 = vld [vmem:[%s13476_s8] ss:$0 sm:$0xff]  ;;  %v6656_v52 = vld [vmem:[#allocation3 + $0xd1] sm:$0xff] }
 0x5a4   : > { %v6688_v16 = vsel %vm15496_vm4, %v6656_v52, 0.0 }
 0x5aa   : > { %v5802_v3 = vpop.f32.mrf.mxu3 }
 0x5ab   : > { %v13278_v31 = vadd.f32 %v5802_v3, %v13080_v2  ;;  %v13318_v3 = vpop.f32.mrf.mxu2 }
 0x5af   : > { %7590 = vmatmul.msk.bf16.gmra.mxu3 %vm4571_vm2, %v6707_v5  ;;  %v6687_v5 = vsel %vm15498_vm6, %v6655_v17, 0.0 }
 0x5b2   : > { %v6789_v8 = vpop.f32.mrf.mxu3 }
 0x5b3   : > { %v6869_v22 = vadd.f32 %v6789_v8, %v13094_v44  ;;  %v13300_v44 = vpop.f32.mrf.mxu0  ;;  %v13333_v62 = vpop.f32.mrf.mxu2 }
 0x5b5   : > { %v6905_v61 = vadd.f32 %v13286_v24, %v6869_v22  ;;  %v6709_v22 = vpack.c.bf16 %v6688_v16, %v6687_v5 }
 0x5b7   : > { %v6937_v2 = vmax.f32 %v6905_v61, 0.0 }
 0x5b9   : > { %6969 = vst [vmem:[%s13294_s24] sm:$0xff] %v6937_v2 }
 0x5ba   : > { %v6791_v33 = vpop.f32.mrf.mxu3 }
 0x5bb   : > { %v6870_v49 = vadd.f32 %v6791_v33, %v13113_v29  ;;  %v13313_v46 = vpop.f32.mrf.mxu0  ;;  %v13347_v17 = vpop.f32.mrf.mxu2 }
 0x5bd   : > { %v6906_v27 = vadd.f32 %v13286_v24, %v6870_v49  ;;  %v6658_v49 = vld [vmem:[#allocation3 + $0xe1] sm:$0xff] }
 0x5bf   : > { %v6938_v56 = vmax.f32 %v6906_v27, 0.0  ;;  %7591 = vmatmul.msk.bf16.gmra.mxu3 %vm4571_vm2, %v6708_v20  ;;  %v15499_v20 = vld [vmem:[#allocation110_spill] sm:$0xff] }
 0x5c0   : > { %vm15500_vm11 = vcmp.eq.s32.totalorder %v15499_v20, 1 }
 0x5c1   : > { %6970 = vst [vmem:[%s13294_s24 + $0x8] sm:$0xff] %v6938_v56  ;;  %v6690_v56 = vsel %vm15500_vm11, %v6658_v49, 0.0  ;;  %v15505_v49 = vld [vmem:[#allocation178_spill] sm:$0xff] }
 0x5c2   : > { %v6794_v42 = vpop.f32.mrf.mxu3  ;;  %vm15506_vm1 = vcmp.eq.s32.totalorder %v15505_v49, 1 }
 0x5c3   : > { %v6871_v29 = vadd.f32 %v6794_v42, %v13127_v50  ;;  %v13327_v2 = vpop.f32.mrf.mxu0 }
 0x5c5   : > { %v6907_v41 = vadd.f32 %v13286_v24, %v6871_v29  ;;  %v13342_v29 = vpop.f32.mrf.mxu1 }
 0x5c7   : > { %v6939_v53 = vmax.f32 %v6907_v41, 0.0 }
 0x5c9   : > { %6971 = vst [vmem:[%s13294_s24 + $0x10] sm:$0xff] %v6939_v53 }
 0x5ca   : > { %v6796_v15 = vpop.f32.mrf.mxu3 }
 0x5cb   : > { %v6872_v50 = vadd.f32 %v6796_v15, %v13139_v21  ;;  %v13337_v45 = vpop.f32.mrf.mxu0 }
 0x5cd   : > { %v6908_v8 = vadd.f32 %v13286_v24, %v6872_v50  ;;  %v13353_v4 = vpop.f32.mrf.mxu1 }
 0x5cf   : > { %v6940_v61 = vmax.f32 %v6908_v8, 0.0  ;;  %7592 = vmatmul.msk.bf16.gmra.mxu3 %vm4571_vm2, %v6709_v22  ;;  %v6660_v8 = vld [vmem:[#allocation3 + $0xf1] sm:$0xff]  ;;  %v13355_v22 = vpop.f32.mrf.mxu2 }
 0x5d1   : > { %6972 = vst [vmem:[%s13294_s24 + $0x18] sm:$0xff] %v6940_v61  ;;  %v6659_v61 = vld [vmem:[#allocation3 + $0xe9] sm:$0xff] }
 0x5d2   : > { %v6799_v25 = vpop.f32.mrf.mxu3 }
 0x5d3   : > { %v6873_v33 = vadd.f32 %v6799_v25, %v13153_v39  ;;  %v15501_v39 = vld [vmem:[#allocation250_spill] sm:$0xff]  ;;  %v6021_v50 = vpop.f32.mrf.mxu0 }
 0x5d4   : > { %vm15502_vm5 = vcmp.eq.s32.totalorder %v15501_v39, 1 }
 0x5d5   : > { %v6909_v21 = vadd.f32 %v13286_v24, %v6873_v33  ;;  %v6689_v41 = vsel %vm15502_vm5, %v6657_v34, 0.0  ;;  %v15503_v33 = vld [vmem:[#allocation170_spill] sm:$0xff]  ;;  %v6079_v34 = vadd.f32 %v13300_v44, %v13008_v12  ;;  %v6080_v12 = vadd.f32 %v13313_v46, %v13014_v28 }
 0x5d6   : > { %v6710_v52 = vpack.c.bf16 %v6690_v56, %v6689_v41  ;;  %vm15504_vm15 = vcmp.eq.s32.totalorder %v15503_v33, 1  ;;  %v6289_v41 = vpop.f32.mrf.mxu1  ;;  %v15509_v28 = vld [vmem:[#allocation186_spill] sm:$0xff] }
 0x5d7   : > { %v6941_v32 = vmax.f32 %v6909_v21, 0.0  ;;  %v6692_v21 = vsel %vm15504_vm15, %v6660_v8, 0.0  ;;  %v6661_v8 = vld [vmem:[#allocation3 + $0xf9] sm:$0xff]  ;;  %vm15510_vm0 = vcmp.eq.s32.totalorder %v15509_v28, 1 }
 0x5d8   : > { %v6693_v46 = vsel %vm15510_vm0, %v6661_v8, 0.0  ;;  %v15511_v8 = vld [vmem:[#allocation179_spill] sm:$0xff] }
 0x5d9   : > { %6973 = vst [vmem:[%s13294_s24 + $0x20] sm:$0xff] %v6941_v32 }
 0x5da   : > { %v6801_v27 = vpop.f32.mrf.mxu3 }
 0x5db   : > { %v6874_v42 = vadd.f32 %v6801_v27, %v13165_v26  ;;  %v6023_v56 = vpop.f32.mrf.mxu0 }
 0x5dd   : > { %v6910_v53 = vadd.f32 %v13286_v24, %v6874_v42  ;;  %v6345_v42 = vadd.f32 %v13305_v35, %v6079_v34  ;;  %v6662_v35 = vld [vmem:[#allocation3 + $0x101] sm:$0xff] }
 0x5df   : > { %v6942_v15 = vmax.f32 %v6910_v53, 0.0  ;;  %7593 = vmatmul.msk.bf16.gmra.mxu3 %vm4571_vm2, %v6710_v52  ;;  %v6611_v53 = vadd.f32 %v13308_v11, %v6345_v42  ;;  %v6292_v11 = vpop.f32.mrf.mxu1 }
 0x5e1   : > { %6974 = vst [vmem:[%s13294_s24 + $0x28] sm:$0xff] %v6942_v15 }
 0x5e2   : > { %v6804_v40 = vpop.f32.mrf.mxu3 }
 0x5e3   : > { %v6875_v16 = vadd.f32 %v6804_v40, %v13179_v1  ;;  %v6691_v1 = vsel %vm15506_vm1, %v6659_v61, 0.0  ;;  %v6346_v40 = vadd.f32 %v13315_v47, %v6080_v12  ;;  %v6081_v47 = vadd.f32 %v13327_v2, %v13036_v13 }
 0x5e4   : > { %v6711_v20 = vpack.c.bf16 %v6692_v21, %v6691_v1 }
 0x5e5   : > { %v6911_v26 = vadd.f32 %v13286_v24, %v6875_v16 }
 0x5e7   : > { %v6943_v5 = vmax.f32 %v6911_v26, 0.0  ;;  %v6026_v26 = vpop.f32.mrf.mxu0 }
 0x5e9   : > { %6975 = vst [vmem:[%s13294_s24 + $0x30] sm:$0xff] %v6943_v5  ;;  %v6612_v5 = vadd.f32 %v13318_v3, %v6346_v40  ;;  %v6347_v3 = vadd.f32 %v13330_v59, %v6081_v47 }
 0x5ea   : > { %v6806_v25 = vpop.f32.mrf.mxu3 }
 0x5eb   : > { %v6876_v32 = vadd.f32 %v6806_v25, %v13191_v60  ;;  %v6555_v60 = vpop.f32.mrf.mxu2  ;;  %v15507_v25 = vld [vmem:[#allocation257_spill] sm:$0xff] }
 0x5ec   : > { %vm15508_vm9 = vcmp.eq.s32.totalorder %v15507_v25, 1 }
 0x5ed   : > { %v6912_v27 = vadd.f32 %v13286_v24, %v6876_v32  ;;  %v6694_v33 = vsel %vm15508_vm9, %v6662_v35, 0.0 }
 0x5ee   : > { %v6712_v1 = vpack.c.bf16 %v6694_v33, %v6693_v46 }
 0x5ef   : > { %v6944_v39 = vmax.f32 %v6912_v27, 0.0  ;;  %7594 = vmatmul.msk.bf16.gmra.mxu3 %vm4571_vm2, %v6711_v20  ;;  %v6613_v27 = vadd.f32 %v13333_v62, %v6347_v3  ;;  %v6028_v20 = vpop.f32.mrf.mxu0  ;;  %v6085_v3 = vadd.f32 %v6026_v26, %v13092_v0 }
 0x5f1   : > { %6976 = vst [vmem:[%s13294_s24 + $0x38] sm:$0xff] %v6944_v39 }
 0x5f2   : > { %v6809_v52 = vpop.f32.mrf.mxu3 }
 0x5f3   : > { %v6877_v15 = vadd.f32 %v6809_v52, %v6611_v53  ;;  %v6558_v32 = vpop.f32.mrf.mxu2  ;;  %v6294_v53 = vpop.f32.mrf.mxu1  ;;  %v6082_v52 = vadd.f32 %v13337_v45, %v13042_v6 }
 0x5f5   : > { %v6913_v44 = vadd.f32 %v13286_v24, %v6877_v15  ;;  %v6348_v15 = vadd.f32 %v13342_v29, %v6082_v52 }
 0x5f7   : > { %v6945_v16 = vmax.f32 %v6913_v44, 0.0  ;;  %v6614_v12 = vadd.f32 %v13347_v17, %v6348_v15  ;;  %v6031_v40 = vpop.f32.mrf.mxu0 }
 0x5f9   : > { %6977 = vst [vmem:[%s13294_s24 + $0x40] sm:$0xff] %v6945_v16  ;;  %v6083_v16 = vadd.f32 %v6021_v50, %v13064_v18  ;;  %v6084_v18 = vadd.f32 %v6023_v56, %v13070_v38  ;;  %v15513_v38 = vld [vmem:[#allocation201_spill] sm:$0xff] }
 0x5fa   : > { %v6811_v61 = vpop.f32.mrf.mxu3  ;;  %v15514_v56 = vld [vmem:[#allocation277_spill] sm:$0xff] }
 0x5fb   : > { %v6878_v21 = vadd.f32 %v6811_v61, %v6612_v5  ;;  %v6560_v2 = vpop.f32.mrf.mxu2  ;;  %v6297_v5 = vpop.f32.mrf.mxu1  ;;  %v6349_v6 = vadd.f32 %v13353_v4, %v6083_v16  ;;  %v15512_v61 = vpack.c.bf16 %v12673_v37, %v15511_v8  ;;  %v6350_v28 = vadd.f32 %v6289_v41, %v6084_v18 }
 0x5fd   : > { %v6914_v49 = vadd.f32 %v13286_v24, %v6878_v21  ;;  %v6615_v17 = vadd.f32 %v13355_v22, %v6349_v6  ;;  %v6616_v47 = vadd.f32 %v6555_v60, %v6350_v28 }
 0x5ff   : > { %v6946_v34 = vmax.f32 %v6914_v49, 0.0  ;;  %7595 = vmatmul.msk.bf16.gmra.mxu3 %vm4571_vm2, %v6712_v1  ;;  %v6033_v21 = vpop.f32.mrf.mxu0 }
 0x601   : > { %6978 = vst [vmem:[%s13294_s24 + $0x48] sm:$0xff] %v6946_v34  ;;  %v6351_v34 = vadd.f32 %v6292_v11, %v6085_v3 }
 0x602   : > { %v6814_v42 = vpop.f32.mrf.mxu3 }
 0x603   : > { %v6879_v39 = vadd.f32 %v6814_v42, %v6613_v27  ;;  %v6563_v29 = vpop.f32.mrf.mxu2  ;;  %v6299_v46 = vpop.f32.mrf.mxu1  ;;  %v15515_v42 = vpack.c.bf16 %v15513_v38, %v15514_v56 }
 0x605   : > { %v6915_v13 = vadd.f32 %v13286_v24, %v6879_v39  ;;  %v6617_v39 = vadd.f32 %v6558_v32, %v6351_v34  ;;  %v6087_v32 = vadd.f32 %v6031_v40, %v13125_v9 }
 0x607   : > { %v6947_v59 = vmax.f32 %v6915_v13, 0.0  ;;  %v6036_v41 = vpop.f32.mrf.mxu0  ;;  %v6353_v8 = vadd.f32 %v6297_v5, %v6087_v32 }
 0x608   : > { %v6089_v5 = vadd.f32 %v6036_v41, %v13151_v51 }
 0x609   : > { %6979 = vst [vmem:[%s13294_s24 + $0x50] sm:$0xff] %v6947_v59  ;;  %v6086_v59 = vadd.f32 %v6028_v20, %v13106_v55  ;;  %v6619_v55 = vadd.f32 %v6563_v29, %v6353_v8 }
 0x60a   : > { %v6816_v44 = vpop.f32.mrf.mxu3 }
 0x60b   : > { %v6880_v62 = vadd.f32 %v6816_v44, %v6614_v12  ;;  %v6565_v37 = vpop.f32.mrf.mxu2  ;;  %v6302_v60 = vpop.f32.mrf.mxu1  ;;  %v6352_v26 = vadd.f32 %v6294_v53, %v6086_v59 }
 0x60d   : > { %v6916_v35 = vadd.f32 %v13286_v24, %v6880_v62  ;;  %v6618_v12 = vadd.f32 %v6560_v2, %v6352_v26  ;;  %v6088_v2 = vadd.f32 %v6033_v21, %v13133_v23 }
 0x60f   : > { %v6948_v45 = vmax.f32 %v6916_v35, 0.0  ;;  %7596 = vmatmul.msk.bf16.gmra.mxu3 %vm4571_vm2, %v15512_v61  ;;  %v6038_v44 = vpop.f32.mrf.mxu0  ;;  %v6354_v18 = vadd.f32 %v6299_v46, %v6088_v2 }
 0x610   : > { %v6090_v34 = vadd.f32 %v6038_v44, %v13159_v30 }
 0x611   : > { %6980 = vst [vmem:[%s13294_s24 + $0x58] sm:$0xff] %v6948_v45  ;;  %v6620_v40 = vadd.f32 %v6565_v37, %v6354_v18 }
 0x612   : > { %v6819_v25 = vpop.f32.mrf.mxu3 }
 0x613   : > { %v6881_v33 = vadd.f32 %v6819_v25, %v6615_v17  ;;  %v6568_v15 = vpop.f32.mrf.mxu2  ;;  %v6304_v35 = vpop.f32.mrf.mxu1 }
 0x615   : > { %v6917_v50 = vadd.f32 %v13286_v24, %v6881_v33 }
 0x617   : > { %v6949_v4 = vmax.f32 %v6917_v50, 0.0  ;;  %v6041_v53 = vpop.f32.mrf.mxu0 }
 0x619   : > { %6981 = vst [vmem:[%s13294_s24 + $0x60] sm:$0xff] %v6949_v4 }
 0x61a   : > { %v6821_v49 = vpop.f32.mrf.mxu3 }
 0x61b   : > { %v6882_v1 = vadd.f32 %v6821_v49, %v6616_v47  ;;  %v6570_v45 = vpop.f32.mrf.mxu2  ;;  %v6307_v33 = vpop.f32.mrf.mxu1  ;;  %v6355_v49 = vadd.f32 %v6302_v60, %v6089_v5 }
 0x61d   : > { %v6918_v22 = vadd.f32 %v13286_v24, %v6882_v1  ;;  %v6621_v21 = vadd.f32 %v6568_v15, %v6355_v49 }
 0x61f   : > { %v6950_v27 = vmax.f32 %v6918_v22, 0.0  ;;  %7597 = vmatmul.msk.bf16.gmra.mxu3 %vm4571_vm2, %v15515_v42  ;;  %v6043_v47 = vpop.f32.mrf.mxu0 }
 0x620   : > { %v6092_v44 = vadd.f32 %v6043_v47, %v13185_v57 }
 0x621   : > { %6982 = vst [vmem:[%s13294_s24 + $0x68] sm:$0xff] %v6950_v27  ;;  %v6356_v27 = vadd.f32 %v6304_v35, %v6090_v34 }
 0x622   : > { %v6824_v52 = vpop.f32.mrf.mxu3 }
 0x623   : > { %v6883_v13 = vadd.f32 %v6824_v52, %v6617_v39  ;;  %v6573_v9 = vpop.f32.mrf.mxu2  ;;  %v6309_v23 = vpop.f32.mrf.mxu1  ;;  %v6622_v56 = vadd.f32 %v6570_v45, %v6356_v27  ;;  %v6091_v52 = vadd.f32 %v6041_v53, %v13177_v63 }
 0x624   : > { %v6358_v35 = vadd.f32 %v6309_v23, %v6092_v44 }
 0x625   : > { %v6919_v0 = vadd.f32 %v13286_v24, %v6883_v13  ;;  %v6357_v15 = vadd.f32 %v6307_v33, %v6091_v52 }
 0x627   : > { %v6951_v11 = vmax.f32 %v6919_v0, 0.0  ;;  %v6046_v51 = vpop.f32.mrf.mxu0  ;;  %v6623_v30 = vadd.f32 %v6573_v9, %v6357_v15 }
 0x629   : > { %6983 = vst [vmem:[%s13294_s24 + $0x70] sm:$0xff] %v6951_v11 }
 0x62a   : > { %v6826_v62 = vpop.f32.mrf.mxu3 }
 0x62b   : > { %v6884_v16 = vadd.f32 %v6826_v62, %v6618_v12  ;;  %v6575_v3 = vpop.f32.mrf.mxu2  ;;  %v6312_v42 = vpop.f32.mrf.mxu1 }
 0x62c   : > { %v6624_v63 = vadd.f32 %v6575_v3, %v6358_v35 }
 0x62d   : > { %v6920_v6 = vadd.f32 %v13286_v24, %v6884_v16 }
 0x62f   : > { %v6952_v61 = vmax.f32 %v6920_v6, 0.0  ;;  %v6048_v0 = vpop.f32.mrf.mxu0 }
 0x630   : > { %v6094_v18 = vadd.f32 %v6048_v0, %v13207_v14 }
 0x631   : > { %6984 = vst [vmem:[%s13294_s24 + $0x78] sm:$0xff] %v6952_v61  ;;  %v6093_v61 = vadd.f32 %v6046_v51, %v13202_v10 }
 0x632   : > { %v6829_v20 = vpop.f32.mrf.mxu3 }
 0x633   : > { %v6885_v17 = vadd.f32 %v6829_v20, %v6619_v55  ;;  %v6578_v60 = vpop.f32.mrf.mxu2  ;;  %v6314_v12 = vpop.f32.mrf.mxu1 }
 0x635   : > { %v6921_v25 = vadd.f32 %v13286_v24, %v6885_v17  ;;  %v6359_v17 = vadd.f32 %v6312_v42, %v6093_v61 }
 0x637   : > { %v6953_v50 = vmax.f32 %v6921_v25, 0.0  ;;  %v6051_v8 = vpop.f32.mrf.mxu0  ;;  %v6625_v2 = vadd.f32 %v6578_v60, %v6359_v17 }
 0x638   : > { %v6095_v49 = vadd.f32 %v6051_v8, %v13222_v43 }
 0x639   : > { %6985 = vst [vmem:[%s13294_s24 + $0x80] sm:$0xff] %v6953_v50 }
 0x63a   : > { %v6831_v28 = vpop.f32.mrf.mxu3 }
 0x63b   : > { %v6886_v4 = vadd.f32 %v6831_v28, %v6620_v40  ;;  %v6580_v16 = vpop.f32.mrf.mxu2  ;;  %v6317_v20 = vpop.f32.mrf.mxu1  ;;  %v6360_v40 = vadd.f32 %v6314_v12, %v6094_v18 }
 0x63c   : > { %v6361_v23 = vadd.f32 %v6317_v20, %v6095_v49 }
 0x63d   : > { %v6922_v29 = vadd.f32 %v13286_v24, %v6886_v4  ;;  %v6626_v4 = vadd.f32 %v6580_v16, %v6360_v40 }
 0x63f   : > { %v6954_v1 = vmax.f32 %v6922_v29, 0.0  ;;  %v6053_v9 = vpop.f32.mrf.mxu0 }
 0x640   : > { %v6096_v27 = vadd.f32 %v6053_v9, %v13227_v48 }
 0x641   : > { %6986 = vst [vmem:[%s13294_s24 + $0x88] sm:$0xff] %v6954_v1 }
 0x642   : > { %v6834_v22 = vpop.f32.mrf.mxu3 }
 0x643   : > { %v6887_v46 = vadd.f32 %v6834_v22, %v6621_v21  ;;  %v6583_v57 = vpop.f32.mrf.mxu2  ;;  %v6319_v10 = vpop.f32.mrf.mxu1 }
 0x644   : > { %v6627_v3 = vadd.f32 %v6583_v57, %v6361_v23  ;;  %v6362_v51 = vadd.f32 %v6319_v10, %v6096_v27 }
 0x645   : > { %v6923_v37 = vadd.f32 %v13286_v24, %v6887_v46 }
 0x647   : > { %v6955_v38 = vmax.f32 %v6923_v37, 0.0  ;;  %v6056_v14 = vpop.f32.mrf.mxu0 }
 0x648   : > { %v6097_v52 = vadd.f32 %v6056_v14, %v13242_v36 }
 0x649   : > { %6987 = vst [vmem:[%s13294_s24 + $0x90] sm:$0xff] %v6955_v38 }
 0x64a   : > { %v6836_v41 = vpop.f32.mrf.mxu3 }
 0x64b   : > { %v6888_v39 = vadd.f32 %v6836_v41, %v6622_v56  ;;  %v6585_v5 = vpop.f32.mrf.mxu2  ;;  %v6322_v22 = vpop.f32.mrf.mxu1 }
 0x64c   : > { %v6628_v43 = vadd.f32 %v6585_v5, %v6362_v51 }
 0x64d   : > { %v6924_v13 = vadd.f32 %v13286_v24, %v6888_v39 }
 0x64f   : > { %v6956_v59 = vmax.f32 %v6924_v13, 0.0  ;;  %v6058_v42 = vpop.f32.mrf.mxu0 }
 0x650   : > { %v6098_v12 = vadd.f32 %v6058_v42, %v13247_v58 }
 0x651   : > { %6988 = vst [vmem:[%s13294_s24 + $0x98] sm:$0xff] %v6956_v59  ;;  %v6363_v59 = vadd.f32 %v6322_v22, %v6097_v52 }
 0x652   : > { %v6839_v26 = vpop.f32.mrf.mxu3 }
 0x653   : > { %v6889_v11 = vadd.f32 %v6839_v26, %v6623_v30  ;;  %v6588_v37 = vpop.f32.mrf.mxu2  ;;  %v6324_v60 = vpop.f32.mrf.mxu1 }
 0x654   : > { %v6629_v48 = vadd.f32 %v6588_v37, %v6363_v59  ;;  %v6364_v16 = vadd.f32 %v6324_v60, %v6098_v12 }
 0x655   : > { %v6925_v62 = vadd.f32 %v13286_v24, %v6889_v11 }
 0x657   : > { %v6957_v32 = vmax.f32 %v6925_v62, 0.0  ;;  %v6061_v11 = vpop.f32.mrf.mxu0 }
 0x659   : > { %6989 = vst [vmem:[%s13294_s24 + $0xa0] sm:$0xff] %v6957_v32 }
 0x65a   : > { %v6841_v6 = vpop.f32.mrf.mxu3 }
 0x65b   : > { %v6890_v45 = vadd.f32 %v6841_v6, %v6624_v63  ;;  %v6590_v15 = vpop.f32.mrf.mxu2  ;;  %v6327_v62 = vpop.f32.mrf.mxu1 }
 0x65c   : > { %v6630_v32 = vadd.f32 %v6590_v15, %v6364_v16 }
 0x65d   : > { %v6926_v55 = vadd.f32 %v13286_v24, %v6890_v45  ;;  %v6099_v45 = vadd.f32 %v6061_v11, %v13262_v7 }
 0x65f   : > { %v6958_v53 = vmax.f32 %v6926_v55, 0.0  ;;  %v6063_v61 = vpop.f32.mrf.mxu0  ;;  %v6365_v55 = vadd.f32 %v6327_v62, %v6099_v45 }
 0x661   : > { %6990 = vst [vmem:[%s13294_s24 + $0xa8] sm:$0xff] %v6958_v53 }
 0x662   : > { %v6844_v25 = vpop.f32.mrf.mxu3 }
 0x663   : > { %v6891_v33 = vadd.f32 %v6844_v25, %v6625_v2  ;;  %v6593_v36 = vpop.f32.mrf.mxu2  ;;  %v6329_v58 = vpop.f32.mrf.mxu1  ;;  %v6100_v25 = vadd.f32 %v6063_v61, %v13267_v19 }
 0x664   : > { %v6631_v17 = vadd.f32 %v6593_v36, %v6365_v55 }
 0x665   : > { %v6927_v50 = vadd.f32 %v13286_v24, %v6891_v33  ;;  %v6366_v18 = vadd.f32 %v6329_v58, %v6100_v25 }
 0x667   : > { %v6959_v28 = vmax.f32 %v6927_v50, 0.0  ;;  %v6066_v7 = vpop.f32.mrf.mxu0 }
 0x668   : > { %v6101_v5 = vadd.f32 %v6066_v7, %v13273_v54 }
 0x669   : > { %6991 = vst [vmem:[%s13294_s24 + $0xb0] sm:$0xff] %v6959_v28 }
 0x66a   : > { %v6846_v29 = vpop.f32.mrf.mxu3 }
 0x66b   : > { %v6892_v47 = vadd.f32 %v6846_v29, %v6626_v4  ;;  %v6595_v53 = vpop.f32.mrf.mxu2  ;;  %v6332_v40 = vpop.f32.mrf.mxu1 }
 0x66c   : > { %v6632_v9 = vadd.f32 %v6595_v53, %v6366_v18 }
 0x66d   : > { %v6928_v1 = vadd.f32 %v13286_v24, %v6892_v47  ;;  %v6367_v47 = vadd.f32 %v6332_v40, %v6101_v5 }
 0x66f   : > { %v6960_v21 = vmax.f32 %v6928_v1, 0.0  ;;  %v6068_v1 = vpop.f32.mrf.mxu0 }
 0x671   : > { %6992 = vst [vmem:[%s13294_s24 + $0xb8] sm:$0xff] %v6960_v21 }
 0x672   : > { %v6849_v46 = vpop.f32.mrf.mxu3 }
 0x673   : > { %v6893_v34 = vadd.f32 %v6849_v46, %v6627_v3  ;;  %v6598_v4 = vpop.f32.mrf.mxu2  ;;  %v6334_v14 = vpop.f32.mrf.mxu1  ;;  %v6102_v3 = vadd.f32 %v6068_v1, %v13278_v31 }
 0x674   : > { %v6633_v19 = vadd.f32 %v6598_v4, %v6367_v47 }
 0x675   : > { %v6929_v38 = vadd.f32 %v13286_v24, %v6893_v34  ;;  %v6368_v34 = vadd.f32 %v6334_v14, %v6102_v3 }
 0x677   : > { %v6961_v56 = vmax.f32 %v6929_v38, 0.0 }
 0x679   : > { %6993 = vst [vmem:[%s13294_s24 + $0xc0] sm:$0xff] %v6961_v56 }
 0x67a   : > { %v6851_v41 = vpop.f32.mrf.mxu3 }
 0x67b   : > { %v6894_v39 = vadd.f32 %v6851_v41, %v6628_v43  ;;  %v6600_v46 = vpop.f32.mrf.mxu2 }
 0x67c   : > { %v6634_v54 = vadd.f32 %v6600_v46, %v6368_v34 }
 0x67d   : > { %v6930_v13 = vadd.f32 %v13286_v24, %v6894_v39 }
 0x67f   : > { %v6962_v30 = vmax.f32 %v6930_v13, 0.0 }
 0x681   : > { %6994 = vst [vmem:[%s13294_s24 + $0xc8] sm:$0xff] %v6962_v30 }
 0x682   : > { %v6854_v0 = vpop.f32.mrf.mxu3 }
 0x683   : > { %v6895_v26 = vadd.f32 %v6854_v0, %v6629_v48 }
 0x685   : > { %v6931_v44 = vadd.f32 %v13286_v24, %v6895_v26 }
 0x687   : > { %v6963_v35 = vmax.f32 %v6931_v44, 0.0 }
 0x689   : > { %6995 = vst [vmem:[%s13294_s24 + $0xd0] sm:$0xff] %v6963_v35 }
 0x68a   : > { %v6856_v63 = vpop.f32.mrf.mxu3 }
 0x68b   : > { %v6896_v6 = vadd.f32 %v6856_v63, %v6630_v32 }
 0x68d   : > { %v6932_v8 = vadd.f32 %v13286_v24, %v6896_v6 }
 0x68f   : > { %v6964_v20 = vmax.f32 %v6932_v8, 0.0 }
 0x691   : > { %6996 = vst [vmem:[%s13294_s24 + $0xd8] sm:$0xff] %v6964_v20 }
 0x692   : > { %v6859_v57 = vpop.f32.mrf.mxu3 }
 0x693   : > { %v6897_v2 = vadd.f32 %v6859_v57, %v6631_v17 }
 0x695   : > { %v6933_v33 = vadd.f32 %v13286_v24, %v6897_v2 }
 0x697   : > { %v6965_v50 = vmax.f32 %v6933_v33, 0.0 }
 0x699   : > { %6997 = vst [vmem:[%s13294_s24 + $0xe0] sm:$0xff] %v6965_v50 }
 0x69a   : > { %v6861_v28 = vpop.f32.mrf.mxu3 }
 0x69b   : > { %v6898_v10 = vadd.f32 %v6861_v28, %v6632_v9 }
 0x69d   : > { %v6934_v29 = vadd.f32 %v13286_v24, %v6898_v10 }
 0x69f   : > { %v6966_v49 = vmax.f32 %v6934_v29, 0.0 }
 0x6a1   : > { %6998 = vst [vmem:[%s13294_s24 + $0xe8] sm:$0xff] %v6966_v49 }
 0x6a2   : > { %v6864_v23 = vpop.f32.mrf.mxu3 }
 0x6a3   : > { %v6899_v21 = vadd.f32 %v6864_v23, %v6633_v19 }
 0x6a5   : > { %v6935_v22 = vadd.f32 %v13286_v24, %v6899_v21 }
 0x6a7   : > { %v6967_v37 = vmax.f32 %v6935_v22, 0.0 }
 0x6a9   : > { %6999 = vst [vmem:[%s13294_s24 + $0xf0] sm:$0xff] %v6967_v37 }
 0x6aa   : > { %v6866_v27 = vpop.f32.mrf.mxu3 }
 0x6ab   : > { %v6900_v38 = vadd.f32 %v6866_v27, %v6634_v54 }
 0x6ad   : > { %v6936_v51 = vadd.f32 %v13286_v24, %v6900_v38 }
 0x6af   : > { %v6968_v56 = vmax.f32 %v6936_v51, 0.0 }
 0x6b1   : > { %7000 = vst [vmem:[%s13294_s24 + $0xf8] sm:$0xff] %v6968_v56 }
 0x6b2 PF: > { %s19_s30 = sadd.s32 1, %s7795_s30  }
 0x6b3   : > { %p16_p4 = scmp.ge.s32.totalorder %s19_s30, 4  }
 0x6b5   :  { %18 = sbr.rel (!%p16_p4) target bundleno = 1 (0x1), region = 102 }

</bundles_post_ra>
